<compile_context>
chip_gen: v7x
topology: tpu7x:2x2x1
jax: 0.10.0
libtpu: 0.0.40
codegen_flags: <defaults>
</compile_context>

<pallas_src>
import jax
import jax.numpy as jnp
from jax.experimental import pallas as pl
from jax.experimental.pallas import tpu as pltpu

LEAKY_SLOPE = 0.01   # torch.nn.LeakyReLU default negative_slope
BN_EPS = 1e-5        # torch.nn.BatchNorm2d default eps
_WPAD = 8            # front padding on W inside the scratch (sublane-aligned store)


def _make_encoder_kernel(layer_cfgs, N):
    """layer_cfgs: tuple of (H, W, Cin, Cout, k, p) per layer (all static)."""
    n_layers = len(layer_cfgs)

    def kernel(*refs):
        x_ref = refs[0]
        param_refs = refs[1:1 + 4 * n_layers]
        o_ref = refs[1 + 4 * n_layers]
        pad_refs = refs[2 + 4 * n_layers:]

        cur = x_ref[...]                                    # (N, H0, W0, Cin0) f32
        for l, (H, W, Cin, Cout, k, p) in enumerate(layer_cfgs):
            w_ref, b_ref, g_ref, be_ref = param_refs[4 * l:4 * l + 4]
            pad_ref = pad_refs[l]

            # ---- zero-pad into VMEM scratch (interior store at aligned offset) ----
            pad_ref[...] = jnp.zeros_like(pad_ref)
            pad_ref[:, p:p + H, _WPAD:_WPAD + W, :] = cur

            # ---- Conv2d: k*k shifted matmuls, batch folded into M = N*H*W ----
            M = N * H * W
            acc = jnp.zeros((M, Cout), jnp.float32)
            for dy in range(k):
                for dx in range(k):
                    c0 = _WPAD - p + dx
                    patch = pad_ref[:, dy:dy + H, c0:c0 + W, :]     # (N, H, W, Cin)
                    acc = acc + jnp.dot(patch.reshape(M, Cin),
                                        w_ref[dy * k + dx],
                                        preferred_element_type=jnp.float32)
            y = acc + b_ref[...]                            # bias (1, Cout) broadcast
            y = jnp.where(y > 0, y, LEAKY_SLOPE * y)        # LeakyReLU

            # ---- MaxPool2d(kernel=2, stride=2) ----
            Ho, Wo = H // 2, W // 2
            t = y.reshape(N * H * Wo, 2, Cout)
            y = jnp.maximum(t[:, 0, :], t[:, 1, :])         # pool along W
            t = y.reshape(N * Ho, 2, Wo, Cout)
            y = jnp.maximum(t[:, 0, :, :], t[:, 1, :, :])   # pool along H
            y = y.reshape(N * Ho * Wo, Cout)

            # ---- BatchNorm2d (training mode: batch stats, biased variance) ----
            mean = jnp.mean(y, axis=0, keepdims=True)
            var = jnp.mean((y - mean) ** 2, axis=0, keepdims=True)
            inv = jax.lax.rsqrt(var + BN_EPS)
            y = (y - mean) * inv * g_ref[...] + be_ref[...]

            cur = y.reshape(N, Ho, Wo, Cout)

        o_ref[...] = cur

    return kernel


def cnn_encoder_forward(x_nchw, params):
    """params: list of (w_torch(out,in,k,k), b(out,), gamma(out,), beta(out,))."""
    x = jnp.transpose(x_nchw, (0, 2, 3, 1)).astype(jnp.float32)     # NCHW -> NHWC
    N, H, W, Cin = x.shape

    layer_cfgs = []
    flat_inputs = [x]
    in_specs = [pl.BlockSpec((N, H, W, Cin), lambda i: (0, 0, 0, 0))]
    scratch_shapes = []

    h, w_sp, cin = H, W, Cin
    for (wt, b, gamma, beta) in params:
        cout, cin_w, k, k2 = wt.shape
        assert cin_w == cin and k == k2, "weight shape mismatch"
        assert k % 2 == 1, "only odd kernel sizes give PyTorch 'same' padding with k//2"
        assert h % 2 == 0 and w_sp % 2 == 0, "spatial dims must be even for MaxPool(2,2)"
        p = k // 2
        assert p <= _WPAD
        layer_cfgs.append((h, w_sp, cin, cout, k, p))

        # PyTorch weight (out, in, kh, kw) -> (kh*kw, in, out)
        w_kio = jnp.transpose(wt, (2, 3, 1, 0)).reshape(k * k, cin, cout).astype(jnp.float32)
        flat_inputs += [
            w_kio,
            b.reshape(1, cout).astype(jnp.float32),
            gamma.reshape(1, cout).astype(jnp.float32),
            beta.reshape(1, cout).astype(jnp.float32),
        ]
        in_specs += [
            pl.BlockSpec((k * k, cin, cout), lambda i: (0, 0, 0)),
            pl.BlockSpec((1, cout), lambda i: (0, 0)),
            pl.BlockSpec((1, cout), lambda i: (0, 0)),
            pl.BlockSpec((1, cout), lambda i: (0, 0)),
        ]
        scratch_shapes.append(
            pltpu.VMEM((N, h + 2 * p, _WPAD + w_sp + p, cin), jnp.float32))

        h, w_sp, cin = h // 2, w_sp // 2, cout

    out_shape = jax.ShapeDtypeStruct((N, h, w_sp, cin), jnp.float32)
    kernel = _make_encoder_kernel(tuple(layer_cfgs), N)

    y = pl.pallas_call(
        kernel,
        out_shape=out_shape,
        grid=(1,),
        in_specs=in_specs,
        out_specs=pl.BlockSpec((N, h, w_sp, cin), lambda i: (0, 0, 0, 0)),
        scratch_shapes=scratch_shapes,
        compiler_params=pltpu.CompilerParams(dimension_semantics=("arbitrary",)),
    )(*flat_inputs)

    # nn.Flatten on the NCHW output: flatten in (C, H, W) order.
    y_nchw = jnp.transpose(y, (0, 3, 1, 2))
    return y_nchw.reshape(N, -1)


if __name__ == "__main__":
    # Module config consistent with the asserts: input_dims[1:] == output_dims[:-1]
    input_dims = [4, 8]
    output_dims = [8, 16]
    kernel_sizes = [3, 3]
    N, H, W = 2, 16, 16

    key = jax.random.PRNGKey(0)
    key, kx = jax.random.split(key)
    x = jax.random.normal(kx, (N, input_dims[0], H, W), jnp.float32)

    params = []
    for cin, cout, k in zip(input_dims, output_dims, kernel_sizes):
        key, kw_key, kb_key = jax.random.split(key, 3)
        w = jax.random.normal(kw_key, (cout, cin, k, k), jnp.float32) * 0.1
        b = jax.random.normal(kb_key, (cout,), jnp.float32) * 0.1
        gamma = jnp.ones((cout,), jnp.float32)     # BatchNorm2d default affine weight
        beta = jnp.zeros((cout,), jnp.float32)     # BatchNorm2d default affine bias
        params.append((w, b, gamma, beta))

    out = cnn_encoder_forward(x, params)
    out = jax.block_until_ready(out)

    # Each layer halves the spatial dims; last layer has output_dims[-1] channels.
    n_layers = len(input_dims)
    expected = (N, output_dims[-1] * (H // 2 ** n_layers) * (W // 2 ** n_layers))
    assert out.shape == expected, (out.shape, expected)
    assert bool(jnp.all(jnp.isfinite(out)))
    print("KERNEL_OK")
</pallas_src>

<mosaic_0001>
module attributes {stable_mosaic.version = 11 : i64} {
  func.func @kernel(%arg0: i32, %arg1: memref<2x16x16x4xf32, #tpu.memory_space<vmem>>, %arg2: memref<9x4x8xf32, #tpu.memory_space<vmem>>, %arg3: memref<1x8xf32, #tpu.memory_space<vmem>>, %arg4: memref<1x8xf32, #tpu.memory_space<vmem>>, %arg5: memref<1x8xf32, #tpu.memory_space<vmem>>, %arg6: memref<9x8x16xf32, #tpu.memory_space<vmem>>, %arg7: memref<1x16xf32, #tpu.memory_space<vmem>>, %arg8: memref<1x16xf32, #tpu.memory_space<vmem>>, %arg9: memref<1x16xf32, #tpu.memory_space<vmem>>, %arg10: memref<2x4x4x16xf32, #tpu.memory_space<vmem>>, %arg11: memref<2x18x25x4xf32, #tpu.memory_space<vmem>>, %arg12: memref<2x10x17x8xf32, #tpu.memory_space<vmem>>) attributes {dimension_semantics = [#tpu.dimension_semantics<arbitrary>], iteration_bounds = array<i64: 1>, scalar_prefetch = 0 : i64, scratch_operands = 2 : i64, tpu.core_type = #tpu.core_type<tc>, window_params = [{pipeline_mode = #tpu.pipeline_mode<synchronous>, transform_indices = @transform_0, window_bounds = array<i64: 2, 16, 16, 4>}, {pipeline_mode = #tpu.pipeline_mode<synchronous>, transform_indices = @transform_1, window_bounds = array<i64: 9, 4, 8>}, {pipeline_mode = #tpu.pipeline_mode<synchronous>, transform_indices = @transform_2, window_bounds = array<i64: 1, 8>}, {pipeline_mode = #tpu.pipeline_mode<synchronous>, transform_indices = @transform_3, window_bounds = array<i64: 1, 8>}, {pipeline_mode = #tpu.pipeline_mode<synchronous>, transform_indices = @transform_4, window_bounds = array<i64: 1, 8>}, {pipeline_mode = #tpu.pipeline_mode<synchronous>, transform_indices = @transform_5, window_bounds = array<i64: 9, 8, 16>}, {pipeline_mode = #tpu.pipeline_mode<synchronous>, transform_indices = @transform_6, window_bounds = array<i64: 1, 16>}, {pipeline_mode = #tpu.pipeline_mode<synchronous>, transform_indices = @transform_7, window_bounds = array<i64: 1, 16>}, {pipeline_mode = #tpu.pipeline_mode<synchronous>, transform_indices = @transform_8, window_bounds = array<i64: 1, 16>}, {pipeline_mode = #tpu.pipeline_mode<synchronous>, transform_indices = @transform_9, window_bounds = array<i64: 2, 4, 4, 16>}]} {
    %c0 = arith.constant 0 : index
    %c0_0 = arith.constant 0 : index
    %c0_1 = arith.constant 0 : index
    %c0_2 = arith.constant 0 : index
    %0 = vector.load %arg1[%c0, %c0_0, %c0_1, %c0_2] : memref<2x16x16x4xf32, #tpu.memory_space<vmem>>, vector<2x16x16x4xf32>
    %cst = arith.constant 0.000000e+00 : f32
    %1 = vector.broadcast %cst : f32 to vector<2x18x25x4xf32>
    %c0_3 = arith.constant 0 : index
    %c0_4 = arith.constant 0 : index
    %c0_5 = arith.constant 0 : index
    %c0_6 = arith.constant 0 : index
    %2 = vector.load %arg11[%c0_3, %c0_4, %c0_5, %c0_6] : memref<2x18x25x4xf32, #tpu.memory_space<vmem>>, vector<2x18x25x4xf32>
    tpu.vector_store %arg11[%c0_3, %c0_4, %c0_5, %c0_6], %1 {strides = array<i32>} : memref<2x18x25x4xf32, #tpu.memory_space<vmem>>, vector<2x18x25x4xf32>,
    %c0_7 = arith.constant 0 : index
    %c1 = arith.constant 1 : index
    %c8 = arith.constant 8 : index
    %c0_8 = arith.constant 0 : index
    %3 = vector.load %arg11[%c0_7, %c1, %c8, %c0_8] : memref<2x18x25x4xf32, #tpu.memory_space<vmem>>, vector<2x16x16x4xf32>
    tpu.vector_store %arg11[%c0_7, %c1, %c8, %c0_8], %0 {strides = array<i32>} : memref<2x18x25x4xf32, #tpu.memory_space<vmem>>, vector<2x16x16x4xf32>,
    %cst_9 = arith.constant 0.000000e+00 : f32
    %4 = vector.broadcast %cst_9 : f32 to vector<512x8xf32>
    %c0_10 = arith.constant 0 : index
    %c0_11 = arith.constant 0 : index
    %c7 = arith.constant 7 : index
    %c0_12 = arith.constant 0 : index
    %5 = vector.load %arg11[%c0_10, %c0_11, %c7, %c0_12] : memref<2x18x25x4xf32, #tpu.memory_space<vmem>>, vector<2x16x16x4xf32>
    %6 = vector.shape_cast %5 : vector<2x16x16x4xf32> to vector<512x4xf32>
    %c0_13 = arith.constant 0 : index
    %c0_14 = arith.constant 0 : index
    %c0_15 = arith.constant 0 : index
    %7 = vector.load %arg2[%c0_13, %c0_14, %c0_15] : memref<9x4x8xf32, #tpu.memory_space<vmem>>, vector<1x4x8xf32>
    %8 = vector.shape_cast %7 : vector<1x4x8xf32> to vector<4x8xf32>
    %cst_16 = arith.constant dense<0.000000e+00> : vector<512x8xf32>
    %9 = tpu.matmul %6, %8, %cst_16 {dimension_numbers = #tpu.dot_dimension_numbers<[1], [0], [0], [1], [0, 0, 1, 1], [], []>} : vector<512x4xf32>, vector<4x8xf32>, vector<512x8xf32> -> vector<512x8xf32>
    %10 = arith.addf %4, %9 : vector<512x8xf32>
    %c0_17 = arith.constant 0 : index
    %c0_18 = arith.constant 0 : index
    %c8_19 = arith.constant 8 : index
    %c0_20 = arith.constant 0 : index
    %11 = vector.load %arg11[%c0_17, %c0_18, %c8_19, %c0_20] : memref<2x18x25x4xf32, #tpu.memory_space<vmem>>, vector<2x16x16x4xf32>
    %12 = vector.shape_cast %11 : vector<2x16x16x4xf32> to vector<512x4xf32>
    %c1_21 = arith.constant 1 : index
    %c0_22 = arith.constant 0 : index
    %c0_23 = arith.constant 0 : index
    %13 = vector.load %arg2[%c1_21, %c0_22, %c0_23] : memref<9x4x8xf32, #tpu.memory_space<vmem>>, vector<1x4x8xf32>
    %14 = vector.shape_cast %13 : vector<1x4x8xf32> to vector<4x8xf32>
    %cst_24 = arith.constant dense<0.000000e+00> : vector<512x8xf32>
    %15 = tpu.matmul %12, %14, %cst_24 {dimension_numbers = #tpu.dot_dimension_numbers<[1], [0], [0], [1], [0, 0, 1, 1], [], []>} : vector<512x4xf32>, vector<4x8xf32>, vector<512x8xf32> -> vector<512x8xf32>
    %16 = arith.addf %10, %15 : vector<512x8xf32>
    %c0_25 = arith.constant 0 : index
    %c0_26 = arith.constant 0 : index
    %c9 = arith.constant 9 : index
    %c0_27 = arith.constant 0 : index
    %17 = vector.load %arg11[%c0_25, %c0_26, %c9, %c0_27] : memref<2x18x25x4xf32, #tpu.memory_space<vmem>>, vector<2x16x16x4xf32>
    %18 = vector.shape_cast %17 : vector<2x16x16x4xf32> to vector<512x4xf32>
    %c2 = arith.constant 2 : index
    %c0_28 = arith.constant 0 : index
    %c0_29 = arith.constant 0 : index
    %19 = vector.load %arg2[%c2, %c0_28, %c0_29] : memref<9x4x8xf32, #tpu.memory_space<vmem>>, vector<1x4x8xf32>
    %20 = vector.shape_cast %19 : vector<1x4x8xf32> to vector<4x8xf32>
    %cst_30 = arith.constant dense<0.000000e+00> : vector<512x8xf32>
    %21 = tpu.matmul %18, %20, %cst_30 {dimension_numbers = #tpu.dot_dimension_numbers<[1], [0], [0], [1], [0, 0, 1, 1], [], []>} : vector<512x4xf32>, vector<4x8xf32>, vector<512x8xf32> -> vector<512x8xf32>
    %22 = arith.addf %16, %21 : vector<512x8xf32>
    %c0_31 = arith.constant 0 : index
    %c1_32 = arith.constant 1 : index
    %c7_33 = arith.constant 7 : index
    %c0_34 = arith.constant 0 : index
    %23 = vector.load %arg11[%c0_31, %c1_32, %c7_33, %c0_34] : memref<2x18x25x4xf32, #tpu.memory_space<vmem>>, vector<2x16x16x4xf32>
    %24 = vector.shape_cast %23 : vector<2x16x16x4xf32> to vector<512x4xf32>
    %c3 = arith.constant 3 : index
    %c0_35 = arith.constant 0 : index
    %c0_36 = arith.constant 0 : index
    %25 = vector.load %arg2[%c3, %c0_35, %c0_36] : memref<9x4x8xf32, #tpu.memory_space<vmem>>, vector<1x4x8xf32>
    %26 = vector.shape_cast %25 : vector<1x4x8xf32> to vector<4x8xf32>
    %cst_37 = arith.constant dense<0.000000e+00> : vector<512x8xf32>
    %27 = tpu.matmul %24, %26, %cst_37 {dimension_numbers = #tpu.dot_dimension_numbers<[1], [0], [0], [1], [0, 0, 1, 1], [], []>} : vector<512x4xf32>, vector<4x8xf32>, vector<512x8xf32> -> vector<512x8xf32>
    %28 = arith.addf %22, %27 : vector<512x8xf32>
    %c0_38 = arith.constant 0 : index
    %c1_39 = arith.constant 1 : index
    %c8_40 = arith.constant 8 : index
    %c0_41 = arith.constant 0 : index
    %29 = vector.load %arg11[%c0_38, %c1_39, %c8_40, %c0_41] : memref<2x18x25x4xf32, #tpu.memory_space<vmem>>, vector<2x16x16x4xf32>
    %30 = vector.shape_cast %29 : vector<2x16x16x4xf32> to vector<512x4xf32>
    %c4 = arith.constant 4 : index
    %c0_42 = arith.constant 0 : index
    %c0_43 = arith.constant 0 : index
    %31 = vector.load %arg2[%c4, %c0_42, %c0_43] : memref<9x4x8xf32, #tpu.memory_space<vmem>>, vector<1x4x8xf32>
    %32 = vector.shape_cast %31 : vector<1x4x8xf32> to vector<4x8xf32>
    %cst_44 = arith.constant dense<0.000000e+00> : vector<512x8xf32>
    %33 = tpu.matmul %30, %32, %cst_44 {dimension_numbers = #tpu.dot_dimension_numbers<[1], [0], [0], [1], [0, 0, 1, 1], [], []>} : vector<512x4xf32>, vector<4x8xf32>, vector<512x8xf32> -> vector<512x8xf32>
    %34 = arith.addf %28, %33 : vector<512x8xf32>
    %c0_45 = arith.constant 0 : index
    %c1_46 = arith.constant 1 : index
    %c9_47 = arith.constant 9 : index
    %c0_48 = arith.constant 0 : index
    %35 = vector.load %arg11[%c0_45, %c1_46, %c9_47, %c0_48] : memref<2x18x25x4xf32, #tpu.memory_space<vmem>>, vector<2x16x16x4xf32>
    %36 = vector.shape_cast %35 : vector<2x16x16x4xf32> to vector<512x4xf32>
    %c5 = arith.constant 5 : index
    %c0_49 = arith.constant 0 : index
    %c0_50 = arith.constant 0 : index
    %37 = vector.load %arg2[%c5, %c0_49, %c0_50] : memref<9x4x8xf32, #tpu.memory_space<vmem>>, vector<1x4x8xf32>
    %38 = vector.shape_cast %37 : vector<1x4x8xf32> to vector<4x8xf32>
    %cst_51 = arith.constant dense<0.000000e+00> : vector<512x8xf32>
    %39 = tpu.matmul %36, %38, %cst_51 {dimension_numbers = #tpu.dot_dimension_numbers<[1], [0], [0], [1], [0, 0, 1, 1], [], []>} : vector<512x4xf32>, vector<4x8xf32>, vector<512x8xf32> -> vector<512x8xf32>
    %40 = arith.addf %34, %39 : vector<512x8xf32>
    %c0_52 = arith.constant 0 : index
    %c2_53 = arith.constant 2 : index
    %c7_54 = arith.constant 7 : index
    %c0_55 = arith.constant 0 : index
    %41 = vector.load %arg11[%c0_52, %c2_53, %c7_54, %c0_55] : memref<2x18x25x4xf32, #tpu.memory_space<vmem>>, vector<2x16x16x4xf32>
    %42 = vector.shape_cast %41 : vector<2x16x16x4xf32> to vector<512x4xf32>
    %c6 = arith.constant 6 : index
    %c0_56 = arith.constant 0 : index
    %c0_57 = arith.constant 0 : index
    %43 = vector.load %arg2[%c6, %c0_56, %c0_57] : memref<9x4x8xf32, #tpu.memory_space<vmem>>, vector<1x4x8xf32>
    %44 = vector.shape_cast %43 : vector<1x4x8xf32> to vector<4x8xf32>
    %cst_58 = arith.constant dense<0.000000e+00> : vector<512x8xf32>
    %45 = tpu.matmul %42, %44, %cst_58 {dimension_numbers = #tpu.dot_dimension_numbers<[1], [0], [0], [1], [0, 0, 1, 1], [], []>} : vector<512x4xf32>, vector<4x8xf32>, vector<512x8xf32> -> vector<512x8xf32>
    %46 = arith.addf %40, %45 : vector<512x8xf32>
    %c0_59 = arith.constant 0 : index
    %c2_60 = arith.constant 2 : index
    %c8_61 = arith.constant 8 : index
    %c0_62 = arith.constant 0 : index
    %47 = vector.load %arg11[%c0_59, %c2_60, %c8_61, %c0_62] : memref<2x18x25x4xf32, #tpu.memory_space<vmem>>, vector<2x16x16x4xf32>
    %48 = vector.shape_cast %47 : vector<2x16x16x4xf32> to vector<512x4xf32>
    %c7_63 = arith.constant 7 : index
    %c0_64 = arith.constant 0 : index
    %c0_65 = arith.constant 0 : index
    %49 = vector.load %arg2[%c7_63, %c0_64, %c0_65] : memref<9x4x8xf32, #tpu.memory_space<vmem>>, vector<1x4x8xf32>
    %50 = vector.shape_cast %49 : vector<1x4x8xf32> to vector<4x8xf32>
    %cst_66 = arith.constant dense<0.000000e+00> : vector<512x8xf32>
    %51 = tpu.matmul %48, %50, %cst_66 {dimension_numbers = #tpu.dot_dimension_numbers<[1], [0], [0], [1], [0, 0, 1, 1], [], []>} : vector<512x4xf32>, vector<4x8xf32>, vector<512x8xf32> -> vector<512x8xf32>
    %52 = arith.addf %46, %51 : vector<512x8xf32>
    %c0_67 = arith.constant 0 : index
    %c2_68 = arith.constant 2 : index
    %c9_69 = arith.constant 9 : index
    %c0_70 = arith.constant 0 : index
    %53 = vector.load %arg11[%c0_67, %c2_68, %c9_69, %c0_70] : memref<2x18x25x4xf32, #tpu.memory_space<vmem>>, vector<2x16x16x4xf32>
    %54 = vector.shape_cast %53 : vector<2x16x16x4xf32> to vector<512x4xf32>
    %c8_71 = arith.constant 8 : index
    %c0_72 = arith.constant 0 : index
    %c0_73 = arith.constant 0 : index
    %55 = vector.load %arg2[%c8_71, %c0_72, %c0_73] : memref<9x4x8xf32, #tpu.memory_space<vmem>>, vector<1x4x8xf32>
    %56 = vector.shape_cast %55 : vector<1x4x8xf32> to vector<4x8xf32>
    %cst_74 = arith.constant dense<0.000000e+00> : vector<512x8xf32>
    %57 = tpu.matmul %54, %56, %cst_74 {dimension_numbers = #tpu.dot_dimension_numbers<[1], [0], [0], [1], [0, 0, 1, 1], [], []>} : vector<512x4xf32>, vector<4x8xf32>, vector<512x8xf32> -> vector<512x8xf32>
    %58 = arith.addf %52, %57 : vector<512x8xf32>
    %c0_75 = arith.constant 0 : index
    %c0_76 = arith.constant 0 : index
    %59 = vector.load %arg3[%c0_75, %c0_76] : memref<1x8xf32, #tpu.memory_space<vmem>>, vector<1x8xf32>
    %60 = vector.broadcast %59 : vector<1x8xf32> to vector<512x8xf32>
    %61 = arith.addf %58, %60 : vector<512x8xf32>
    %cst_77 = arith.constant 0.000000e+00 : f32
    %62 = vector.broadcast %cst_77 : f32 to vector<512x8xf32>
    %63 = arith.cmpf ogt, %61, %62 : vector<512x8xf32>
    %cst_78 = arith.constant 0.00999999977 : f32
    %64 = vector.broadcast %cst_78 : f32 to vector<512x8xf32>
    %65 = arith.mulf %64, %61 : vector<512x8xf32>
    %66 = arith.select %63, %61, %65 : vector<512x8xi1>, vector<512x8xf32>
    %67 = vector.shape_cast %66 : vector<512x8xf32> to vector<256x2x8xf32>
    %68 = vector.extract_strided_slice %67 {offsets = [0, 0, 0], sizes = [256, 1, 8], strides = [1, 1, 1]} : vector<256x2x8xf32> to vector<256x1x8xf32>
    %69 = vector.shape_cast %68 : vector<256x1x8xf32> to vector<256x8xf32>
    %70 = vector.extract_strided_slice %67 {offsets = [0, 1, 0], sizes = [256, 1, 8], strides = [1, 1, 1]} : vector<256x2x8xf32> to vector<256x1x8xf32>
    %71 = vector.shape_cast %70 : vector<256x1x8xf32> to vector<256x8xf32>
    %72 = arith.maximumf %69, %71 : vector<256x8xf32>
    %73 = vector.shape_cast %72 : vector<256x8xf32> to vector<16x2x8x8xf32>
    %74 = vector.extract_strided_slice %73 {offsets = [0, 0, 0, 0], sizes = [16, 1, 8, 8], strides = [1, 1, 1, 1]} : vector<16x2x8x8xf32> to vector<16x1x8x8xf32>
    %75 = vector.shape_cast %74 : vector<16x1x8x8xf32> to vector<16x8x8xf32>
    %76 = vector.extract_strided_slice %73 {offsets = [0, 1, 0, 0], sizes = [16, 1, 8, 8], strides = [1, 1, 1, 1]} : vector<16x2x8x8xf32> to vector<16x1x8x8xf32>
    %77 = vector.shape_cast %76 : vector<16x1x8x8xf32> to vector<16x8x8xf32>
    %78 = arith.maximumf %75, %77 : vector<16x8x8xf32>
    %79 = vector.shape_cast %78 : vector<16x8x8xf32> to vector<128x8xf32>
    %cst_79 = arith.constant dense<0.000000e+00> : vector<8xf32>
    %80 = vector.multi_reduction <add>, %79, %cst_79 [0] : vector<128x8xf32> to vector<8xf32>
    %81 = vector.shape_cast %80 : vector<8xf32> to vector<1x8xf32>
    %cst_80 = arith.constant 1.280000e+02 : f32
    %82 = vector.broadcast %cst_80 : f32 to vector<1x8xf32>
    %83 = arith.divf %81, %82 : vector<1x8xf32>
    %84 = vector.broadcast %83 : vector<1x8xf32> to vector<128x8xf32>
    %85 = arith.subf %79, %84 : vector<128x8xf32>
    %86 = arith.mulf %85, %85 : vector<128x8xf32>
    %cst_81 = arith.constant dense<0.000000e+00> : vector<8xf32>
    %87 = vector.multi_reduction <add>, %86, %cst_81 [0] : vector<128x8xf32> to vector<8xf32>
    %88 = vector.shape_cast %87 : vector<8xf32> to vector<1x8xf32>
    %cst_82 = arith.constant 1.280000e+02 : f32
    %89 = vector.broadcast %cst_82 : f32 to vector<1x8xf32>
    %90 = arith.divf %88, %89 : vector<1x8xf32>
    %cst_83 = arith.constant 9.99999974E-6 : f32
    %91 = vector.broadcast %cst_83 : f32 to vector<1x8xf32>
    %92 = arith.addf %90, %91 : vector<1x8xf32>
    %93 = math.rsqrt %92 : vector<1x8xf32>
    %94 = vector.broadcast %83 : vector<1x8xf32> to vector<128x8xf32>
    %95 = arith.subf %79, %94 : vector<128x8xf32>
    %96 = vector.broadcast %93 : vector<1x8xf32> to vector<128x8xf32>
    %97 = arith.mulf %95, %96 : vector<128x8xf32>
    %c0_84 = arith.constant 0 : index
    %c0_85 = arith.constant 0 : index
    %98 = vector.load %arg4[%c0_84, %c0_85] : memref<1x8xf32, #tpu.memory_space<vmem>>, vector<1x8xf32>
    %99 = vector.broadcast %98 : vector<1x8xf32> to vector<128x8xf32>
    %100 = arith.mulf %97, %99 : vector<128x8xf32>
    %c0_86 = arith.constant 0 : index
    %c0_87 = arith.constant 0 : index
    %101 = vector.load %arg5[%c0_86, %c0_87] : memref<1x8xf32, #tpu.memory_space<vmem>>, vector<1x8xf32>
    %102 = vector.broadcast %101 : vector<1x8xf32> to vector<128x8xf32>
    %103 = arith.addf %100, %102 : vector<128x8xf32>
    %104 = vector.shape_cast %103 : vector<128x8xf32> to vector<2x8x8x8xf32>
    %cst_88 = arith.constant 0.000000e+00 : f32
    %105 = vector.broadcast %cst_88 : f32 to vector<2x10x17x8xf32>
    %c0_89 = arith.constant 0 : index
    %c0_90 = arith.constant 0 : index
    %c0_91 = arith.constant 0 : index
    %c0_92 = arith.constant 0 : index
    %106 = vector.load %arg12[%c0_89, %c0_90, %c0_91, %c0_92] : memref<2x10x17x8xf32, #tpu.memory_space<vmem>>, vector<2x10x17x8xf32>
    tpu.vector_store %arg12[%c0_89, %c0_90, %c0_91, %c0_92], %105 {strides = array<i32>} : memref<2x10x17x8xf32, #tpu.memory_space<vmem>>, vector<2x10x17x8xf32>,
    %c0_93 = arith.constant 0 : index
    %c1_94 = arith.constant 1 : index
    %c8_95 = arith.constant 8 : index
    %c0_96 = arith.constant 0 : index
    %107 = vector.load %arg12[%c0_93, %c1_94, %c8_95, %c0_96] : memref<2x10x17x8xf32, #tpu.memory_space<vmem>>, vector<2x8x8x8xf32>
    tpu.vector_store %arg12[%c0_93, %c1_94, %c8_95, %c0_96], %104 {strides = array<i32>} : memref<2x10x17x8xf32, #tpu.memory_space<vmem>>, vector<2x8x8x8xf32>,
    %cst_97 = arith.constant 0.000000e+00 : f32
    %108 = vector.broadcast %cst_97 : f32 to vector<128x16xf32>
    %c0_98 = arith.constant 0 : index
    %c0_99 = arith.constant 0 : index
    %c7_100 = arith.constant 7 : index
    %c0_101 = arith.constant 0 : index
    %109 = vector.load %arg12[%c0_98, %c0_99, %c7_100, %c0_101] : memref<2x10x17x8xf32, #tpu.memory_space<vmem>>, vector<2x8x8x8xf32>
    %110 = vector.shape_cast %109 : vector<2x8x8x8xf32> to vector<128x8xf32>
    %c0_102 = arith.constant 0 : index
    %c0_103 = arith.constant 0 : index
    %c0_104 = arith.constant 0 : index
    %111 = vector.load %arg6[%c0_102, %c0_103, %c0_104] : memref<9x8x16xf32, #tpu.memory_space<vmem>>, vector<1x8x16xf32>
    %112 = vector.shape_cast %111 : vector<1x8x16xf32> to vector<8x16xf32>
    %cst_105 = arith.constant dense<0.000000e+00> : vector<128x16xf32>
    %113 = tpu.matmul %110, %112, %cst_105 {dimension_numbers = #tpu.dot_dimension_numbers<[1], [0], [0], [1], [0, 0, 1, 1], [], []>} : vector<128x8xf32>, vector<8x16xf32>, vector<128x16xf32> -> vector<128x16xf32>
    %114 = arith.addf %108, %113 : vector<128x16xf32>
    %c0_106 = arith.constant 0 : index
    %c0_107 = arith.constant 0 : index
    %c8_108 = arith.constant 8 : index
    %c0_109 = arith.constant 0 : index
    %115 = vector.load %arg12[%c0_106, %c0_107, %c8_108, %c0_109] : memref<2x10x17x8xf32, #tpu.memory_space<vmem>>, vector<2x8x8x8xf32>
    %116 = vector.shape_cast %115 : vector<2x8x8x8xf32> to vector<128x8xf32>
    %c1_110 = arith.constant 1 : index
    %c0_111 = arith.constant 0 : index
    %c0_112 = arith.constant 0 : index
    %117 = vector.load %arg6[%c1_110, %c0_111, %c0_112] : memref<9x8x16xf32, #tpu.memory_space<vmem>>, vector<1x8x16xf32>
    %118 = vector.shape_cast %117 : vector<1x8x16xf32> to vector<8x16xf32>
    %cst_113 = arith.constant dense<0.000000e+00> : vector<128x16xf32>
    %119 = tpu.matmul %116, %118, %cst_113 {dimension_numbers = #tpu.dot_dimension_numbers<[1], [0], [0], [1], [0, 0, 1, 1], [], []>} : vector<128x8xf32>, vector<8x16xf32>, vector<128x16xf32> -> vector<128x16xf32>
    %120 = arith.addf %114, %119 : vector<128x16xf32>
    %c0_114 = arith.constant 0 : index
    %c0_115 = arith.constant 0 : index
    %c9_116 = arith.constant 9 : index
    %c0_117 = arith.constant 0 : index
    %121 = vector.load %arg12[%c0_114, %c0_115, %c9_116, %c0_117] : memref<2x10x17x8xf32, #tpu.memory_space<vmem>>, vector<2x8x8x8xf32>
    %122 = vector.shape_cast %121 : vector<2x8x8x8xf32> to vector<128x8xf32>
    %c2_118 = arith.constant 2 : index
    %c0_119 = arith.constant 0 : index
    %c0_120 = arith.constant 0 : index
    %123 = vector.load %arg6[%c2_118, %c0_119, %c0_120] : memref<9x8x16xf32, #tpu.memory_space<vmem>>, vector<1x8x16xf32>
    %124 = vector.shape_cast %123 : vector<1x8x16xf32> to vector<8x16xf32>
    %cst_121 = arith.constant dense<0.000000e+00> : vector<128x16xf32>
    %125 = tpu.matmul %122, %124, %cst_121 {dimension_numbers = #tpu.dot_dimension_numbers<[1], [0], [0], [1], [0, 0, 1, 1], [], []>} : vector<128x8xf32>, vector<8x16xf32>, vector<128x16xf32> -> vector<128x16xf32>
    %126 = arith.addf %120, %125 : vector<128x16xf32>
    %c0_122 = arith.constant 0 : index
    %c1_123 = arith.constant 1 : index
    %c7_124 = arith.constant 7 : index
    %c0_125 = arith.constant 0 : index
    %127 = vector.load %arg12[%c0_122, %c1_123, %c7_124, %c0_125] : memref<2x10x17x8xf32, #tpu.memory_space<vmem>>, vector<2x8x8x8xf32>
    %128 = vector.shape_cast %127 : vector<2x8x8x8xf32> to vector<128x8xf32>
    %c3_126 = arith.constant 3 : index
    %c0_127 = arith.constant 0 : index
    %c0_128 = arith.constant 0 : index
    %129 = vector.load %arg6[%c3_126, %c0_127, %c0_128] : memref<9x8x16xf32, #tpu.memory_space<vmem>>, vector<1x8x16xf32>
    %130 = vector.shape_cast %129 : vector<1x8x16xf32> to vector<8x16xf32>
    %cst_129 = arith.constant dense<0.000000e+00> : vector<128x16xf32>
    %131 = tpu.matmul %128, %130, %cst_129 {dimension_numbers = #tpu.dot_dimension_numbers<[1], [0], [0], [1], [0, 0, 1, 1], [], []>} : vector<128x8xf32>, vector<8x16xf32>, vector<128x16xf32> -> vector<128x16xf32>
    %132 = arith.addf %126, %131 : vector<128x16xf32>
    %c0_130 = arith.constant 0 : index
    %c1_131 = arith.constant 1 : index
    %c8_132 = arith.constant 8 : index
    %c0_133 = arith.constant 0 : index
    %133 = vector.load %arg12[%c0_130, %c1_131, %c8_132, %c0_133] : memref<2x10x17x8xf32, #tpu.memory_space<vmem>>, vector<2x8x8x8xf32>
    %134 = vector.shape_cast %133 : vector<2x8x8x8xf32> to vector<128x8xf32>
    %c4_134 = arith.constant 4 : index
    %c0_135 = arith.constant 0 : index
    %c0_136 = arith.constant 0 : index
    %135 = vector.load %arg6[%c4_134, %c0_135, %c0_136] : memref<9x8x16xf32, #tpu.memory_space<vmem>>, vector<1x8x16xf32>
    %136 = vector.shape_cast %135 : vector<1x8x16xf32> to vector<8x16xf32>
    %cst_137 = arith.constant dense<0.000000e+00> : vector<128x16xf32>
    %137 = tpu.matmul %134, %136, %cst_137 {dimension_numbers = #tpu.dot_dimension_numbers<[1], [0], [0], [1], [0, 0, 1, 1], [], []>} : vector<128x8xf32>, vector<8x16xf32>, vector<128x16xf32> -> vector<128x16xf32>
    %138 = arith.addf %132, %137 : vector<128x16xf32>
    %c0_138 = arith.constant 0 : index
    %c1_139 = arith.constant 1 : index
    %c9_140 = arith.constant 9 : index
    %c0_141 = arith.constant 0 : index
    %139 = vector.load %arg12[%c0_138, %c1_139, %c9_140, %c0_141] : memref<2x10x17x8xf32, #tpu.memory_space<vmem>>, vector<2x8x8x8xf32>
    %140 = vector.shape_cast %139 : vector<2x8x8x8xf32> to vector<128x8xf32>
    %c5_142 = arith.constant 5 : index
    %c0_143 = arith.constant 0 : index
    %c0_144 = arith.constant 0 : index
    %141 = vector.load %arg6[%c5_142, %c0_143, %c0_144] : memref<9x8x16xf32, #tpu.memory_space<vmem>>, vector<1x8x16xf32>
    %142 = vector.shape_cast %141 : vector<1x8x16xf32> to vector<8x16xf32>
    %cst_145 = arith.constant dense<0.000000e+00> : vector<128x16xf32>
    %143 = tpu.matmul %140, %142, %cst_145 {dimension_numbers = #tpu.dot_dimension_numbers<[1], [0], [0], [1], [0, 0, 1, 1], [], []>} : vector<128x8xf32>, vector<8x16xf32>, vector<128x16xf32> -> vector<128x16xf32>
    %144 = arith.addf %138, %143 : vector<128x16xf32>
    %c0_146 = arith.constant 0 : index
    %c2_147 = arith.constant 2 : index
    %c7_148 = arith.constant 7 : index
    %c0_149 = arith.constant 0 : index
    %145 = vector.load %arg12[%c0_146, %c2_147, %c7_148, %c0_149] : memref<2x10x17x8xf32, #tpu.memory_space<vmem>>, vector<2x8x8x8xf32>
    %146 = vector.shape_cast %145 : vector<2x8x8x8xf32> to vector<128x8xf32>
    %c6_150 = arith.constant 6 : index
    %c0_151 = arith.constant 0 : index
    %c0_152 = arith.constant 0 : index
    %147 = vector.load %arg6[%c6_150, %c0_151, %c0_152] : memref<9x8x16xf32, #tpu.memory_space<vmem>>, vector<1x8x16xf32>
    %148 = vector.shape_cast %147 : vector<1x8x16xf32> to vector<8x16xf32>
    %cst_153 = arith.constant dense<0.000000e+00> : vector<128x16xf32>
    %149 = tpu.matmul %146, %148, %cst_153 {dimension_numbers = #tpu.dot_dimension_numbers<[1], [0], [0], [1], [0, 0, 1, 1], [], []>} : vector<128x8xf32>, vector<8x16xf32>, vector<128x16xf32> -> vector<128x16xf32>
    %150 = arith.addf %144, %149 : vector<128x16xf32>
    %c0_154 = arith.constant 0 : index
    %c2_155 = arith.constant 2 : index
    %c8_156 = arith.constant 8 : index
    %c0_157 = arith.constant 0 : index
    %151 = vector.load %arg12[%c0_154, %c2_155, %c8_156, %c0_157] : memref<2x10x17x8xf32, #tpu.memory_space<vmem>>, vector<2x8x8x8xf32>
    %152 = vector.shape_cast %151 : vector<2x8x8x8xf32> to vector<128x8xf32>
    %c7_158 = arith.constant 7 : index
    %c0_159 = arith.constant 0 : index
    %c0_160 = arith.constant 0 : index
    %153 = vector.load %arg6[%c7_158, %c0_159, %c0_160] : memref<9x8x16xf32, #tpu.memory_space<vmem>>, vector<1x8x16xf32>
    %154 = vector.shape_cast %153 : vector<1x8x16xf32> to vector<8x16xf32>
    %cst_161 = arith.constant dense<0.000000e+00> : vector<128x16xf32>
    %155 = tpu.matmul %152, %154, %cst_161 {dimension_numbers = #tpu.dot_dimension_numbers<[1], [0], [0], [1], [0, 0, 1, 1], [], []>} : vector<128x8xf32>, vector<8x16xf32>, vector<128x16xf32> -> vector<128x16xf32>
    %156 = arith.addf %150, %155 : vector<128x16xf32>
    %c0_162 = arith.constant 0 : index
    %c2_163 = arith.constant 2 : index
    %c9_164 = arith.constant 9 : index
    %c0_165 = arith.constant 0 : index
    %157 = vector.load %arg12[%c0_162, %c2_163, %c9_164, %c0_165] : memref<2x10x17x8xf32, #tpu.memory_space<vmem>>, vector<2x8x8x8xf32>
    %158 = vector.shape_cast %157 : vector<2x8x8x8xf32> to vector<128x8xf32>
    %c8_166 = arith.constant 8 : index
    %c0_167 = arith.constant 0 : index
    %c0_168 = arith.constant 0 : index
    %159 = vector.load %arg6[%c8_166, %c0_167, %c0_168] : memref<9x8x16xf32, #tpu.memory_space<vmem>>, vector<1x8x16xf32>
    %160 = vector.shape_cast %159 : vector<1x8x16xf32> to vector<8x16xf32>
    %cst_169 = arith.constant dense<0.000000e+00> : vector<128x16xf32>
    %161 = tpu.matmul %158, %160, %cst_169 {dimension_numbers = #tpu.dot_dimension_numbers<[1], [0], [0], [1], [0, 0, 1, 1], [], []>} : vector<128x8xf32>, vector<8x16xf32>, vector<128x16xf32> -> vector<128x16xf32>
    %162 = arith.addf %156, %161 : vector<128x16xf32>
    %c0_170 = arith.constant 0 : index
    %c0_171 = arith.constant 0 : index
    %163 = vector.load %arg7[%c0_170, %c0_171] : memref<1x16xf32, #tpu.memory_space<vmem>>, vector<1x16xf32>
    %164 = vector.broadcast %163 : vector<1x16xf32> to vector<128x16xf32>
    %165 = arith.addf %162, %164 : vector<128x16xf32>
    %cst_172 = arith.constant 0.000000e+00 : f32
    %166 = vector.broadcast %cst_172 : f32 to vector<128x16xf32>
    %167 = arith.cmpf ogt, %165, %166 : vector<128x16xf32>
    %cst_173 = arith.constant 0.00999999977 : f32
    %168 = vector.broadcast %cst_173 : f32 to vector<128x16xf32>
    %169 = arith.mulf %168, %165 : vector<128x16xf32>
    %170 = arith.select %167, %165, %169 : vector<128x16xi1>, vector<128x16xf32>
    %171 = vector.shape_cast %170 : vector<128x16xf32> to vector<64x2x16xf32>
    %172 = vector.extract_strided_slice %171 {offsets = [0, 0, 0], sizes = [64, 1, 16], strides = [1, 1, 1]} : vector<64x2x16xf32> to vector<64x1x16xf32>
    %173 = vector.shape_cast %172 : vector<64x1x16xf32> to vector<64x16xf32>
    %174 = vector.extract_strided_slice %171 {offsets = [0, 1, 0], sizes = [64, 1, 16], strides = [1, 1, 1]} : vector<64x2x16xf32> to vector<64x1x16xf32>
    %175 = vector.shape_cast %174 : vector<64x1x16xf32> to vector<64x16xf32>
    %176 = arith.maximumf %173, %175 : vector<64x16xf32>
    %177 = vector.shape_cast %176 : vector<64x16xf32> to vector<8x2x4x16xf32>
    %178 = vector.extract_strided_slice %177 {offsets = [0, 0, 0, 0], sizes = [8, 1, 4, 16], strides = [1, 1, 1, 1]} : vector<8x2x4x16xf32> to vector<8x1x4x16xf32>
    %179 = vector.shape_cast %178 : vector<8x1x4x16xf32> to vector<8x4x16xf32>
    %180 = vector.extract_strided_slice %177 {offsets = [0, 1, 0, 0], sizes = [8, 1, 4, 16], strides = [1, 1, 1, 1]} : vector<8x2x4x16xf32> to vector<8x1x4x16xf32>
    %181 = vector.shape_cast %180 : vector<8x1x4x16xf32> to vector<8x4x16xf32>
    %182 = arith.maximumf %179, %181 : vector<8x4x16xf32>
    %183 = vector.shape_cast %182 : vector<8x4x16xf32> to vector<32x16xf32>
    %cst_174 = arith.constant dense<0.000000e+00> : vector<16xf32>
    %184 = vector.multi_reduction <add>, %183, %cst_174 [0] : vector<32x16xf32> to vector<16xf32>
    %185 = vector.shape_cast %184 : vector<16xf32> to vector<1x16xf32>
    %cst_175 = arith.constant 3.200000e+01 : f32
    %186 = vector.broadcast %cst_175 : f32 to vector<1x16xf32>
    %187 = arith.divf %185, %186 : vector<1x16xf32>
    %188 = vector.broadcast %187 : vector<1x16xf32> to vector<32x16xf32>
    %189 = arith.subf %183, %188 : vector<32x16xf32>
    %190 = arith.mulf %189, %189 : vector<32x16xf32>
    %cst_176 = arith.constant dense<0.000000e+00> : vector<16xf32>
    %191 = vector.multi_reduction <add>, %190, %cst_176 [0] : vector<32x16xf32> to vector<16xf32>
    %192 = vector.shape_cast %191 : vector<16xf32> to vector<1x16xf32>
    %cst_177 = arith.constant 3.200000e+01 : f32
    %193 = vector.broadcast %cst_177 : f32 to vector<1x16xf32>
    %194 = arith.divf %192, %193 : vector<1x16xf32>
    %cst_178 = arith.constant 9.99999974E-6 : f32
    %195 = vector.broadcast %cst_178 : f32 to vector<1x16xf32>
    %196 = arith.addf %194, %195 : vector<1x16xf32>
    %197 = math.rsqrt %196 : vector<1x16xf32>
    %198 = vector.broadcast %187 : vector<1x16xf32> to vector<32x16xf32>
    %199 = arith.subf %183, %198 : vector<32x16xf32>
    %200 = vector.broadcast %197 : vector<1x16xf32> to vector<32x16xf32>
    %201 = arith.mulf %199, %200 : vector<32x16xf32>
    %c0_179 = arith.constant 0 : index
    %c0_180 = arith.constant 0 : index
    %202 = vector.load %arg8[%c0_179, %c0_180] : memref<1x16xf32, #tpu.memory_space<vmem>>, vector<1x16xf32>
    %203 = vector.broadcast %202 : vector<1x16xf32> to vector<32x16xf32>
    %204 = arith.mulf %201, %203 : vector<32x16xf32>
    %c0_181 = arith.constant 0 : index
    %c0_182 = arith.constant 0 : index
    %205 = vector.load %arg9[%c0_181, %c0_182] : memref<1x16xf32, #tpu.memory_space<vmem>>, vector<1x16xf32>
    %206 = vector.broadcast %205 : vector<1x16xf32> to vector<32x16xf32>
    %207 = arith.addf %204, %206 : vector<32x16xf32>
    %208 = vector.shape_cast %207 : vector<32x16xf32> to vector<2x4x4x16xf32>
    %c0_183 = arith.constant 0 : index
    %c0_184 = arith.constant 0 : index
    %c0_185 = arith.constant 0 : index
    %c0_186 = arith.constant 0 : index
    %209 = vector.load %arg10[%c0_183, %c0_184, %c0_185, %c0_186] : memref<2x4x4x16xf32, #tpu.memory_space<vmem>>, vector<2x4x4x16xf32>
    tpu.vector_store %arg10[%c0_183, %c0_184, %c0_185, %c0_186], %208 {strides = array<i32>} : memref<2x4x4x16xf32, #tpu.memory_space<vmem>>, vector<2x4x4x16xf32>,
    return
  }
  func.func @transform_0(%arg0: i32) -> (i32, i32, i32, i32) {
    %c0_i32 = arith.constant 0 : i32
    %c0_i32_0 = arith.constant 0 : i32
    %c0_i32_1 = arith.constant 0 : i32
    %c0_i32_2 = arith.constant 0 : i32
    %c0_i32_3 = arith.constant 0 : i32
    return %c0_i32, %c0_i32_0, %c0_i32_1, %c0_i32_2 : i32, i32, i32, i32
  }
  func.func @transform_1(%arg0: i32) -> (i32, i32, i32) {
    %c0_i32 = arith.constant 0 : i32
    %c0_i32_0 = arith.constant 0 : i32
    %c0_i32_1 = arith.constant 0 : i32
    %c0_i32_2 = arith.constant 0 : i32
    return %c0_i32, %c0_i32_0, %c0_i32_1 : i32, i32, i32
  }
  func.func @transform_2(%arg0: i32) -> (i32, i32) {
    %c0_i32 = arith.constant 0 : i32
    %c0_i32_0 = arith.constant 0 : i32
    %c0_i32_1 = arith.constant 0 : i32
    return %c0_i32, %c0_i32_0 : i32, i32
  }
  func.func @transform_3(%arg0: i32) -> (i32, i32) {
    %c0_i32 = arith.constant 0 : i32
    %c0_i32_0 = arith.constant 0 : i32
    %c0_i32_1 = arith.constant 0 : i32
    return %c0_i32, %c0_i32_0 : i32, i32
  }
  func.func @transform_4(%arg0: i32) -> (i32, i32) {
    %c0_i32 = arith.constant 0 : i32
    %c0_i32_0 = arith.constant 0 : i32
    %c0_i32_1 = arith.constant 0 : i32
    return %c0_i32, %c0_i32_0 : i32, i32
  }
  func.func @transform_5(%arg0: i32) -> (i32, i32, i32) {
    %c0_i32 = arith.constant 0 : i32
    %c0_i32_0 = arith.constant 0 : i32
    %c0_i32_1 = arith.constant 0 : i32
    %c0_i32_2 = arith.constant 0 : i32
    return %c0_i32, %c0_i32_0, %c0_i32_1 : i32, i32, i32
  }
  func.func @transform_6(%arg0: i32) -> (i32, i32) {
    %c0_i32 = arith.constant 0 : i32
    %c0_i32_0 = arith.constant 0 : i32
    %c0_i32_1 = arith.constant 0 : i32
    return %c0_i32, %c0_i32_0 : i32, i32
  }
  func.func @transform_7(%arg0: i32) -> (i32, i32) {
    %c0_i32 = arith.constant 0 : i32
    %c0_i32_0 = arith.constant 0 : i32
    %c0_i32_1 = arith.constant 0 : i32
    return %c0_i32, %c0_i32_0 : i32, i32
  }
  func.func @transform_8(%arg0: i32) -> (i32, i32) {
    %c0_i32 = arith.constant 0 : i32
    %c0_i32_0 = arith.constant 0 : i32
    %c0_i32_1 = arith.constant 0 : i32
    return %c0_i32, %c0_i32_0 : i32, i32
  }
  func.func @transform_9(%arg0: i32) -> (i32, i32, i32, i32) {
    %c0_i32 = arith.constant 0 : i32
    %c0_i32_0 = arith.constant 0 : i32
    %c0_i32_1 = arith.constant 0 : i32
    %c0_i32_2 = arith.constant 0 : i32
    %c0_i32_3 = arith.constant 0 : i32
    return %c0_i32, %c0_i32_0, %c0_i32_1, %c0_i32_2 : i32, i32, i32, i32
  }
}

</mosaic_0001>

<bundles_post_ra>
// kernel: tpu_custom_call.1
= control target key start
LH: loop header
LB: loop body
LE: loop exit
PB: predicated region body
PF: predicated region fallthrough
CT: control target
= control target key end

     0   :  { %vm631_vm0 = vcmask 1043456   ;;  %vm97_vm1 = vcmask 31744   ;;  %v27185_v5 = vmov 0.0   ;;  %s27175_s0 = inlined_call_operand.vmem [shape: f32[2,16,16,4], index: 0, kind: input, shape index: {}]   ;;  %s27176_s1 = inlined_call_operand.vmem [shape: f32[9,4,8], index: 1, kind: input, shape index: {}]   ;;  %s27177_s2 = inlined_call_operand.vmem [shape: f32[1,8], index: 2, kind: input, shape index: {}]   ;;  %s27178_s3 = inlined_call_operand.vmem [shape: f32[1,8], index: 3, kind: input, shape index: {}]   ;;  %s27179_s4 = inlined_call_operand.vmem [shape: f32[1,8], index: 4, kind: input, shape index: {}]   ;;  %s27180_s5 = inlined_call_operand.vmem [shape: f32[9,8,16], index: 5, kind: input, shape index: {}]   ;;  %s27181_s6 = inlined_call_operand.vmem [shape: f32[1,16], index: 6, kind: input, shape index: {}]   ;;  %s27182_s7 = inlined_call_operand.vmem [shape: f32[1,16], index: 7, kind: input, shape index: {}]   ;;  %s27183_s8 = inlined_call_operand.vmem [shape: f32[1,16], index: 8, kind: input, shape index: {}]   ;;  %s27184_s9 = inlined_call_operand.hbm [shape: f32[2,4,4,16], index: 9, kind: output, shape index: {}]  }
   0x1   :  { %v16294_v0 = vld [vmem:[%s27176_s1 + $0x4] sm:$0xf]  ;;  %v19959_v1 = vld [vmem:[%s27176_s1 + $0xc] sm:$0xf]  ;;  %v19972_v3 = vld [vmem:[%s27176_s1 + $0x10] sm:$0xf] }
   0x2   :  { %18103 = vmatprep.subr.msk.mxu1 %vm631_vm0, %v16294_v0  ;;  %18397 = vmatprep.subr.msk.mxu0 %vm631_vm0, %v19959_v1  ;;  %v19967_v2 = vld [vmem:[%s27175_s0] sm:$0xff]  ;;  %v19977_v4 = vld [vmem:[%s27175_s0 + $0x8] sm:$0xff]  ;;  %99 = vst.msk [vmem:[#allocation2 + $0x8] sm:$0xff] %vm97_vm1, %v27185_v5  ;;  %98 = vst.msk [vmem:[#allocation2] sm:$0xff] %vm97_vm1, %v27185_v5 }
   0x3   :  { %18104 = vmatpush3.msk.msra.mxu1 %vm631_vm0, %v16294_v0  ;;  %100 = vst.msk [vmem:[#allocation2 + $0x10] sm:$0xff] %vm97_vm1, %v27185_v5  ;;  %103 = vst.msk [vmem:[#allocation2 + $0x20] sm:$0xff] %vm97_vm1, %v27185_v5  ;;  %18398 = vmatpush3.msk.msra.mxu0 %vm631_vm0, %v19959_v1  ;;  %v35_v6 = vld [vmem:[%s27175_s0 + $0x10] sm:$0xff]  ;;  %v36_v7 = vld [vmem:[%s27175_s0 + $0x18] sm:$0xff] }
   0x4   :  { %104 = vst.msk [vmem:[#allocation2 + $0x28] sm:$0xff] %vm97_vm1, %v27185_v5  ;;  %105 = vst.msk [vmem:[#allocation2 + $0x30] sm:$0xff] %vm97_vm1, %v27185_v5  ;;  %v37_v8 = vld [vmem:[%s27175_s0 + $0x20] sm:$0xff]  ;;  %18495 = vmatprep.subr.msk.mxu0 %vm631_vm0, %v19972_v3  ;;  %v38_v9 = vld [vmem:[%s27175_s0 + $0x28] sm:$0xff] }
   0x5   :  { %107 = vst.msk [vmem:[#allocation2 + $0x40] sm:$0xff] %vm97_vm1, %v27185_v5  ;;  %108 = vst.msk [vmem:[#allocation2 + $0x48] sm:$0xff] %vm97_vm1, %v27185_v5  ;;  %v39_v10 = vld [vmem:[%s27175_s0 + $0x30] sm:$0xff]  ;;  %v40_v11 = vld [vmem:[%s27175_s0 + $0x38] sm:$0xff] }
   0x6   :  { %109 = vst.msk [vmem:[#allocation2 + $0x50] sm:$0xff] %vm97_vm1, %v27185_v5  ;;  %111 = vst.msk [vmem:[#allocation2 + $0x60] sm:$0xff] %vm97_vm1, %v27185_v5  ;;  %v41_v12 = vld [vmem:[%s27175_s0 + $0x40] sm:$0xff]  ;;  %v42_v13 = vld [vmem:[%s27175_s0 + $0x48] sm:$0xff] }
   0x7   :  { %112 = vst.msk [vmem:[#allocation2 + $0x68] sm:$0xff] %vm97_vm1, %v27185_v5  ;;  %113 = vst.msk [vmem:[#allocation2 + $0x70] sm:$0xff] %vm97_vm1, %v27185_v5  ;;  %v43_v14 = vld [vmem:[%s27175_s0 + $0x50] sm:$0xff]  ;;  %v44_v15 = vld [vmem:[%s27175_s0 + $0x58] sm:$0xff] }
   0x8   :  { %115 = vst.msk [vmem:[#allocation2 + $0x80] sm:$0xff] %vm97_vm1, %v27185_v5  ;;  %116 = vst.msk [vmem:[#allocation2 + $0x88] sm:$0xff] %vm97_vm1, %v27185_v5  ;;  %v45_v16 = vld [vmem:[%s27175_s0 + $0x60] sm:$0xff]  ;;  %v46_v17 = vld [vmem:[%s27175_s0 + $0x68] sm:$0xff] }
   0x9   :  { %117 = vst.msk [vmem:[#allocation2 + $0x90] sm:$0xff] %vm97_vm1, %v27185_v5  ;;  %119 = vst.msk [vmem:[#allocation2 + $0xa0] sm:$0xff] %vm97_vm1, %v27185_v5  ;;  %v47_v18 = vld [vmem:[%s27175_s0 + $0x70] sm:$0xff]  ;;  %v48_v19 = vld [vmem:[%s27175_s0 + $0x78] sm:$0xff] }
   0xa   :  { %120 = vst.msk [vmem:[#allocation2 + $0xa8] sm:$0xff] %vm97_vm1, %v27185_v5  ;;  %121 = vst.msk [vmem:[#allocation2 + $0xb0] sm:$0xff] %vm97_vm1, %v27185_v5  ;;  %v49_v20 = vld [vmem:[%s27175_s0 + $0x80] sm:$0xff]  ;;  %v50_v21 = vld [vmem:[%s27175_s0 + $0x88] sm:$0xff] }
   0xb   :  { %123 = vst.msk [vmem:[#allocation2 + $0xc0] sm:$0xff] %vm97_vm1, %v27185_v5  ;;  %124 = vst.msk [vmem:[#allocation2 + $0xc8] sm:$0xff] %vm97_vm1, %v27185_v5  ;;  %v51_v22 = vld [vmem:[%s27175_s0 + $0x90] sm:$0xff]  ;;  %v52_v23 = vld [vmem:[%s27175_s0 + $0x98] sm:$0xff] }
   0xc   :  { %125 = vst.msk [vmem:[#allocation2 + $0xd0] sm:$0xff] %vm97_vm1, %v27185_v5  ;;  %127 = vst.msk [vmem:[#allocation2 + $0xe0] sm:$0xff] %vm97_vm1, %v27185_v5  ;;  %v53_v24 = vld [vmem:[%s27175_s0 + $0xa0] sm:$0xff]  ;;  %v54_v25 = vld [vmem:[%s27175_s0 + $0xa8] sm:$0xff] }
   0xd   :  { %128 = vst.msk [vmem:[#allocation2 + $0xe8] sm:$0xff] %vm97_vm1, %v27185_v5  ;;  %129 = vst.msk [vmem:[#allocation2 + $0xf0] sm:$0xff] %vm97_vm1, %v27185_v5  ;;  %v55_v26 = vld [vmem:[%s27175_s0 + $0xb0] sm:$0xff]  ;;  %v373_v27 = vld [vmem:[#allocation2 + $0x8] sm:$0xff] }
   0xe   :  { %131 = vst.msk [vmem:[#allocation2 + $0x100] sm:$0xff] %vm97_vm1, %v27185_v5  ;;  %132 = vst.msk [vmem:[#allocation2 + $0x108] sm:$0xff] %vm97_vm1, %v27185_v5  ;;  %v374_v28 = vld [vmem:[#allocation2 + $0x10] sm:$0xff]  ;;  %v56_v29 = vld [vmem:[%s27175_s0 + $0xb8] sm:$0xff]  ;;  %18105 = vmatprep.mubr.msk.f32.mxu1 %vm97_vm1, %v373_v27 }
   0xf   :  { %133 = vst.msk [vmem:[#allocation2 + $0x110] sm:$0xff] %vm97_vm1, %v27185_v5  ;;  %135 = vst.msk [vmem:[#allocation2 + $0x120] sm:$0xff] %vm97_vm1, %v27185_v5  ;;  %18106 = vmatmul.mubr.msk.f32.vlgmr.msra.gmra.mrb[0].mxu1 %vm97_vm1, %v374_v28  ;;  %v57_v51 = vld [vmem:[%s27175_s0 + $0xc0] sm:$0xff]  ;;  %v58_v52 = vld [vmem:[%s27175_s0 + $0xc8] sm:$0xff] }
  0x10   :  { %136 = vst.msk [vmem:[#allocation2 + $0x128] sm:$0xff] %vm97_vm1, %v27185_v5  ;;  %137 = vst.msk [vmem:[#allocation2 + $0x130] sm:$0xff] %vm97_vm1, %v27185_v5  ;;  %v59_v53 = vld [vmem:[%s27175_s0 + $0xd0] sm:$0xff]  ;;  %v60_v55 = vld [vmem:[%s27175_s0 + $0xd8] sm:$0xff] }
  0x11   :  { %139 = vst.msk [vmem:[#allocation2 + $0x140] sm:$0xff] %vm97_vm1, %v27185_v5  ;;  %140 = vst.msk [vmem:[#allocation2 + $0x148] sm:$0xff] %vm97_vm1, %v27185_v5  ;;  %v61_v56 = vld [vmem:[%s27175_s0 + $0xe0] sm:$0xff]  ;;  %v62_v57 = vld [vmem:[%s27175_s0 + $0xe8] sm:$0xff] }
  0x12   :  { %141 = vst.msk [vmem:[#allocation2 + $0x150] sm:$0xff] %vm97_vm1, %v27185_v5  ;;  %143 = vst.msk [vmem:[#allocation2 + $0x160] sm:$0xff] %vm97_vm1, %v27185_v5  ;;  %v63_v59 = vld [vmem:[%s27175_s0 + $0xf0] sm:$0xff]  ;;  %v64_v60 = vld [vmem:[%s27175_s0 + $0xf8] sm:$0xff] }
  0x13   :  { %144 = vst.msk [vmem:[#allocation2 + $0x168] sm:$0xff] %vm97_vm1, %v27185_v5  ;;  %145 = vst.msk [vmem:[#allocation2 + $0x170] sm:$0xff] %vm97_vm1, %v27185_v5  ;;  %v65_v62 = vld [vmem:[%s27175_s0 + $0x100] sm:$0xff]  ;;  %v66_v63 = vld [vmem:[%s27175_s0 + $0x108] sm:$0xff] }
  0x14   :  { %147 = vst.msk [vmem:[#allocation2 + $0x180] sm:$0xff] %vm97_vm1, %v27185_v5  ;;  %148 = vst.msk [vmem:[#allocation2 + $0x188] sm:$0xff] %vm97_vm1, %v27185_v5  ;;  %v67_v1 = vld [vmem:[%s27175_s0 + $0x110] sm:$0xff] }
  0x15   :  { %149 = vst.msk [vmem:[#allocation2 + $0x190] sm:$0xff] %vm97_vm1, %v27185_v5  ;;  %151 = vst.msk [vmem:[#allocation2 + $0x1a0] sm:$0xff] %vm97_vm1, %v27185_v5 }
  0x16   :  { %152 = vst.msk [vmem:[#allocation2 + $0x1a8] sm:$0xff] %vm97_vm1, %v27185_v5  ;;  %153 = vst.msk [vmem:[#allocation2 + $0x1b0] sm:$0xff] %vm97_vm1, %v27185_v5 }
  0x17   :  { %155 = vst.msk [vmem:[#allocation2 + $0x1c0] sm:$0xff] %vm97_vm1, %v27185_v5  ;;  %156 = vst.msk [vmem:[#allocation2 + $0x1c8] sm:$0xff] %vm97_vm1, %v27185_v5 }
  0x18   :  { %157 = vst.msk [vmem:[#allocation2 + $0x1d0] sm:$0xff] %vm97_vm1, %v27185_v5  ;;  %159 = vst.msk [vmem:[#allocation2 + $0x1e0] sm:$0xff] %vm97_vm1, %v27185_v5 }
  0x19   :  { %160 = vst.msk [vmem:[#allocation2 + $0x1e8] sm:$0xff] %vm97_vm1, %v27185_v5  ;;  %161 = vst.msk [vmem:[#allocation2 + $0x1f0] sm:$0xff] %vm97_vm1, %v27185_v5 }
  0x1a   :  { %163 = vst.msk [vmem:[#allocation2 + $0x200] sm:$0xff] %vm97_vm1, %v27185_v5  ;;  %164 = vst.msk [vmem:[#allocation2 + $0x208] sm:$0xff] %vm97_vm1, %v27185_v5 }
  0x1b   :  { %165 = vst.msk [vmem:[#allocation2 + $0x210] sm:$0xff] %vm97_vm1, %v27185_v5  ;;  %167 = vst.msk [vmem:[#allocation2 + $0x220] sm:$0xff] %vm97_vm1, %v27185_v5 }
  0x1c   :  { %168 = vst.msk [vmem:[#allocation2 + $0x228] sm:$0xff] %vm97_vm1, %v27185_v5  ;;  %169 = vst.msk [vmem:[#allocation2 + $0x230] sm:$0xff] %vm97_vm1, %v27185_v5 }
  0x1d   :  { %171 = vst.msk [vmem:[#allocation2 + $0x240] sm:$0xff] %vm97_vm1, %v27185_v5  ;;  %172 = vst.msk [vmem:[#allocation2 + $0x248] sm:$0xff] %vm97_vm1, %v27185_v5 }
  0x1e   :  { %173 = vst.msk [vmem:[#allocation2 + $0x250] sm:$0xff] %vm97_vm1, %v27185_v5  ;;  %175 = vst.msk [vmem:[#allocation2 + $0x260] sm:$0xff] %vm97_vm1, %v27185_v5 }
  0x1f   :  { %176 = vst.msk [vmem:[#allocation2 + $0x268] sm:$0xff] %vm97_vm1, %v27185_v5  ;;  %177 = vst.msk [vmem:[#allocation2 + $0x270] sm:$0xff] %vm97_vm1, %v27185_v5 }
  0x20   :  { %179 = vst.msk [vmem:[#allocation2 + $0x280] sm:$0xff] %vm97_vm1, %v27185_v5  ;;  %180 = vst.msk [vmem:[#allocation2 + $0x288] sm:$0xff] %vm97_vm1, %v27185_v5 }
  0x21   :  { %181 = vst.msk [vmem:[#allocation2 + $0x290] sm:$0xff] %vm97_vm1, %v27185_v5  ;;  %183 = vst.msk [vmem:[#allocation2 + $0x2a0] sm:$0xff] %vm97_vm1, %v27185_v5 }
  0x22   :  { %184 = vst.msk [vmem:[#allocation2 + $0x2a8] sm:$0xff] %vm97_vm1, %v27185_v5  ;;  %185 = vst.msk [vmem:[#allocation2 + $0x2b0] sm:$0xff] %vm97_vm1, %v27185_v5 }
  0x23   :  { %187 = vst.msk [vmem:[#allocation2 + $0x2c0] sm:$0xff] %vm97_vm1, %v27185_v5  ;;  %188 = vst.msk [vmem:[#allocation2 + $0x2c8] sm:$0xff] %vm97_vm1, %v27185_v5 }
  0x24   :  { %189 = vst.msk [vmem:[#allocation2 + $0x2d0] sm:$0xff] %vm97_vm1, %v27185_v5  ;;  %191 = vst.msk [vmem:[#allocation2 + $0x2e0] sm:$0xff] %vm97_vm1, %v27185_v5 }
  0x25   :  { %192 = vst.msk [vmem:[#allocation2 + $0x2e8] sm:$0xff] %vm97_vm1, %v27185_v5  ;;  %193 = vst.msk [vmem:[#allocation2 + $0x2f0] sm:$0xff] %vm97_vm1, %v27185_v5 }
  0x26   :  { %195 = vst.msk [vmem:[#allocation2 + $0x300] sm:$0xff] %vm97_vm1, %v27185_v5  ;;  %196 = vst.msk [vmem:[#allocation2 + $0x308] sm:$0xff] %vm97_vm1, %v27185_v5 }
  0x27   :  { %197 = vst.msk [vmem:[#allocation2 + $0x310] sm:$0xff] %vm97_vm1, %v27185_v5  ;;  %199 = vst.msk [vmem:[#allocation2 + $0x320] sm:$0xff] %vm97_vm1, %v27185_v5 }
  0x28   :  { %200 = vst.msk [vmem:[#allocation2 + $0x328] sm:$0xff] %vm97_vm1, %v27185_v5  ;;  %201 = vst.msk [vmem:[#allocation2 + $0x330] sm:$0xff] %vm97_vm1, %v27185_v5 }
  0x29   :  { %203 = vst.msk [vmem:[#allocation2 + $0x340] sm:$0xff] %vm97_vm1, %v27185_v5  ;;  %204 = vst.msk [vmem:[#allocation2 + $0x348] sm:$0xff] %vm97_vm1, %v27185_v5 }
  0x2a   :  { %205 = vst.msk [vmem:[#allocation2 + $0x350] sm:$0xff] %vm97_vm1, %v27185_v5  ;;  %207 = vst.msk [vmem:[#allocation2 + $0x360] sm:$0xff] %vm97_vm1, %v27185_v5 }
  0x2b   :  { %208 = vst.msk [vmem:[#allocation2 + $0x368] sm:$0xff] %vm97_vm1, %v27185_v5  ;;  %209 = vst.msk [vmem:[#allocation2 + $0x370] sm:$0xff] %vm97_vm1, %v27185_v5 }
  0x2c   :  { %211 = vst.msk [vmem:[#allocation2 + $0x380] sm:$0xff] %vm97_vm1, %v27185_v5  ;;  %212 = vst.msk [vmem:[#allocation2 + $0x388] sm:$0xff] %vm97_vm1, %v27185_v5 }
  0x2d   :  { %213 = vst.msk [vmem:[#allocation2 + $0x390] sm:$0xff] %vm97_vm1, %v27185_v5  ;;  %215 = vst.msk [vmem:[#allocation2 + $0x3a0] sm:$0xff] %vm97_vm1, %v27185_v5 }
  0x2e   :  { %216 = vst.msk [vmem:[#allocation2 + $0x3a8] sm:$0xff] %vm97_vm1, %v27185_v5  ;;  %217 = vst.msk [vmem:[#allocation2 + $0x3b0] sm:$0xff] %vm97_vm1, %v27185_v5 }
  0x2f   :  { %219 = vst.msk [vmem:[#allocation2 + $0x3c0] sm:$0xff] %vm97_vm1, %v27185_v5  ;;  %220 = vst.msk [vmem:[#allocation2 + $0x3c8] sm:$0xff] %vm97_vm1, %v27185_v5 }
  0x30   :  { %221 = vst.msk [vmem:[#allocation2 + $0x3d0] sm:$0xff] %vm97_vm1, %v27185_v5  ;;  %223 = vst.msk [vmem:[#allocation2 + $0x3e0] sm:$0xff] %vm97_vm1, %v27185_v5 }
  0x31   :  { %224 = vst.msk [vmem:[#allocation2 + $0x3e8] sm:$0xff] %vm97_vm1, %v27185_v5  ;;  %225 = vst.msk [vmem:[#allocation2 + $0x3f0] sm:$0xff] %vm97_vm1, %v27185_v5 }
  0x32   :  { %227 = vst.msk [vmem:[#allocation2 + $0x400] sm:$0xff] %vm97_vm1, %v27185_v5  ;;  %228 = vst.msk [vmem:[#allocation2 + $0x408] sm:$0xff] %vm97_vm1, %v27185_v5 }
  0x33   :  { %229 = vst.msk [vmem:[#allocation2 + $0x410] sm:$0xff] %vm97_vm1, %v27185_v5  ;;  %231 = vst.msk [vmem:[#allocation2 + $0x420] sm:$0xff] %vm97_vm1, %v27185_v5 }
  0x34   :  { %232 = vst.msk [vmem:[#allocation2 + $0x428] sm:$0xff] %vm97_vm1, %v27185_v5  ;;  %233 = vst.msk [vmem:[#allocation2 + $0x430] sm:$0xff] %vm97_vm1, %v27185_v5 }
  0x35   :  { %235 = vst.msk [vmem:[#allocation2 + $0x440] sm:$0xff] %vm97_vm1, %v27185_v5  ;;  %236 = vst.msk [vmem:[#allocation2 + $0x448] sm:$0xff] %vm97_vm1, %v27185_v5 }
  0x36   :  { %237 = vst.msk [vmem:[#allocation2 + $0x450] sm:$0xff] %vm97_vm1, %v27185_v5  ;;  %239 = vst.msk [vmem:[#allocation2 + $0x460] sm:$0xff] %vm97_vm1, %v27185_v5 }
  0x37   :  { %240 = vst.msk [vmem:[#allocation2 + $0x468] sm:$0xff] %vm97_vm1, %v27185_v5  ;;  %241 = vst.msk [vmem:[#allocation2 + $0x470] sm:$0xff] %vm97_vm1, %v27185_v5 }
  0x38   :  { %244 = vst.msk [vmem:[#allocation2 + $0x28] sm:$0xff] %vm97_vm1, %v19967_v2  ;;  %245 = vst.msk [vmem:[#allocation2 + $0x30] sm:$0xff] %vm97_vm1, %v19977_v4  ;;  %v68_v2 = vld [vmem:[%s27175_s0 + $0x118] sm:$0xff] }
  0x39   :  { %246 = vst.msk [vmem:[#allocation2 + $0x48] sm:$0xff] %vm97_vm1, %v35_v6  ;;  %247 = vst.msk [vmem:[#allocation2 + $0x50] sm:$0xff] %vm97_vm1, %v36_v7  ;;  %v70_v7 = vld [vmem:[%s27175_s0 + $0x128] sm:$0xff] }
  0x3a   :  { %248 = vst.msk [vmem:[#allocation2 + $0x68] sm:$0xff] %vm97_vm1, %v37_v8  ;;  %249 = vst.msk [vmem:[#allocation2 + $0x70] sm:$0xff] %vm97_vm1, %v38_v9  ;;  %v71_v8 = vld [vmem:[%s27175_s0 + $0x130] sm:$0xff]  ;;  %v72_v9 = vld [vmem:[%s27175_s0 + $0x138] sm:$0xff] }
  0x3b   :  { %250 = vst.msk [vmem:[#allocation2 + $0x88] sm:$0xff] %vm97_vm1, %v39_v10  ;;  %251 = vst.msk [vmem:[#allocation2 + $0x90] sm:$0xff] %vm97_vm1, %v40_v11  ;;  %v20463_v10 = vld [vmem:[%s27176_s1 + $0x14] sm:$0xf]  ;;  %v73_v11 = vld [vmem:[%s27175_s0 + $0x140] sm:$0xff] }
  0x3c   :  { %252 = vst.msk [vmem:[#allocation2 + $0xa8] sm:$0xff] %vm97_vm1, %v41_v12  ;;  %253 = vst.msk [vmem:[#allocation2 + $0xb0] sm:$0xff] %vm97_vm1, %v42_v13  ;;  %v74_v12 = vld [vmem:[%s27175_s0 + $0x148] sm:$0xff]  ;;  %v75_v13 = vld [vmem:[%s27175_s0 + $0x150] sm:$0xff] }
  0x3d   :  { %254 = vst.msk [vmem:[#allocation2 + $0xc8] sm:$0xff] %vm97_vm1, %v43_v14  ;;  %255 = vst.msk [vmem:[#allocation2 + $0xd0] sm:$0xff] %vm97_vm1, %v44_v15  ;;  %v76_v14 = vld [vmem:[%s27175_s0 + $0x158] sm:$0xff]  ;;  %v77_v15 = vld [vmem:[%s27175_s0 + $0x160] sm:$0xff] }
  0x3e   :  { %256 = vst.msk [vmem:[#allocation2 + $0xe8] sm:$0xff] %vm97_vm1, %v45_v16  ;;  %257 = vst.msk [vmem:[#allocation2 + $0xf0] sm:$0xff] %vm97_vm1, %v46_v17 }
  0x3f   :  { %258 = vst.msk [vmem:[#allocation2 + $0x108] sm:$0xff] %vm97_vm1, %v47_v18  ;;  %259 = vst.msk [vmem:[#allocation2 + $0x110] sm:$0xff] %vm97_vm1, %v48_v19  ;;  %v20292_v30 = vld [vmem:[#allocation2 + $0x27] sm:$0xff]  ;;  %v20294_v31 = vld [vmem:[#allocation2 + $0x2f] sm:$0xff] }
  0x40   :  { %260 = vst.msk [vmem:[#allocation2 + $0x128] sm:$0xff] %vm97_vm1, %v49_v20  ;;  %261 = vst.msk [vmem:[#allocation2 + $0x130] sm:$0xff] %vm97_vm1, %v50_v21  ;;  %v20296_v32 = vld [vmem:[#allocation2 + $0x28] sm:$0xff]  ;;  %18399 = vmatprep.mubr.msk.f32.mxu0 %vm97_vm1, %v20292_v30  ;;  %v20308_v34 = vld [vmem:[#allocation2 + $0x30] sm:$0xff] }
  0x41   :  { %262 = vst.msk [vmem:[#allocation2 + $0x148] sm:$0xff] %vm97_vm1, %v51_v22  ;;  %263 = vst.msk [vmem:[#allocation2 + $0x150] sm:$0xff] %vm97_vm1, %v52_v23  ;;  %v20302_v33 = vld [vmem:[#allocation2 + $0x47] sm:$0xff]  ;;  %18400 = vmatmul.mubr.msk.f32.vlgmr.msra.gmra.mrb[0].mxu0 %vm97_vm1, %v20294_v31  ;;  %18108 = vmatprep.mubr.msk.f32.mxu1 %vm97_vm1, %v20296_v32  ;;  %v20314_v35 = vld [vmem:[#allocation2 + $0x4f] sm:$0xff] }
  0x42   :  { %264 = vst.msk [vmem:[#allocation2 + $0x168] sm:$0xff] %vm97_vm1, %v53_v24  ;;  %265 = vst.msk [vmem:[#allocation2 + $0x170] sm:$0xff] %vm97_vm1, %v54_v25  ;;  %18496 = vmatpush3.msk.msra.mxu0 %vm631_vm0, %v19972_v3  ;;  %18402 = vmatprep.mubr.msk.f32.mxu0 %vm97_vm1, %v20302_v33  ;;  %v20316_v36 = vld [vmem:[#allocation2 + $0x48] sm:$0xff]  ;;  %v20326_v38 = vld [vmem:[#allocation2 + $0x50] sm:$0xff] }
  0x43   :  { %266 = vst.msk [vmem:[#allocation2 + $0x188] sm:$0xff] %vm97_vm1, %v55_v26  ;;  %267 = vst.msk [vmem:[#allocation2 + $0x190] sm:$0xff] %vm97_vm1, %v56_v29  ;;  %v20318_v37 = vld [vmem:[#allocation2 + $0x67] sm:$0xff]  ;;  %18109 = vmatmul.mubr.msk.f32.gmra.mrb[2].mxu1 %vm97_vm1, %v20308_v34  ;;  %v20330_v39 = vld [vmem:[#allocation2 + $0x6f] sm:$0xff]  ;;  %18593 = vmatprep.subr.msk.mxu0 %vm631_vm0, %v20463_v10 }
  0x44   :  { %18111 = vmatprep.mubr.msk.f32.mxu1 %vm97_vm1, %v20316_v36  ;;  %v20332_v40 = vld [vmem:[#allocation2 + $0x68] sm:$0xff]  ;;  %v20342_v42 = vld [vmem:[#allocation2 + $0x70] sm:$0xff]  ;;  %268 = vst.msk [vmem:[#allocation2 + $0x1a8] sm:$0xff] %vm97_vm1, %v57_v51  ;;  %269 = vst.msk [vmem:[#allocation2 + $0x1b0] sm:$0xff] %vm97_vm1, %v58_v52 }
  0x45   :  { %18403 = vmatmul.mubr.msk.f32.gmra.mrb[2].mxu0 %vm97_vm1, %v20314_v35  ;;  %v20334_v41 = vld [vmem:[#allocation2 + $0x87] sm:$0xff]  ;;  %v20346_v43 = vld [vmem:[#allocation2 + $0x8f] sm:$0xff]  ;;  %270 = vst.msk [vmem:[#allocation2 + $0x1c8] sm:$0xff] %vm97_vm1, %v59_v53  ;;  %271 = vst.msk [vmem:[#allocation2 + $0x1d0] sm:$0xff] %vm97_vm1, %v60_v55 }
  0x46   :  { %18405 = vmatprep.mubr.msk.f32.mxu0 %vm97_vm1, %v20318_v37  ;;  %v20348_v44 = vld [vmem:[#allocation2 + $0x88] sm:$0xff]  ;;  %v20358_v46 = vld [vmem:[#allocation2 + $0x90] sm:$0xff]  ;;  %272 = vst.msk [vmem:[#allocation2 + $0x1e8] sm:$0xff] %vm97_vm1, %v61_v56  ;;  %273 = vst.msk [vmem:[#allocation2 + $0x1f0] sm:$0xff] %vm97_vm1, %v62_v57 }
  0x47   :  { %18112 = vmatmul.mubr.msk.f32.gmra.mrb[4].mxu1 %vm97_vm1, %v20326_v38  ;;  %v20350_v45 = vld [vmem:[#allocation2 + $0xa7] sm:$0xff]  ;;  %v20362_v47 = vld [vmem:[#allocation2 + $0xaf] sm:$0xff]  ;;  %274 = vst.msk [vmem:[#allocation2 + $0x208] sm:$0xff] %vm97_vm1, %v63_v59  ;;  %275 = vst.msk [vmem:[#allocation2 + $0x210] sm:$0xff] %vm97_vm1, %v64_v60 }
  0x48   :  { %18114 = vmatprep.mubr.msk.f32.mxu1 %vm97_vm1, %v20332_v40  ;;  %v20364_v48 = vld [vmem:[#allocation2 + $0xa8] sm:$0xff]  ;;  %v20368_v50 = vld [vmem:[#allocation2 + $0xb0] sm:$0xff]  ;;  %276 = vst.msk [vmem:[#allocation2 + $0x268] sm:$0xff] %vm97_vm1, %v65_v62  ;;  %277 = vst.msk [vmem:[#allocation2 + $0x270] sm:$0xff] %vm97_vm1, %v66_v63 }
  0x49   :  { %18406 = vmatmul.mubr.msk.f32.gmra.mrb[4].mxu0 %vm97_vm1, %v20330_v39  ;;  %v20366_v49 = vld [vmem:[#allocation2 + $0xc7] sm:$0xff]  ;;  %v20381_v54 = vld [vmem:[#allocation2 + $0xcf] sm:$0xff]  ;;  %278 = vst.msk [vmem:[#allocation2 + $0x288] sm:$0xff] %vm97_vm1, %v67_v1  ;;  %279 = vst.msk [vmem:[#allocation2 + $0x290] sm:$0xff] %vm97_vm1, %v68_v2 }
  0x4a   :  { %18408 = vmatprep.mubr.msk.f32.mxu0 %vm97_vm1, %v20334_v41  ;;  %v20399_v58 = vld [vmem:[#allocation2 + $0xc8] sm:$0xff]  ;;  %v20422_v0 = vld [vmem:[#allocation2 + $0xd0] sm:$0xff]  ;;  %v69_v3 = vld [vmem:[%s27175_s0 + $0x120] sm:$0xff]  ;;  %281 = vst.msk [vmem:[#allocation2 + $0x2b0] sm:$0xff] %vm97_vm1, %v70_v7 }
  0x4b   :  { %18115 = vmatmul.mubr.msk.f32.gmra.mrb[6].mxu1 %vm97_vm1, %v20342_v42  ;;  %v20412_v61 = vld [vmem:[#allocation2 + $0xe7] sm:$0xff]  ;;  %v20437_v4 = vld [vmem:[#allocation2 + $0xef] sm:$0xff]  ;;  %280 = vst.msk [vmem:[#allocation2 + $0x2a8] sm:$0xff] %vm97_vm1, %v69_v3  ;;  %282 = vst.msk [vmem:[#allocation2 + $0x2c8] sm:$0xff] %vm97_vm1, %v71_v8 }
  0x4c   :  { %18117 = vmatprep.mubr.msk.f32.mxu1 %vm97_vm1, %v20348_v44  ;;  %v20439_v6 = vld [vmem:[#allocation2 + $0xe8] sm:$0xff]  ;;  %283 = vst.msk [vmem:[#allocation2 + $0x2d0] sm:$0xff] %vm97_vm1, %v72_v9  ;;  %284 = vst.msk [vmem:[#allocation2 + $0x2e8] sm:$0xff] %vm97_vm1, %v73_v11  ;;  %v20497_v17 = vld [vmem:[#allocation2 + $0xf0] sm:$0xff] }
  0x4d   :  { %18409 = vmatmul.mubr.msk.f32.gmra.mrb[6].mxu0 %vm97_vm1, %v20346_v43  ;;  %285 = vst.msk [vmem:[#allocation2 + $0x2f0] sm:$0xff] %vm97_vm1, %v74_v12  ;;  %v20486_v16 = vld [vmem:[#allocation2 + $0x107] sm:$0xff]  ;;  %286 = vst.msk [vmem:[#allocation2 + $0x308] sm:$0xff] %vm97_vm1, %v75_v13  ;;  %v20501_v18 = vld [vmem:[#allocation2 + $0x10f] sm:$0xff] }
  0x4e   :  { %18411 = vmatprep.mubr.msk.f32.mxu0 %vm97_vm1, %v20350_v45  ;;  %287 = vst.msk [vmem:[#allocation2 + $0x310] sm:$0xff] %vm97_vm1, %v76_v14  ;;  %288 = vst.msk [vmem:[#allocation2 + $0x328] sm:$0xff] %vm97_vm1, %v77_v15  ;;  %v20503_v19 = vld [vmem:[#allocation2 + $0x108] sm:$0xff]  ;;  %v20513_v21 = vld [vmem:[#allocation2 + $0x110] sm:$0xff] }
  0x4f   :  { %18118 = vmatmul.mubr.msk.f32.gmra.mrb[8].mxu1 %vm97_vm1, %v20358_v46  ;;  %v20505_v20 = vld [vmem:[#allocation2 + $0x127] sm:$0xff]  ;;  %v20517_v22 = vld [vmem:[#allocation2 + $0x12f] sm:$0xff]  ;;  %v80_v53 = vld [vmem:[%s27175_s0 + $0x178] sm:$0xff] }
  0x50   :  { %18120 = vmatprep.mubr.msk.f32.mxu1 %vm97_vm1, %v20364_v48  ;;  %v20519_v23 = vld [vmem:[#allocation2 + $0x128] sm:$0xff]  ;;  %v20529_v25 = vld [vmem:[#allocation2 + $0x130] sm:$0xff]  ;;  %v81_v55 = vld [vmem:[%s27175_s0 + $0x180] sm:$0xff]  ;;  %291 = vst.msk [vmem:[#allocation2 + $0x350] sm:$0xff] %vm97_vm1, %v80_v53 }
  0x51   :  { %18412 = vmatmul.mubr.msk.f32.gmra.mrb[8].mxu0 %vm97_vm1, %v20362_v47  ;;  %v20521_v24 = vld [vmem:[#allocation2 + $0x147] sm:$0xff]  ;;  %v20531_v26 = vld [vmem:[#allocation2 + $0x14f] sm:$0xff]  ;;  %292 = vst.msk [vmem:[#allocation2 + $0x368] sm:$0xff] %vm97_vm1, %v81_v55  ;;  %v84_v62 = vld [vmem:[%s27175_s0 + $0x198] sm:$0xff] }
  0x52   :  { %18414 = vmatprep.mubr.msk.f32.mxu0 %vm97_vm1, %v20366_v49  ;;  %v20535_v27 = vld [vmem:[#allocation2 + $0x148] sm:$0xff]  ;;  %v20542_v51 = vld [vmem:[#allocation2 + $0x150] sm:$0xff]  ;;  %295 = vst.msk [vmem:[#allocation2 + $0x390] sm:$0xff] %vm97_vm1, %v84_v62  ;;  %v85_v1 = vld [vmem:[%s27175_s0 + $0x1a0] sm:$0xff] }
  0x53   :  { %18121 = vmatmul.mubr.msk.f32.gmra.mrb[10].mxu1 %vm97_vm1, %v20368_v50  ;;  %v20537_v28 = vld [vmem:[#allocation2 + $0x167] sm:$0xff]  ;;  %v79_v52 = vld [vmem:[%s27175_s0 + $0x170] sm:$0xff]  ;;  %296 = vst.msk [vmem:[#allocation2 + $0x3a8] sm:$0xff] %vm97_vm1, %v85_v1  ;;  %v88_v7 = vld [vmem:[%s27175_s0 + $0x1b8] sm:$0xff] }
  0x54   :  { %18123 = vmatprep.mubr.msk.f32.mxu1 %vm97_vm1, %v20399_v58  ;;  %v78_v29 = vld [vmem:[%s27175_s0 + $0x168] sm:$0xff]  ;;  %290 = vst.msk [vmem:[#allocation2 + $0x348] sm:$0xff] %vm97_vm1, %v79_v52  ;;  %v83_v60 = vld [vmem:[%s27175_s0 + $0x190] sm:$0xff]  ;;  %v89_v8 = vld [vmem:[%s27175_s0 + $0x1c0] sm:$0xff] }
  0x55   :  { %18415 = vmatmul.mubr.msk.f32.gmra.mrb[10].mxu0 %vm97_vm1, %v20381_v54  ;;  %289 = vst.msk [vmem:[#allocation2 + $0x330] sm:$0xff] %vm97_vm1, %v78_v29  ;;  %v20556_v56 = vld [vmem:[#allocation2 + $0x16f] sm:$0xff]  ;;  %v20576_v63 = vld [vmem:[#allocation2 + $0x187] sm:$0xff]  ;;  %294 = vst.msk [vmem:[#allocation2 + $0x388] sm:$0xff] %vm97_vm1, %v83_v60 }
  0x56   :  { %18417 = vmatprep.mubr.msk.f32.mxu0 %vm97_vm1, %v20412_v61  ;;  %v20558_v57 = vld [vmem:[#allocation2 + $0x168] sm:$0xff]  ;;  %27542 = vst [vmem:[#allocation7_spill] sm:$0xff] %v20576_v63  ;;  %v87_v3 = vld [vmem:[%s27175_s0 + $0x1b0] sm:$0xff]  ;;  %299 = vst.msk [vmem:[#allocation2 + $0x3d0] sm:$0xff] %vm97_vm1, %v88_v7 }
  0x57   :  { %18124 = vmatmul.mubr.msk.f32.gmra.mrb[12].mxu1 %vm97_vm1, %v20422_v0  ;;  %v82_v59 = vld [vmem:[%s27175_s0 + $0x188] sm:$0xff]  ;;  %298 = vst.msk [vmem:[#allocation2 + $0x3c8] sm:$0xff] %vm97_vm1, %v87_v3  ;;  %300 = vst.msk [vmem:[#allocation2 + $0x3e8] sm:$0xff] %vm97_vm1, %v89_v8  ;;  %v91_v11 = vld [vmem:[%s27175_s0 + $0x1d0] sm:$0xff] }
  0x58   :  { %18126 = vmatprep.mubr.msk.f32.mxu1 %vm97_vm1, %v20439_v6  ;;  %293 = vst.msk [vmem:[#allocation2 + $0x370] sm:$0xff] %vm97_vm1, %v82_v59  ;;  %v86_v2 = vld [vmem:[%s27175_s0 + $0x1a8] sm:$0xff]  ;;  %v92_v12 = vld [vmem:[%s27175_s0 + $0x1d8] sm:$0xff]  ;;  %v93_v13 = vld [vmem:[%s27175_s0 + $0x1e0] sm:$0xff] }
  0x59   :  { %18418 = vmatmul.mubr.msk.f32.gmra.mrb[12].mxu0 %vm97_vm1, %v20437_v4  ;;  %297 = vst.msk [vmem:[#allocation2 + $0x3b0] sm:$0xff] %vm97_vm1, %v86_v2  ;;  %v90_v9 = vld [vmem:[%s27175_s0 + $0x1c8] sm:$0xff]  ;;  %302 = vst.msk [vmem:[#allocation2 + $0x408] sm:$0xff] %vm97_vm1, %v91_v11  ;;  %v372_v15 = vld [vmem:[%s27176_s1] sm:$0xf] }
  0x5a   :  { %18420 = vmatprep.mubr.msk.f32.mxu0 %vm97_vm1, %v20486_v16  ;;  %301 = vst.msk [vmem:[#allocation2 + $0x3f0] sm:$0xff] %vm97_vm1, %v90_v9  ;;  %303 = vst.msk [vmem:[#allocation2 + $0x410] sm:$0xff] %vm97_vm1, %v92_v12  ;;  %v94_v14 = vld [vmem:[%s27175_s0 + $0x1e8] sm:$0xff]  ;;  %v20631_v29 = vld [vmem:[#allocation2 + $0x170] sm:$0xff]  ;;  %18201 = vmatprep.subr.msk.mxu1 %vm631_vm0, %v372_v15 }
  0x5b   :  { %18127 = vmatmul.mubr.msk.f32.gmra.mrb[14].mxu1 %vm97_vm1, %v20497_v17  ;;  %304 = vst.msk [vmem:[#allocation2 + $0x428] sm:$0xff] %vm97_vm1, %v93_v13  ;;  %305 = vst.msk [vmem:[#allocation2 + $0x430] sm:$0xff] %vm97_vm1, %v94_v14  ;;  %v20636_v52 = vld [vmem:[#allocation2 + $0x18f] sm:$0xff] }
  0x5c   :  { %18129 = vmatprep.mubr.msk.f32.mxu1 %vm97_vm1, %v20503_v19  ;;  %27543 = vst [vmem:[#allocation8_spill] sm:$0xff] %v20636_v52  ;;  %v20638_v53 = vld [vmem:[#allocation2 + $0x188] sm:$0xff] }
  0x5d   :  { %18421 = vmatmul.mubr.msk.f32.gmra.mrb[14].mxu0 %vm97_vm1, %v20501_v18 }
  0x5e   :  { %18423 = vmatprep.mubr.msk.f32.mxu0 %vm97_vm1, %v20505_v20 }
  0x5f   :  { %18130 = vmatmul.mubr.msk.f32.gmra.mrb[16].mxu1 %vm97_vm1, %v20513_v21 }
  0x60   :  { %18132 = vmatprep.mubr.msk.f32.mxu1 %vm97_vm1, %v20519_v23 }
  0x61   :  { %18424 = vmatmul.mubr.msk.f32.gmra.mrb[16].mxu0 %vm97_vm1, %v20517_v22 }
  0x62   :  { %18426 = vmatprep.mubr.msk.f32.mxu0 %vm97_vm1, %v20521_v24 }
  0x63   :  { %18133 = vmatmul.mubr.msk.f32.gmra.mrb[18].mxu1 %vm97_vm1, %v20529_v25 }
  0x64   :  { %18135 = vmatprep.mubr.msk.f32.mxu1 %vm97_vm1, %v20535_v27 }
  0x65   :  { %18427 = vmatmul.mubr.msk.f32.gmra.mrb[18].mxu0 %vm97_vm1, %v20531_v26 }
  0x66   :  { %18429 = vmatprep.mubr.msk.f32.mxu0 %vm97_vm1, %v20537_v28 }
  0x67   :  { %18136 = vmatmul.mubr.msk.f32.gmra.mrb[20].mxu1 %vm97_vm1, %v20542_v51 }
  0x68   :  { %18138 = vmatprep.mubr.msk.f32.mxu1 %vm97_vm1, %v20558_v57 }
  0x69   :  { %18430 = vmatmul.mubr.msk.f32.gmra.mrb[20].mxu0 %vm97_vm1, %v20556_v56 }
  0x6a   :  { %18432 = vmatprep.mubr.msk.f32.mxu0 %vm97_vm1, %v20576_v63 }
  0x6b   :  { %14 = vsyncpa [#allocation5], 0  ;;  %v20641_v55 = vld [vmem:[#allocation2 + $0x1a7] sm:$0xff]  ;;  %18202 = vmatpush3.msk.msra.mxu1 %vm631_vm0, %v372_v15  ;;  %v20650_v59 = vld [vmem:[#allocation2 + $0x190] sm:$0xff]  ;;  %vm101_vm2 = vcmask 24576   ;;  %vm10169_vm3 = vcmask 64512  }
  0x6c   :  { %27544 = vst [vmem:[#allocation9_spill] sm:$0xff] %v20641_v55  ;;  %18139 = vmatmul.mubr.msk.f32.gmra.mrb[22].mxu1 %vm97_vm1, %v20631_v29  ;;  %v20654_v60 = vld [vmem:[#allocation2 + $0x1af] sm:$0xff]  ;;  %v20658_v1 = vld [vmem:[#allocation2 + $0x1c7] sm:$0xff]  ;;  %vm10034_vm8 = vcmask 1041409   ;;  %vm10036_vm10 = vcmask 1042434   ;;  %vm10038_vm11 = vcmask 1043459  }
  0x6d   :  { %18433 = vmatmul.mubr.msk.f32.gmra.mrb[22].mxu0 %vm97_vm1, %v20636_v52  ;;  %18141 = vmatprep.mubr.msk.f32.mxu1 %vm97_vm1, %v20638_v53  ;;  %27545 = vst [vmem:[#allocation10_spill] sm:$0xff] %v20654_v60  ;;  %v20656_v62 = vld [vmem:[#allocation2 + $0x1a8] sm:$0xff]  ;;  %27546 = vst [vmem:[#allocation11_spill] sm:$0xff] %v20658_v1  ;;  %v20666_v2 = vld [vmem:[#allocation2 + $0x1b0] sm:$0xff]  ;;  %vm10040_vm12 = vcmask 1044484   ;;  %vm10042_vm13 = vcmask 1045509  }
  0x6e   :  { %18435 = vmatprep.mubr.msk.f32.mxu0 %vm97_vm1, %v20641_v55  ;;  %v20670_v3 = vld [vmem:[#allocation2 + $0x1cf] sm:$0xff]  ;;  %v20674_v8 = vld [vmem:[#allocation2 + $0x1e7] sm:$0xff]  ;;  %vm10044_vm14 = vcmask 1046534   ;;  %vm10046_vm15 = vcmask 1047559  }
  0x6f   :  { %27547 = vst [vmem:[#allocation12_spill] sm:$0xff] %v20670_v3  ;;  %v20672_v7 = vld [vmem:[#allocation2 + $0x1c8] sm:$0xff]  ;;  %27548 = vst [vmem:[#allocation13_spill] sm:$0xff] %v20674_v8  ;;  %v20682_v9 = vld [vmem:[#allocation2 + $0x1d0] sm:$0xff] }
  0x70   :  { %18142 = vmatmul.mubr.msk.f32.gmra.mrb[24].mxu1 %vm97_vm1, %v20650_v59  ;;  %v20686_v11 = vld [vmem:[#allocation2 + $0x1ef] sm:$0xff]  ;;  %v2340_v13 = vld [vmem:[#allocation2 + $0x207] sm:$0xff] }
  0x71   :  { %18436 = vmatmul.mubr.msk.f32.gmra.mrb[24].mxu0 %vm97_vm1, %v20654_v60  ;;  %18144 = vmatprep.mubr.msk.f32.mxu1 %vm97_vm1, %v20656_v62  ;;  %27549 = vst [vmem:[#allocation14_spill] sm:$0xff] %v20686_v11  ;;  %v20688_v12 = vld [vmem:[#allocation2 + $0x1e8] sm:$0xff]  ;;  %v20696_v14 = vld [vmem:[#allocation2 + $0x1f0] sm:$0xff] }
  0x72   :  { %18438 = vmatprep.mubr.msk.f32.mxu0 %vm97_vm1, %v20658_v1  ;;  %v2341_v15 = vld [vmem:[#allocation2 + $0x20f] sm:$0xff]  ;;  %v20726_v60 = vld [vmem:[#allocation2 + $0x2a7] sm:$0xff] }
  0x73   :  { %v405_v5 = vld [vmem:[#allocation2 + $0x248] sm:$0xff]  ;;  %27554 = vst [vmem:[#allocation19_spill] sm:$0xff] %v20726_v60  ;;  %v20844_v63 = vld [vmem:[#allocation2 + $0x2d0] sm:$0xff] }
  0x74   :  { %18145 = vmatmul.mubr.msk.f32.gmra.mrb[26].mxu1 %vm97_vm1, %v20666_v2  ;;  %v20709_v1 = vld [vmem:[#allocation2 + $0x268] sm:$0xff] }
  0x75   :  { %18439 = vmatmul.mubr.msk.f32.gmra.mrb[26].mxu0 %vm97_vm1, %v20670_v3  ;;  %18147 = vmatprep.mubr.msk.f32.mxu1 %vm97_vm1, %v20672_v7  ;;  %v406_v3 = vld [vmem:[#allocation2 + $0x250] sm:$0xff]  ;;  %v20750_v52 = vld [vmem:[#allocation2 + $0x2c7] sm:$0xff] }
  0x76   :  { %18441 = vmatprep.mubr.msk.f32.mxu0 %vm97_vm1, %v20674_v8  ;;  %v20699_v8 = vld [vmem:[#allocation2 + $0x267] sm:$0xff]  ;;  %v20746_v55 = vld [vmem:[#allocation2 + $0x2af] sm:$0xff]  ;;  %27556 = vst [vmem:[#allocation21_spill] sm:$0xff] %v20750_v52 }
  0x77   :  { %27550 = vst [vmem:[#allocation15_spill] sm:$0xff] %v20699_v8  ;;  %27555 = vst [vmem:[#allocation20_spill] sm:$0xff] %v20746_v55 }
  0x78   :  { %18148 = vmatmul.mubr.msk.f32.gmra.mrb[28].mxu1 %vm97_vm1, %v20682_v9 }
  0x79   :  { %18442 = vmatmul.mubr.msk.f32.gmra.mrb[28].mxu0 %vm97_vm1, %v20686_v11  ;;  %18150 = vmatprep.mubr.msk.f32.mxu1 %vm97_vm1, %v20688_v12  ;;  %v20707_v11 = vld [vmem:[#allocation2 + $0x26f] sm:$0xff] }
  0x7a   :  { %18444 = vmatprep.mubr.msk.f32.mxu0 %vm97_vm1, %v2340_v13  ;;  %27551 = vst [vmem:[#allocation16_spill] sm:$0xff] %v20707_v11  ;;  %v20711_v13 = vld [vmem:[#allocation2 + $0x287] sm:$0xff] }
  0x7b   :  { %27552 = vst [vmem:[#allocation17_spill] sm:$0xff] %v20711_v13 }
  0x7c   :  { %18151 = vmatmul.mubr.msk.f32.gmra.mrb[30].mxu1 %vm97_vm1, %v20696_v14 }
  0x7d   :  { %18445 = vmatmul.mubr.msk.f32.gmra.mrb[30].mxu0 %vm97_vm1, %v2341_v15  ;;  %18153 = vmatprep.mubr.msk.f32.mxu1 %vm97_vm1, %v405_v5  ;;  %v20718_v15 = vld [vmem:[#allocation2 + $0x270] sm:$0xff] }
  0x7e   :  { %18447 = vmatprep.mubr.msk.f32.mxu0 %vm97_vm1, %v20699_v8  ;;  %v20722_v5 = vld [vmem:[#allocation2 + $0x28f] sm:$0xff] }
  0x7f   :  { %27553 = vst [vmem:[#allocation18_spill] sm:$0xff] %v20722_v5  ;;  %v20724_v8 = vld [vmem:[#allocation2 + $0x288] sm:$0xff] }
  0x80   :  { %18154 = vmatmul.mubr.msk.f32.gmra.mrb[32].mxu1 %vm97_vm1, %v406_v3  ;;  %v95_v3 = vld [vmem:[%s27175_s0 + $0x1f0] sm:$0xff] }
  0x81   :  { %18448 = vmatmul.mubr.msk.f32.gmra.mrb[32].mxu0 %vm97_vm1, %v20707_v11  ;;  %18156 = vmatprep.mubr.msk.f32.mxu1 %vm97_vm1, %v20709_v1  ;;  %306 = vst.msk [vmem:[#allocation2 + $0x448] sm:$0xff] %vm97_vm1, %v95_v3  ;;  %v96_v11 = vld [vmem:[%s27175_s0 + $0x1f8] sm:$0xff]  ;;  %v20748_v3 = vld [vmem:[#allocation2 + $0x2a8] sm:$0xff] }
  0x82   :  { %18450 = vmatprep.mubr.msk.f32.mxu0 %vm97_vm1, %v20711_v13  ;;  %v20741_v13 = vld [vmem:[#allocation2 + $0x290] sm:$0xff]  ;;  %307 = vst.msk [vmem:[#allocation2 + $0x450] sm:$0xff] %vm97_vm1, %v96_v11 }
  0x83   :  { %v20758_v11 = vld [vmem:[#allocation2 + $0x2b0] sm:$0xff] }
  0x84   :  { %18157 = vmatmul.mubr.msk.f32.gmra.mrb[34].mxu1 %vm97_vm1, %v20718_v15 }
  0x85   :  { %18451 = vmatmul.mubr.msk.f32.gmra.mrb[34].mxu0 %vm97_vm1, %v20722_v5  ;;  %18159 = vmatprep.mubr.msk.f32.mxu1 %vm97_vm1, %v20724_v8  ;;  %v27557_v5 = vmov 0.0  }
  0x86   :  { %18453 = vmatprep.mubr.msk.f32.mxu0 %vm97_vm1, %v20726_v60  ;;  %106 = vst.msk [vmem:[#allocation2 + $0x38] sm:$0x1] %vm101_vm2, %v27557_v5  ;;  %102 = vst.msk [vmem:[#allocation2 + $0x18] sm:$0x1] %vm101_vm2, %v27557_v5  ;;  %v20836_v60 = vld [vmem:[#allocation2 + $0x2c8] sm:$0xff] }
  0x87   :  { %110 = vst.msk [vmem:[#allocation2 + $0x58] sm:$0x1] %vm101_vm2, %v27557_v5  ;;  %114 = vst.msk [vmem:[#allocation2 + $0x78] sm:$0x1] %vm101_vm2, %v27557_v5 }
  0x88   :  { %18160 = vmatmul.mubr.msk.f32.gmra.mrb[36].mxu1 %vm97_vm1, %v20741_v13  ;;  %118 = vst.msk [vmem:[#allocation2 + $0x98] sm:$0x1] %vm101_vm2, %v27557_v5  ;;  %122 = vst.msk [vmem:[#allocation2 + $0xb8] sm:$0x1] %vm101_vm2, %v27557_v5 }
  0x89   :  { %18454 = vmatmul.mubr.msk.f32.gmra.mrb[36].mxu0 %vm97_vm1, %v20746_v55  ;;  %18162 = vmatprep.mubr.msk.f32.mxu1 %vm97_vm1, %v20748_v3  ;;  %126 = vst.msk [vmem:[#allocation2 + $0xd8] sm:$0x1] %vm101_vm2, %v27557_v5  ;;  %130 = vst.msk [vmem:[#allocation2 + $0xf8] sm:$0x1] %vm101_vm2, %v27557_v5  ;;  %v20834_v55 = vld [vmem:[#allocation2 + $0x2cf] sm:$0xff] }
  0x8a   :  { %134 = vst.msk [vmem:[#allocation2 + $0x118] sm:$0x1] %vm101_vm2, %v27557_v5  ;;  %138 = vst.msk [vmem:[#allocation2 + $0x138] sm:$0x1] %vm101_vm2, %v27557_v5  ;;  %18456 = vmatprep.mubr.msk.f32.mxu0 %vm97_vm1, %v20750_v52  ;;  %v20855_v52 = vld [vmem:[%s27176_s1 + $0x18] sm:$0xf] }
  0x8b   :  { %142 = vst.msk [vmem:[#allocation2 + $0x158] sm:$0x1] %vm101_vm2, %v27557_v5  ;;  %146 = vst.msk [vmem:[#allocation2 + $0x178] sm:$0x1] %vm101_vm2, %v27557_v5 }
  0x8c   :  { %150 = vst.msk [vmem:[#allocation2 + $0x198] sm:$0x1] %vm101_vm2, %v27557_v5  ;;  %154 = vst.msk [vmem:[#allocation2 + $0x1b8] sm:$0x1] %vm101_vm2, %v27557_v5  ;;  %18163 = vmatmul.mubr.msk.f32.gmra.mrb[38].mxu1 %vm97_vm1, %v20758_v11 }
  0x8d   :  { %158 = vst.msk [vmem:[#allocation2 + $0x1d8] sm:$0x1] %vm101_vm2, %v27557_v5  ;;  %162 = vst.msk [vmem:[#allocation2 + $0x1f8] sm:$0x1] %vm101_vm2, %v27557_v5  ;;  %18457 = vmatmul.mubr.msk.f32.gmra.mrb[38].mxu0 %vm97_vm1, %v20834_v55  ;;  %18165 = vmatprep.mubr.msk.f32.mxu1 %vm97_vm1, %v20836_v60 }
  0x8e   :  { %166 = vst.msk [vmem:[#allocation2 + $0x218] sm:$0x1] %vm101_vm2, %v27557_v5  ;;  %170 = vst.msk [vmem:[#allocation2 + $0x238] sm:$0x1] %vm101_vm2, %v27557_v5  ;;  %18497 = vmatprep.mubr.msk.f32.mxu0 %vm97_vm1, %v20296_v32  ;;  %v20867_v32 = vld [vmem:[#allocation2 + $0x308] sm:$0xff] }
  0x8f   :  { %174 = vst.msk [vmem:[#allocation2 + $0x258] sm:$0x1] %vm101_vm2, %v27557_v5  ;;  %178 = vst.msk [vmem:[#allocation2 + $0x278] sm:$0x1] %vm101_vm2, %v27557_v5 }
  0x90   :  { %182 = vst.msk [vmem:[#allocation2 + $0x298] sm:$0x1] %vm101_vm2, %v27557_v5  ;;  %186 = vst.msk [vmem:[#allocation2 + $0x2b8] sm:$0x1] %vm101_vm2, %v27557_v5  ;;  %18166 = vmatmul.mubr.msk.f32.gmra.mrb[40].mxu1 %vm97_vm1, %v20844_v63 }
  0x91   :  { %190 = vst.msk [vmem:[#allocation2 + $0x2d8] sm:$0x1] %vm101_vm2, %v27557_v5  ;;  %194 = vst.msk [vmem:[#allocation2 + $0x2f8] sm:$0x1] %vm101_vm2, %v27557_v5  ;;  %18498 = vmatmul.mubr.msk.f32.vlgmr.msra.gmra.mrb[0].mxu0 %vm97_vm1, %v20308_v34  ;;  %v20877_v34 = vld [vmem:[#allocation2 + $0x310] sm:$0xff] }
  0x92   :  { %198 = vst.msk [vmem:[#allocation2 + $0x318] sm:$0x1] %vm101_vm2, %v27557_v5  ;;  %202 = vst.msk [vmem:[#allocation2 + $0x338] sm:$0x1] %vm101_vm2, %v27557_v5  ;;  %18594 = vmatpush3.msk.msra.mxu0 %vm631_vm0, %v20463_v10  ;;  %18500 = vmatprep.mubr.msk.f32.mxu0 %vm97_vm1, %v20316_v36  ;;  %v20881_v36 = vld [vmem:[#allocation2 + $0x328] sm:$0xff] }
  0x93   :  { %206 = vst.msk [vmem:[#allocation2 + $0x358] sm:$0x1] %vm101_vm2, %v27557_v5  ;;  %210 = vst.msk [vmem:[#allocation2 + $0x378] sm:$0x1] %vm101_vm2, %v27557_v5  ;;  %18691 = vmatprep.subr.msk.mxu0 %vm631_vm0, %v20855_v52  ;;  %v20893_v10 = vld [vmem:[#allocation2 + $0x348] sm:$0xff] }
  0x94   :  { %214 = vst.msk [vmem:[#allocation2 + $0x398] sm:$0x1] %vm101_vm2, %v27557_v5  ;;  %218 = vst.msk [vmem:[#allocation2 + $0x3b8] sm:$0x1] %vm101_vm2, %v27557_v5 }
  0x95   :  { %222 = vst.msk [vmem:[#allocation2 + $0x3d8] sm:$0x1] %vm101_vm2, %v27557_v5  ;;  %226 = vst.msk [vmem:[#allocation2 + $0x3f8] sm:$0x1] %vm101_vm2, %v27557_v5  ;;  %18501 = vmatmul.mubr.msk.f32.gmra.mrb[2].mxu0 %vm97_vm1, %v20326_v38  ;;  %v20889_v38 = vld [vmem:[#allocation2 + $0x330] sm:$0xff] }
  0x96   :  { %230 = vst.msk [vmem:[#allocation2 + $0x418] sm:$0x1] %vm101_vm2, %v27557_v5  ;;  %234 = vst.msk [vmem:[#allocation2 + $0x438] sm:$0x1] %vm101_vm2, %v27557_v5  ;;  %18503 = vmatprep.mubr.msk.f32.mxu0 %vm97_vm1, %v20332_v40  ;;  %v20901_v40 = vld [vmem:[#allocation2 + $0x350] sm:$0xff] }
  0x97   :  { %238 = vst.msk [vmem:[#allocation2 + $0x458] sm:$0x1] %vm101_vm2, %v27557_v5  ;;  %242 = vst.msk [vmem:[#allocation2 + $0x478] sm:$0x1] %vm101_vm2, %v27557_v5  ;;  %v20848_v5 = vld [vmem:[#allocation2 + $0x2e8] sm:$0xff] }
  0x98   :  { %27558 = vst [vmem:[#allocation22_spill] sm:$0xff] %v20834_v55  ;;  %18168 = vmatprep.mubr.msk.f32.mxu1 %vm97_vm1, %v20848_v5  ;;  %v20861_v55 = vld [vmem:[#allocation2 + $0x2f0] sm:$0xff] }
  0x99   :  { %18169 = vmatmul.mubr.msk.f32.gmra.mrb[42].mxu1 %vm97_vm1, %v20861_v55  ;;  %18504 = vmatmul.mubr.msk.f32.gmra.mrb[4].mxu0 %vm97_vm1, %v20342_v42  ;;  %v20905_v42 = vld [vmem:[#allocation2 + $0x368] sm:$0xff] }
  0x9a   :  { %18171 = vmatprep.mubr.msk.f32.mxu1 %vm97_vm1, %v20867_v32  ;;  %18506 = vmatprep.mubr.msk.f32.mxu0 %vm97_vm1, %v20348_v44  ;;  %v20913_v44 = vld [vmem:[#allocation2 + $0x370] sm:$0xff] }
  0x9d   :  { %18172 = vmatmul.mubr.msk.f32.gmra.mrb[44].mxu1 %vm97_vm1, %v20877_v34  ;;  %18507 = vmatmul.mubr.msk.f32.gmra.mrb[6].mxu0 %vm97_vm1, %v20358_v46  ;;  %v20917_v46 = vld [vmem:[#allocation2 + $0x388] sm:$0xff] }
  0x9e   :  { %18174 = vmatprep.mubr.msk.f32.mxu1 %vm97_vm1, %v20881_v36  ;;  %18509 = vmatprep.mubr.msk.f32.mxu0 %vm97_vm1, %v20364_v48  ;;  %v20925_v48 = vld [vmem:[#allocation2 + $0x390] sm:$0xff] }
  0xa1   :  { %18175 = vmatmul.mubr.msk.f32.gmra.mrb[46].mxu1 %vm97_vm1, %v20889_v38  ;;  %18510 = vmatmul.mubr.msk.f32.gmra.mrb[8].mxu0 %vm97_vm1, %v20368_v50  ;;  %v20929_v50 = vld [vmem:[#allocation2 + $0x3a8] sm:$0xff] }
  0xa2   :  { %18177 = vmatprep.mubr.msk.f32.mxu1 %vm97_vm1, %v20893_v10  ;;  %18512 = vmatprep.mubr.msk.f32.mxu0 %vm97_vm1, %v20399_v58  ;;  %v20937_v58 = vld [vmem:[#allocation2 + $0x3b0] sm:$0xff] }
  0xa5   :  { %18178 = vmatmul.mubr.msk.f32.gmra.mrb[48].mxu1 %vm97_vm1, %v20901_v40  ;;  %18513 = vmatmul.mubr.msk.f32.gmra.mrb[10].mxu0 %vm97_vm1, %v20422_v0  ;;  %v20941_v0 = vld [vmem:[#allocation2 + $0x3c8] sm:$0xff] }
  0xa6   :  { %18180 = vmatprep.mubr.msk.f32.mxu1 %vm97_vm1, %v20905_v42  ;;  %18515 = vmatprep.mubr.msk.f32.mxu0 %vm97_vm1, %v20439_v6  ;;  %v20949_v6 = vld [vmem:[#allocation2 + $0x3d0] sm:$0xff] }
  0xa9   :  { %18181 = vmatmul.mubr.msk.f32.gmra.mrb[50].mxu1 %vm97_vm1, %v20913_v44  ;;  %18516 = vmatmul.mubr.msk.f32.gmra.mrb[12].mxu0 %vm97_vm1, %v20497_v17  ;;  %v20953_v17 = vld [vmem:[#allocation2 + $0x3e8] sm:$0xff] }
  0xaa   :  { %18183 = vmatprep.mubr.msk.f32.mxu1 %vm97_vm1, %v20917_v46  ;;  %18518 = vmatprep.mubr.msk.f32.mxu0 %vm97_vm1, %v20503_v19  ;;  %v20961_v19 = vld [vmem:[#allocation2 + $0x3f0] sm:$0xff] }
  0xad   :  { %18184 = vmatmul.mubr.msk.f32.gmra.mrb[52].mxu1 %vm97_vm1, %v20925_v48  ;;  %18519 = vmatmul.mubr.msk.f32.gmra.mrb[14].mxu0 %vm97_vm1, %v20513_v21  ;;  %v20965_v21 = vld [vmem:[#allocation2 + $0x408] sm:$0xff] }
  0xae   :  { %18186 = vmatprep.mubr.msk.f32.mxu1 %vm97_vm1, %v20929_v50  ;;  %18521 = vmatprep.mubr.msk.f32.mxu0 %vm97_vm1, %v20519_v23  ;;  %v20973_v23 = vld [vmem:[#allocation2 + $0x410] sm:$0xff] }
  0xb1   :  { %18187 = vmatmul.mubr.msk.f32.gmra.mrb[54].mxu1 %vm97_vm1, %v20937_v58  ;;  %18522 = vmatmul.mubr.msk.f32.gmra.mrb[16].mxu0 %vm97_vm1, %v20529_v25  ;;  %v20977_v25 = vld [vmem:[#allocation2 + $0x428] sm:$0xff] }
  0xb2   :  { %18189 = vmatprep.mubr.msk.f32.mxu1 %vm97_vm1, %v20941_v0  ;;  %18524 = vmatprep.mubr.msk.f32.mxu0 %vm97_vm1, %v20535_v27  ;;  %v20985_v27 = vld [vmem:[#allocation2 + $0x430] sm:$0xff] }
  0xb5   :  { %18190 = vmatmul.mubr.msk.f32.gmra.mrb[56].mxu1 %vm97_vm1, %v20949_v6  ;;  %18525 = vmatmul.mubr.msk.f32.gmra.mrb[18].mxu0 %vm97_vm1, %v20542_v51  ;;  %v308_v51 = vld [vmem:[#allocation2 + $0x7] sm:$0xff] }
  0xb6   :  { %18192 = vmatprep.mubr.msk.f32.mxu1 %vm97_vm1, %v20953_v17  ;;  %18527 = vmatprep.mubr.msk.f32.mxu0 %vm97_vm1, %v20558_v57  ;;  %v309_v57 = vld [vmem:[#allocation2 + $0xf] sm:$0xff] }
  0xb9   :  { %18193 = vmatmul.mubr.msk.f32.gmra.mrb[58].mxu1 %vm97_vm1, %v20961_v19  ;;  %18528 = vmatmul.mubr.msk.f32.gmra.mrb[20].mxu0 %vm97_vm1, %v20631_v29  ;;  %v16425_v29 = vld [vmem:[%s27176_s1 + $0x8] sm:$0xf] }
  0xba   :  { %18195 = vmatprep.mubr.msk.f32.mxu1 %vm97_vm1, %v20965_v21  ;;  %18530 = vmatprep.mubr.msk.f32.mxu0 %vm97_vm1, %v20638_v53  ;;  %v21011_v53 = vld [vmem:[%s27176_s1 + $0xc] sm:$0xf] }
  0xbb   :  { %18299 = vmatprep.subr.msk.mxu1 %vm631_vm0, %v16425_v29 }
  0xbd   :  { %18196 = vmatmul.mubr.msk.f32.gmra.mrb[60].mxu1 %vm97_vm1, %v20973_v23  ;;  %18531 = vmatmul.mubr.msk.f32.gmra.mrb[22].mxu0 %vm97_vm1, %v20650_v59  ;;  %v21167_v59 = vld [vmem:[#allocation2 + $0x49] sm:$0xff] }
  0xbe   :  { %18198 = vmatprep.mubr.msk.f32.mxu1 %vm97_vm1, %v20977_v25  ;;  %18533 = vmatprep.mubr.msk.f32.mxu0 %vm97_vm1, %v20656_v62  ;;  %v21174_v62 = vld [vmem:[%s27176_s1 + $0x1c] sm:$0xf] }
  0xc1   :  { %18199 = vmatmul.mubr.msk.f32.gmra.mrb[62].mxu1 %vm97_vm1, %v20985_v27  ;;  %18534 = vmatmul.mubr.msk.f32.gmra.mrb[24].mxu0 %vm97_vm1, %v20666_v2  ;;  %v21186_v2 = vld [vmem:[#allocation2 + $0x51] sm:$0xff] }
  0xc2   :  { %18203 = vmatprep.mubr.msk.f32.mxu1 %vm97_vm1, %v308_v51  ;;  %18536 = vmatprep.mubr.msk.f32.mxu0 %vm97_vm1, %v20672_v7  ;;  %v21188_v7 = vld [vmem:[#allocation2 + $0x307] sm:$0xff]  ;;  %v21316_v51 = vld [vmem:[#allocation2 + $0x151] sm:$0xff] }
  0xc5   :  { %18204 = vmatmul.mubr.msk.f32.vlgmr.msra.gmra.mrb[0].mxu1 %vm97_vm1, %v309_v57  ;;  %18537 = vmatmul.mubr.msk.f32.gmra.mrb[26].mxu0 %vm97_vm1, %v20682_v9  ;;  %v21204_v9 = vld [vmem:[#allocation2 + $0x71] sm:$0xff]  ;;  %v21318_v57 = vld [vmem:[#allocation2 + $0x407] sm:$0xff] }
  0xc6   :  { %18206 = vmatprep.mubr.msk.f32.mxu1 %vm97_vm1, %v20292_v30  ;;  %18300 = vmatpush3.msk.msra.mxu1 %vm631_vm0, %v16425_v29  ;;  %v3050_v30 = vld [vmem:[#allocation2 + $0x208] sm:$0xff] }
  0xc7   :  { %19219 = vmatprep.subr.msk.mxu1 %vm631_vm0, %v21011_v53  ;;  %18539 = vmatprep.mubr.msk.f32.mxu0 %vm97_vm1, %v20688_v12  ;;  %v21206_v12 = vld [vmem:[#allocation2 + $0x327] sm:$0xff] }
  0xc8   :  { %v21320_v29 = vld [vmem:[#allocation2 + $0x169] sm:$0xff] }
  0xc9   :  { %18207 = vmatmul.mubr.msk.f32.gmra.mrb[2].mxu1 %vm97_vm1, %v20294_v31  ;;  %18540 = vmatmul.mubr.msk.f32.gmra.mrb[28].mxu0 %vm97_vm1, %v20696_v14  ;;  %v3051_v31 = vld [vmem:[#allocation2 + $0x210] sm:$0xff] }
  0xca   :  { %18209 = vmatprep.mubr.msk.f32.mxu1 %vm97_vm1, %v20302_v33  ;;  %18542 = vmatprep.mubr.msk.f32.mxu0 %vm97_vm1, %v3050_v30  ;;  %v27559_v33 = vld [vmem:[#allocation7_spill] sm:$0xff]  ;;  %v21208_v14 = vld [vmem:[#allocation2 + $0x89] sm:$0xff] }
  0xcb   :  { %v21328_v30 = vld [vmem:[#allocation2 + $0x40f] sm:$0xff] }
  0xcd   :  { %18210 = vmatmul.mubr.msk.f32.gmra.mrb[4].mxu1 %vm97_vm1, %v20314_v35  ;;  %18543 = vmatmul.mubr.msk.f32.gmra.mrb[30].mxu0 %vm97_vm1, %v3051_v31  ;;  %v27560_v35 = vld [vmem:[#allocation8_spill] sm:$0xff]  ;;  %v21332_v31 = vld [vmem:[#allocation2 + $0x171] sm:$0xff] }
  0xce   :  { %18212 = vmatprep.mubr.msk.f32.mxu1 %vm97_vm1, %v20318_v37  ;;  %18545 = vmatprep.mubr.msk.f32.mxu0 %vm97_vm1, %v20709_v1  ;;  %v27561_v37 = vld [vmem:[#allocation9_spill] sm:$0xff] }
  0xcf   :  { %v21180_v1 = vld [vmem:[#allocation2 + $0x2ef] sm:$0xff] }
  0xd1   :  { %18213 = vmatmul.mubr.msk.f32.gmra.mrb[6].mxu1 %vm97_vm1, %v20330_v39  ;;  %18546 = vmatmul.mubr.msk.f32.gmra.mrb[32].mxu0 %vm97_vm1, %v20718_v15  ;;  %v27562_v39 = vld [vmem:[#allocation10_spill] sm:$0xff] }
  0xd2   :  { %18215 = vmatprep.mubr.msk.f32.mxu1 %vm97_vm1, %v20334_v41  ;;  %18548 = vmatprep.mubr.msk.f32.mxu0 %vm97_vm1, %v20724_v8  ;;  %v27563_v41 = vld [vmem:[#allocation11_spill] sm:$0xff]  ;;  %v21190_v8 = vld [vmem:[#allocation2 + $0x69] sm:$0xff]  ;;  %v21220_v15 = vld [vmem:[#allocation2 + $0x91] sm:$0xff] }
  0xd5   :  { %18216 = vmatmul.mubr.msk.f32.gmra.mrb[8].mxu1 %vm97_vm1, %v20346_v43  ;;  %18549 = vmatmul.mubr.msk.f32.gmra.mrb[34].mxu0 %vm97_vm1, %v20741_v13  ;;  %v27564_v43 = vld [vmem:[#allocation12_spill] sm:$0xff] }
  0xd6   :  { %18218 = vmatprep.mubr.msk.f32.mxu1 %vm97_vm1, %v20350_v45  ;;  %18551 = vmatprep.mubr.msk.f32.mxu0 %vm97_vm1, %v20748_v3  ;;  %v27565_v45 = vld [vmem:[#allocation13_spill] sm:$0xff] }
  0xd7   :  { %v21216_v13 = vld [vmem:[#allocation2 + $0x32f] sm:$0xff] }
  0xd8   :  { %v21224_v3 = vld [vmem:[#allocation2 + $0xa9] sm:$0xff] }
  0xd9   :  { %18219 = vmatmul.mubr.msk.f32.gmra.mrb[10].mxu1 %vm97_vm1, %v20362_v47  ;;  %18552 = vmatmul.mubr.msk.f32.gmra.mrb[36].mxu0 %vm97_vm1, %v20758_v11  ;;  %v340_v47 = vld [vmem:[#allocation2 + $0x247] sm:$0xff]  ;;  %v21232_v11 = vld [vmem:[#allocation2 + $0x34f] sm:$0xff] }
  0xda   :  { %18221 = vmatprep.mubr.msk.f32.mxu1 %vm97_vm1, %v20366_v49  ;;  %18554 = vmatprep.mubr.msk.f32.mxu0 %vm97_vm1, %v20836_v60  ;;  %v27566_v49 = vld [vmem:[#allocation14_spill] sm:$0xff] }
  0xdb   :  { %v27574_v60 = vld [vmem:[#allocation22_spill] sm:$0xff] }
  0xdd   :  { %18222 = vmatmul.mubr.msk.f32.gmra.mrb[12].mxu1 %vm97_vm1, %v20381_v54  ;;  %18555 = vmatmul.mubr.msk.f32.gmra.mrb[38].mxu0 %vm97_vm1, %v20844_v63  ;;  %v341_v54 = vld [vmem:[#allocation2 + $0x24f] sm:$0xff] }
  0xde   :  { %18224 = vmatprep.mubr.msk.f32.mxu1 %vm97_vm1, %v20412_v61  ;;  %18557 = vmatprep.mubr.msk.f32.mxu0 %vm97_vm1, %v20848_v5  ;;  %v27567_v61 = vld [vmem:[#allocation15_spill] sm:$0xff]  ;;  %v21163_v63 = vld [vmem:[#allocation2 + $0x31] sm:$0xff] }
  0xdf   :  { %v21222_v5 = vld [vmem:[#allocation2 + $0x347] sm:$0xff] }
  0xe1   :  { %18225 = vmatmul.mubr.msk.f32.gmra.mrb[14].mxu1 %vm97_vm1, %v20437_v4  ;;  %18558 = vmatmul.mubr.msk.f32.gmra.mrb[40].mxu0 %vm97_vm1, %v20861_v55  ;;  %v27568_v4 = vld [vmem:[#allocation16_spill] sm:$0xff] }
  0xe2   :  { %18227 = vmatprep.mubr.msk.f32.mxu1 %vm97_vm1, %v20486_v16  ;;  %18560 = vmatprep.mubr.msk.f32.mxu0 %vm97_vm1, %v20867_v32  ;;  %v27569_v16 = vld [vmem:[#allocation17_spill] sm:$0xff]  ;;  %v21165_v55 = vld [vmem:[#allocation2 + $0x2e7] sm:$0xff] }
  0xe3   :  { %v21236_v32 = vld [vmem:[#allocation2 + $0xb1] sm:$0xff] }
  0xe5   :  { %18228 = vmatmul.mubr.msk.f32.gmra.mrb[16].mxu1 %vm97_vm1, %v20501_v18  ;;  %18561 = vmatmul.mubr.msk.f32.gmra.mrb[42].mxu0 %vm97_vm1, %v20877_v34  ;;  %v3082_v18 = vld [vmem:[#allocation2 + $0x448] sm:$0xff] }
  0xe6   :  { %18230 = vmatprep.mubr.msk.f32.mxu1 %vm97_vm1, %v20505_v20  ;;  %18563 = vmatprep.mubr.msk.f32.mxu0 %vm97_vm1, %v20881_v36  ;;  %v27570_v20 = vld [vmem:[#allocation18_spill] sm:$0xff]  ;;  %v21238_v34 = vld [vmem:[#allocation2 + $0x367] sm:$0xff] }
  0xe7   :  { %v21240_v36 = vld [vmem:[#allocation2 + $0xc9] sm:$0xff] }
  0xe9   :  { %18231 = vmatmul.mubr.msk.f32.gmra.mrb[18].mxu1 %vm97_vm1, %v20517_v22  ;;  %18564 = vmatmul.mubr.msk.f32.gmra.mrb[44].mxu0 %vm97_vm1, %v20889_v38  ;;  %v27571_v22 = vld [vmem:[#allocation19_spill] sm:$0xff]  ;;  %v21248_v38 = vld [vmem:[#allocation2 + $0x36f] sm:$0xff] }
  0xea   :  { %18233 = vmatprep.mubr.msk.f32.mxu1 %vm97_vm1, %v20521_v24  ;;  %18566 = vmatprep.mubr.msk.f32.mxu0 %vm97_vm1, %v20893_v10  ;;  %v3083_v24 = vld [vmem:[#allocation2 + $0x450] sm:$0xff] }
  0xeb   :  { %v21252_v10 = vld [vmem:[#allocation2 + $0xd1] sm:$0xff] }
  0xed   :  { %18234 = vmatmul.mubr.msk.f32.gmra.mrb[20].mxu1 %vm97_vm1, %v20531_v26  ;;  %18567 = vmatmul.mubr.msk.f32.gmra.mrb[46].mxu0 %vm97_vm1, %v20901_v40  ;;  %v21154_v26 = vld [vmem:[#allocation2 + $0x29] sm:$0xff] }
  0xee   :  { %18236 = vmatprep.mubr.msk.f32.mxu1 %vm97_vm1, %v20537_v28  ;;  %18569 = vmatprep.mubr.msk.f32.mxu0 %vm97_vm1, %v20905_v42  ;;  %v27572_v28 = vld [vmem:[#allocation20_spill] sm:$0xff] }
  0xef   :  { %v21254_v40 = vld [vmem:[#allocation2 + $0x387] sm:$0xff] }
  0xf0   :  { %v21256_v42 = vld [vmem:[#allocation2 + $0xe9] sm:$0xff] }
  0xf1   :  { %18237 = vmatmul.mubr.msk.f32.gmra.mrb[22].mxu1 %vm97_vm1, %v20556_v56  ;;  %18570 = vmatmul.mubr.msk.f32.gmra.mrb[48].mxu0 %vm97_vm1, %v20913_v44  ;;  %v27573_v56 = vld [vmem:[#allocation21_spill] sm:$0xff] }
  0xf2   :  { %18239 = vmatprep.mubr.msk.f32.mxu1 %vm97_vm1, %v27559_v33  ;;  %18572 = vmatprep.mubr.msk.f32.mxu0 %vm97_vm1, %v20917_v46  ;;  %v21264_v44 = vld [vmem:[#allocation2 + $0x38f] sm:$0xff]  ;;  %v21334_v33 = vld [vmem:[#allocation2 + $0x427] sm:$0xff] }
  0xf3   :  { %v21268_v46 = vld [vmem:[#allocation2 + $0xf1] sm:$0xff] }
  0xf5   :  { %18240 = vmatmul.mubr.msk.f32.gmra.mrb[24].mxu1 %vm97_vm1, %v27560_v35  ;;  %18573 = vmatmul.mubr.msk.f32.gmra.mrb[50].mxu0 %vm97_vm1, %v20925_v48  ;;  %v21270_v48 = vld [vmem:[#allocation2 + $0x3a7] sm:$0xff] }
  0xf6   :  { %18242 = vmatprep.mubr.msk.f32.mxu1 %vm97_vm1, %v27561_v37  ;;  %18575 = vmatprep.mubr.msk.f32.mxu0 %vm97_vm1, %v20929_v50  ;;  %v21272_v50 = vld [vmem:[#allocation2 + $0x109] sm:$0xff] }
  0xf7   :  { %v21336_v35 = vld [vmem:[#allocation2 + $0x189] sm:$0xff] }
  0xf8   :  { %v21344_v37 = vld [vmem:[#allocation2 + $0x42f] sm:$0xff] }
  0xf9   :  { %18243 = vmatmul.mubr.msk.f32.gmra.mrb[26].mxu1 %vm97_vm1, %v27562_v39  ;;  %18576 = vmatmul.mubr.msk.f32.gmra.mrb[52].mxu0 %vm97_vm1, %v20937_v58  ;;  %v21280_v58 = vld [vmem:[#allocation2 + $0x3af] sm:$0xff] }
  0xfa   :  { %18245 = vmatprep.mubr.msk.f32.mxu1 %vm97_vm1, %v27563_v41  ;;  %18578 = vmatprep.mubr.msk.f32.mxu0 %vm97_vm1, %v20941_v0  ;;  %v21284_v0 = vld [vmem:[#allocation2 + $0x111] sm:$0xff]  ;;  %v1600_v41 = vld [vmem:[#allocation2 + $0x9] sm:$0xff] }
  0xfb   :  { %v21348_v39 = vld [vmem:[#allocation2 + $0x191] sm:$0xff] }
  0xfd   :  { %18246 = vmatmul.mubr.msk.f32.gmra.mrb[28].mxu1 %vm97_vm1, %v27564_v43  ;;  %18579 = vmatmul.mubr.msk.f32.gmra.mrb[54].mxu0 %vm97_vm1, %v20949_v6  ;;  %v21286_v6 = vld [vmem:[#allocation2 + $0x3c7] sm:$0xff] }
  0xfe   :  { %18248 = vmatprep.mubr.msk.f32.mxu1 %vm97_vm1, %v27565_v45  ;;  %18581 = vmatprep.mubr.msk.f32.mxu0 %vm97_vm1, %v20953_v17  ;;  %v21288_v17 = vld [vmem:[#allocation2 + $0x129] sm:$0xff]  ;;  %v1601_v45 = vld [vmem:[#allocation2 + $0x11] sm:$0xff] }
  0xff   :  { %v21350_v43 = vld [vmem:[#allocation2 + $0x1a9] sm:$0xff] }
 0x101   :  { %18249 = vmatmul.mubr.msk.f32.gmra.mrb[30].mxu1 %vm97_vm1, %v27566_v49  ;;  %18582 = vmatmul.mubr.msk.f32.gmra.mrb[56].mxu0 %vm97_vm1, %v20961_v19  ;;  %v21296_v19 = vld [vmem:[#allocation2 + $0x3cf] sm:$0xff] }
 0x102   :  { %18251 = vmatprep.mubr.msk.f32.mxu1 %vm97_vm1, %v340_v47  ;;  %18584 = vmatprep.mubr.msk.f32.mxu0 %vm97_vm1, %v20965_v21  ;;  %v21300_v21 = vld [vmem:[#allocation2 + $0x131] sm:$0xff]  ;;  %v21361_v49 = vld [vmem:[#allocation2 + $0x1c9] sm:$0xff] }
 0x103   :  { %v21359_v47 = vld [vmem:[#allocation2 + $0x1b1] sm:$0xff] }
 0x105   :  { %18252 = vmatmul.mubr.msk.f32.gmra.mrb[32].mxu1 %vm97_vm1, %v341_v54  ;;  %18585 = vmatmul.mubr.msk.f32.gmra.mrb[58].mxu0 %vm97_vm1, %v20973_v23  ;;  %v21302_v23 = vld [vmem:[#allocation2 + $0x3e7] sm:$0xff]  ;;  %v21370_v54 = vld [vmem:[#allocation2 + $0x1d1] sm:$0xff] }
 0x106   :  { %18254 = vmatprep.mubr.msk.f32.mxu1 %vm97_vm1, %v27567_v61  ;;  %18587 = vmatprep.mubr.msk.f32.mxu0 %vm97_vm1, %v20977_v25  ;;  %v21304_v25 = vld [vmem:[#allocation2 + $0x149] sm:$0xff] }
 0x107   :  { %v21374_v61 = vld [vmem:[#allocation2 + $0x1e9] sm:$0xff] }
 0x109   :  { %18255 = vmatmul.mubr.msk.f32.gmra.mrb[34].mxu1 %vm97_vm1, %v27568_v4  ;;  %18588 = vmatmul.mubr.msk.f32.gmra.mrb[60].mxu0 %vm97_vm1, %v20985_v27  ;;  %v21312_v27 = vld [vmem:[#allocation2 + $0x3ef] sm:$0xff] }
 0x10a   :  { %18257 = vmatprep.mubr.msk.f32.mxu1 %vm97_vm1, %v27569_v16  ;;  %18590 = vmatprep.mubr.msk.f32.mxu0 %vm97_vm1, %v3082_v18  ;;  %v21384_v4 = vld [vmem:[#allocation2 + $0x1f1] sm:$0xff]  ;;  %v3760_v16 = vld [vmem:[#allocation2 + $0x209] sm:$0xff] }
 0x10b   :  { %v21393_v18 = vld [vmem:[#allocation2 + $0x269] sm:$0xff] }
 0x10d   :  { %18258 = vmatmul.mubr.msk.f32.gmra.mrb[36].mxu1 %vm97_vm1, %v27570_v20  ;;  %18591 = vmatmul.mubr.msk.f32.gmra.mrb[62].mxu0 %vm97_vm1, %v3083_v24  ;;  %v21402_v20 = vld [vmem:[#allocation2 + $0x271] sm:$0xff] }
 0x10e   :  { %18260 = vmatprep.mubr.msk.f32.mxu1 %vm97_vm1, %v27571_v22  ;;  %18595 = vmatprep.mubr.msk.f32.mxu0 %vm97_vm1, %v21154_v26  ;;  %v21404_v22 = vld [vmem:[#allocation2 + $0x289] sm:$0xff]  ;;  %v21414_v24 = vld [vmem:[#allocation2 + $0x291] sm:$0xff] }
 0x111   :  { %18261 = vmatmul.mubr.msk.f32.gmra.mrb[38].mxu1 %vm97_vm1, %v27572_v28  ;;  %18596 = vmatmul.mubr.msk.f32.vlgmr.msra.gmra.mrb[0].mxu0 %vm97_vm1, %v21163_v63  ;;  %v21426_v28 = vld [vmem:[#allocation2 + $0x2b1] sm:$0xff] }
 0x112   :  { %18263 = vmatprep.mubr.msk.f32.mxu1 %vm97_vm1, %v27573_v56  ;;  %18692 = vmatpush3.msk.msra.mxu0 %vm631_vm0, %v20855_v52  ;;  %v21200_v52 = vld [vmem:[#allocation2 + $0x30f] sm:$0xff] }
 0x113   :  { %18598 = vmatprep.mubr.msk.f32.mxu0 %vm97_vm1, %v21167_v59  ;;  %18789 = vmatprep.subr.msk.mxu0 %vm631_vm0, %v21174_v62  ;;  %v21428_v56 = vld [vmem:[#allocation2 + $0x2c9] sm:$0xff] }
 0x115   :  { %18264 = vmatmul.mubr.msk.f32.gmra.mrb[40].mxu1 %vm97_vm1, %v27574_v60  ;;  %18599 = vmatmul.mubr.msk.f32.gmra.mrb[2].mxu0 %vm97_vm1, %v21186_v2  ;;  %v21450_v60 = vld [vmem:[#allocation2 + $0x2f1] sm:$0xff] }
 0x116   :  { %18266 = vmatprep.mubr.msk.f32.mxu1 %vm97_vm1, %v21165_v55  ;;  %18601 = vmatprep.mubr.msk.f32.mxu0 %vm97_vm1, %v21190_v8 }
 0x119   :  { %18267 = vmatmul.mubr.msk.f32.gmra.mrb[42].mxu1 %vm97_vm1, %v21180_v1  ;;  %18602 = vmatmul.mubr.msk.f32.gmra.mrb[4].mxu0 %vm97_vm1, %v21204_v9 }
 0x11a   :  { %18269 = vmatprep.mubr.msk.f32.mxu1 %vm97_vm1, %v21188_v7  ;;  %18604 = vmatprep.mubr.msk.f32.mxu0 %vm97_vm1, %v21208_v14 }
 0x11d   :  { %18270 = vmatmul.mubr.msk.f32.gmra.mrb[44].mxu1 %vm97_vm1, %v21200_v52  ;;  %18605 = vmatmul.mubr.msk.f32.gmra.mrb[6].mxu0 %vm97_vm1, %v21220_v15 }
 0x11e   :  { %18272 = vmatprep.mubr.msk.f32.mxu1 %vm97_vm1, %v21206_v12  ;;  %18607 = vmatprep.mubr.msk.f32.mxu0 %vm97_vm1, %v21224_v3 }
 0x121   :  { %18273 = vmatmul.mubr.msk.f32.gmra.mrb[46].mxu1 %vm97_vm1, %v21216_v13  ;;  %18608 = vmatmul.mubr.msk.f32.gmra.mrb[8].mxu0 %vm97_vm1, %v21236_v32 }
 0x122   :  { %18275 = vmatprep.mubr.msk.f32.mxu1 %vm97_vm1, %v21222_v5  ;;  %18610 = vmatprep.mubr.msk.f32.mxu0 %vm97_vm1, %v21240_v36 }
 0x125   :  { %18276 = vmatmul.mubr.msk.f32.gmra.mrb[48].mxu1 %vm97_vm1, %v21232_v11  ;;  %18611 = vmatmul.mubr.msk.f32.gmra.mrb[10].mxu0 %vm97_vm1, %v21252_v10 }
 0x126   :  { %18278 = vmatprep.mubr.msk.f32.mxu1 %vm97_vm1, %v21238_v34  ;;  %18613 = vmatprep.mubr.msk.f32.mxu0 %vm97_vm1, %v21256_v42 }
 0x129   :  { %18279 = vmatmul.mubr.msk.f32.gmra.mrb[50].mxu1 %vm97_vm1, %v21248_v38  ;;  %18614 = vmatmul.mubr.msk.f32.gmra.mrb[12].mxu0 %vm97_vm1, %v21268_v46 }
 0x12a   :  { %18281 = vmatprep.mubr.msk.f32.mxu1 %vm97_vm1, %v21254_v40  ;;  %18616 = vmatprep.mubr.msk.f32.mxu0 %vm97_vm1, %v21272_v50 }
 0x12d   :  { %18282 = vmatmul.mubr.msk.f32.gmra.mrb[52].mxu1 %vm97_vm1, %v21264_v44  ;;  %18617 = vmatmul.mubr.msk.f32.gmra.mrb[14].mxu0 %vm97_vm1, %v21284_v0 }
 0x12e   :  { %18284 = vmatprep.mubr.msk.f32.mxu1 %vm97_vm1, %v21270_v48  ;;  %18619 = vmatprep.mubr.msk.f32.mxu0 %vm97_vm1, %v21288_v17 }
 0x131   :  { %18285 = vmatmul.mubr.msk.f32.gmra.mrb[54].mxu1 %vm97_vm1, %v21280_v58  ;;  %18620 = vmatmul.mubr.msk.f32.gmra.mrb[16].mxu0 %vm97_vm1, %v21300_v21 }
 0x132   :  { %18287 = vmatprep.mubr.msk.f32.mxu1 %vm97_vm1, %v21286_v6  ;;  %18622 = vmatprep.mubr.msk.f32.mxu0 %vm97_vm1, %v21304_v25 }
 0x135   :  { %18288 = vmatmul.mubr.msk.f32.gmra.mrb[56].mxu1 %vm97_vm1, %v21296_v19  ;;  %18623 = vmatmul.mubr.msk.f32.gmra.mrb[18].mxu0 %vm97_vm1, %v21316_v51 }
 0x136   :  { %18290 = vmatprep.mubr.msk.f32.mxu1 %vm97_vm1, %v21302_v23  ;;  %18625 = vmatprep.mubr.msk.f32.mxu0 %vm97_vm1, %v21320_v29 }
 0x139   :  { %18291 = vmatmul.mubr.msk.f32.gmra.mrb[58].mxu1 %vm97_vm1, %v21312_v27  ;;  %18626 = vmatmul.mubr.msk.f32.gmra.mrb[20].mxu0 %vm97_vm1, %v21332_v31 }
 0x13a   :  { %18293 = vmatprep.mubr.msk.f32.mxu1 %vm97_vm1, %v21318_v57  ;;  %18628 = vmatprep.mubr.msk.f32.mxu0 %vm97_vm1, %v21336_v35 }
 0x13d   :  { %18294 = vmatmul.mubr.msk.f32.gmra.mrb[60].mxu1 %vm97_vm1, %v21328_v30  ;;  %18629 = vmatmul.mubr.msk.f32.gmra.mrb[22].mxu0 %vm97_vm1, %v21348_v39 }
 0x13e   :  { %18296 = vmatprep.mubr.msk.f32.mxu1 %vm97_vm1, %v21334_v33  ;;  %18631 = vmatprep.mubr.msk.f32.mxu0 %vm97_vm1, %v21350_v43 }
 0x141   :  { %18297 = vmatmul.mubr.msk.f32.gmra.mrb[62].mxu1 %vm97_vm1, %v21344_v37  ;;  %18632 = vmatmul.mubr.msk.f32.gmra.mrb[24].mxu0 %vm97_vm1, %v21359_v47 }
 0x142   :  { %18301 = vmatprep.mubr.msk.f32.mxu1 %vm97_vm1, %v1600_v41  ;;  %18634 = vmatprep.mubr.msk.f32.mxu0 %vm97_vm1, %v21361_v49  ;;  %v21568_v41 = vld [vmem:[#allocation2 + $0x431] sm:$0xff] }
 0x145   :  { %18302 = vmatmul.mubr.msk.f32.vlgmr.msra.gmra.mrb[0].mxu1 %vm97_vm1, %v1601_v45  ;;  %18635 = vmatmul.mubr.msk.f32.gmra.mrb[26].mxu0 %vm97_vm1, %v21370_v54  ;;  %v3793_v45 = vld [vmem:[#allocation2 + $0x451] sm:$0xff] }
 0x146   :  { %18304 = vmatprep.mubr.msk.f32.mxu1 %vm97_vm1, %v21154_v26  ;;  %19220 = vmatpush3.msk.msra.mxu1 %vm631_vm0, %v21011_v53  ;;  %v3761_v53 = vld [vmem:[#allocation2 + $0x211] sm:$0xff]  ;;  %v21416_v26 = vld [vmem:[#allocation2 + $0x2a9] sm:$0xff] }
 0x147   :  { %18637 = vmatprep.mubr.msk.f32.mxu0 %vm97_vm1, %v21374_v61 }
 0x149   :  { %18305 = vmatmul.mubr.msk.f32.gmra.mrb[2].mxu1 %vm97_vm1, %v21163_v63  ;;  %18638 = vmatmul.mubr.msk.f32.gmra.mrb[28].mxu0 %vm97_vm1, %v21384_v4  ;;  %v21438_v63 = vld [vmem:[#allocation2 + $0x2d1] sm:$0xff] }
 0x14a   :  { %18307 = vmatprep.mubr.msk.f32.mxu1 %vm97_vm1, %v21167_v59  ;;  %18640 = vmatprep.mubr.msk.f32.mxu0 %vm97_vm1, %v3760_v16  ;;  %v21440_v59 = vld [vmem:[#allocation2 + $0x2e9] sm:$0xff] }
 0x14b   :  { %v4445_v16 = vld [vmem:[#allocation2 + $0x87] sm:$0xff] }
 0x14d   :  { %18308 = vmatmul.mubr.msk.f32.gmra.mrb[4].mxu1 %vm97_vm1, %v21186_v2  ;;  %18641 = vmatmul.mubr.msk.f32.gmra.mrb[30].mxu0 %vm97_vm1, %v3761_v53  ;;  %v21452_v2 = vld [vmem:[#allocation2 + $0x309] sm:$0xff] }
 0x14e   :  { %18310 = vmatprep.mubr.msk.f32.mxu1 %vm97_vm1, %v21190_v8  ;;  %18643 = vmatprep.mubr.msk.f32.mxu0 %vm97_vm1, %v21393_v18  ;;  %v21462_v8 = vld [vmem:[#allocation2 + $0x311] sm:$0xff] }
 0x14f   :  { %v4446_v53 = vld [vmem:[#allocation2 + $0x8f] sm:$0xff] }
 0x151   :  { %18311 = vmatmul.mubr.msk.f32.gmra.mrb[6].mxu1 %vm97_vm1, %v21204_v9  ;;  %18644 = vmatmul.mubr.msk.f32.gmra.mrb[32].mxu0 %vm97_vm1, %v21402_v20  ;;  %v21464_v9 = vld [vmem:[#allocation2 + $0x329] sm:$0xff] }
 0x152   :  { %18313 = vmatprep.mubr.msk.f32.mxu1 %vm97_vm1, %v21208_v14  ;;  %18646 = vmatprep.mubr.msk.f32.mxu0 %vm97_vm1, %v21404_v22  ;;  %v21474_v14 = vld [vmem:[#allocation2 + $0x331] sm:$0xff] }
 0x155   :  { %18314 = vmatmul.mubr.msk.f32.gmra.mrb[8].mxu1 %vm97_vm1, %v21220_v15  ;;  %18647 = vmatmul.mubr.msk.f32.gmra.mrb[34].mxu0 %vm97_vm1, %v21414_v24  ;;  %v21476_v15 = vld [vmem:[#allocation2 + $0x349] sm:$0xff] }
 0x156   :  { %18316 = vmatprep.mubr.msk.f32.mxu1 %vm97_vm1, %v21224_v3  ;;  %18649 = vmatprep.mubr.msk.f32.mxu0 %vm97_vm1, %v21416_v26  ;;  %v21486_v3 = vld [vmem:[#allocation2 + $0x351] sm:$0xff] }
 0x159   :  { %18317 = vmatmul.mubr.msk.f32.gmra.mrb[10].mxu1 %vm97_vm1, %v21236_v32  ;;  %18650 = vmatmul.mubr.msk.f32.gmra.mrb[36].mxu0 %vm97_vm1, %v21426_v28  ;;  %v21488_v32 = vld [vmem:[#allocation2 + $0x369] sm:$0xff] }
 0x15a   :  { %18319 = vmatprep.mubr.msk.f32.mxu1 %vm97_vm1, %v21240_v36  ;;  %18652 = vmatprep.mubr.msk.f32.mxu0 %vm97_vm1, %v21428_v56  ;;  %v21498_v36 = vld [vmem:[#allocation2 + $0x371] sm:$0xff] }
 0x15d   :  { %18320 = vmatmul.mubr.msk.f32.gmra.mrb[12].mxu1 %vm97_vm1, %v21252_v10  ;;  %18653 = vmatmul.mubr.msk.f32.gmra.mrb[38].mxu0 %vm97_vm1, %v21438_v63  ;;  %v21500_v10 = vld [vmem:[#allocation2 + $0x389] sm:$0xff] }
 0x15e   :  { %18322 = vmatprep.mubr.msk.f32.mxu1 %vm97_vm1, %v21256_v42  ;;  %18655 = vmatprep.mubr.msk.f32.mxu0 %vm97_vm1, %v21440_v59  ;;  %v21510_v42 = vld [vmem:[#allocation2 + $0x391] sm:$0xff] }
 0x161   :  { %18323 = vmatmul.mubr.msk.f32.gmra.mrb[14].mxu1 %vm97_vm1, %v21268_v46  ;;  %18656 = vmatmul.mubr.msk.f32.gmra.mrb[40].mxu0 %vm97_vm1, %v21450_v60  ;;  %v21512_v46 = vld [vmem:[#allocation2 + $0x3a9] sm:$0xff] }
 0x162   :  { %18325 = vmatprep.mubr.msk.f32.mxu1 %vm97_vm1, %v21272_v50  ;;  %18658 = vmatprep.mubr.msk.f32.mxu0 %vm97_vm1, %v21452_v2  ;;  %v21522_v50 = vld [vmem:[#allocation2 + $0x3b1] sm:$0xff] }
 0x165   :  { %18326 = vmatmul.mubr.msk.f32.gmra.mrb[16].mxu1 %vm97_vm1, %v21284_v0  ;;  %18659 = vmatmul.mubr.msk.f32.gmra.mrb[42].mxu0 %vm97_vm1, %v21462_v8  ;;  %v21524_v0 = vld [vmem:[#allocation2 + $0x3c9] sm:$0xff] }
 0x166   :  { %18328 = vmatprep.mubr.msk.f32.mxu1 %vm97_vm1, %v21288_v17  ;;  %18661 = vmatprep.mubr.msk.f32.mxu0 %vm97_vm1, %v21464_v9  ;;  %v21534_v17 = vld [vmem:[#allocation2 + $0x3d1] sm:$0xff] }
 0x169   :  { %18329 = vmatmul.mubr.msk.f32.gmra.mrb[18].mxu1 %vm97_vm1, %v21300_v21  ;;  %18662 = vmatmul.mubr.msk.f32.gmra.mrb[44].mxu0 %vm97_vm1, %v21474_v14  ;;  %v1632_v21 = vld [vmem:[#allocation2 + $0x249] sm:$0xff] }
 0x16a   :  { %18331 = vmatprep.mubr.msk.f32.mxu1 %vm97_vm1, %v21304_v25  ;;  %18664 = vmatprep.mubr.msk.f32.mxu0 %vm97_vm1, %v21476_v15  ;;  %v21536_v25 = vld [vmem:[#allocation2 + $0x3e9] sm:$0xff] }
 0x16d   :  { %18332 = vmatmul.mubr.msk.f32.gmra.mrb[20].mxu1 %vm97_vm1, %v21316_v51  ;;  %18665 = vmatmul.mubr.msk.f32.gmra.mrb[46].mxu0 %vm97_vm1, %v21486_v3  ;;  %v1633_v51 = vld [vmem:[#allocation2 + $0x251] sm:$0xff] }
 0x16e   :  { %18334 = vmatprep.mubr.msk.f32.mxu1 %vm97_vm1, %v21320_v29  ;;  %18667 = vmatprep.mubr.msk.f32.mxu0 %vm97_vm1, %v21488_v32  ;;  %v21545_v29 = vld [vmem:[#allocation2 + $0x3f1] sm:$0xff] }
 0x171   :  { %18335 = vmatmul.mubr.msk.f32.gmra.mrb[22].mxu1 %vm97_vm1, %v21332_v31  ;;  %18668 = vmatmul.mubr.msk.f32.gmra.mrb[48].mxu0 %vm97_vm1, %v21498_v36  ;;  %v21547_v31 = vld [vmem:[#allocation2 + $0x409] sm:$0xff] }
 0x172   :  { %18337 = vmatprep.mubr.msk.f32.mxu1 %vm97_vm1, %v21336_v35  ;;  %18670 = vmatprep.mubr.msk.f32.mxu0 %vm97_vm1, %v21500_v10  ;;  %v21556_v35 = vld [vmem:[#allocation2 + $0x411] sm:$0xff] }
 0x175   :  { %18338 = vmatmul.mubr.msk.f32.gmra.mrb[24].mxu1 %vm97_vm1, %v21348_v39  ;;  %18671 = vmatmul.mubr.msk.f32.gmra.mrb[50].mxu0 %vm97_vm1, %v21510_v42  ;;  %v21558_v39 = vld [vmem:[#allocation2 + $0x429] sm:$0xff] }
 0x176   :  { %18340 = vmatprep.mubr.msk.f32.mxu1 %vm97_vm1, %v21350_v43  ;;  %18673 = vmatprep.mubr.msk.f32.mxu0 %vm97_vm1, %v21512_v46  ;;  %v3792_v43 = vld [vmem:[#allocation2 + $0x449] sm:$0xff] }
 0x179   :  { %18341 = vmatmul.mubr.msk.f32.gmra.mrb[26].mxu1 %vm97_vm1, %v21359_v47  ;;  %18674 = vmatmul.mubr.msk.f32.gmra.mrb[52].mxu0 %vm97_vm1, %v21522_v50  ;;  %v4441_v47 = vld [vmem:[#allocation2 + $0x47] sm:$0xff] }
 0x17a   :  { %18343 = vmatprep.mubr.msk.f32.mxu1 %vm97_vm1, %v21361_v49  ;;  %18676 = vmatprep.mubr.msk.f32.mxu0 %vm97_vm1, %v21524_v0  ;;  %v4442_v49 = vld [vmem:[#allocation2 + $0x4f] sm:$0xff] }
 0x17d   :  { %18344 = vmatmul.mubr.msk.f32.gmra.mrb[28].mxu1 %vm97_vm1, %v21370_v54  ;;  %18677 = vmatmul.mubr.msk.f32.gmra.mrb[54].mxu0 %vm97_vm1, %v21534_v17  ;;  %v4443_v54 = vld [vmem:[#allocation2 + $0x67] sm:$0xff] }
 0x17e   :  { %18346 = vmatprep.mubr.msk.f32.mxu1 %vm97_vm1, %v21374_v61  ;;  %18679 = vmatprep.mubr.msk.f32.mxu0 %vm97_vm1, %v21536_v25  ;;  %v21588_v61 = vld [vmem:[%s27176_s1 + $0x20] sm:$0xf] }
 0x181   :  { %18347 = vmatmul.mubr.msk.f32.gmra.mrb[30].mxu1 %vm97_vm1, %v21384_v4  ;;  %18680 = vmatmul.mubr.msk.f32.gmra.mrb[56].mxu0 %vm97_vm1, %v21545_v29  ;;  %v4444_v4 = vld [vmem:[#allocation2 + $0x6f] sm:$0xff] }
 0x182   :  { %18349 = vmatprep.mubr.msk.f32.mxu1 %vm97_vm1, %v1632_v21  ;;  %18682 = vmatprep.mubr.msk.f32.mxu0 %vm97_vm1, %v21547_v31  ;;  %v4472_v21 = vld [vmem:[#allocation2 + $0x22f] sm:$0xff] }
 0x185   :  { %18350 = vmatmul.mubr.msk.f32.gmra.mrb[32].mxu1 %vm97_vm1, %v1633_v51  ;;  %18683 = vmatmul.mubr.msk.f32.gmra.mrb[58].mxu0 %vm97_vm1, %v21556_v35  ;;  %v4474_v51 = vld [vmem:[#allocation2 + $0x28f] sm:$0xff] }
 0x186   :  { %18352 = vmatprep.mubr.msk.f32.mxu1 %vm97_vm1, %v21393_v18  ;;  %18685 = vmatprep.mubr.msk.f32.mxu0 %vm97_vm1, %v21558_v39  ;;  %v4447_v18 = vld [vmem:[#allocation2 + $0xa7] sm:$0xff] }
 0x189   :  { %18353 = vmatmul.mubr.msk.f32.gmra.mrb[34].mxu1 %vm97_vm1, %v21402_v20  ;;  %18686 = vmatmul.mubr.msk.f32.gmra.mrb[60].mxu0 %vm97_vm1, %v21568_v41  ;;  %v4449_v20 = vld [vmem:[#allocation2 + $0xc7] sm:$0xff] }
 0x18a   :  { %18355 = vmatprep.mubr.msk.f32.mxu1 %vm97_vm1, %v21404_v22  ;;  %18688 = vmatprep.mubr.msk.f32.mxu0 %vm97_vm1, %v3792_v43  ;;  %v4450_v22 = vld [vmem:[#allocation2 + $0xcf] sm:$0xff] }
 0x18b   :  { %v5162_v43 = vld [vmem:[#allocation2 + $0xf0] sm:$0xff] }
 0x18d   :  { %18356 = vmatmul.mubr.msk.f32.gmra.mrb[36].mxu1 %vm97_vm1, %v21414_v24  ;;  %18689 = vmatmul.mubr.msk.f32.gmra.mrb[62].mxu0 %vm97_vm1, %v3793_v45  ;;  %v4451_v24 = vld [vmem:[#allocation2 + $0xe7] sm:$0xff] }
 0x18e   :  { %18358 = vmatprep.mubr.msk.f32.mxu1 %vm97_vm1, %v21416_v26  ;;  %18693 = vmatprep.mubr.msk.f32.mxu0 %vm97_vm1, %v4441_v47  ;;  %v4452_v26 = vld [vmem:[#allocation2 + $0xef] sm:$0xff] }
 0x18f   :  { %v5163_v45 = vld [vmem:[#allocation2 + $0x108] sm:$0xff] }
 0x191   :  { %18359 = vmatmul.mubr.msk.f32.gmra.mrb[38].mxu1 %vm97_vm1, %v21426_v28  ;;  %18694 = vmatmul.mubr.msk.f32.vlgmr.msra.gmra.mrb[0].mxu0 %vm97_vm1, %v4442_v49  ;;  %v4453_v28 = vld [vmem:[#allocation2 + $0x107] sm:$0xff] }
 0x192   :  { %18361 = vmatprep.mubr.msk.f32.mxu1 %vm97_vm1, %v21428_v56  ;;  %18790 = vmatpush3.msk.msra.mxu0 %vm631_vm0, %v21174_v62  ;;  %v4448_v62 = vld [vmem:[#allocation2 + $0xaf] sm:$0xff] }
 0x193   :  { %18696 = vmatprep.mubr.msk.f32.mxu0 %vm97_vm1, %v4443_v54  ;;  %18887 = vmatprep.subr.msk.mxu0 %vm631_vm0, %v21588_v61  ;;  %v4454_v56 = vld [vmem:[#allocation2 + $0x10f] sm:$0xff] }
 0x194   :  { %v5164_v54 = vld [vmem:[#allocation2 + $0x110] sm:$0xff] }
 0x195   :  { %18362 = vmatmul.mubr.msk.f32.gmra.mrb[40].mxu1 %vm97_vm1, %v21438_v63  ;;  %18697 = vmatmul.mubr.msk.f32.gmra.mrb[2].mxu0 %vm97_vm1, %v4444_v4  ;;  %v4455_v63 = vld [vmem:[#allocation2 + $0x127] sm:$0xff] }
 0x196   :  { %18364 = vmatprep.mubr.msk.f32.mxu1 %vm97_vm1, %v21440_v59  ;;  %18699 = vmatprep.mubr.msk.f32.mxu0 %vm97_vm1, %v4445_v16  ;;  %v4456_v59 = vld [vmem:[#allocation2 + $0x12f] sm:$0xff] }
 0x199   :  { %18365 = vmatmul.mubr.msk.f32.gmra.mrb[42].mxu1 %vm97_vm1, %v21450_v60  ;;  %18700 = vmatmul.mubr.msk.f32.gmra.mrb[4].mxu0 %vm97_vm1, %v4446_v53  ;;  %v4457_v60 = vld [vmem:[#allocation2 + $0x147] sm:$0xff]  ;;  %v5166_v53 = vld [vmem:[#allocation2 + $0x130] sm:$0xff] }
 0x19a   :  { %18367 = vmatprep.mubr.msk.f32.mxu1 %vm97_vm1, %v21452_v2  ;;  %18702 = vmatprep.mubr.msk.f32.mxu0 %vm97_vm1, %v4447_v18  ;;  %v4458_v2 = vld [vmem:[#allocation2 + $0x14f] sm:$0xff] }
 0x19b   :  { %v5167_v18 = vld [vmem:[#allocation2 + $0x148] sm:$0xff] }
 0x19d   :  { %18368 = vmatmul.mubr.msk.f32.gmra.mrb[44].mxu1 %vm97_vm1, %v21462_v8  ;;  %18703 = vmatmul.mubr.msk.f32.gmra.mrb[6].mxu0 %vm97_vm1, %v4448_v62  ;;  %v4459_v8 = vld [vmem:[#allocation2 + $0x167] sm:$0xff] }
 0x19e   :  { %18370 = vmatprep.mubr.msk.f32.mxu1 %vm97_vm1, %v21464_v9  ;;  %18705 = vmatprep.mubr.msk.f32.mxu0 %vm97_vm1, %v4449_v20  ;;  %v4460_v9 = vld [vmem:[#allocation2 + $0x16f] sm:$0xff] }
 0x1a1   :  { %18371 = vmatmul.mubr.msk.f32.gmra.mrb[46].mxu1 %vm97_vm1, %v21474_v14  ;;  %18706 = vmatmul.mubr.msk.f32.gmra.mrb[8].mxu0 %vm97_vm1, %v4450_v22  ;;  %v4461_v14 = vld [vmem:[#allocation2 + $0x187] sm:$0xff]  ;;  %v5168_v22 = vld [vmem:[#allocation2 + $0x150] sm:$0xff] }
 0x1a2   :  { %18373 = vmatprep.mubr.msk.f32.mxu1 %vm97_vm1, %v21476_v15  ;;  %18708 = vmatprep.mubr.msk.f32.mxu0 %vm97_vm1, %v4451_v24  ;;  %v4462_v15 = vld [vmem:[#allocation2 + $0x18f] sm:$0xff] }
 0x1a3   :  { %v5169_v24 = vld [vmem:[#allocation2 + $0x168] sm:$0xff] }
 0x1a5   :  { %18374 = vmatmul.mubr.msk.f32.gmra.mrb[48].mxu1 %vm97_vm1, %v21486_v3  ;;  %18709 = vmatmul.mubr.msk.f32.gmra.mrb[10].mxu0 %vm97_vm1, %v4452_v26  ;;  %v4463_v3 = vld [vmem:[#allocation2 + $0x1a7] sm:$0xff] }
 0x1a6   :  { %18376 = vmatprep.mubr.msk.f32.mxu1 %vm97_vm1, %v21488_v32  ;;  %18711 = vmatprep.mubr.msk.f32.mxu0 %vm97_vm1, %v4453_v28  ;;  %v4464_v32 = vld [vmem:[#allocation2 + $0x1af] sm:$0xff] }
 0x1a9   :  { %18377 = vmatmul.mubr.msk.f32.gmra.mrb[50].mxu1 %vm97_vm1, %v21498_v36  ;;  %18712 = vmatmul.mubr.msk.f32.gmra.mrb[12].mxu0 %vm97_vm1, %v4454_v56  ;;  %v4465_v36 = vld [vmem:[#allocation2 + $0x1c7] sm:$0xff]  ;;  %v5170_v56 = vld [vmem:[#allocation2 + $0x170] sm:$0xff] }
 0x1aa   :  { %18379 = vmatprep.mubr.msk.f32.mxu1 %vm97_vm1, %v21500_v10  ;;  %18714 = vmatprep.mubr.msk.f32.mxu0 %vm97_vm1, %v4455_v63  ;;  %v4466_v10 = vld [vmem:[#allocation2 + $0x1cf] sm:$0xff] }
 0x1ab   :  { %v5171_v63 = vld [vmem:[#allocation2 + $0x188] sm:$0xff] }
 0x1ad   :  { %18380 = vmatmul.mubr.msk.f32.gmra.mrb[52].mxu1 %vm97_vm1, %v21510_v42  ;;  %18715 = vmatmul.mubr.msk.f32.gmra.mrb[14].mxu0 %vm97_vm1, %v4456_v59  ;;  %v4467_v42 = vld [vmem:[#allocation2 + $0x1e7] sm:$0xff] }
 0x1ae   :  { %18382 = vmatprep.mubr.msk.f32.mxu1 %vm97_vm1, %v21512_v46  ;;  %18717 = vmatprep.mubr.msk.f32.mxu0 %vm97_vm1, %v4457_v60  ;;  %v4468_v46 = vld [vmem:[#allocation2 + $0x1ef] sm:$0xff] }
 0x1b1   :  { %18383 = vmatmul.mubr.msk.f32.gmra.mrb[54].mxu1 %vm97_vm1, %v21522_v50  ;;  %18718 = vmatmul.mubr.msk.f32.gmra.mrb[16].mxu0 %vm97_vm1, %v4458_v2  ;;  %v4469_v50 = vld [vmem:[#allocation2 + $0x207] sm:$0xff]  ;;  %v5172_v2 = vld [vmem:[#allocation2 + $0x190] sm:$0xff] }
 0x1b2   :  { %18385 = vmatprep.mubr.msk.f32.mxu1 %vm97_vm1, %v21524_v0  ;;  %18720 = vmatprep.mubr.msk.f32.mxu0 %vm97_vm1, %v4459_v8  ;;  %v4470_v0 = vld [vmem:[#allocation2 + $0x20f] sm:$0xff] }
 0x1b3   :  { %v5173_v8 = vld [vmem:[#allocation2 + $0x1a8] sm:$0xff] }
 0x1b5   :  { %18386 = vmatmul.mubr.msk.f32.gmra.mrb[56].mxu1 %vm97_vm1, %v21534_v17  ;;  %18721 = vmatmul.mubr.msk.f32.gmra.mrb[18].mxu0 %vm97_vm1, %v4460_v9  ;;  %v4471_v17 = vld [vmem:[#allocation2 + $0x227] sm:$0xff] }
 0x1b6   :  { %18388 = vmatprep.mubr.msk.f32.mxu1 %vm97_vm1, %v21536_v25  ;;  %18723 = vmatprep.mubr.msk.f32.mxu0 %vm97_vm1, %v4461_v14  ;;  %v4473_v25 = vld [vmem:[#allocation2 + $0x287] sm:$0xff] }
 0x1b9   :  { %18389 = vmatmul.mubr.msk.f32.gmra.mrb[58].mxu1 %vm97_vm1, %v21545_v29  ;;  %18724 = vmatmul.mubr.msk.f32.gmra.mrb[20].mxu0 %vm97_vm1, %v4462_v15  ;;  %v4475_v29 = vld [vmem:[#allocation2 + $0x2a7] sm:$0xff]  ;;  %v5174_v15 = vld [vmem:[#allocation2 + $0x1b0] sm:$0xff] }
 0x1ba   :  { %18391 = vmatprep.mubr.msk.f32.mxu1 %vm97_vm1, %v21547_v31  ;;  %18726 = vmatprep.mubr.msk.f32.mxu0 %vm97_vm1, %v4463_v3  ;;  %v4476_v31 = vld [vmem:[#allocation2 + $0x2af] sm:$0xff] }
 0x1bb   :  { %v5175_v3 = vld [vmem:[#allocation2 + $0x1c8] sm:$0xff] }
 0x1bd   :  { %18392 = vmatmul.mubr.msk.f32.gmra.mrb[60].mxu1 %vm97_vm1, %v21556_v35  ;;  %18727 = vmatmul.mubr.msk.f32.gmra.mrb[22].mxu0 %vm97_vm1, %v4464_v32  ;;  %v4477_v35 = vld [vmem:[#allocation2 + $0x2c7] sm:$0xff] }
 0x1be   :  { %18394 = vmatprep.mubr.msk.f32.mxu1 %vm97_vm1, %v21558_v39  ;;  %18729 = vmatprep.mubr.msk.f32.mxu0 %vm97_vm1, %v4465_v36  ;;  %v4478_v39 = vld [vmem:[#allocation2 + $0x2cf] sm:$0xff] }
 0x1c1   :  { %18395 = vmatmul.mubr.msk.f32.gmra.mrb[62].mxu1 %vm97_vm1, %v21568_v41  ;;  %18730 = vmatmul.mubr.msk.f32.gmra.mrb[24].mxu0 %vm97_vm1, %v4466_v10  ;;  %v5176_v10 = vld [vmem:[#allocation2 + $0x1d0] sm:$0xff] }
 0x1c2   :  { %18459 = vmatprep.mubr.msk.f32.mxu1 %vm97_vm1, %v21165_v55  ;;  %18732 = vmatprep.mubr.msk.f32.mxu0 %vm97_vm1, %v4467_v42  ;;  %v5177_v42 = vld [vmem:[#allocation2 + $0x1e8] sm:$0xff] }
 0x1c5   :  { %18460 = vmatmul.mubr.msk.f32.vlgmr.msra.gmra.mrb[40].mxu1 %vm97_vm1, %v21180_v1  ;;  %18733 = vmatmul.mubr.msk.f32.gmra.mrb[26].mxu0 %vm97_vm1, %v4468_v46 }
 0x1c6   :  { %18462 = vmatprep.mubr.msk.f32.mxu1 %vm97_vm1, %v21188_v7  ;;  %18735 = vmatprep.mubr.msk.f32.mxu0 %vm97_vm1, %v4469_v50 }
 0x1c9   :  { %18463 = vmatmul.mubr.msk.f32.gmra.mrb[42].mxu1 %vm97_vm1, %v21200_v52  ;;  %18736 = vmatmul.mubr.msk.f32.gmra.mrb[28].mxu0 %vm97_vm1, %v4470_v0  ;;  %v5178_v0 = vld [vmem:[#allocation2 + $0x1f0] sm:$0xff] }
 0x1ca   :  { %18465 = vmatprep.mubr.msk.f32.mxu1 %vm97_vm1, %v21206_v12  ;;  %18738 = vmatprep.mubr.msk.f32.mxu0 %vm97_vm1, %v4471_v17  ;;  %v5179_v17 = vld [vmem:[#allocation2 + $0x208] sm:$0xff] }
 0x1cd   :  { %18466 = vmatmul.mubr.msk.f32.gmra.mrb[44].mxu1 %vm97_vm1, %v21216_v13  ;;  %18739 = vmatmul.mubr.msk.f32.gmra.mrb[30].mxu0 %vm97_vm1, %v4472_v21 }
 0x1ce   :  { %18468 = vmatprep.mubr.msk.f32.mxu1 %vm97_vm1, %v21222_v5  ;;  %18741 = vmatprep.mubr.msk.f32.mxu0 %vm97_vm1, %v4473_v25 }
 0x1d1   :  { %18469 = vmatmul.mubr.msk.f32.gmra.mrb[46].mxu1 %vm97_vm1, %v21232_v11  ;;  %18742 = vmatmul.mubr.msk.f32.gmra.mrb[32].mxu0 %vm97_vm1, %v4474_v51  ;;  %v5180_v51 = vld [vmem:[#allocation2 + $0x210] sm:$0xff] }
 0x1d2   :  { %18471 = vmatprep.mubr.msk.f32.mxu1 %vm97_vm1, %v21238_v34  ;;  %18744 = vmatprep.mubr.msk.f32.mxu0 %vm97_vm1, %v4475_v29  ;;  %v5181_v29 = vld [vmem:[#allocation2 + $0x228] sm:$0xff] }
 0x1d5   :  { %18472 = vmatmul.mubr.msk.f32.gmra.mrb[48].mxu1 %vm97_vm1, %v21248_v38  ;;  %18745 = vmatmul.mubr.msk.f32.gmra.mrb[34].mxu0 %vm97_vm1, %v4476_v31 }
 0x1d6   :  { %18474 = vmatprep.mubr.msk.f32.mxu1 %vm97_vm1, %v21254_v40  ;;  %18747 = vmatprep.mubr.msk.f32.mxu0 %vm97_vm1, %v4477_v35 }
 0x1d9   :  { %18475 = vmatmul.mubr.msk.f32.gmra.mrb[50].mxu1 %vm97_vm1, %v21264_v44  ;;  %18748 = vmatmul.mubr.msk.f32.gmra.mrb[36].mxu0 %vm97_vm1, %v4478_v39  ;;  %v5182_v39 = vld [vmem:[#allocation2 + $0x230] sm:$0xff] }
 0x1da   :  { %18477 = vmatprep.mubr.msk.f32.mxu1 %vm97_vm1, %v21270_v48  ;;  %18750 = vmatprep.mubr.msk.f32.mxu0 %vm97_vm1, %v21165_v55  ;;  %v2372_v55 = vld [vmem:[#allocation2 + $0x447] sm:$0xff] }
 0x1dd   :  { %18478 = vmatmul.mubr.msk.f32.gmra.mrb[52].mxu1 %vm97_vm1, %v21280_v58  ;;  %18751 = vmatmul.mubr.msk.f32.gmra.mrb[38].mxu0 %vm97_vm1, %v21180_v1  ;;  %v2373_v1 = vld [vmem:[#allocation2 + $0x44f] sm:$0xff] }
 0x1de   :  { %18480 = vmatprep.mubr.msk.f32.mxu1 %vm97_vm1, %v21286_v6  ;;  %18753 = vmatprep.mubr.msk.f32.mxu0 %vm97_vm1, %v21188_v7  ;;  %v4503_v7 = vld [vmem:[#allocation2 + $0x467] sm:$0xff] }
 0x1e1   :  { %18481 = vmatmul.mubr.msk.f32.gmra.mrb[54].mxu1 %vm97_vm1, %v21296_v19  ;;  %18754 = vmatmul.mubr.msk.f32.gmra.mrb[40].mxu0 %vm97_vm1, %v21200_v52  ;;  %v4504_v52 = vld [vmem:[#allocation2 + $0x46f] sm:$0xff] }
 0x1e2   :  { %18483 = vmatprep.mubr.msk.f32.mxu1 %vm97_vm1, %v21302_v23  ;;  %18756 = vmatprep.mubr.msk.f32.mxu0 %vm97_vm1, %v21206_v12  ;;  %v5151_v12 = vld [vmem:[#allocation2 + $0x48] sm:$0xff] }
 0x1e5   :  { %18484 = vmatmul.mubr.msk.f32.gmra.mrb[56].mxu1 %vm97_vm1, %v21312_v27  ;;  %18757 = vmatmul.mubr.msk.f32.gmra.mrb[42].mxu0 %vm97_vm1, %v21216_v13  ;;  %v5152_v13 = vld [vmem:[#allocation2 + $0x50] sm:$0xff] }
 0x1e6   :  { %18486 = vmatprep.mubr.msk.f32.mxu1 %vm97_vm1, %v21318_v57  ;;  %18759 = vmatprep.mubr.msk.f32.mxu0 %vm97_vm1, %v21222_v5  ;;  %v5153_v5 = vld [vmem:[#allocation2 + $0x68] sm:$0xff] }
 0x1e9   :  { %18487 = vmatmul.mubr.msk.f32.gmra.mrb[58].mxu1 %vm97_vm1, %v21328_v30  ;;  %18760 = vmatmul.mubr.msk.f32.gmra.mrb[44].mxu0 %vm97_vm1, %v21232_v11  ;;  %v5154_v11 = vld [vmem:[#allocation2 + $0x70] sm:$0xff] }
 0x1ea   :  { %18489 = vmatprep.mubr.msk.f32.mxu1 %vm97_vm1, %v21334_v33  ;;  %18762 = vmatprep.mubr.msk.f32.mxu0 %vm97_vm1, %v21238_v34  ;;  %v5155_v34 = vld [vmem:[#allocation2 + $0x88] sm:$0xff] }
 0x1ed   :  { %18490 = vmatmul.mubr.msk.f32.gmra.mrb[60].mxu1 %vm97_vm1, %v21344_v37  ;;  %18763 = vmatmul.mubr.msk.f32.gmra.mrb[46].mxu0 %vm97_vm1, %v21248_v38 }
 0x1ee   :  { %18492 = vmatprep.mubr.msk.f32.mxu1 %vm97_vm1, %v2372_v55  ;;  %18765 = vmatprep.mubr.msk.f32.mxu0 %vm97_vm1, %v21254_v40 }
 0x1f1   :  { %18493 = vmatmul.mubr.msk.f32.gmra.mrb[62].mxu1 %vm97_vm1, %v2373_v1  ;;  %18766 = vmatmul.mubr.msk.f32.gmra.mrb[48].mxu0 %vm97_vm1, %v21264_v44  ;;  %v5156_v44 = vld [vmem:[#allocation2 + $0x90] sm:$0xff] }
 0x1f2   :  { %18768 = vmatprep.mubr.msk.f32.mxu0 %vm97_vm1, %v21270_v48  ;;  %v5157_v48 = vld [vmem:[#allocation2 + $0xa8] sm:$0xff] }
 0x1f5   :  { %18769 = vmatmul.mubr.msk.f32.gmra.mrb[50].mxu0 %vm97_vm1, %v21280_v58 }
 0x1f6   :  { %18771 = vmatprep.mubr.msk.f32.mxu0 %vm97_vm1, %v21286_v6 }
 0x1f9   :  { %18772 = vmatmul.mubr.msk.f32.gmra.mrb[52].mxu0 %vm97_vm1, %v21296_v19  ;;  %v5158_v19 = vld [vmem:[#allocation2 + $0xb0] sm:$0xff] }
 0x1fa   :  { %18774 = vmatprep.mubr.msk.f32.mxu0 %vm97_vm1, %v21302_v23  ;;  %v5159_v23 = vld [vmem:[#allocation2 + $0xc8] sm:$0xff] }
 0x1fd   :  { %18775 = vmatmul.mubr.msk.f32.gmra.mrb[54].mxu0 %vm97_vm1, %v21312_v27 }
 0x1fe   :  { %18777 = vmatprep.mubr.msk.f32.mxu0 %vm97_vm1, %v21318_v57 }
 0x201   :  { %18778 = vmatmul.mubr.msk.f32.gmra.mrb[56].mxu0 %vm97_vm1, %v21328_v30  ;;  %v5160_v30 = vld [vmem:[#allocation2 + $0xd0] sm:$0xff] }
 0x202   :  { %18780 = vmatprep.mubr.msk.f32.mxu0 %vm97_vm1, %v21334_v33  ;;  %v5161_v33 = vld [vmem:[#allocation2 + $0xe8] sm:$0xff] }
 0x205   :  { %18781 = vmatmul.mubr.msk.f32.gmra.mrb[58].mxu0 %vm97_vm1, %v21344_v37 }
 0x206   :  { %18783 = vmatprep.mubr.msk.f32.mxu0 %vm97_vm1, %v2372_v55  ;;  %v5183_v55 = vld [vmem:[#allocation2 + $0x288] sm:$0xff] }
 0x209   :  { %18784 = vmatmul.mubr.msk.f32.gmra.mrb[60].mxu0 %vm97_vm1, %v2373_v1 }
 0x20a   :  { %18786 = vmatprep.mubr.msk.f32.mxu0 %vm97_vm1, %v4503_v7 }
 0x20d   :  { %18787 = vmatmul.mubr.msk.f32.gmra.mrb[62].mxu0 %vm97_vm1, %v4504_v52  ;;  %v5184_v52 = vld [vmem:[#allocation2 + $0x290] sm:$0xff] }
 0x20e   :  { %18791 = vmatprep.mubr.msk.f32.mxu0 %vm97_vm1, %v5151_v12  ;;  %v5185_v12 = vld [vmem:[#allocation2 + $0x2a8] sm:$0xff] }
 0x211   :  { %18792 = vmatmul.mubr.msk.f32.vlgmr.msra.gmra.mrb[0].mxu0 %vm97_vm1, %v5152_v13 }
 0x212   :  { %18888 = vmatpush3.msk.msra.mxu0 %vm631_vm0, %v21588_v61  ;;  %18794 = vmatprep.mubr.msk.f32.mxu0 %vm97_vm1, %v5153_v5  ;;  %v5165_v61 = vld [vmem:[#allocation2 + $0x128] sm:$0xff] }
 0x215   :  { %18795 = vmatmul.mubr.msk.f32.gmra.mrb[2].mxu0 %vm97_vm1, %v5154_v11  ;;  %v5186_v11 = vld [vmem:[#allocation2 + $0x2b0] sm:$0xff] }
 0x216   :  { %18797 = vmatprep.mubr.msk.f32.mxu0 %vm97_vm1, %v5155_v34  ;;  %v5187_v34 = vld [vmem:[#allocation2 + $0x2c8] sm:$0xff] }
 0x218   :  { %v21774_v38 = vpop.f32.mrb[0].mxu1 }
 0x219   :  { %v21776_v40 = vpop.f32.mrb[1].mxu1  ;;  %18798 = vmatmul.mubr.msk.f32.gmra.mrb[4].mxu0 %vm97_vm1, %v5156_v44 }
 0x21a   :  { %18800 = vmatprep.mubr.msk.f32.mxu0 %vm97_vm1, %v5157_v48 }
 0x21c   :  { %v21780_v58 = vpop.f32.mrb[2].mxu1 }
 0x21d   :  { %v21782_v6 = vpop.f32.mrb[3].mxu1  ;;  %18801 = vmatmul.mubr.msk.f32.gmra.mrb[6].mxu0 %vm97_vm1, %v5158_v19  ;;  %v5188_v19 = vld [vmem:[#allocation2 + $0x2d0] sm:$0xff] }
 0x21e   :  { %18803 = vmatprep.mubr.msk.f32.mxu0 %vm97_vm1, %v5159_v23  ;;  %v5189_v23 = vld [vmem:[#allocation2 + $0x2e8] sm:$0xff] }
 0x220   :  { %v21786_v27 = vpop.f32.mrb[4].mxu1 }
 0x221   :  { %v21788_v57 = vpop.f32.mrb[5].mxu1  ;;  %18804 = vmatmul.mubr.msk.f32.gmra.mrb[8].mxu0 %vm97_vm1, %v5160_v30 }
 0x222   :  { %18806 = vmatprep.mubr.msk.f32.mxu0 %vm97_vm1, %v5161_v33 }
 0x224   :  { %v21792_v37 = vpop.f32.mrb[6].mxu1 }
 0x225   :  { %v21794_v41 = vpop.f32.mrb[7].mxu1  ;;  %18807 = vmatmul.mubr.msk.f32.gmra.mrb[10].mxu0 %vm97_vm1, %v5162_v43  ;;  %v5190_v43 = vld [vmem:[#allocation2 + $0x2f0] sm:$0xff] }
 0x226   :  { %18809 = vmatprep.mubr.msk.f32.mxu0 %vm97_vm1, %v5163_v45  ;;  %v5191_v45 = vld [vmem:[#allocation2 + $0x308] sm:$0xff] }
 0x228   :  { %v21798_v47 = vpop.f32.mrb[8].mxu1 }
 0x229   :  { %v21800_v49 = vpop.f32.mrb[9].mxu1  ;;  %18810 = vmatmul.mubr.msk.f32.gmra.mrb[12].mxu0 %vm97_vm1, %v5164_v54 }
 0x22a   :  { %18812 = vmatprep.mubr.msk.f32.mxu0 %vm97_vm1, %v5165_v61 }
 0x22c   :  { %v21804_v4 = vpop.f32.mrb[10].mxu1 }
 0x22d   :  { %v21806_v16 = vpop.f32.mrb[11].mxu1  ;;  %18813 = vmatmul.mubr.msk.f32.gmra.mrb[14].mxu0 %vm97_vm1, %v5166_v53  ;;  %v5192_v53 = vld [vmem:[#allocation2 + $0x310] sm:$0xff] }
 0x22e   :  { %18815 = vmatprep.mubr.msk.f32.mxu0 %vm97_vm1, %v5167_v18  ;;  %v5193_v18 = vld [vmem:[#allocation2 + $0x328] sm:$0xff] }
 0x230   :  { %v21810_v62 = vpop.f32.mrb[12].mxu1 }
 0x231   :  { %v21812_v20 = vpop.f32.mrb[13].mxu1  ;;  %18816 = vmatmul.mubr.msk.f32.gmra.mrb[16].mxu0 %vm97_vm1, %v5168_v22 }
 0x232   :  { %18818 = vmatprep.mubr.msk.f32.mxu0 %vm97_vm1, %v5169_v24 }
 0x234   :  { %v21816_v26 = vpop.f32.mrb[14].mxu1 }
 0x235   :  { %v21818_v28 = vpop.f32.mrb[15].mxu1  ;;  %18819 = vmatmul.mubr.msk.f32.gmra.mrb[18].mxu0 %vm97_vm1, %v5170_v56  ;;  %v5194_v56 = vld [vmem:[#allocation2 + $0x330] sm:$0xff] }
 0x236   :  { %18821 = vmatprep.mubr.msk.f32.mxu0 %vm97_vm1, %v5171_v63  ;;  %v5195_v63 = vld [vmem:[#allocation2 + $0x348] sm:$0xff] }
 0x238   :  { %v21822_v59 = vpop.f32.mrb[16].mxu1 }
 0x239   :  { %v21824_v60 = vpop.f32.mrb[17].mxu1  ;;  %18822 = vmatmul.mubr.msk.f32.gmra.mrb[20].mxu0 %vm97_vm1, %v5172_v2  ;;  %v5196_v2 = vld [vmem:[#allocation2 + $0x350] sm:$0xff] }
 0x23a   :  { %18824 = vmatprep.mubr.msk.f32.mxu0 %vm97_vm1, %v5173_v8  ;;  %v5197_v8 = vld [vmem:[#allocation2 + $0x368] sm:$0xff] }
 0x23c   :  { %v21828_v9 = vpop.f32.mrb[18].mxu1 }
 0x23d   :  { %v21830_v14 = vpop.f32.mrb[19].mxu1  ;;  %18825 = vmatmul.mubr.msk.f32.gmra.mrb[22].mxu0 %vm97_vm1, %v5174_v15  ;;  %v5198_v15 = vld [vmem:[#allocation2 + $0x370] sm:$0xff] }
 0x23e   :  { %18827 = vmatprep.mubr.msk.f32.mxu0 %vm97_vm1, %v5175_v3  ;;  %v5199_v3 = vld [vmem:[#allocation2 + $0x388] sm:$0xff] }
 0x240   :  { %v21834_v32 = vpop.f32.mrb[20].mxu1 }
 0x241   :  { %v21836_v36 = vpop.f32.mrb[21].mxu1  ;;  %18828 = vmatmul.mubr.msk.f32.gmra.mrb[24].mxu0 %vm97_vm1, %v5176_v10  ;;  %v5200_v10 = vld [vmem:[#allocation2 + $0x390] sm:$0xff] }
 0x242   :  { %18830 = vmatprep.mubr.msk.f32.mxu0 %vm97_vm1, %v5177_v42  ;;  %v5201_v42 = vld [vmem:[#allocation2 + $0x3a8] sm:$0xff] }
 0x244   :  { %v21840_v46 = vpop.f32.mrb[22].mxu1 }
 0x245   :  { %27575 = vst [vmem:[#allocation7_spill] sm:$0xff] %v21840_v46  ;;  %v21842_v50 = vpop.f32.mrb[23].mxu1  ;;  %18831 = vmatmul.mubr.msk.f32.gmra.mrb[26].mxu0 %vm97_vm1, %v5178_v0  ;;  %v5202_v0 = vld [vmem:[#allocation2 + $0x3b0] sm:$0xff] }
 0x246   :  { %27576 = vst [vmem:[#allocation8_spill] sm:$0xff] %v21842_v50  ;;  %18833 = vmatprep.mubr.msk.f32.mxu0 %vm97_vm1, %v5179_v17  ;;  %v5203_v17 = vld [vmem:[#allocation2 + $0x3c8] sm:$0xff] }
 0x248   :  { %v21846_v21 = vpop.f32.mrb[24].mxu1 }
 0x249   :  { %27577 = vst [vmem:[#allocation9_spill] sm:$0xff] %v21846_v21  ;;  %v21848_v25 = vpop.f32.mrb[25].mxu1  ;;  %18834 = vmatmul.mubr.msk.f32.gmra.mrb[28].mxu0 %vm97_vm1, %v5180_v51  ;;  %v5204_v51 = vld [vmem:[#allocation2 + $0x3d0] sm:$0xff] }
 0x24a   :  { %27578 = vst [vmem:[#allocation10_spill] sm:$0xff] %v21848_v25  ;;  %18836 = vmatprep.mubr.msk.f32.mxu0 %vm97_vm1, %v5181_v29  ;;  %v5205_v29 = vld [vmem:[#allocation2 + $0x3e8] sm:$0xff] }
 0x24c   :  { %v21852_v31 = vpop.f32.mrb[26].mxu1 }
 0x24d   :  { %27579 = vst [vmem:[#allocation11_spill] sm:$0xff] %v21852_v31  ;;  %v21854_v35 = vpop.f32.mrb[27].mxu1  ;;  %18837 = vmatmul.mubr.msk.f32.gmra.mrb[30].mxu0 %vm97_vm1, %v5182_v39  ;;  %v5206_v39 = vld [vmem:[#allocation2 + $0x3f0] sm:$0xff] }
 0x24e   :  { %27580 = vst [vmem:[#allocation12_spill] sm:$0xff] %v21854_v35  ;;  %18839 = vmatprep.mubr.msk.f32.mxu0 %vm97_vm1, %v5183_v55  ;;  %v5207_v55 = vld [vmem:[#allocation2 + $0x408] sm:$0xff] }
 0x250   :  { %v21858_v1 = vpop.f32.mrb[28].mxu1 }
 0x251   :  { %27581 = vst [vmem:[#allocation13_spill] sm:$0xff] %v21858_v1  ;;  %v21860_v7 = vpop.f32.mrb[29].mxu1  ;;  %18840 = vmatmul.mubr.msk.f32.gmra.mrb[32].mxu0 %vm97_vm1, %v5184_v52  ;;  %v5208_v52 = vld [vmem:[#allocation2 + $0x410] sm:$0xff] }
 0x252   :  { %27582 = vst [vmem:[#allocation14_spill] sm:$0xff] %v21860_v7  ;;  %18842 = vmatprep.mubr.msk.f32.mxu0 %vm97_vm1, %v5185_v12  ;;  %v5209_v12 = vld [vmem:[#allocation2 + $0x428] sm:$0xff] }
 0x254   :  { %v21864_v13 = vpop.f32.mrb[30].mxu1 }
 0x255   :  { %27583 = vst [vmem:[#allocation15_spill] sm:$0xff] %v21864_v13  ;;  %v21866_v5 = vpop.f32.mrb[31].mxu1  ;;  %18843 = vmatmul.mubr.msk.f32.gmra.mrb[34].mxu0 %vm97_vm1, %v5186_v11  ;;  %v5210_v11 = vld [vmem:[#allocation2 + $0x430] sm:$0xff] }
 0x256   :  { %27584 = vst [vmem:[#allocation16_spill] sm:$0xff] %v21866_v5  ;;  %18845 = vmatprep.mubr.msk.f32.mxu0 %vm97_vm1, %v5187_v34  ;;  %v5211_v34 = vld [vmem:[#allocation2 + $0x448] sm:$0xff] }
 0x258   :  { %v21870_v44 = vpop.f32.mrb[32].mxu1 }
 0x259   :  { %27585 = vst [vmem:[#allocation17_spill] sm:$0xff] %v21870_v44  ;;  %v21872_v48 = vpop.f32.mrb[33].mxu1  ;;  %18846 = vmatmul.mubr.msk.f32.gmra.mrb[36].mxu0 %vm97_vm1, %v5188_v19  ;;  %v5212_v19 = vld [vmem:[#allocation2 + $0x450] sm:$0xff] }
 0x25a   :  { %27586 = vst [vmem:[#allocation18_spill] sm:$0xff] %v21872_v48  ;;  %18848 = vmatprep.mubr.msk.f32.mxu0 %vm97_vm1, %v5189_v23  ;;  %v5213_v23 = vld [vmem:[#allocation2 + $0x468] sm:$0xff] }
 0x25c   :  { %v21876_v30 = vpop.f32.mrb[34].mxu1 }
 0x25d   :  { %27587 = vst [vmem:[#allocation19_spill] sm:$0xff] %v21876_v30  ;;  %v21878_v33 = vpop.f32.mrb[35].mxu1  ;;  %18849 = vmatmul.mubr.msk.f32.gmra.mrb[38].mxu0 %vm97_vm1, %v5190_v43  ;;  %v5214_v43 = vld [vmem:[#allocation2 + $0x470] sm:$0xff] }
 0x25e   :  { %27588 = vst [vmem:[#allocation20_spill] sm:$0xff] %v21878_v33  ;;  %18851 = vmatprep.mubr.msk.f32.mxu0 %vm97_vm1, %v5191_v45  ;;  %v5861_v45 = vld [vmem:[#allocation2 + $0x49] sm:$0xff] }
 0x260   :  { %v21882_v54 = vpop.f32.mrb[36].mxu1 }
 0x261   :  { %27589 = vst [vmem:[#allocation21_spill] sm:$0xff] %v21882_v54  ;;  %v21884_v61 = vpop.f32.mrb[37].mxu1  ;;  %18852 = vmatmul.mubr.msk.f32.gmra.mrb[40].mxu0 %vm97_vm1, %v5192_v53  ;;  %v5862_v53 = vld [vmem:[#allocation2 + $0x51] sm:$0xff] }
 0x262   :  { %27590 = vst [vmem:[#allocation22_spill] sm:$0xff] %v21884_v61  ;;  %18854 = vmatprep.mubr.msk.f32.mxu0 %vm97_vm1, %v5193_v18  ;;  %v5863_v18 = vld [vmem:[#allocation2 + $0x69] sm:$0xff] }
 0x264   :  { %v21888_v22 = vpop.f32.mrb[38].mxu1 }
 0x265   :  { %27591 = vst [vmem:[#allocation23_spill] sm:$0xff] %v21888_v22  ;;  %v21890_v24 = vpop.f32.mrb[39].mxu1  ;;  %18855 = vmatmul.mubr.msk.f32.gmra.mrb[42].mxu0 %vm97_vm1, %v5194_v56  ;;  %v5864_v56 = vld [vmem:[#allocation2 + $0x71] sm:$0xff] }
 0x266   :  { %27592 = vst [vmem:[#allocation24_spill] sm:$0xff] %v21890_v24  ;;  %18857 = vmatprep.mubr.msk.f32.mxu0 %vm97_vm1, %v5195_v63 }
 0x269   :  { %18858 = vmatmul.mubr.msk.f32.gmra.mrb[44].mxu0 %vm97_vm1, %v5196_v2  ;;  %v5865_v2 = vld [vmem:[#allocation2 + $0x89] sm:$0xff] }
 0x26a   :  { %18860 = vmatprep.mubr.msk.f32.mxu0 %vm97_vm1, %v5197_v8 }
 0x26d   :  { %18861 = vmatmul.mubr.msk.f32.gmra.mrb[46].mxu0 %vm97_vm1, %v5198_v15  ;;  %v5866_v15 = vld [vmem:[#allocation2 + $0x91] sm:$0xff] }
 0x26e   :  { %18863 = vmatprep.mubr.msk.f32.mxu0 %vm97_vm1, %v5199_v3 }
 0x271   :  { %18864 = vmatmul.mubr.msk.f32.gmra.mrb[48].mxu0 %vm97_vm1, %v5200_v10  ;;  %v5867_v10 = vld [vmem:[#allocation2 + $0xa9] sm:$0xff] }
 0x272   :  { %18866 = vmatprep.mubr.msk.f32.mxu0 %vm97_vm1, %v5201_v42 }
 0x275   :  { %18867 = vmatmul.mubr.msk.f32.gmra.mrb[50].mxu0 %vm97_vm1, %v5202_v0  ;;  %v5868_v0 = vld [vmem:[#allocation2 + $0xb1] sm:$0xff] }
 0x276   :  { %18869 = vmatprep.mubr.msk.f32.mxu0 %vm97_vm1, %v5203_v17 }
 0x279   :  { %18870 = vmatmul.mubr.msk.f32.gmra.mrb[52].mxu0 %vm97_vm1, %v5204_v51  ;;  %v5869_v51 = vld [vmem:[#allocation2 + $0xc9] sm:$0xff] }
 0x27a   :  { %18872 = vmatprep.mubr.msk.f32.mxu0 %vm97_vm1, %v5205_v29 }
 0x27d   :  { %18873 = vmatmul.mubr.msk.f32.gmra.mrb[54].mxu0 %vm97_vm1, %v5206_v39  ;;  %v5870_v39 = vld [vmem:[#allocation2 + $0xd1] sm:$0xff] }
 0x27e   :  { %18875 = vmatprep.mubr.msk.f32.mxu0 %vm97_vm1, %v5207_v55 }
 0x281   :  { %18876 = vmatmul.mubr.msk.f32.gmra.mrb[56].mxu0 %vm97_vm1, %v5208_v52  ;;  %v5871_v52 = vld [vmem:[#allocation2 + $0xe9] sm:$0xff] }
 0x282   :  { %18878 = vmatprep.mubr.msk.f32.mxu0 %vm97_vm1, %v5209_v12 }
 0x285   :  { %18879 = vmatmul.mubr.msk.f32.gmra.mrb[58].mxu0 %vm97_vm1, %v5210_v11  ;;  %v5872_v11 = vld [vmem:[#allocation2 + $0xf1] sm:$0xff] }
 0x286   :  { %18881 = vmatprep.mubr.msk.f32.mxu0 %vm97_vm1, %v5211_v34 }
 0x289   :  { %18882 = vmatmul.mubr.msk.f32.gmra.mrb[60].mxu0 %vm97_vm1, %v5212_v19  ;;  %v5873_v19 = vld [vmem:[#allocation2 + $0x109] sm:$0xff] }
 0x28a   :  { %18884 = vmatprep.mubr.msk.f32.mxu0 %vm97_vm1, %v5213_v23 }
 0x28d   :  { %18885 = vmatmul.mubr.msk.f32.gmra.mrb[62].mxu0 %vm97_vm1, %v5214_v43  ;;  %v5874_v43 = vld [vmem:[#allocation2 + $0x111] sm:$0xff] }
 0x28e   :  { %18889 = vmatprep.mubr.msk.f32.mxu0 %vm97_vm1, %v5861_v45 }
 0x291   :  { %18890 = vmatmul.mubr.msk.f32.vlgmr.msra.gmra.mrb[0].mxu0 %vm97_vm1, %v5862_v53  ;;  %v5875_v53 = vld [vmem:[#allocation2 + $0x129] sm:$0xff] }
 0x292   :  { %18892 = vmatprep.mubr.msk.f32.mxu0 %vm97_vm1, %v5863_v18 }
 0x295   :  { %18893 = vmatmul.mubr.msk.f32.gmra.mrb[2].mxu0 %vm97_vm1, %v5864_v56  ;;  %v5876_v56 = vld [vmem:[#allocation2 + $0x131] sm:$0xff] }
 0x296   :  { %18895 = vmatprep.mubr.msk.f32.mxu0 %vm97_vm1, %v5865_v2 }
 0x298   :  { %v21918_v63 = vpop.f32.mrb[40].mxu1 }
 0x299   :  { %27593 = vst [vmem:[#allocation25_spill] sm:$0xff] %v21918_v63  ;;  %v21920_v8 = vpop.f32.mrb[41].mxu1  ;;  %18896 = vmatmul.mubr.msk.f32.gmra.mrb[4].mxu0 %vm97_vm1, %v5866_v15  ;;  %v5877_v15 = vld [vmem:[#allocation2 + $0x149] sm:$0xff] }
 0x29a   :  { %27594 = vst [vmem:[#allocation26_spill] sm:$0xff] %v21920_v8  ;;  %18898 = vmatprep.mubr.msk.f32.mxu0 %vm97_vm1, %v5867_v10 }
 0x29c   :  { %v21924_v3 = vpop.f32.mrb[42].mxu1 }
 0x29d   :  { %27595 = vst [vmem:[#allocation27_spill] sm:$0xff] %v21924_v3  ;;  %v21926_v42 = vpop.f32.mrb[43].mxu1  ;;  %18899 = vmatmul.mubr.msk.f32.gmra.mrb[6].mxu0 %vm97_vm1, %v5868_v0  ;;  %v5878_v0 = vld [vmem:[#allocation2 + $0x151] sm:$0xff] }
 0x29e   :  { %27596 = vst [vmem:[#allocation28_spill] sm:$0xff] %v21926_v42  ;;  %18901 = vmatprep.mubr.msk.f32.mxu0 %vm97_vm1, %v5869_v51 }
 0x2a0   :  { %v21930_v17 = vpop.f32.mrb[44].mxu1 }
 0x2a1   :  { %27597 = vst [vmem:[#allocation29_spill] sm:$0xff] %v21930_v17  ;;  %v21932_v29 = vpop.f32.mrb[45].mxu1  ;;  %18902 = vmatmul.mubr.msk.f32.gmra.mrb[8].mxu0 %vm97_vm1, %v5870_v39  ;;  %v5879_v39 = vld [vmem:[#allocation2 + $0x169] sm:$0xff] }
 0x2a2   :  { %27598 = vst [vmem:[#allocation30_spill] sm:$0xff] %v21932_v29  ;;  %18904 = vmatprep.mubr.msk.f32.mxu0 %vm97_vm1, %v5871_v52 }
 0x2a4   :  { %v21936_v55 = vpop.f32.mrb[46].mxu1 }
 0x2a5   :  { %27599 = vst [vmem:[#allocation31_spill] sm:$0xff] %v21936_v55  ;;  %v21938_v12 = vpop.f32.mrb[47].mxu1  ;;  %18905 = vmatmul.mubr.msk.f32.gmra.mrb[10].mxu0 %vm97_vm1, %v5872_v11  ;;  %v5880_v11 = vld [vmem:[#allocation2 + $0x171] sm:$0xff] }
 0x2a6   :  { %27600 = vst [vmem:[#allocation32_spill] sm:$0xff] %v21938_v12  ;;  %18907 = vmatprep.mubr.msk.f32.mxu0 %vm97_vm1, %v5873_v19 }
 0x2a8   :  { %v21942_v34 = vpop.f32.mrb[48].mxu1 }
 0x2a9   :  { %27601 = vst [vmem:[#allocation33_spill] sm:$0xff] %v21942_v34  ;;  %v21944_v23 = vpop.f32.mrb[49].mxu1  ;;  %18908 = vmatmul.mubr.msk.f32.gmra.mrb[12].mxu0 %vm97_vm1, %v5874_v43  ;;  %v5881_v43 = vld [vmem:[#allocation2 + $0x189] sm:$0xff] }
 0x2aa   :  { %27602 = vst [vmem:[#allocation34_spill] sm:$0xff] %v21944_v23  ;;  %18910 = vmatprep.mubr.msk.f32.mxu0 %vm97_vm1, %v5875_v53 }
 0x2ac   :  { %v21948_v45 = vpop.f32.mrb[50].mxu1 }
 0x2ad   :  { %27603 = vst [vmem:[#allocation35_spill] sm:$0xff] %v21948_v45  ;;  %v21950_v18 = vpop.f32.mrb[51].mxu1  ;;  %18911 = vmatmul.mubr.msk.f32.gmra.mrb[14].mxu0 %vm97_vm1, %v5876_v56  ;;  %v5882_v56 = vld [vmem:[#allocation2 + $0x191] sm:$0xff] }
 0x2ae   :  { %27604 = vst [vmem:[#allocation36_spill] sm:$0xff] %v21950_v18  ;;  %18913 = vmatprep.mubr.msk.f32.mxu0 %vm97_vm1, %v5877_v15 }
 0x2b0   :  { %v21954_v2 = vpop.f32.mrb[52].mxu1 }
 0x2b1   :  { %27605 = vst [vmem:[#allocation37_spill] sm:$0xff] %v21954_v2  ;;  %v21956_v10 = vpop.f32.mrb[53].mxu1  ;;  %18914 = vmatmul.mubr.msk.f32.gmra.mrb[16].mxu0 %vm97_vm1, %v5878_v0  ;;  %v5884_v0 = vld [vmem:[#allocation2 + $0x1b1] sm:$0xff] }
 0x2b2   :  { %27606 = vst [vmem:[#allocation38_spill] sm:$0xff] %v21956_v10  ;;  %18916 = vmatprep.mubr.msk.f32.mxu0 %vm97_vm1, %v5879_v39 }
 0x2b4   :  { %v21960_v51 = vpop.f32.mrb[54].mxu1 }
 0x2b5   :  { %27607 = vst [vmem:[#allocation39_spill] sm:$0xff] %v21960_v51  ;;  %v21962_v52 = vpop.f32.mrb[55].mxu1  ;;  %18917 = vmatmul.mubr.msk.f32.gmra.mrb[18].mxu0 %vm97_vm1, %v5880_v11  ;;  %v5883_v51 = vld [vmem:[#allocation2 + $0x1a9] sm:$0xff]  ;;  %v5886_v11 = vld [vmem:[#allocation2 + $0x1d1] sm:$0xff] }
 0x2b6   :  { %27608 = vst [vmem:[#allocation40_spill] sm:$0xff] %v21962_v52  ;;  %18919 = vmatprep.mubr.msk.f32.mxu0 %vm97_vm1, %v5881_v43 }
 0x2b8   :  { %v21966_v19 = vpop.f32.mrb[56].mxu1 }
 0x2b9   :  { %27609 = vst [vmem:[#allocation41_spill] sm:$0xff] %v21966_v19  ;;  %v21968_v53 = vpop.f32.mrb[57].mxu1  ;;  %18920 = vmatmul.mubr.msk.f32.gmra.mrb[20].mxu0 %vm97_vm1, %v5882_v56  ;;  %v5885_v19 = vld [vmem:[#allocation2 + $0x1c9] sm:$0xff] }
 0x2ba   :  { %27610 = vst [vmem:[#allocation42_spill] sm:$0xff] %v21968_v53  ;;  %18922 = vmatprep.mubr.msk.f32.mxu0 %vm97_vm1, %v5883_v51  ;;  %v5888_v51 = vld [vmem:[#allocation2 + $0x1f1] sm:$0xff]  ;;  %v5889_v56 = vld [vmem:[#allocation2 + $0x209] sm:$0xff] }
 0x2bc   :  { %v21972_v15 = vpop.f32.mrb[58].mxu1 }
 0x2bd   :  { %27611 = vst [vmem:[#allocation43_spill] sm:$0xff] %v21972_v15  ;;  %v21974_v10 = vpop.f32.mrb[59].mxu1  ;;  %18923 = vmatmul.mubr.msk.f32.gmra.mrb[22].mxu0 %vm97_vm1, %v5884_v0  ;;  %v5887_v15 = vld [vmem:[#allocation2 + $0x1e9] sm:$0xff] }
 0x2be   :  { %27612 = vst [vmem:[#allocation44_spill] sm:$0xff] %v21974_v10  ;;  %18925 = vmatprep.mubr.msk.f32.mxu0 %vm97_vm1, %v5885_v19  ;;  %v5891_v0 = vld [vmem:[#allocation2 + $0x229] sm:$0xff]  ;;  %v5892_v19 = vld [vmem:[#allocation2 + $0x231] sm:$0xff] }
 0x2c0   :  { %v21978_v39 = vpop.f32.mrb[60].mxu1 }
 0x2c1   :  { %27613 = vst [vmem:[#allocation45_spill] sm:$0xff] %v21978_v39  ;;  %v21980_v52 = vpop.f32.mrb[61].mxu1  ;;  %18926 = vmatmul.mubr.msk.f32.gmra.mrb[24].mxu0 %vm97_vm1, %v5886_v11  ;;  %v5894_v11 = vld [vmem:[#allocation2 + $0x291] sm:$0xff] }
 0x2c2   :  { %27614 = vst [vmem:[#allocation46_spill] sm:$0xff] %v21980_v52  ;;  %18928 = vmatprep.mubr.msk.f32.mxu0 %vm97_vm1, %v5887_v15  ;;  %v5890_v52 = vld [vmem:[#allocation2 + $0x211] sm:$0xff]  ;;  %v5895_v15 = vld [vmem:[#allocation2 + $0x2a9] sm:$0xff] }
 0x2c4   :  { %v21984_v43 = vpop.f32.mrb[62].mxu1 }
 0x2c5   :  { %27615 = vst [vmem:[#allocation47_spill] sm:$0xff] %v21984_v43  ;;  %v21986_v53 = vpop.f32.mrb[63].mxu1  ;;  %18929 = vmatmul.mubr.msk.f32.gmra.mrb[26].mxu0 %vm97_vm1, %v5888_v51  ;;  %v5893_v43 = vld [vmem:[#allocation2 + $0x289] sm:$0xff]  ;;  %v5896_v51 = vld [vmem:[#allocation2 + $0x2b1] sm:$0xff] }
 0x2c6   :  { %27616 = vst [vmem:[#allocation48_spill] sm:$0xff] %v21986_v53  ;;  %18931 = vmatprep.mubr.msk.f32.mxu0 %vm97_vm1, %v5889_v56  ;;  %v5897_v56 = vld [vmem:[#allocation2 + $0x2c9] sm:$0xff] }
 0x2c9   :  { %18932 = vmatmul.mubr.msk.f32.gmra.mrb[28].mxu0 %vm97_vm1, %v5890_v52  ;;  %v5898_v52 = vld [vmem:[#allocation2 + $0x2d1] sm:$0xff] }
 0x2ca   :  { %18934 = vmatprep.mubr.msk.f32.mxu0 %vm97_vm1, %v5891_v0  ;;  %v5899_v0 = vld [vmem:[#allocation2 + $0x2e9] sm:$0xff] }
 0x2cd   :  { %18935 = vmatmul.mubr.msk.f32.gmra.mrb[30].mxu0 %vm97_vm1, %v5892_v19  ;;  %v5900_v19 = vld [vmem:[#allocation2 + $0x2f1] sm:$0xff] }
 0x2ce   :  { %18937 = vmatprep.mubr.msk.f32.mxu0 %vm97_vm1, %v5893_v43  ;;  %v5901_v43 = vld [vmem:[#allocation2 + $0x309] sm:$0xff] }
 0x2d1   :  { %18938 = vmatmul.mubr.msk.f32.gmra.mrb[32].mxu0 %vm97_vm1, %v5894_v11  ;;  %v5902_v11 = vld [vmem:[#allocation2 + $0x311] sm:$0xff] }
 0x2d2   :  { %18940 = vmatprep.mubr.msk.f32.mxu0 %vm97_vm1, %v5895_v15  ;;  %v5903_v15 = vld [vmem:[#allocation2 + $0x329] sm:$0xff] }
 0x2d5   :  { %18941 = vmatmul.mubr.msk.f32.gmra.mrb[34].mxu0 %vm97_vm1, %v5896_v51  ;;  %v5904_v51 = vld [vmem:[#allocation2 + $0x331] sm:$0xff] }
 0x2d6   :  { %18943 = vmatprep.mubr.msk.f32.mxu0 %vm97_vm1, %v5897_v56  ;;  %v5905_v56 = vld [vmem:[#allocation2 + $0x349] sm:$0xff] }
 0x2d9   :  { %18944 = vmatmul.mubr.msk.f32.gmra.mrb[36].mxu0 %vm97_vm1, %v5898_v52  ;;  %v5906_v52 = vld [vmem:[#allocation2 + $0x351] sm:$0xff] }
 0x2da   :  { %18946 = vmatprep.mubr.msk.f32.mxu0 %vm97_vm1, %v5899_v0  ;;  %v5907_v0 = vld [vmem:[#allocation2 + $0x369] sm:$0xff] }
 0x2dd   :  { %18947 = vmatmul.mubr.msk.f32.gmra.mrb[38].mxu0 %vm97_vm1, %v5900_v19  ;;  %v5908_v19 = vld [vmem:[#allocation2 + $0x371] sm:$0xff] }
 0x2de   :  { %18949 = vmatprep.mubr.msk.f32.mxu0 %vm97_vm1, %v5901_v43  ;;  %v5909_v43 = vld [vmem:[#allocation2 + $0x389] sm:$0xff] }
 0x2e1   :  { %18950 = vmatmul.mubr.msk.f32.gmra.mrb[40].mxu0 %vm97_vm1, %v5902_v11  ;;  %v5910_v11 = vld [vmem:[#allocation2 + $0x391] sm:$0xff] }
 0x2e2   :  { %18952 = vmatprep.mubr.msk.f32.mxu0 %vm97_vm1, %v5903_v15  ;;  %v5911_v15 = vld [vmem:[#allocation2 + $0x3a9] sm:$0xff] }
 0x2e5   :  { %18953 = vmatmul.mubr.msk.f32.gmra.mrb[42].mxu0 %vm97_vm1, %v5904_v51  ;;  %v5912_v51 = vld [vmem:[#allocation2 + $0x3b1] sm:$0xff] }
 0x2e6   :  { %18955 = vmatprep.mubr.msk.f32.mxu0 %vm97_vm1, %v5905_v56  ;;  %v5913_v56 = vld [vmem:[#allocation2 + $0x3c9] sm:$0xff] }
 0x2e9   :  { %18956 = vmatmul.mubr.msk.f32.gmra.mrb[44].mxu0 %vm97_vm1, %v5906_v52  ;;  %v5914_v52 = vld [vmem:[#allocation2 + $0x3d1] sm:$0xff] }
 0x2ea   :  { %18958 = vmatprep.mubr.msk.f32.mxu0 %vm97_vm1, %v5907_v0  ;;  %v5915_v0 = vld [vmem:[#allocation2 + $0x3e9] sm:$0xff] }
 0x2ed   :  { %18959 = vmatmul.mubr.msk.f32.gmra.mrb[46].mxu0 %vm97_vm1, %v5908_v19  ;;  %v5916_v19 = vld [vmem:[#allocation2 + $0x3f1] sm:$0xff] }
 0x2ee   :  { %18961 = vmatprep.mubr.msk.f32.mxu0 %vm97_vm1, %v5909_v43  ;;  %v5917_v43 = vld [vmem:[#allocation2 + $0x409] sm:$0xff] }
 0x2f1   :  { %18962 = vmatmul.mubr.msk.f32.gmra.mrb[48].mxu0 %vm97_vm1, %v5910_v11  ;;  %v5918_v11 = vld [vmem:[#allocation2 + $0x411] sm:$0xff] }
 0x2f2   :  { %18964 = vmatprep.mubr.msk.f32.mxu0 %vm97_vm1, %v5911_v15  ;;  %v5919_v15 = vld [vmem:[#allocation2 + $0x429] sm:$0xff] }
 0x2f5   :  { %18965 = vmatmul.mubr.msk.f32.gmra.mrb[50].mxu0 %vm97_vm1, %v5912_v51  ;;  %v5920_v51 = vld [vmem:[#allocation2 + $0x431] sm:$0xff] }
 0x2f6   :  { %18967 = vmatprep.mubr.msk.f32.mxu0 %vm97_vm1, %v5913_v56  ;;  %v5921_v56 = vld [vmem:[#allocation2 + $0x449] sm:$0xff] }
 0x2f9   :  { %18968 = vmatmul.mubr.msk.f32.gmra.mrb[52].mxu0 %vm97_vm1, %v5914_v52  ;;  %v5922_v52 = vld [vmem:[#allocation2 + $0x451] sm:$0xff] }
 0x2fa   :  { %18970 = vmatprep.mubr.msk.f32.mxu0 %vm97_vm1, %v5915_v0  ;;  %v5923_v0 = vld [vmem:[#allocation2 + $0x469] sm:$0xff] }
 0x2fd   :  { %18971 = vmatmul.mubr.msk.f32.gmra.mrb[54].mxu0 %vm97_vm1, %v5916_v19  ;;  %v5924_v19 = vld [vmem:[#allocation2 + $0x471] sm:$0xff] }
 0x2fe   :  { %18973 = vmatprep.mubr.msk.f32.mxu0 %vm97_vm1, %v5917_v43  ;;  %v27617_v43 = vmov 0.0  }
 0x2ff   :  { %11795 = vst.msk [vmem:[#allocation3] sm:$0xff] %vm10169_vm3, %v27617_v43  ;;  %11796 = vst.msk [vmem:[#allocation3 + $0x8] sm:$0xff] %vm10169_vm3, %v27617_v43 }
 0x300   :  { %11799 = vst.msk [vmem:[#allocation3 + $0x18] sm:$0xff] %vm10169_vm3, %v27617_v43  ;;  %11800 = vst.msk [vmem:[#allocation3 + $0x20] sm:$0xff] %vm10169_vm3, %v27617_v43 }
 0x301   :  { %18974 = vmatmul.mubr.msk.f32.gmra.mrb[56].mxu0 %vm97_vm1, %v5918_v11  ;;  %11802 = vst.msk [vmem:[#allocation3 + $0x30] sm:$0xff] %vm10169_vm3, %v27617_v43  ;;  %11803 = vst.msk [vmem:[#allocation3 + $0x38] sm:$0xff] %vm10169_vm3, %v27617_v43  ;;  %v19899_v11 = vmov 1983009808  }
 0x302   :  { %18976 = vmatprep.mubr.msk.f32.mxu0 %vm97_vm1, %v5919_v15  ;;  %11805 = vst.msk [vmem:[#allocation3 + $0x48] sm:$0xff] %vm10169_vm3, %v27617_v43  ;;  %11806 = vst.msk [vmem:[#allocation3 + $0x50] sm:$0xff] %vm10169_vm3, %v27617_v43  ;;  %v6900_v15 = vunpack.c.l.s4 %v19899_v11 }
 0x303   :  { %11808 = vst.msk [vmem:[#allocation3 + $0x60] sm:$0xff] %vm10169_vm3, %v27617_v43  ;;  %11809 = vst.msk [vmem:[#allocation3 + $0x68] sm:$0xff] %vm10169_vm3, %v27617_v43 }
 0x304   :  { %11811 = vst.msk [vmem:[#allocation3 + $0x78] sm:$0xff] %vm10169_vm3, %v27617_v43  ;;  %11812 = vst.msk [vmem:[#allocation3 + $0x80] sm:$0xff] %vm10169_vm3, %v27617_v43 }
 0x305   :  { %18977 = vmatmul.mubr.msk.f32.gmra.mrb[58].mxu0 %vm97_vm1, %v5920_v51  ;;  %11814 = vst.msk [vmem:[#allocation3 + $0x90] sm:$0xff] %vm10169_vm3, %v27617_v43  ;;  %11815 = vst.msk [vmem:[#allocation3 + $0x98] sm:$0xff] %vm10169_vm3, %v27617_v43  ;;  %v6902_v51 = vlaneseq }
 0x306   :  { %18979 = vmatprep.mubr.msk.f32.mxu0 %vm97_vm1, %v5921_v56  ;;  %11817 = vst.msk [vmem:[#allocation3 + $0xa8] sm:$0xff] %vm10169_vm3, %v27617_v43  ;;  %11818 = vst.msk [vmem:[#allocation3 + $0xb0] sm:$0xff] %vm10169_vm3, %v27617_v43 }
 0x307   :  { %11820 = vst.msk [vmem:[#allocation3 + $0xc0] sm:$0xff] %vm10169_vm3, %v27617_v43  ;;  %11821 = vst.msk [vmem:[#allocation3 + $0xc8] sm:$0xff] %vm10169_vm3, %v27617_v43  ;;  %v6903_v53 = vshrl.u32 %v6902_v51, 7 }
 0x308   :  { %11823 = vst.msk [vmem:[#allocation3 + $0xd8] sm:$0xff] %vm10169_vm3, %v27617_v43  ;;  %11824 = vst.msk [vmem:[#allocation3 + $0xe0] sm:$0xff] %vm10169_vm3, %v27617_v43 }
 0x309   :  { %18980 = vmatmul.mubr.msk.f32.gmra.mrb[60].mxu0 %vm97_vm1, %v5922_v52  ;;  %11826 = vst.msk [vmem:[#allocation3 + $0xf0] sm:$0xff] %vm10169_vm3, %v27617_v43  ;;  %11827 = vst.msk [vmem:[#allocation3 + $0xf8] sm:$0xff] %vm10169_vm3, %v27617_v43  ;;  %v22110_v52 = vld [vmem:[%s27177_s2] ss:$0 sm:$0xff] }
 0x30a   :  { %18982 = vmatprep.mubr.msk.f32.mxu0 %vm97_vm1, %v5923_v0  ;;  %11829 = vst.msk [vmem:[#allocation3 + $0x108] sm:$0xff] %vm10169_vm3, %v27617_v43  ;;  %11830 = vst.msk [vmem:[#allocation3 + $0x110] sm:$0xff] %vm10169_vm3, %v27617_v43  ;;  %v6901_v0 = vunpack.c.0.s8 %v6900_v15 }
 0x30b   :  { %11832 = vst.msk [vmem:[#allocation3 + $0x120] sm:$0xff] %vm10169_vm3, %v27617_v43  ;;  %11833 = vst.msk [vmem:[#allocation3 + $0x128] sm:$0xff] %vm10169_vm3, %v27617_v43 }
 0x30c   :  { %11835 = vst.msk [vmem:[#allocation3 + $0x138] sm:$0xff] %vm10169_vm3, %v27617_v43  ;;  %11836 = vst.msk [vmem:[#allocation3 + $0x140] sm:$0xff] %vm10169_vm3, %v27617_v43  ;;  %v22115_v18 = vsub.s32 %v6901_v0, %v6903_v53 }
 0x30d   :  { %11838 = vst.msk [vmem:[#allocation3 + $0x150] sm:$0xff] %vm10169_vm3, %v27617_v43  ;;  %11839 = vst.msk [vmem:[#allocation3 + $0x158] sm:$0xff] %vm10169_vm3, %v27617_v43  ;;  %18983 = vmatmul.mubr.msk.f32.gmra.mrb[62].mxu0 %vm97_vm1, %v5924_v19 }
 0x30e   :  { %11841 = vst.msk [vmem:[#allocation3 + $0x168] sm:$0xff] %vm10169_vm3, %v27617_v43  ;;  %11842 = vst.msk [vmem:[#allocation3 + $0x170] sm:$0xff] %vm10169_vm3, %v27617_v43 }
 0x30f   :  { %11844 = vst.msk [vmem:[#allocation3 + $0x180] sm:$0xff] %vm10169_vm3, %v27617_v43  ;;  %11845 = vst.msk [vmem:[#allocation3 + $0x188] sm:$0xff] %vm10169_vm3, %v27617_v43 }
 0x310   :  { %11847 = vst.msk [vmem:[#allocation3 + $0x198] sm:$0xff] %vm10169_vm3, %v27617_v43  ;;  %11848 = vst.msk [vmem:[#allocation3 + $0x1a0] sm:$0xff] %vm10169_vm3, %v27617_v43 }
 0x311   :  { %11850 = vst.msk [vmem:[#allocation3 + $0x1b0] sm:$0xff] %vm10169_vm3, %v27617_v43  ;;  %11851 = vst.msk [vmem:[#allocation3 + $0x1b8] sm:$0xff] %vm10169_vm3, %v27617_v43 }
 0x312   :  { %11853 = vst.msk [vmem:[#allocation3 + $0x1c8] sm:$0xff] %vm10169_vm3, %v27617_v43  ;;  %11854 = vst.msk [vmem:[#allocation3 + $0x1d0] sm:$0xff] %vm10169_vm3, %v27617_v43 }
 0x313   :  { %27618 = vst [vmem:[#allocation49_spill] sm:$0xff] %v22115_v18 }
 0x364   :  { %v18891_v56 = vpop.f32.mrb[0].mxu0 }
 0x365   :  { %v19221_v39 = vadd.f32 %v18891_v56, %v21774_v38  ;;  %v6188_v10 = vpop.f32.mrb[1].mxu0 }
 0x366   :  { %v19222_v2 = vadd.f32 %v6188_v10, %v21776_v40 }
 0x367   :  { %v6579_v43 = vadd.f32 %v19221_v39, %v22110_v52 }
 0x368   :  { %v6578_v19 = vadd.f32 %v19222_v2, %v22110_v52  ;;  %v18894_v11 = vpop.f32.mrb[2].mxu0 }
 0x369   :  { %vm6643_vm4 = vcmp.gt.f32.partialorder %v6579_v43, 0.0  ;;  %v6707_v45 = vmul.f32 0.01, %v6579_v43  ;;  %v19223_v23 = vadd.f32 %v18894_v11, %v21780_v58  ;;  %v6198_v34 = vpop.f32.mrb[3].mxu0 }
 0x36a   :  { %vm6642_vm5 = vcmp.gt.f32.partialorder %v6578_v19, 0.0  ;;  %v6706_v15 = vmul.f32 0.01, %v6578_v19  ;;  %v19224_v51 = vadd.f32 %v6198_v34, %v21782_v6  ;;  %v22125_v34 = vsub.s32 0, %v6903_v53 }
 0x36b   :  { %v6771_v38 = vsel %vm6643_vm4, %v6579_v43, %v6707_v45  ;;  %v6581_v56 = vadd.f32 %v19223_v23, %v22110_v52 }
 0x36c   :  { %v6915_v40 = vcombine.high %v6771_v38, %v6771_v38  ;;  %v6922_v10 = vrot.slane %v6771_v38, %v22115_v18  ;;  %v6770_v39 = vsel %vm6642_vm5, %v6578_v19, %v6706_v15  ;;  %v6580_v0 = vadd.f32 %v19224_v51, %v22110_v52  ;;  %v18897_v2 = vpop.f32.mrb[4].mxu0  ;;  %27619 = vst [vmem:[#allocation50_spill] sm:$0xff] %v22125_v34 }
 0x36d   :  { %v6898_v12 = vcombine.high %v6770_v39, %v6770_v39  ;;  %v6905_v55 = vrot.slane %v6770_v39, %v22115_v18  ;;  %vm6645_vm6 = vcmp.gt.f32.partialorder %v6581_v56, 0.0  ;;  %v6709_v58 = vmul.f32 0.01, %v6581_v56  ;;  %v6208_v11 = vpop.f32.mrb[5].mxu0 }
 0x36e   :  { %v6929_v29 = vrot.slane %v6915_v40, %v22115_v18  ;;  %v6930_v17 = vcombine.high %v6922_v10, %v6922_v10  ;;  %v16892_v6 = vrot.slane %v6922_v10, 9  ;;  %vm6644_vm7 = vcmp.gt.f32.partialorder %v6580_v0, 0.0 }
 0x36f   :  { %v6912_v23 = vrot.slane %v6898_v12, %v22115_v18  ;;  %v6913_v45 = vcombine.high %v6905_v55, %v6905_v55  ;;  %v16888_v43 = vrot.slane %v6905_v55, 9  ;;  %v6773_v19 = vsel %vm6645_vm6, %v6581_v56, %v6709_v58 }
 0x370   :  { %v6931_v15 = vcombine.high %v6929_v29, %v6929_v29  ;;  %v16893_v51 = vrot.slane %v6930_v17, 9  ;;  %v16894_v38 = vrot.slane %v6929_v29, 9  ;;  %v22128_v42 = vpop.f32.mrb[6].mxu0  ;;  %v9014_v39 = vmax.f32 %v6922_v10, %v16892_v6 }
 0x371   :  { %v6914_v3 = vcombine.high %v6912_v23, %v6912_v23  ;;  %v16889_v8 = vrot.slane %v6913_v45, 9  ;;  %v16890_v63 = vrot.slane %v6912_v23, 9  ;;  %v22130_v40 = vpop.f32.mrb[7].mxu0  ;;  %v9010_v22 = vmax.f32 %v6905_v55, %v16888_v43 }
 0x372   :  { %v16895_v24 = vrot.slane %v6931_v15, 9  ;;  %v9015_v53 = vmax.f32 %v6930_v17, %v16893_v51  ;;  %v6949_v61 = vcombine.high %v6773_v19, %v6773_v19  ;;  %v9016_v12 = vmax.f32 %v6929_v29, %v16894_v38 }
 0x373   :  { %v16891_v54 = vrot.slane %v6914_v3, 9  ;;  %v9011_v33 = vmax.f32 %v6913_v45, %v16889_v8  ;;  %v6956_v56 = vrot.slane %v6773_v19, %v22115_v18  ;;  %v9012_v58 = vmax.f32 %v6912_v23, %v16890_v63 }
 0x374   :  { %v6963_v30 = vrot.slane %v6949_v61, %v22115_v18  ;;  %v6708_v48 = vmul.f32 0.01, %v6580_v0  ;;  %v19225_v10 = vadd.f32 %v18897_v2, %v21786_v27  ;;  %v22135_v6 = vpop.f32.mrb[8].mxu0  ;;  %v9017_v44 = vmax.f32 %v6931_v15, %v16895_v24 }
 0x375   :  { %v6964_v5 = vcombine.high %v6956_v56, %v6956_v56  ;;  %v16900_v13 = vrot.slane %v6956_v56, 9  ;;  %v19226_v17 = vadd.f32 %v6208_v11, %v21788_v57  ;;  %v22138_v55 = vpop.f32.mrb[9].mxu0 }
 0x376   :  { %v6965_v29 = vcombine.high %v6963_v30, %v6963_v30  ;;  %v16902_v43 = vrot.slane %v6963_v30, 9  ;;  %v6772_v8 = vsel %vm6644_vm7, %v6580_v0, %v6708_v48  ;;  %v6583_v63 = vadd.f32 %v19225_v10, %v22110_v52 }
 0x377   :  { %v16901_v23 = vrot.slane %v6964_v5, 9  ;;  %v9022_v61 = vmax.f32 %v6956_v56, %v16900_v13  ;;  %v6932_v45 = vcombine.high %v6772_v8, %v6772_v8  ;;  %v6939_v27 = vrot.slane %v6772_v8, %v22115_v18 }
 0x378   :  { %v16903_v2 = vrot.slane %v6965_v29, 9  ;;  %v9024_v19 = vmax.f32 %v6963_v30, %v16902_v43  ;;  %vm6647_vm9 = vcmp.gt.f32.partialorder %v6583_v63, 0.0  ;;  %v6711_v24 = vmul.f32 0.01, %v6583_v63  ;;  %v22143_v15 = vpop.f32.mrb[10].mxu0 }
 0x379   :  { %v9023_v57 = vmax.f32 %v6964_v5, %v16901_v23  ;;  %v22145_v11 = vmax.f32 %v9014_v39, %v9022_v61  ;;  %v6946_v51 = vrot.slane %v6932_v45, %v22115_v18  ;;  %v6947_v48 = vcombine.high %v6939_v27, %v6939_v27  ;;  %v22148_v0 = vpop.f32.mrb[11].mxu0 }
 0x37a   :  { %v9025_v13 = vmax.f32 %v6965_v29, %v16903_v2  ;;  %v22150_v38 = vmax.f32 %v9016_v12, %v9024_v19  ;;  %v16896_v56 = vrot.slane %v6939_v27, 9  ;;  %v6775_v30 = vsel %vm6647_vm9, %v6583_v63, %v6711_v24 }
 0x37b   :  { %27620 = vst [vmem:[#allocation51_spill] sm:$0xff] %v22145_v11  ;;  %v9013_v10 = vmax.f32 %v6914_v3, %v16891_v54  ;;  %v22152_v43 = vmax.f32 %v9015_v53, %v9023_v57  ;;  %v6948_v8 = vcombine.high %v6946_v51, %v6946_v51  ;;  %v16897_v7 = vrot.slane %v6947_v48, 9 }
 0x37c   :  { %27621 = vst [vmem:[#allocation52_spill] sm:$0xff] %v22150_v38  ;;  %v22154_v5 = vmax.f32 %v9017_v44, %v9025_v13  ;;  %v9541_v39 = vrot.slane %v22145_v11, %v22125_v34  ;;  %v16898_v23 = vrot.slane %v6946_v51, 9  ;;  %v9018_v61 = vmax.f32 %v6939_v27, %v16896_v56  ;;  %v22158_v29 = vpop.f32.mrb[12].mxu0 }
 0x37d   :  { %27622 = vst [vmem:[#allocation53_spill] sm:$0xff] %v22152_v43  ;;  %v9549_v12 = vrot.slane %v22150_v38, %v22125_v34  ;;  %v16899_v63 = vrot.slane %v6948_v8, 9  ;;  %v9019_v54 = vmax.f32 %v6947_v48, %v16897_v7  ;;  %v6983_v3 = vcombine.high %v6775_v30, %v6775_v30  ;;  %v22162_v53 = vpop.f32.mrb[13].mxu0 }
 0x37e   :  { %27623 = vst [vmem:[#allocation54_spill] sm:$0xff] %v22154_v5  ;;  %v9545_v44 = vrot.slane %v22152_v43, %v22125_v34  ;;  %v9020_v45 = vmax.f32 %v6946_v51, %v16898_v23  ;;  %v22166_v2 = vmax.f32 %v9010_v22, %v9018_v61  ;;  %v6990_v27 = vrot.slane %v6775_v30, %v22115_v18 }
 0x37f   :  { %v9021_v19 = vmax.f32 %v6948_v8, %v16899_v63  ;;  %v22169_v24 = vmax.f32 %v9011_v33, %v9019_v54  ;;  %v6997_v57 = vrot.slane %v6983_v3, %v22115_v18  ;;  %v6582_v7 = vadd.f32 %v19226_v17, %v22110_v52 }
 0x380   :  { %27624 = vst [vmem:[#allocation55_spill] sm:$0xff] %v22166_v2  ;;  %v22173_v48 = vmax.f32 %v9012_v58, %v9020_v45  ;;  %v9525_v13 = vrot.slane %v22166_v2, %v22125_v34  ;;  %v6998_v56 = vcombine.high %v6990_v27, %v6990_v27  ;;  %v16908_v38 = vrot.slane %v6990_v27, 9  ;;  %v22177_v51 = vpop.f32.mrb[14].mxu0 }
 0x381   :  { %27625 = vst [vmem:[#allocation56_spill] sm:$0xff] %v22169_v24  ;;  %v22179_v22 = vmax.f32 %v9013_v10, %v9021_v19  ;;  %v9529_v30 = vrot.slane %v22169_v24, %v22125_v34  ;;  %v6999_v33 = vcombine.high %v6997_v57, %v6997_v57  ;;  %v16910_v8 = vrot.slane %v6997_v57, 9  ;;  %v22183_v23 = vpop.f32.mrb[15].mxu0 }
 0x382   :  { %27626 = vst [vmem:[#allocation57_spill] sm:$0xff] %v22173_v48  ;;  %v9553_v58 = vrot.slane %v22154_v5, %v22125_v34  ;;  %v9533_v17 = vrot.slane %v22173_v48, %v22125_v34  ;;  %v16909_v61 = vrot.slane %v6998_v56, 9  ;;  %v22189_v63 = vmax.f32 %v6990_v27, %v16908_v38 }
 0x383   :  { %27627 = vst [vmem:[#allocation58_spill] sm:$0xff] %v22179_v22  ;;  %v9537_v10 = vrot.slane %v22179_v22, %v22125_v34  ;;  %v10035_v54 = vsel %vm10034_vm8, %v9529_v30, %v9525_v13  ;;  %v16911_v3 = vrot.slane %v6999_v33, 9  ;;  %vm6646_vm0 = vcmp.gt.f32.partialorder %v6582_v7, 0.0 }
 0x384   :  { %v10037_v45 = vsel %vm10036_vm10, %v9533_v17, %v10035_v54  ;;  %v22195_v19 = vmax.f32 %v6997_v57, %v16910_v8  ;;  %v6710_v43 = vmul.f32 0.01, %v6582_v7  ;;  %v19227_v5 = vadd.f32 %v22128_v42, %v21792_v37  ;;  %v22199_v11 = vpop.f32.mrb[16].mxu0 }
 0x385   :  { %v10039_v38 = vsel %vm10038_vm11, %v9537_v10, %v10037_v45  ;;  %v22202_v27 = vmax.f32 %v6998_v56, %v16909_v61  ;;  %v19228_v22 = vadd.f32 %v22130_v40, %v21794_v41  ;;  %v19229_v13 = vadd.f32 %v22135_v6, %v21798_v47  ;;  %v22208_v30 = vpop.f32.mrb[17].mxu0 }
 0x386   :  { %v10041_v57 = vsel %vm10040_vm12, %v9541_v39, %v10039_v38  ;;  %v6774_v8 = vsel %vm6646_vm0, %v6582_v7, %v6710_v43  ;;  %v6585_v17 = vadd.f32 %v19227_v5, %v22110_v52  ;;  %v19230_v37 = vadd.f32 %v22138_v55, %v21800_v49 }
 0x387   :  { %v10043_v42 = vsel %vm10042_vm13, %v9545_v44, %v10041_v57  ;;  %v6966_v56 = vcombine.high %v6774_v8, %v6774_v8  ;;  %v6973_v61 = vrot.slane %v6774_v8, %v22115_v18  ;;  %v6584_v41 = vadd.f32 %v19228_v22, %v22110_v52 }
 0x388   :  { %v10045_v40 = vsel %vm10044_vm14, %v9549_v12, %v10043_v42  ;;  %vm6649_vm1 = vcmp.gt.f32.partialorder %v6585_v17, 0.0  ;;  %v6713_v47 = vmul.f32 0.01, %v6585_v17  ;;  %v22219_v6 = vadd.f32 %v19229_v13, %v22110_v52  ;;  %v22221_v43 = vpop.f32.mrb[18].mxu0 }
 0x389   :  { %v10047_v5 = vsel %vm10046_vm15, %v9553_v58, %v10045_v40  ;;  %v6980_v49 = vrot.slane %v6966_v56, %v22115_v18  ;;  %v6981_v55 = vcombine.high %v6973_v61, %v6973_v61  ;;  %v16904_v39 = vrot.slane %v6973_v61, 9  ;;  %v22225_v44 = vpop.f32.mrb[19].mxu0 }
 0x38a   :  { %v9033_v7 = vmax.f32 %v6999_v33, %v16911_v3  ;;  %v6777_v10 = vsel %vm6649_vm1, %v6585_v17, %v6713_v47  ;;  %vm6648_vm2 = vcmp.gt.f32.partialorder %v6584_v41, 0.0  ;;  %v6712_v22 = vmul.f32 0.01, %v6584_v41 }
 0x38b   :  { %v22228_v12 = vsel %vm10169_vm3, %v10047_v5, 0.0  ;;  %v6982_v54 = vcombine.high %v6980_v49, %v6980_v49  ;;  %v16905_v45 = vrot.slane %v6981_v55, 9  ;;  %v16906_v38 = vrot.slane %v6980_v49, 9 }
 0x38c   :  { %v9026_v13 = vmax.f32 %v6973_v61, %v16904_v39  ;;  %v7017_v57 = vcombine.high %v6777_v10, %v6777_v10  ;;  %v7024_v58 = vrot.slane %v6777_v10, %v22115_v18  ;;  %v6776_v8 = vsel %vm6648_vm2, %v6584_v41, %v6712_v22  ;;  %v22231_v42 = vpop.f32.mrb[20].mxu0 }
 0x38d   :  { %v16907_v56 = vrot.slane %v6982_v54, 9  ;;  %v9027_v40 = vmax.f32 %v6981_v55, %v16905_v45  ;;  %v7000_v48 = vcombine.high %v6776_v8, %v6776_v8  ;;  %vm6651_vm4 = vcmp.gt.f32.partialorder %v22219_v6, 0.0  ;;  %v22234_v33 = vpop.f32.mrb[21].mxu0 }
 0x38e   :  { %v7031_v3 = vrot.slane %v7017_v57, %v22115_v18  ;;  %v7032_v17 = vcombine.high %v7024_v58, %v7024_v58  ;;  %v16916_v47 = vrot.slane %v7024_v58, 9  ;;  %v7007_v5 = vrot.slane %v6776_v8, %v22115_v18 }
 0x38f   :  { %v9028_v61 = vmax.f32 %v6980_v49, %v16906_v38  ;;  %v9029_v39 = vmax.f32 %v6982_v54, %v16907_v56  ;;  %v7014_v10 = vrot.slane %v7000_v48, %v22115_v18  ;;  %v6715_v41 = vmul.f32 0.01, %v22219_v6 }
 0x390   :  { %v7033_v22 = vcombine.high %v7031_v3, %v7031_v3  ;;  %v16917_v24 = vrot.slane %v7032_v17, 9  ;;  %v16918_v55 = vrot.slane %v7031_v3, 9  ;;  %v9038_v45 = vmax.f32 %v7024_v58, %v16916_v47  ;;  %v22240_v2 = vpop.f32.mrb[22].mxu0 }
 0x391   :  { %27628 = vst [vmem:[#allocation59_spill] sm:$0xff] %v22240_v2  ;;  %v7015_v1 = vcombine.high %v7007_v5, %v7007_v5  ;;  %v7016_v35 = vcombine.high %v7014_v10, %v7014_v10  ;;  %v16912_v31 = vrot.slane %v7007_v5, 9  ;;  %v16914_v57 = vrot.slane %v7014_v10, 9  ;;  %v22242_v25 = vpop.f32.mrb[23].mxu0 }
 0x392   :  { %27629 = vst [vmem:[#allocation60_spill] sm:$0xff] %v22242_v25  ;;  %v16919_v21 = vrot.slane %v7033_v22, 9  ;;  %v9039_v8 = vmax.f32 %v7032_v17, %v16917_v24  ;;  %v9040_v49 = vmax.f32 %v7031_v3, %v16918_v55  ;;  %v22245_v54 = vmax.f32 %v22189_v63, %v9038_v45 }
 0x393   :  { %v16913_v48 = vrot.slane %v7015_v1, 9  ;;  %v16915_v38 = vrot.slane %v7016_v35, 9  ;;  %v9034_v56 = vmax.f32 %v7007_v5, %v16912_v31  ;;  %v9036_v50 = vmax.f32 %v7014_v10, %v16914_v57 }
 0x394   :  { %27630 = vst [vmem:[#allocation61_spill] sm:$0xff] %v22245_v54  ;;  %v9041_v46 = vmax.f32 %v7033_v22, %v16919_v21  ;;  %v22248_v58 = vmax.f32 %v22202_v27, %v9039_v8  ;;  %v22251_v47 = vmax.f32 %v22195_v19, %v9040_v49  ;;  %v6586_v2 = vadd.f32 %v19230_v37, %v22110_v52  ;;  %v22254_v25 = vpop.f32.mrb[24].mxu0 }
 0x395   :  { %v9035_v24 = vmax.f32 %v7015_v1, %v16913_v48  ;;  %v9037_v3 = vmax.f32 %v7016_v35, %v16915_v38  ;;  %v22256_v17 = vmax.f32 %v9026_v13, %v9034_v56  ;;  %v22258_v63 = vmax.f32 %v9028_v61, %v9036_v50  ;;  %v22260_v55 = vpop.f32.mrb[25].mxu0 }
 0x396   :  { %27631 = vst [vmem:[#allocation62_spill] sm:$0xff] %v22248_v58  ;;  %27632 = vst [vmem:[#allocation63_spill] sm:$0xff] %v22251_v47  ;;  %v22262_v31 = vmax.f32 %v9033_v7, %v9041_v46  ;;  %v9573_v21 = vrot.slane %v22245_v54, %v22125_v34  ;;  %v9577_v19 = vrot.slane %v22248_v58, %v22125_v34  ;;  %vm6650_vm5 = vcmp.gt.f32.partialorder %v6586_v2, 0.0 }
 0x397   :  { %27633 = vst [vmem:[#allocation64_spill] sm:$0xff] %v22256_v17  ;;  %27634 = vst [vmem:[#allocation65_spill] sm:$0xff] %v22258_v63  ;;  %v6779_v27 = vsel %vm6651_vm4, %v22219_v6, %v6715_v41  ;;  %v9581_v35 = vrot.slane %v22251_v47, %v22125_v34  ;;  %v22273_v1 = vmax.f32 %v9027_v40, %v9035_v24  ;;  %v6714_v61 = vmul.f32 0.01, %v6586_v2 }
 0x398   :  { %27635 = vst [vmem:[#allocation66_spill] sm:$0xff] %v22262_v31  ;;  %v22275_v50 = vmax.f32 %v9029_v39, %v9037_v3  ;;  %v9557_v46 = vrot.slane %v22256_v17, %v22125_v34  ;;  %v9565_v37 = vrot.slane %v22258_v63, %v22125_v34  ;;  %v7051_v7 = vcombine.high %v6779_v27, %v6779_v27  ;;  %v22282_v5 = vpop.f32.mrb[26].mxu0 }
 0x399   :  { %27636 = vst [vmem:[#allocation67_spill] sm:$0xff] %v22273_v1  ;;  %v7058_v13 = vrot.slane %v6779_v27, %v22115_v18  ;;  %v9561_v6 = vrot.slane %v22273_v1, %v22125_v34  ;;  %v19231_v39 = vadd.f32 %v22143_v15, %v21804_v4  ;;  %v22290_v10 = vpop.f32.mrb[27].mxu0  ;;  %v19232_v57 = vadd.f32 %v22148_v0, %v21806_v16 }
 0x39a   :  { %27637 = vst [vmem:[#allocation68_spill] sm:$0xff] %v22275_v50  ;;  %v9569_v40 = vrot.slane %v22275_v50, %v22125_v34  ;;  %v7065_v41 = vrot.slane %v7051_v7, %v22115_v18  ;;  %v6778_v49 = vsel %vm6650_vm5, %v6586_v2, %v6714_v61  ;;  %v19233_v38 = vadd.f32 %v22158_v29, %v21810_v62 }
 0x39b   :  { %v7066_v22 = vcombine.high %v7058_v13, %v7058_v13  ;;  %v16924_v45 = vrot.slane %v7058_v13, 9  ;;  %v10048_v8 = vsel %vm10034_vm8, %v9561_v6, %v9557_v46  ;;  %v6589_v48 = vadd.f32 %v19231_v39, %v22110_v52 }
 0x39c   :  { %v10049_v56 = vsel %vm10036_vm10, %v9565_v37, %v10048_v8  ;;  %v7067_v4 = vcombine.high %v7065_v41, %v7065_v41  ;;  %v16926_v24 = vrot.slane %v7065_v41, 9  ;;  %v22300_v3 = vpop.f32.mrb[28].mxu0  ;;  %v9585_v27 = vrot.slane %v22262_v31, %v22125_v34 }
 0x39d   :  { %v16925_v15 = vrot.slane %v7066_v22, 9  ;;  %v10050_v16 = vsel %vm10038_vm11, %v9569_v40, %v10049_v56  ;;  %v7034_v0 = vcombine.high %v6778_v49, %v6778_v49  ;;  %v7041_v2 = vrot.slane %v6778_v49, %v22115_v18  ;;  %v22306_v46 = vpop.f32.mrb[29].mxu0 }
 0x39e   :  { %v10051_v7 = vsel %vm10040_vm12, %v9573_v21, %v10050_v16  ;;  %v16927_v62 = vrot.slane %v7067_v4, 9  ;;  %v9046_v29 = vmax.f32 %v7058_v13, %v16924_v45  ;;  %v9048_v47 = vmax.f32 %v7065_v41, %v16926_v24 }
 0x39f   :  { %v9047_v37 = vmax.f32 %v7066_v22, %v16925_v15  ;;  %v10052_v6 = vsel %vm10042_vm13, %v9577_v19, %v10051_v7  ;;  %v7048_v61 = vrot.slane %v7034_v0, %v22115_v18  ;;  %v7049_v39 = vcombine.high %v7041_v2, %v7041_v2 }
 0x3a0   :  { %v16920_v8 = vrot.slane %v7041_v2, 9  ;;  %v10053_v31 = vsel %vm10044_vm14, %v9581_v35, %v10052_v6  ;;  %vm6653_vm6 = vcmp.gt.f32.partialorder %v6589_v48, 0.0  ;;  %v6717_v40 = vmul.f32 0.01, %v6589_v48  ;;  %v22312_v56 = vpop.f32.mrb[30].mxu0 }
 0x3a1   :  { %v10054_v49 = vsel %vm10046_vm15, %v9585_v27, %v10053_v31  ;;  %v7050_v58 = vcombine.high %v7048_v61, %v7048_v61  ;;  %v16921_v21 = vrot.slane %v7049_v39, 9  ;;  %v16922_v16 = vrot.slane %v7048_v61, 9  ;;  %v22315_v13 = vpop.f32.mrb[31].mxu0 }
 0x3a2   :  { %27638 = vst [vmem:[#allocation69_spill] sm:$0xff] %v22315_v13  ;;  %v10171_v19 = vsel %vm10169_vm3, %v10054_v49, 0.0  ;;  %v9049_v22 = vmax.f32 %v7067_v4, %v16927_v62  ;;  %v6781_v45 = vsel %vm6653_vm6, %v6589_v48, %v6717_v40  ;;  %v6588_v15 = vadd.f32 %v19232_v57, %v22110_v52 }
 0x3a3   :  { %v22320_v35 = vadd.f32 %v10171_v19, %v22228_v12  ;;  %v16923_v41 = vrot.slane %v7050_v58, 9  ;;  %v9042_v24 = vmax.f32 %v7041_v2, %v16920_v8  ;;  %v9043_v0 = vmax.f32 %v7049_v39, %v16921_v21 }
 0x3a4   :  { %v7085_v7 = vcombine.high %v6781_v45, %v6781_v45  ;;  %v7092_v31 = vrot.slane %v6781_v45, %v22115_v18  ;;  %vm6652_vm7 = vcmp.gt.f32.partialorder %v6588_v15, 0.0  ;;  %v6716_v27 = vmul.f32 0.01, %v6588_v15  ;;  %v22323_v6 = vpop.f32.mrb[32].mxu0 }
 0x3a5   :  { %27639 = vst [vmem:[#allocation70_spill] sm:$0xff] %v22323_v6  ;;  %v9044_v54 = vmax.f32 %v7048_v61, %v16922_v16  ;;  %v6591_v49 = vadd.f32 %v19233_v38, %v22110_v52  ;;  %v19234_v48 = vadd.f32 %v22162_v53, %v21812_v20  ;;  %v19235_v12 = vadd.f32 %v22177_v51, %v21816_v26  ;;  %v22330_v57 = vpop.f32.mrb[33].mxu0 }
 0x3a6   :  { %27640 = vst [vmem:[#allocation71_spill] sm:$0xff] %v22330_v57  ;;  %v7099_v4 = vrot.slane %v7085_v7, %v22115_v18  ;;  %v7100_v2 = vcombine.high %v7092_v31, %v7092_v31  ;;  %v16932_v62 = vrot.slane %v7092_v31, 9  ;;  %v6780_v39 = vsel %vm6652_vm7, %v6588_v15, %v6716_v27 }
 0x3a7   :  { %v7068_v8 = vcombine.high %v6780_v39, %v6780_v39  ;;  %v7075_v40 = vrot.slane %v6780_v39, %v22115_v18  ;;  %vm6655_vm9 = vcmp.gt.f32.partialorder %v6591_v49, 0.0  ;;  %v6719_v61 = vmul.f32 0.01, %v6591_v49 }
 0x3a8   :  { %v7101_v21 = vcombine.high %v7099_v4, %v7099_v4  ;;  %v16933_v38 = vrot.slane %v7100_v2, 9  ;;  %v16934_v16 = vrot.slane %v7099_v4, 9  ;;  %v9054_v19 = vmax.f32 %v7092_v31, %v16932_v62  ;;  %v22341_v31 = vpop.f32.mrb[34].mxu0 }
 0x3a9   :  { %v7082_v20 = vrot.slane %v7068_v8, %v22115_v18  ;;  %v7083_v53 = vcombine.high %v7075_v40, %v7075_v40  ;;  %v16928_v26 = vrot.slane %v7075_v40, 9  ;;  %v6783_v51 = vsel %vm6655_vm9, %v6591_v49, %v6719_v61 }
 0x3aa   :  { %v16935_v45 = vrot.slane %v7101_v21, 9  ;;  %v9055_v50 = vmax.f32 %v7100_v2, %v16933_v38  ;;  %v9056_v7 = vmax.f32 %v7099_v4, %v16934_v16  ;;  %v22335_v63 = vmax.f32 %v9046_v29, %v9054_v19  ;;  %v22345_v4 = vpop.f32.mrb[35].mxu0 }
 0x3ab   :  { %v7084_v15 = vcombine.high %v7082_v20, %v7082_v20  ;;  %v16929_v27 = vrot.slane %v7083_v53, 9  ;;  %v16930_v1 = vrot.slane %v7082_v20, 9  ;;  %v9050_v39 = vmax.f32 %v7075_v40, %v16928_v26 }
 0x3ac   :  { %27641 = vst [vmem:[#allocation72_spill] sm:$0xff] %v22335_v63  ;;  %v9045_v17 = vmax.f32 %v7050_v58, %v16923_v41  ;;  %v9057_v57 = vmax.f32 %v7101_v21, %v16935_v45  ;;  %v22337_v6 = vmax.f32 %v9047_v37, %v9055_v50  ;;  %v22339_v13 = vmax.f32 %v9048_v47, %v9056_v7  ;;  %v22371_v26 = vpop.f32.mrb[36].mxu0 }
 0x3ad   :  { %v16931_v62 = vrot.slane %v7084_v15, 9  ;;  %v9051_v8 = vmax.f32 %v7083_v53, %v16929_v27  ;;  %v9052_v49 = vmax.f32 %v7082_v20, %v16930_v1  ;;  %v22343_v61 = vmax.f32 %v9042_v24, %v9050_v39 }
 0x3ae   :  { %27642 = vst [vmem:[#allocation73_spill] sm:$0xff] %v22337_v6  ;;  %27643 = vst [vmem:[#allocation74_spill] sm:$0xff] %v22339_v13  ;;  %v22347_v29 = vmax.f32 %v9049_v22, %v9057_v57  ;;  %v9605_v2 = vrot.slane %v22335_v63, %v22125_v34  ;;  %v9609_v58 = vrot.slane %v22337_v6, %v22125_v34 }
 0x3af   :  { %27644 = vst [vmem:[#allocation75_spill] sm:$0xff] %v22343_v61  ;;  %v7119_v50 = vcombine.high %v6783_v51, %v6783_v51  ;;  %v9613_v47 = vrot.slane %v22339_v13, %v22125_v34  ;;  %v9053_v37 = vmax.f32 %v7084_v15, %v16931_v62  ;;  %v22355_v41 = vmax.f32 %v9043_v0, %v9051_v8 }
 0x3b0   :  { %27645 = vst [vmem:[#allocation76_spill] sm:$0xff] %v22347_v29  ;;  %v22357_v1 = vmax.f32 %v9044_v54, %v9052_v49  ;;  %v9589_v24 = vrot.slane %v22343_v61, %v22125_v34  ;;  %v7126_v22 = vrot.slane %v6783_v51, %v22115_v18  ;;  %v6590_v40 = vadd.f32 %v19234_v48, %v22110_v52 }
 0x3b1   :  { %27646 = vst [vmem:[#allocation77_spill] sm:$0xff] %v22355_v41  ;;  %v7133_v57 = vrot.slane %v7119_v50, %v22115_v18  ;;  %v22364_v21 = vmax.f32 %v9045_v17, %v9053_v37  ;;  %v9593_v38 = vrot.slane %v22355_v41, %v22125_v34  ;;  %v6593_v54 = vadd.f32 %v19235_v12, %v22110_v52 }
 0x3b2   :  { %27647 = vst [vmem:[#allocation78_spill] sm:$0xff] %v22357_v1  ;;  %v9597_v0 = vrot.slane %v22357_v1, %v22125_v34  ;;  %v7134_v16 = vcombine.high %v7126_v22, %v7126_v22  ;;  %v16940_v20 = vrot.slane %v7126_v22, 9  ;;  %vm6654_vm0 = vcmp.gt.f32.partialorder %v6590_v40, 0.0 }
 0x3b3   :  { %27648 = vst [vmem:[#allocation79_spill] sm:$0xff] %v22364_v21  ;;  %v7135_v19 = vcombine.high %v7133_v57, %v7133_v57  ;;  %v16942_v53 = vrot.slane %v7133_v57, 9  ;;  %v9601_v51 = vrot.slane %v22364_v21, %v22125_v34  ;;  %v10055_v17 = vsel %vm10034_vm8, %v9593_v38, %v9589_v24 }
 0x3b4   :  { %v6718_v48 = vmul.f32 0.01, %v6590_v40  ;;  %v9617_v45 = vrot.slane %v22347_v29, %v22125_v34  ;;  %v10056_v7 = vsel %vm10036_vm10, %v9597_v0, %v10055_v17  ;;  %v16941_v15 = vrot.slane %v7134_v16, 9 }
 0x3b5   :  { %v16943_v12 = vrot.slane %v7135_v19, 9  ;;  %v10057_v27 = vsel %vm10038_vm11, %v9601_v51, %v10056_v7  ;;  %v9062_v39 = vmax.f32 %v7126_v22, %v16940_v20  ;;  %v9064_v62 = vmax.f32 %v7133_v57, %v16942_v53 }
 0x3b6   :  { %v6782_v8 = vsel %vm6654_vm0, %v6590_v40, %v6718_v48  ;;  %v10058_v49 = vsel %vm10040_vm12, %v9605_v2, %v10057_v27  ;;  %v9063_v50 = vmax.f32 %v7134_v16, %v16941_v15  ;;  %vm6657_vm1 = vcmp.gt.f32.partialorder %v6593_v54, 0.0 }
 0x3b7   :  { %v7102_v37 = vcombine.high %v6782_v8, %v6782_v8  ;;  %v10059_v24 = vsel %vm10042_vm13, %v9609_v58, %v10058_v49  ;;  %v7109_v38 = vrot.slane %v6782_v8, %v22115_v18  ;;  %v6721_v13 = vmul.f32 0.01, %v6593_v54  ;;  %v22400_v8 = vpop.f32.mrb[37].mxu0 }
 0x3b8   :  { %v19236_v0 = vadd.f32 %v22183_v23, %v21818_v28  ;;  %v10060_v17 = vsel %vm10044_vm14, %v9613_v47, %v10059_v24  ;;  %v19237_v22 = vadd.f32 %v22199_v11, %v21822_v59  ;;  %v19238_v2 = vadd.f32 %v22208_v30, %v21824_v60 }
 0x3b9   :  { %v7116_v51 = vrot.slane %v7102_v37, %v22115_v18  ;;  %v10061_v57 = vsel %vm10046_vm15, %v9617_v45, %v10060_v17  ;;  %v7117_v40 = vcombine.high %v7109_v38, %v7109_v38  ;;  %v16936_v58 = vrot.slane %v7109_v38, 9 }
 0x3ba   :  { %v6785_v16 = vsel %vm6657_vm1, %v6593_v54, %v6721_v13  ;;  %v10173_v20 = vsel %vm10169_vm3, %v10061_v57, 0.0  ;;  %v9065_v47 = vmax.f32 %v7135_v19, %v16943_v12  ;;  %v6592_v30 = vadd.f32 %v19236_v0, %v22110_v52 }
 0x3bb   :  { %v7118_v53 = vcombine.high %v7116_v51, %v7116_v51  ;;  %v16938_v48 = vrot.slane %v7116_v51, 9  ;;  %v7153_v28 = vcombine.high %v6785_v16, %v6785_v16  ;;  %v22394_v23 = vadd.f32 %v10173_v20, %v22320_v35 }
 0x3bc   :  { %v16937_v7 = vrot.slane %v7117_v40, 9  ;;  %v7160_v59 = vrot.slane %v6785_v16, %v22115_v18  ;;  %v9058_v15 = vmax.f32 %v7109_v38, %v16936_v58  ;;  %v6595_v27 = vadd.f32 %v19237_v22, %v22110_v52 }
 0x3bd   :  { %v16939_v11 = vrot.slane %v7118_v53, 9  ;;  %v7167_v60 = vrot.slane %v7153_v28, %v22115_v18  ;;  %v9060_v45 = vmax.f32 %v7116_v51, %v16938_v48  ;;  %vm6656_vm2 = vcmp.gt.f32.partialorder %v6592_v30, 0.0 }
 0x3be   :  { %v7168_v13 = vcombine.high %v7160_v59, %v7160_v59  ;;  %v16948_v54 = vrot.slane %v7160_v59, 9  ;;  %v9059_v49 = vmax.f32 %v7117_v40, %v16937_v7  ;;  %v6720_v24 = vmul.f32 0.01, %v6592_v30 }
 0x3bf   :  { %v7169_v35 = vcombine.high %v7167_v60, %v7167_v60  ;;  %v16950_v37 = vrot.slane %v7167_v60, 9  ;;  %vm6659_vm4 = vcmp.gt.f32.partialorder %v6595_v27, 0.0  ;;  %v6723_v57 = vmul.f32 0.01, %v6595_v27 }
 0x3c0   :  { %v16949_v19 = vrot.slane %v7168_v13, 9  ;;  %v9070_v12 = vmax.f32 %v7160_v59, %v16948_v54  ;;  %v6594_v0 = vadd.f32 %v19238_v2, %v22110_v52  ;;  %v6784_v16 = vsel %vm6656_vm2, %v6592_v30, %v6720_v24 }
 0x3c1   :  { %v16951_v38 = vrot.slane %v7169_v35, 9  ;;  %v9072_v17 = vmax.f32 %v7167_v60, %v16950_v37  ;;  %v19239_v22 = vadd.f32 %v22221_v43, %v21828_v9  ;;  %v7136_v48 = vcombine.high %v6784_v16, %v6784_v16 }
 0x3c2   :  { %v9071_v51 = vmax.f32 %v7168_v13, %v16949_v19  ;;  %v22403_v58 = vmax.f32 %v9062_v39, %v9070_v12  ;;  %v7143_v28 = vrot.slane %v6784_v16, %v22115_v18  ;;  %v9061_v7 = vmax.f32 %v7118_v53, %v16939_v11  ;;  %v22415_v39 = vpop.f32.mrb[38].mxu0 }
 0x3c3   :  { %v9073_v40 = vmax.f32 %v7169_v35, %v16951_v38  ;;  %v22407_v20 = vmax.f32 %v9064_v62, %v9072_v17  ;;  %v6787_v2 = vsel %vm6659_vm4, %v6595_v27, %v6723_v57  ;;  %v7150_v9 = vrot.slane %v7136_v48, %v22115_v18  ;;  %v22425_v37 = vpop.f32.mrb[39].mxu0 }
 0x3c4   :  { %27649 = vst [vmem:[#allocation80_spill] sm:$0xff] %v22403_v58  ;;  %v22410_v59 = vmax.f32 %v9063_v50, %v9071_v51  ;;  %v9637_v60 = vrot.slane %v22403_v58, %v22125_v34  ;;  %v7151_v43 = vcombine.high %v7143_v28, %v7143_v28  ;;  %vm6658_vm5 = vcmp.gt.f32.partialorder %v6594_v0, 0.0 }
 0x3c5   :  { %27650 = vst [vmem:[#allocation81_spill] sm:$0xff] %v22407_v20  ;;  %v22417_v30 = vmax.f32 %v9065_v47, %v9073_v40  ;;  %v9645_v62 = vrot.slane %v22407_v20, %v22125_v34  ;;  %v16944_v13 = vrot.slane %v7143_v28, 9  ;;  %v7187_v53 = vcombine.high %v6787_v2, %v6787_v2 }
 0x3c6   :  { %27651 = vst [vmem:[#allocation82_spill] sm:$0xff] %v22410_v59  ;;  %v7194_v50 = vrot.slane %v6787_v2, %v22115_v18  ;;  %v9641_v11 = vrot.slane %v22410_v59, %v22125_v34  ;;  %v7152_v54 = vcombine.high %v7150_v9, %v7150_v9  ;;  %v16945_v27 = vrot.slane %v7151_v43, 9 }
 0x3c7   :  { %27652 = vst [vmem:[#allocation83_spill] sm:$0xff] %v22417_v30  ;;  %v16946_v35 = vrot.slane %v7150_v9, 9  ;;  %v9066_v47 = vmax.f32 %v7143_v28, %v16944_v13  ;;  %v7201_v19 = vrot.slane %v7187_v53, %v22115_v18  ;;  %v6722_v51 = vmul.f32 0.01, %v6594_v0 }
 0x3c8   :  { %v7202_v12 = vcombine.high %v7194_v50, %v7194_v50  ;;  %v16956_v24 = vrot.slane %v7194_v50, 9  ;;  %v16947_v38 = vrot.slane %v7152_v54, 9  ;;  %v9067_v17 = vmax.f32 %v7151_v43, %v16945_v27 }
 0x3c9   :  { %v9068_v57 = vmax.f32 %v7150_v9, %v16946_v35  ;;  %v22428_v16 = vmax.f32 %v9058_v15, %v9066_v47  ;;  %v7203_v40 = vcombine.high %v7201_v19, %v7201_v19  ;;  %v16958_v2 = vrot.slane %v7201_v19, 9  ;;  %v22442_v15 = vpop.f32.mrb[40].mxu0 }
 0x3ca   :  { %v16957_v48 = vrot.slane %v7202_v12, 9  ;;  %v9649_v20 = vrot.slane %v22417_v30, %v22125_v34  ;;  %v9069_v59 = vmax.f32 %v7152_v54, %v16947_v38  ;;  %v22432_v58 = vmax.f32 %v9059_v49, %v9067_v17 }
 0x3cb   :  { %27653 = vst [vmem:[#allocation84_spill] sm:$0xff] %v22428_v16  ;;  %v22434_v28 = vmax.f32 %v9060_v45, %v9068_v57  ;;  %v9621_v13 = vrot.slane %v22428_v16, %v22125_v34  ;;  %v16959_v53 = vrot.slane %v7203_v40, 9  ;;  %v22438_v43 = vmax.f32 %v7194_v50, %v16956_v24 }
 0x3cc   :  { %27654 = vst [vmem:[#allocation85_spill] sm:$0xff] %v22432_v58  ;;  %v22440_v9 = vmax.f32 %v7202_v12, %v16957_v48  ;;  %v22444_v27 = vmax.f32 %v9061_v7, %v9069_v59  ;;  %v9625_v35 = vrot.slane %v22432_v58, %v22125_v34  ;;  %v6786_v45 = vsel %vm6658_vm5, %v6594_v0, %v6722_v51 }
 0x3cd   :  { %27655 = vst [vmem:[#allocation86_spill] sm:$0xff] %v22434_v28  ;;  %v9629_v49 = vrot.slane %v22434_v28, %v22125_v34  ;;  %v22451_v54 = vmax.f32 %v7201_v19, %v16958_v2  ;;  %v7170_v47 = vcombine.high %v6786_v45, %v6786_v45  ;;  %v7177_v50 = vrot.slane %v6786_v45, %v22115_v18 }
 0x3ce   :  { %27656 = vst [vmem:[#allocation87_spill] sm:$0xff] %v22444_v27  ;;  %v6597_v12 = vadd.f32 %v19239_v22, %v22110_v52  ;;  %v9633_v24 = vrot.slane %v22444_v27, %v22125_v34  ;;  %v10062_v7 = vsel %vm10034_vm8, %v9625_v35, %v9621_v13  ;;  %v19240_v59 = vadd.f32 %v22225_v44, %v21830_v14 }
 0x3cf   :  { %v19241_v38 = vadd.f32 %v22231_v42, %v21834_v32  ;;  %v10063_v0 = vsel %vm10036_vm10, %v9629_v49, %v10062_v7  ;;  %v7184_v19 = vrot.slane %v7170_v47, %v22115_v18  ;;  %v7185_v17 = vcombine.high %v7177_v50, %v7177_v50 }
 0x3d0   :  { %v16952_v57 = vrot.slane %v7177_v50, 9  ;;  %v10064_v51 = vsel %vm10038_vm11, %v9633_v24, %v10063_v0  ;;  %vm6661_vm6 = vcmp.gt.f32.partialorder %v6597_v12, 0.0  ;;  %v6725_v22 = vmul.f32 0.01, %v6597_v12  ;;  %v22469_v24 = vpop.f32.mrb[41].mxu0 }
 0x3d1   :  { %v6596_v48 = vadd.f32 %v19240_v59, %v22110_v52  ;;  %v10065_v2 = vsel %vm10040_vm12, %v9637_v60, %v10064_v51  ;;  %v7186_v13 = vcombine.high %v7184_v19, %v7184_v19  ;;  %v16953_v35 = vrot.slane %v7185_v17, 9 }
 0x3d2   :  { %v16954_v14 = vrot.slane %v7184_v19, 9  ;;  %v10066_v44 = vsel %vm10042_vm13, %v9641_v11, %v10065_v2  ;;  %v9081_v32 = vmax.f32 %v7203_v40, %v16959_v53  ;;  %v9074_v42 = vmax.f32 %v7177_v50, %v16952_v57 }
 0x3d3   :  { %v6789_v49 = vsel %vm6661_vm6, %v6597_v12, %v6725_v22  ;;  %v10067_v45 = vsel %vm10044_vm14, %v9645_v62, %v10066_v44  ;;  %v16955_v47 = vrot.slane %v7186_v13, 9  ;;  %v9075_v7 = vmax.f32 %v7185_v17, %v16953_v35 }
 0x3d4   :  { %vm6660_vm7 = vcmp.gt.f32.partialorder %v6596_v48, 0.0  ;;  %v10068_v0 = vsel %vm10046_vm15, %v9649_v20, %v10067_v45  ;;  %v7221_v59 = vcombine.high %v6789_v49, %v6789_v49  ;;  %v7228_v60 = vrot.slane %v6789_v49, %v22115_v18 }
 0x3d5   :  { %v6724_v51 = vmul.f32 0.01, %v6596_v48  ;;  %v10175_v30 = vsel %vm10169_vm3, %v10068_v0, 0.0  ;;  %v9076_v27 = vmax.f32 %v7184_v19, %v16954_v14  ;;  %v6599_v11 = vadd.f32 %v19241_v38, %v22110_v52 }
 0x3d6   :  { %v19242_v40 = vadd.f32 %v22234_v33, %v21836_v36  ;;  %v22478_v62 = vadd.f32 %v10175_v30, %v22394_v23  ;;  %v7235_v53 = vrot.slane %v7221_v59, %v22115_v18  ;;  %v7236_v50 = vcombine.high %v7228_v60, %v7228_v60 }
 0x3d7   :  { %v16964_v12 = vrot.slane %v7228_v60, 9  ;;  %v6788_v20 = vsel %vm6660_vm7, %v6596_v48, %v6724_v51  ;;  %vm6663_vm9 = vcmp.gt.f32.partialorder %v6599_v11, 0.0  ;;  %v6727_v17 = vmul.f32 0.01, %v6599_v11 }
 0x3d8   :  { %v6598_v57 = vadd.f32 %v19242_v40, %v22110_v52  ;;  %v7237_v22 = vcombine.high %v7235_v53, %v7235_v53  ;;  %v16965_v2 = vrot.slane %v7236_v50, 9  ;;  %v16966_v19 = vrot.slane %v7235_v53, 9 }
 0x3d9   :  { %v9086_v35 = vmax.f32 %v7228_v60, %v16964_v12  ;;  %v9077_v38 = vmax.f32 %v7186_v13, %v16955_v47  ;;  %v7204_v14 = vcombine.high %v6788_v20, %v6788_v20  ;;  %v7211_v36 = vrot.slane %v6788_v20, %v22115_v18  ;;  %v22493_v60 = vpop.f32.mrb[42].mxu0 }
 0x3da   :  { %v6791_v33 = vsel %vm6663_vm9, %v6599_v11, %v6727_v17  ;;  %v16967_v23 = vrot.slane %v7237_v22, 9  ;;  %v9087_v30 = vmax.f32 %v7236_v50, %v16965_v2  ;;  %v9088_v44 = vmax.f32 %v7235_v53, %v16966_v19  ;;  %v22495_v53 = vpop.f32.mrb[43].mxu0 }
 0x3db   :  { %v22484_v49 = vmax.f32 %v22438_v43, %v9086_v35  ;;  %v7218_v48 = vrot.slane %v7204_v14, %v22115_v18  ;;  %v7219_v45 = vcombine.high %v7211_v36, %v7211_v36  ;;  %v16960_v0 = vrot.slane %v7211_v36, 9 }
 0x3dc   :  { %vm6662_vm0 = vcmp.gt.f32.partialorder %v6598_v57, 0.0  ;;  %v9089_v52 = vmax.f32 %v7237_v22, %v16967_v23  ;;  %v22488_v59 = vmax.f32 %v22440_v9, %v9087_v30  ;;  %v22491_v13 = vmax.f32 %v22451_v54, %v9088_v44 }
 0x3dd   :  { %27657 = vst [vmem:[#allocation88_spill] sm:$0xff] %v22484_v49  ;;  %v7255_v47 = vcombine.high %v6791_v33, %v6791_v33  ;;  %v7220_v51 = vcombine.high %v7218_v48, %v7218_v48  ;;  %v16961_v11 = vrot.slane %v7219_v45, 9  ;;  %v16962_v40 = vrot.slane %v7218_v48, 9 }
 0x3de   :  { %27658 = vst [vmem:[#allocation89_spill] sm:$0xff] %v22488_v59  ;;  %27659 = vst [vmem:[#allocation90_spill] sm:$0xff] %v22491_v13  ;;  %v9082_v43 = vmax.f32 %v7211_v36, %v16960_v0  ;;  %v22497_v50 = vmax.f32 %v9081_v32, %v9089_v52  ;;  %v9669_v12 = vrot.slane %v22484_v49, %v22125_v34 }
 0x3df   :  { %v9673_v9 = vrot.slane %v22488_v59, %v22125_v34  ;;  %v7262_v54 = vrot.slane %v6791_v33, %v22115_v18  ;;  %v16963_v20 = vrot.slane %v7220_v51, 9  ;;  %v9083_v17 = vmax.f32 %v7219_v45, %v16961_v11 }
 0x3e0   :  { %27660 = vst [vmem:[#allocation91_spill] sm:$0xff] %v22497_v50  ;;  %v9084_v22 = vmax.f32 %v7218_v48, %v16962_v40  ;;  %v22504_v2 = vmax.f32 %v9074_v42, %v9082_v43  ;;  %v9677_v19 = vrot.slane %v22491_v13, %v22125_v34  ;;  %v7269_v35 = vrot.slane %v7255_v47, %v22115_v18  ;;  %v27665_v40 = vld [vmem:[#allocation7_spill] sm:$0xff] }
 0x3e1   :  { %v7270_v32 = vcombine.high %v7262_v54, %v7262_v54  ;;  %v16972_v14 = vrot.slane %v7262_v54, 9  ;;  %v9681_v36 = vrot.slane %v22497_v50, %v22125_v34  ;;  %v9085_v23 = vmax.f32 %v7220_v51, %v16963_v20  ;;  %v27666_v43 = vld [vmem:[#allocation59_spill] sm:$0xff]  ;;  %v27668_v50 = vld [vmem:[#allocation60_spill] sm:$0xff] }
 0x3e2   :  { %27661 = vst [vmem:[#allocation92_spill] sm:$0xff] %v22504_v2  ;;  %v22511_v30 = vmax.f32 %v9075_v7, %v9083_v17  ;;  %v22513_v44 = vmax.f32 %v9076_v27, %v9084_v22  ;;  %v9653_v33 = vrot.slane %v22504_v2, %v22125_v34  ;;  %v7271_v42 = vcombine.high %v7269_v35, %v7269_v35 }
 0x3e3   :  { %v16973_v48 = vrot.slane %v7270_v32, 9  ;;  %v16974_v45 = vrot.slane %v7269_v35, 9  ;;  %v22517_v0 = vmax.f32 %v9077_v38, %v9085_v23  ;;  %v6726_v11 = vmul.f32 0.01, %v6598_v57  ;;  %v27667_v23 = vld [vmem:[#allocation8_spill] sm:$0xff] }
 0x3e4   :  { %27662 = vst [vmem:[#allocation93_spill] sm:$0xff] %v22511_v30  ;;  %27663 = vst [vmem:[#allocation94_spill] sm:$0xff] %v22513_v44  ;;  %v9657_v52 = vrot.slane %v22511_v30, %v22125_v34  ;;  %v9661_v47 = vrot.slane %v22513_v44, %v22125_v34  ;;  %v16975_v51 = vrot.slane %v7271_v42, 9  ;;  %v22523_v7 = vmax.f32 %v7262_v54, %v16972_v14  ;;  %v22539_v14 = vpop.f32.mrb[44].mxu0 }
 0x3e5   :  { %27664 = vst [vmem:[#allocation95_spill] sm:$0xff] %v22517_v0  ;;  %v22525_v27 = vmax.f32 %v7270_v32, %v16973_v48  ;;  %v19243_v20 = vadd.f32 %v27666_v43, %v27665_v40  ;;  %v9665_v17 = vrot.slane %v22517_v0, %v22125_v34  ;;  %v6790_v22 = vsel %vm6662_vm0, %v6598_v57, %v6726_v11 }
 0x3e6   :  { %v10069_v38 = vsel %vm10034_vm8, %v9657_v52, %v9653_v33  ;;  %v19244_v13 = vadd.f32 %v27668_v50, %v27667_v23  ;;  %v22536_v49 = vmax.f32 %v7269_v35, %v16974_v45  ;;  %v7238_v54 = vcombine.high %v6790_v22, %v6790_v22  ;;  %v22545_v33 = vld [vmem:[%s27177_s2] ss:$0 sm:$0xff]  ;;  %v27669_v52 = vld [vmem:[#allocation9_spill] sm:$0xff]  ;;  %v22551_v45 = vpop.f32.mrb[45].mxu0 }
 0x3e7   :  { %v10070_v59 = vsel %vm10036_vm10, %v9661_v47, %v10069_v38  ;;  %v7245_v32 = vrot.slane %v6790_v22, %v22115_v18  ;;  %v6601_v57 = vadd.f32 %v22545_v33, %v19243_v20  ;;  %v19245_v35 = vadd.f32 %v22254_v25, %v27669_v52 }
 0x3e8   :  { %v10071_v48 = vsel %vm10038_vm11, %v9665_v17, %v10070_v59  ;;  %v6600_v50 = vadd.f32 %v22545_v33, %v19244_v13  ;;  %v7252_v11 = vrot.slane %v7238_v54, %v22115_v18  ;;  %v9097_v23 = vmax.f32 %v7271_v42, %v16975_v51 }
 0x3e9   :  { %v10072_v47 = vsel %vm10040_vm12, %v9669_v12, %v10071_v48  ;;  %v7253_v40 = vcombine.high %v7245_v32, %v7245_v32  ;;  %v16968_v59 = vrot.slane %v7245_v32, 9  ;;  %vm6665_vm1 = vcmp.gt.f32.partialorder %v6601_v57, 0.0 }
 0x3ea   :  { %v10073_v43 = vsel %vm10042_vm13, %v9673_v9, %v10072_v47  ;;  %v6729_v17 = vmul.f32 0.01, %v6601_v57  ;;  %vm6664_vm2 = vcmp.gt.f32.partialorder %v6600_v50, 0.0  ;;  %v7254_v38 = vcombine.high %v7252_v11, %v7252_v11 }
 0x3eb   :  { %v10074_v20 = vsel %vm10044_vm14, %v9677_v19, %v10073_v43  ;;  %v16969_v13 = vrot.slane %v7253_v40, 9  ;;  %v16970_v22 = vrot.slane %v7252_v11, 9  ;;  %v6728_v0 = vmul.f32 0.01, %v6600_v50 }
 0x3ec   :  { %v10075_v25 = vsel %vm10046_vm15, %v9681_v36, %v10074_v20  ;;  %v6793_v52 = vsel %vm6665_vm1, %v6601_v57, %v6729_v17  ;;  %v16971_v54 = vrot.slane %v7254_v38, 9  ;;  %v9090_v48 = vmax.f32 %v7245_v32, %v16968_v59  ;;  %v27670_v17 = vld [vmem:[#allocation10_spill] sm:$0xff] }
 0x3ed   :  { %v10177_v12 = vsel %vm10169_vm3, %v10075_v25, 0.0  ;;  %v9091_v44 = vmax.f32 %v7253_v40, %v16969_v13  ;;  %v7289_v47 = vcombine.high %v6793_v52, %v6793_v52  ;;  %v7296_v30 = vrot.slane %v6793_v52, %v22115_v18 }
 0x3ee   :  { %v22560_v9 = vadd.f32 %v10177_v12, %v22478_v62  ;;  %v6792_v19 = vsel %vm6664_vm2, %v6600_v50, %v6728_v0  ;;  %v9092_v43 = vmax.f32 %v7252_v11, %v16970_v22  ;;  %v9093_v28 = vmax.f32 %v7254_v38, %v16971_v54 }
 0x3ef   :  { %v7272_v58 = vcombine.high %v6792_v19, %v6792_v19  ;;  %v7279_v36 = vrot.slane %v6792_v19, %v22115_v18  ;;  %v7303_v42 = vrot.slane %v7289_v47, %v22115_v18  ;;  %v7304_v51 = vcombine.high %v7296_v30, %v7296_v30 }
 0x3f0   :  { %v16980_v57 = vrot.slane %v7296_v30, 9  ;;  %v19246_v32 = vadd.f32 %v22260_v55, %v27670_v17  ;;  %v6603_v20 = vadd.f32 %v22545_v33, %v19245_v35 }
 0x3f1   :  { %v7286_v62 = vrot.slane %v7272_v58, %v22115_v18  ;;  %v7287_v40 = vcombine.high %v7279_v36, %v7279_v36  ;;  %v16976_v59 = vrot.slane %v7279_v36, 9  ;;  %v7305_v13 = vcombine.high %v7303_v42, %v7303_v42 }
 0x3f2   :  { %v16981_v0 = vrot.slane %v7304_v51, 9  ;;  %v16982_v50 = vrot.slane %v7303_v42, 9  ;;  %v9102_v11 = vmax.f32 %v7296_v30, %v16980_v57  ;;  %vm6667_vm4 = vcmp.gt.f32.partialorder %v6603_v20, 0.0 }
 0x3f3   :  { %v7288_v38 = vcombine.high %v7286_v62, %v7286_v62  ;;  %v16977_v22 = vrot.slane %v7287_v40, 9  ;;  %v16978_v25 = vrot.slane %v7286_v62, 9  ;;  %v9098_v52 = vmax.f32 %v7279_v36, %v16976_v59  ;;  %v22581_v36 = vpop.f32.mrb[46].mxu0 }
 0x3f4   :  { %v16983_v12 = vrot.slane %v7305_v13, 9  ;;  %v9103_v54 = vmax.f32 %v7304_v51, %v16981_v0  ;;  %v9104_v47 = vmax.f32 %v7303_v42, %v16982_v50  ;;  %v22571_v19 = vmax.f32 %v22523_v7, %v9102_v11  ;;  %v27679_v50 = vld [vmem:[#allocation11_spill] sm:$0xff] }
 0x3f5   :  { %v16979_v55 = vrot.slane %v7288_v38, 9  ;;  %v9099_v58 = vmax.f32 %v7287_v40, %v16977_v22  ;;  %v9100_v17 = vmax.f32 %v7286_v62, %v16978_v25  ;;  %v22573_v29 = vmax.f32 %v9090_v48, %v9098_v52  ;;  %v22595_v40 = vpop.f32.mrb[47].mxu0 }
 0x3f6   :  { %27671 = vst [vmem:[#allocation7_spill] sm:$0xff] %v22571_v19  ;;  %v9105_v35 = vmax.f32 %v7305_v13, %v16983_v12  ;;  %v22576_v6 = vmax.f32 %v22525_v27, %v9103_v54  ;;  %v22579_v30 = vmax.f32 %v22536_v49, %v9104_v47  ;;  %v9701_v42 = vrot.slane %v22571_v19, %v22125_v34 }
 0x3f7   :  { %27672 = vst [vmem:[#allocation59_spill] sm:$0xff] %v22573_v29  ;;  %v9101_v7 = vmax.f32 %v7288_v38, %v16979_v55  ;;  %v22585_v51 = vmax.f32 %v9091_v44, %v9099_v58  ;;  %v22587_v57 = vmax.f32 %v9092_v43, %v9100_v17  ;;  %v9685_v49 = vrot.slane %v22573_v29, %v22125_v34  ;;  %v27680_v38 = vld [vmem:[#allocation12_spill] sm:$0xff]  ;;  %v22619_v58 = vpop.f32.mrb[48].mxu0 }
 0x3f8   :  { %27673 = vst [vmem:[#allocation8_spill] sm:$0xff] %v22576_v6  ;;  %27674 = vst [vmem:[#allocation60_spill] sm:$0xff] %v22579_v30  ;;  %v22589_v48 = vmax.f32 %v9097_v23, %v9105_v35  ;;  %v9705_v27 = vrot.slane %v22576_v6, %v22125_v34  ;;  %v6731_v62 = vmul.f32 0.01, %v6603_v20  ;;  %v6602_v23 = vadd.f32 %v22545_v33, %v19246_v32 }
 0x3f9   :  { %27675 = vst [vmem:[#allocation9_spill] sm:$0xff] %v22585_v51  ;;  %27676 = vst [vmem:[#allocation10_spill] sm:$0xff] %v22587_v57  ;;  %v22597_v59 = vmax.f32 %v9093_v28, %v9101_v7  ;;  %v9689_v13 = vrot.slane %v22585_v51, %v22125_v34  ;;  %v9693_v44 = vrot.slane %v22587_v57, %v22125_v34 }
 0x3fa   :  { %27677 = vst [vmem:[#allocation96_spill] sm:$0xff] %v22589_v48  ;;  %v9709_v43 = vrot.slane %v22579_v30, %v22125_v34  ;;  %v6795_v0 = vsel %vm6667_vm4, %v6603_v20, %v6731_v62  ;;  %v19247_v11 = vadd.f32 %v22282_v5, %v27679_v50  ;;  %v19248_v28 = vadd.f32 %v22290_v10, %v27680_v38 }
 0x3fb   :  { %27678 = vst [vmem:[#allocation97_spill] sm:$0xff] %v22597_v59  ;;  %v9697_v22 = vrot.slane %v22597_v59, %v22125_v34  ;;  %v10076_v25 = vsel %vm10034_vm8, %v9689_v13, %v9685_v49  ;;  %v7323_v52 = vcombine.high %v6795_v0, %v6795_v0  ;;  %v7330_v12 = vrot.slane %v6795_v0, %v22115_v18 }
 0x3fc   :  { %v10077_v32 = vsel %vm10036_vm10, %v9693_v44, %v10076_v25  ;;  %vm6666_vm5 = vcmp.gt.f32.partialorder %v6602_v23, 0.0  ;;  %v6730_v54 = vmul.f32 0.01, %v6602_v23  ;;  %v6605_v20 = vadd.f32 %v22545_v33, %v19247_v11 }
 0x3fd   :  { %v10078_v47 = vsel %vm10038_vm11, %v9697_v22, %v10077_v32  ;;  %v7337_v5 = vrot.slane %v7323_v52, %v22115_v18  ;;  %v7338_v55 = vcombine.high %v7330_v12, %v7330_v12  ;;  %v16988_v10 = vrot.slane %v7330_v12, 9 }
 0x3fe   :  { %v9713_v17 = vrot.slane %v22589_v48, %v22125_v34  ;;  %v10079_v35 = vsel %vm10040_vm12, %v9701_v42, %v10078_v47  ;;  %v6794_v7 = vsel %vm6666_vm5, %v6602_v23, %v6730_v54  ;;  %v6733_v49 = vmul.f32 0.01, %v6605_v20 }
 0x3ff   :  { %v10080_v62 = vsel %vm10042_vm13, %v9705_v27, %v10079_v35  ;;  %v7339_v13 = vcombine.high %v7337_v5, %v7337_v5  ;;  %v16989_v44 = vrot.slane %v7338_v55, 9  ;;  %v16990_v0 = vrot.slane %v7337_v5, 9 }
 0x400   :  { %v10081_v50 = vsel %vm10044_vm14, %v9709_v43, %v10080_v62  ;;  %v7306_v11 = vcombine.high %v6794_v7, %v6794_v7  ;;  %v7313_v38 = vrot.slane %v6794_v7, %v22115_v18  ;;  %vm6669_vm6 = vcmp.gt.f32.partialorder %v6605_v20, 0.0 }
 0x401   :  { %v10082_v22 = vsel %vm10046_vm15, %v9713_v17, %v10081_v50  ;;  %v16991_v25 = vrot.slane %v7339_v13, 9  ;;  %v9110_v52 = vmax.f32 %v7330_v12, %v16988_v10  ;;  %v9111_v32 = vmax.f32 %v7338_v55, %v16989_v44  ;;  %v22634_v50 = vpop.f32.mrb[49].mxu0 }
 0x402   :  { %v10179_v42 = vsel %vm10169_vm3, %v10082_v22, 0.0  ;;  %v7320_v23 = vrot.slane %v7306_v11, %v22115_v18  ;;  %v7321_v54 = vcombine.high %v7313_v38, %v7313_v38  ;;  %v16984_v27 = vrot.slane %v7313_v38, 9 }
 0x403   :  { %v22631_v47 = vadd.f32 %v10179_v42, %v22560_v9  ;;  %v9112_v35 = vmax.f32 %v7337_v5, %v16990_v0  ;;  %v6797_v43 = vsel %vm6669_vm6, %v6605_v20, %v6733_v49  ;;  %v6604_v62 = vadd.f32 %v22545_v33, %v19248_v28  ;;  %v27681_v9 = vld [vmem:[#allocation13_spill] sm:$0xff] }
 0x404   :  { %v9113_v7 = vmax.f32 %v7339_v13, %v16991_v25  ;;  %v7322_v48 = vcombine.high %v7320_v23, %v7320_v23  ;;  %v16985_v30 = vrot.slane %v7321_v54, 9  ;;  %v16986_v17 = vrot.slane %v7320_v23, 9 }
 0x405   :  { %v7357_v12 = vcombine.high %v6797_v43, %v6797_v43  ;;  %v7364_v55 = vrot.slane %v6797_v43, %v22115_v18  ;;  %vm6668_vm7 = vcmp.gt.f32.partialorder %v6604_v62, 0.0  ;;  %v6732_v10 = vmul.f32 0.01, %v6604_v62 }
 0x406   :  { %v16987_v44 = vrot.slane %v7322_v48, 9  ;;  %v9106_v11 = vmax.f32 %v7313_v38, %v16984_v27  ;;  %v9107_v22 = vmax.f32 %v7321_v54, %v16985_v30  ;;  %v19249_v5 = vadd.f32 %v22300_v3, %v27681_v9 }
 0x407   :  { %v7371_v20 = vrot.slane %v7357_v12, %v22115_v18  ;;  %v7372_v28 = vcombine.high %v7364_v55, %v7364_v55  ;;  %v16996_v49 = vrot.slane %v7364_v55, 9  ;;  %v6796_v13 = vsel %vm6668_vm7, %v6604_v62, %v6732_v10 }
 0x408   :  { %v9108_v0 = vmax.f32 %v7320_v23, %v16986_v17  ;;  %v7340_v25 = vcombine.high %v6796_v13, %v6796_v13  ;;  %v7347_v42 = vrot.slane %v6796_v13, %v22115_v18  ;;  %v6607_v6 = vadd.f32 %v22545_v33, %v19249_v5 }
 0x409   :  { %v7373_v43 = vcombine.high %v7371_v20, %v7371_v20  ;;  %v16997_v19 = vrot.slane %v7372_v28, 9  ;;  %v16998_v59 = vrot.slane %v7371_v20, 9  ;;  %v9118_v57 = vmax.f32 %v7364_v55, %v16996_v49 }
 0x40a   :  { %v9109_v38 = vmax.f32 %v7322_v48, %v16987_v44  ;;  %v7354_v30 = vrot.slane %v7340_v25, %v22115_v18  ;;  %v7355_v54 = vcombine.high %v7347_v42, %v7347_v42  ;;  %v16992_v3 = vrot.slane %v7347_v42, 9  ;;  %v22649_v48 = vpop.f32.mrb[50].mxu0 }
 0x40b   :  { %v16999_v27 = vrot.slane %v7373_v43, 9  ;;  %v9119_v12 = vmax.f32 %v7372_v28, %v16997_v19  ;;  %v9120_v9 = vmax.f32 %v7371_v20, %v16998_v59  ;;  %v22643_v51 = vmax.f32 %v9110_v52, %v9118_v57 }
 0x40c   :  { %v7356_v23 = vcombine.high %v7354_v30, %v7354_v30  ;;  %v16993_v62 = vrot.slane %v7355_v54, 9  ;;  %v16994_v17 = vrot.slane %v7354_v30, 9  ;;  %v9114_v10 = vmax.f32 %v7347_v42, %v16992_v3 }
 0x40d   :  { %27682 = vst [vmem:[#allocation11_spill] sm:$0xff] %v22643_v51  ;;  %v9121_v13 = vmax.f32 %v7373_v43, %v16999_v27  ;;  %v22645_v5 = vmax.f32 %v9111_v32, %v9119_v12  ;;  %v22647_v29 = vmax.f32 %v9112_v35, %v9120_v9  ;;  %vm6671_vm9 = vcmp.gt.f32.partialorder %v6607_v6, 0.0  ;;  %v22659_v32 = vpop.f32.mrb[51].mxu0  ;;  %v27689_v43 = vld [vmem:[#allocation14_spill] sm:$0xff] }
 0x40e   :  { %v16995_v55 = vrot.slane %v7356_v23, 9  ;;  %v9115_v44 = vmax.f32 %v7355_v54, %v16993_v62  ;;  %v9116_v49 = vmax.f32 %v7354_v30, %v16994_v17  ;;  %v22651_v25 = vmax.f32 %v9106_v11, %v9114_v10  ;;  %v27690_v54 = vld [vmem:[#allocation15_spill] sm:$0xff]  ;;  %v27692_v62 = vld [vmem:[#allocation16_spill] sm:$0xff] }
 0x40f   :  { %27683 = vst [vmem:[#allocation12_spill] sm:$0xff] %v22645_v5  ;;  %27684 = vst [vmem:[#allocation13_spill] sm:$0xff] %v22647_v29  ;;  %v22653_v19 = vmax.f32 %v9113_v7, %v9121_v13  ;;  %v9733_v57 = vrot.slane %v22643_v51, %v22125_v34  ;;  %v9737_v59 = vrot.slane %v22645_v5, %v22125_v34  ;;  %v6735_v52 = vmul.f32 0.01, %v6607_v6  ;;  %v27694_v13 = vld [vmem:[#allocation17_spill] sm:$0xff] }
 0x410   :  { %27685 = vst [vmem:[#allocation98_spill] sm:$0xff] %v22651_v25  ;;  %v9741_v35 = vrot.slane %v22647_v29, %v22125_v34  ;;  %v9117_v20 = vmax.f32 %v7356_v23, %v16995_v55  ;;  %v22663_v28 = vmax.f32 %v9107_v22, %v9115_v44  ;;  %v22665_v42 = vmax.f32 %v9108_v0, %v9116_v49  ;;  %v27695_v55 = vld [vmem:[#allocation70_spill] sm:$0xff] }
 0x411   :  { %27686 = vst [vmem:[#allocation99_spill] sm:$0xff] %v22653_v19  ;;  %v9717_v7 = vrot.slane %v22651_v25, %v22125_v34  ;;  %v6799_v11 = vsel %vm6671_vm9, %v6607_v6, %v6735_v52  ;;  %v19250_v30 = vadd.f32 %v22306_v46, %v27689_v43  ;;  %v19251_v3 = vadd.f32 %v22312_v56, %v27690_v54  ;;  %v27693_v46 = vld [vmem:[#allocation69_spill] sm:$0xff] }
 0x412   :  { %27687 = vst [vmem:[#allocation100_spill] sm:$0xff] %v22663_v28  ;;  %27688 = vst [vmem:[#allocation101_spill] sm:$0xff] %v22665_v42  ;;  %v22674_v27 = vmax.f32 %v9109_v38, %v9117_v20  ;;  %v9721_v12 = vrot.slane %v22663_v28, %v22125_v34  ;;  %v9725_v22 = vrot.slane %v22665_v42, %v22125_v34 }
 0x413   :  { %v7391_v0 = vcombine.high %v6799_v11, %v6799_v11  ;;  %v7398_v9 = vrot.slane %v6799_v11, %v22115_v18  ;;  %v6606_v23 = vadd.f32 %v22545_v33, %v19250_v30  ;;  %v6609_v6 = vadd.f32 %v22545_v33, %v19251_v3 }
 0x414   :  { %27691 = vst [vmem:[#allocation14_spill] sm:$0xff] %v22674_v27  ;;  %v19252_v17 = vadd.f32 %v27693_v46, %v27692_v62  ;;  %v9729_v56 = vrot.slane %v22674_v27, %v22125_v34  ;;  %v10083_v38 = vsel %vm10034_vm8, %v9721_v12, %v9717_v7  ;;  %v19253_v44 = vadd.f32 %v27695_v55, %v27694_v13 }
 0x415   :  { %v7405_v10 = vrot.slane %v7391_v0, %v22115_v18  ;;  %v10084_v49 = vsel %vm10036_vm10, %v9725_v22, %v10083_v38  ;;  %v7406_v52 = vcombine.high %v7398_v9, %v7398_v9  ;;  %v17004_v20 = vrot.slane %v7398_v9, 9 }
 0x416   :  { %vm6670_vm0 = vcmp.gt.f32.partialorder %v6606_v23, 0.0  ;;  %v10085_v11 = vsel %vm10038_vm11, %v9729_v56, %v10084_v49  ;;  %v6734_v54 = vmul.f32 0.01, %v6606_v23  ;;  %v9745_v3 = vrot.slane %v22653_v19, %v22125_v34  ;;  %v22699_v49 = vpop.f32.mrb[52].mxu0 }
 0x417   :  { %v7407_v43 = vcombine.high %v7405_v10, %v7405_v10  ;;  %v17006_v30 = vrot.slane %v7405_v10, 9  ;;  %v10086_v7 = vsel %vm10040_vm12, %v9733_v57, %v10085_v11  ;;  %v17005_v12 = vrot.slane %v7406_v52, 9 }
 0x418   :  { %v9126_v0 = vmax.f32 %v7398_v9, %v17004_v20  ;;  %v10087_v62 = vsel %vm10042_vm13, %v9737_v59, %v10086_v7  ;;  %v6798_v13 = vsel %vm6670_vm0, %v6606_v23, %v6734_v54  ;;  %vm6673_vm1 = vcmp.gt.f32.partialorder %v6609_v6, 0.0  ;;  %v22703_v9 = vpop.f32.mrb[53].mxu0 }
 0x419   :  { %v17007_v46 = vrot.slane %v7407_v43, 9  ;;  %v10088_v22 = vsel %vm10044_vm14, %v9741_v35, %v10087_v62  ;;  %v9128_v38 = vmax.f32 %v7405_v10, %v17006_v30  ;;  %v7374_v55 = vcombine.high %v6798_v13, %v6798_v13 }
 0x41a   :  { %v7381_v56 = vrot.slane %v6798_v13, %v22115_v18  ;;  %v10089_v29 = vsel %vm10046_vm15, %v9745_v3, %v10088_v22  ;;  %v9127_v19 = vmax.f32 %v7406_v52, %v17005_v12  ;;  %v6737_v5 = vmul.f32 0.01, %v6609_v6 }
 0x41b   :  { %v6608_v57 = vadd.f32 %v22545_v33, %v19252_v17  ;;  %v10181_v59 = vsel %vm10169_vm3, %v10089_v29, 0.0  ;;  %v7388_v23 = vrot.slane %v7374_v55, %v22115_v18  ;;  %v9129_v54 = vmax.f32 %v7407_v43, %v17007_v46 }
 0x41c   :  { %v7389_v20 = vcombine.high %v7381_v56, %v7381_v56  ;;  %v17000_v35 = vrot.slane %v7381_v56, 9  ;;  %v22708_v10 = vadd.f32 %v10181_v59, %v22631_v47  ;;  %v6801_v11 = vsel %vm6673_vm1, %v6609_v6, %v6737_v5 }
 0x41d   :  { %vm6672_vm2 = vcmp.gt.f32.partialorder %v6608_v57, 0.0  ;;  %v6736_v30 = vmul.f32 0.01, %v6608_v57  ;;  %v7390_v52 = vcombine.high %v7388_v23, %v7388_v23  ;;  %v17002_v7 = vrot.slane %v7388_v23, 9 }
 0x41e   :  { %v17001_v3 = vrot.slane %v7389_v20, 9  ;;  %v7425_v17 = vcombine.high %v6801_v11, %v6801_v11  ;;  %v7432_v12 = vrot.slane %v6801_v11, %v22115_v18  ;;  %v6611_v29 = vadd.f32 %v22545_v33, %v19253_v44 }
 0x41f   :  { %v6800_v62 = vsel %vm6672_vm2, %v6608_v57, %v6736_v30  ;;  %v17003_v13 = vrot.slane %v7390_v52, 9  ;;  %v9122_v22 = vmax.f32 %v7381_v56, %v17000_v35  ;;  %v9124_v43 = vmax.f32 %v7388_v23, %v17002_v7 }
 0x420   :  { %v9123_v55 = vmax.f32 %v7389_v20, %v17001_v3  ;;  %v7408_v51 = vcombine.high %v6800_v62, %v6800_v62  ;;  %v7439_v47 = vrot.slane %v7425_v17, %v22115_v18  ;;  %v7440_v59 = vcombine.high %v7432_v12, %v7432_v12 }
 0x421   :  { %v17012_v5 = vrot.slane %v7432_v12, 9  ;;  %v7415_v6 = vrot.slane %v6800_v62, %v22115_v18  ;;  %vm6675_vm4 = vcmp.gt.f32.partialorder %v6611_v29, 0.0  ;;  %v6739_v27 = vmul.f32 0.01, %v6611_v29 }
 0x422   :  { %v7422_v46 = vrot.slane %v7408_v51, %v22115_v18  ;;  %v7441_v42 = vcombine.high %v7439_v47, %v7439_v47  ;;  %v17013_v11 = vrot.slane %v7440_v59, 9  ;;  %v17014_v57 = vrot.slane %v7439_v47, 9 }
 0x423   :  { %v9134_v30 = vmax.f32 %v7432_v12, %v17012_v5  ;;  %v7423_v44 = vcombine.high %v7415_v6, %v7415_v6  ;;  %v17008_v56 = vrot.slane %v7415_v6, 9  ;;  %v9125_v51 = vmax.f32 %v7390_v52, %v17003_v13  ;;  %v22722_v12 = vpop.f32.mrb[54].mxu0 }
 0x424   :  { %v7424_v28 = vcombine.high %v7422_v46, %v7422_v46  ;;  %v17010_v20 = vrot.slane %v7422_v46, 9  ;;  %v17015_v35 = vrot.slane %v7441_v42, 9  ;;  %v9135_v3 = vmax.f32 %v7440_v59, %v17013_v11  ;;  %v27707_v11 = vld [vmem:[#allocation20_spill] sm:$0xff] }
 0x425   :  { %v9136_v17 = vmax.f32 %v7439_v47, %v17014_v57  ;;  %v22716_v25 = vmax.f32 %v9126_v0, %v9134_v30  ;;  %v17009_v63 = vrot.slane %v7423_v44, 9  ;;  %v9130_v23 = vmax.f32 %v7415_v6, %v17008_v56  ;;  %v27704_v6 = vld [vmem:[#allocation18_spill] sm:$0xff] }
 0x426   :  { %v17011_v62 = vrot.slane %v7424_v28, 9  ;;  %v9132_v7 = vmax.f32 %v7422_v46, %v17010_v20  ;;  %v9137_v21 = vmax.f32 %v7441_v42, %v17015_v35  ;;  %v22718_v1 = vmax.f32 %v9127_v19, %v9135_v3 }
 0x427   :  { %27696 = vst [vmem:[#allocation15_spill] sm:$0xff] %v22716_v25  ;;  %v22720_v41 = vmax.f32 %v9128_v38, %v9136_v17  ;;  %v9131_v5 = vmax.f32 %v7423_v44, %v17009_v63  ;;  %v22724_v16 = vmax.f32 %v9122_v22, %v9130_v23  ;;  %v9765_v47 = vrot.slane %v22716_v25, %v22125_v34  ;;  %v22735_v38 = vpop.f32.mrb[55].mxu0 }
 0x428   :  { %27697 = vst [vmem:[#allocation16_spill] sm:$0xff] %v22718_v1  ;;  %v9133_v2 = vmax.f32 %v7424_v28, %v17011_v62  ;;  %v22726_v59 = vmax.f32 %v9124_v43, %v9132_v7  ;;  %v22728_v0 = vmax.f32 %v9129_v54, %v9137_v21  ;;  %v9769_v42 = vrot.slane %v22718_v1, %v22125_v34  ;;  %v27708_v62 = vld [vmem:[#allocation21_spill] sm:$0xff] }
 0x429   :  { %27698 = vst [vmem:[#allocation69_spill] sm:$0xff] %v22720_v41  ;;  %27699 = vst [vmem:[#allocation17_spill] sm:$0xff] %v22724_v16  ;;  %v6803_v19 = vsel %vm6675_vm4, %v6611_v29, %v6739_v27  ;;  %v9773_v63 = vrot.slane %v22720_v41, %v22125_v34  ;;  %v22739_v28 = vmax.f32 %v9123_v55, %v9131_v5  ;;  %v27705_v27 = vld [vmem:[#allocation71_spill] sm:$0xff] }
 0x42a   :  { %27700 = vst [vmem:[#allocation70_spill] sm:$0xff] %v22726_v59  ;;  %27701 = vst [vmem:[#allocation102_spill] sm:$0xff] %v22728_v0  ;;  %v22741_v52 = vmax.f32 %v9125_v51, %v9133_v2  ;;  %v9749_v21 = vrot.slane %v22724_v16, %v22125_v34  ;;  %v9757_v54 = vrot.slane %v22726_v59, %v22125_v34  ;;  %v27706_v2 = vld [vmem:[#allocation19_spill] sm:$0xff] }
 0x42b   :  { %27702 = vst [vmem:[#allocation103_spill] sm:$0xff] %v22739_v28  ;;  %v7459_v13 = vcombine.high %v6803_v19, %v6803_v19  ;;  %v7466_v22 = vrot.slane %v6803_v19, %v22115_v18  ;;  %v19254_v29 = vadd.f32 %v27705_v27, %v27704_v6  ;;  %v9753_v43 = vrot.slane %v22739_v28, %v22125_v34  ;;  %v22771_v6 = vpop.f32.mrb[56].mxu0 }
 0x42c   :  { %27703 = vst [vmem:[#allocation104_spill] sm:$0xff] %v22741_v52  ;;  %v9761_v55 = vrot.slane %v22741_v52, %v22125_v34  ;;  %v19255_v46 = vadd.f32 %v22341_v31, %v27706_v2  ;;  %v19256_v57 = vadd.f32 %v22345_v4, %v27707_v11  ;;  %v9777_v35 = vrot.slane %v22728_v0, %v22125_v34 }
 0x42d   :  { %v7473_v30 = vrot.slane %v7459_v13, %v22115_v18  ;;  %v7474_v44 = vcombine.high %v7466_v22, %v7466_v22  ;;  %v17020_v56 = vrot.slane %v7466_v22, 9  ;;  %v6610_v20 = vadd.f32 %v22545_v33, %v19254_v29 }
 0x42e   :  { %v10090_v3 = vsel %vm10034_vm8, %v9753_v43, %v9749_v21  ;;  %v6613_v17 = vadd.f32 %v22545_v33, %v19255_v46  ;;  %v22766_v23 = vadd.f32 %v22371_v26, %v27708_v62  ;;  %v6612_v13 = vadd.f32 %v22545_v33, %v19256_v57  ;;  %v22777_v62 = vpop.f32.mrb[57].mxu0 }
 0x42f   :  { %v10091_v31 = vsel %vm10036_vm10, %v9757_v54, %v10090_v3  ;;  %v7475_v4 = vcombine.high %v7473_v30, %v7473_v30  ;;  %v17021_v7 = vrot.slane %v7474_v44, 9  ;;  %v17022_v51 = vrot.slane %v7473_v30, 9 }
 0x430   :  { %v10092_v5 = vsel %vm10038_vm11, %v9761_v55, %v10091_v31  ;;  %vm6674_vm5 = vcmp.gt.f32.partialorder %v6610_v20, 0.0  ;;  %v6738_v19 = vmul.f32 0.01, %v6610_v20  ;;  %v9142_v29 = vmax.f32 %v7466_v22, %v17020_v56 }
 0x431   :  { %v10093_v21 = vsel %vm10040_vm12, %v9765_v47, %v10092_v5  ;;  %v17023_v27 = vrot.slane %v7475_v4, 9  ;;  %v9143_v43 = vmax.f32 %v7474_v44, %v17021_v7  ;;  %vm6677_vm6 = vcmp.gt.f32.partialorder %v6613_v17, 0.0 }
 0x432   :  { %v10094_v26 = vsel %vm10042_vm13, %v9769_v42, %v10093_v21  ;;  %v6802_v2 = vsel %vm6674_vm5, %v6610_v20, %v6738_v19  ;;  %v6741_v54 = vmul.f32 0.01, %v6613_v17  ;;  %v9144_v11 = vmax.f32 %v7473_v30, %v17022_v51 }
 0x433   :  { %v10095_v46 = vsel %vm10044_vm14, %v9773_v63, %v10094_v26  ;;  %v7442_v55 = vcombine.high %v6802_v2, %v6802_v2  ;;  %v7449_v3 = vrot.slane %v6802_v2, %v22115_v18  ;;  %vm6676_vm7 = vcmp.gt.f32.partialorder %v6612_v13, 0.0 }
 0x434   :  { %v10096_v57 = vsel %vm10046_vm15, %v9777_v35, %v10095_v46  ;;  %v6805_v31 = vsel %vm6677_vm6, %v6613_v17, %v6741_v54  ;;  %v6740_v47 = vmul.f32 0.01, %v6612_v13  ;;  %v9145_v51 = vmax.f32 %v7475_v4, %v17023_v27 }
 0x435   :  { %v10183_v22 = vsel %vm10169_vm3, %v10096_v57, 0.0  ;;  %v7456_v42 = vrot.slane %v7442_v55, %v22115_v18  ;;  %v7457_v44 = vcombine.high %v7449_v3, %v7449_v3  ;;  %v17016_v56 = vrot.slane %v7449_v3, 9 }
 0x436   :  { %v22783_v20 = vadd.f32 %v10183_v22, %v22708_v10  ;;  %v7493_v63 = vcombine.high %v6805_v31, %v6805_v31  ;;  %v7500_v30 = vrot.slane %v6805_v31, %v22115_v18  ;;  %v6804_v7 = vsel %vm6676_vm7, %v6612_v13, %v6740_v47 }
 0x437   :  { %v7458_v5 = vcombine.high %v7456_v42, %v7456_v42  ;;  %v17017_v19 = vrot.slane %v7457_v44, 9  ;;  %v17018_v35 = vrot.slane %v7456_v42, 9  ;;  %v7476_v2 = vcombine.high %v6804_v7, %v6804_v7 }
 0x438   :  { %v7507_v17 = vrot.slane %v7493_v63, %v22115_v18  ;;  %v7508_v21 = vcombine.high %v7500_v30, %v7500_v30  ;;  %v17028_v26 = vrot.slane %v7500_v30, 9  ;;  %v9138_v46 = vmax.f32 %v7449_v3, %v17016_v56 }
 0x439   :  { %v17019_v54 = vrot.slane %v7458_v5, 9  ;;  %v9139_v55 = vmax.f32 %v7457_v44, %v17017_v19  ;;  %v7483_v57 = vrot.slane %v6804_v7, %v22115_v18  ;;  %v9140_v31 = vmax.f32 %v7456_v42, %v17018_v35 }
 0x43a   :  { %v7509_v10 = vcombine.high %v7507_v17, %v7507_v17  ;;  %v17029_v22 = vrot.slane %v7508_v21, 9  ;;  %v17030_v0 = vrot.slane %v7507_v17, 9  ;;  %v9150_v41 = vmax.f32 %v7500_v30, %v17028_v26 }
 0x43b   :  { %v7490_v4 = vrot.slane %v7476_v2, %v22115_v18  ;;  %v7491_v13 = vcombine.high %v7483_v57, %v7483_v57  ;;  %v17024_v27 = vrot.slane %v7483_v57, 9  ;;  %v9141_v56 = vmax.f32 %v7458_v5, %v17019_v54  ;;  %v22797_v2 = vpop.f32.mrb[58].mxu0 }
 0x43c   :  { %v17031_v47 = vrot.slane %v7509_v10, 9  ;;  %v9151_v1 = vmax.f32 %v7508_v21, %v17029_v22  ;;  %v9152_v63 = vmax.f32 %v7507_v17, %v17030_v0  ;;  %v22789_v25 = vmax.f32 %v9142_v29, %v9150_v41  ;;  %v27716_v21 = vld [vmem:[#allocation22_spill] sm:$0xff] }
 0x43d   :  { %v7492_v52 = vcombine.high %v7490_v4, %v7490_v4  ;;  %v17025_v59 = vrot.slane %v7491_v13, 9  ;;  %v17026_v3 = vrot.slane %v7490_v4, 9  ;;  %v9146_v44 = vmax.f32 %v7483_v57, %v17024_v27 }
 0x43e   :  { %27709 = vst [vmem:[#allocation18_spill] sm:$0xff] %v22789_v25  ;;  %v9153_v7 = vmax.f32 %v7509_v10, %v17031_v47  ;;  %v22791_v19 = vmax.f32 %v9143_v43, %v9151_v1  ;;  %v22793_v28 = vmax.f32 %v9144_v11, %v9152_v63  ;;  %v9797_v41 = vrot.slane %v22789_v25, %v22125_v34  ;;  %v22825_v10 = vpop.f32.mrb[59].mxu0 }
 0x43f   :  { %v17027_v42 = vrot.slane %v7492_v52, 9  ;;  %v9147_v30 = vmax.f32 %v7491_v13, %v17025_v59  ;;  %v9148_v35 = vmax.f32 %v7490_v4, %v17026_v3  ;;  %v22795_v26 = vmax.f32 %v9138_v46, %v9146_v44  ;;  %v27719_v4 = vld [vmem:[#allocation24_spill] sm:$0xff] }
 0x440   :  { %27710 = vst [vmem:[#allocation71_spill] sm:$0xff] %v22791_v19  ;;  %27711 = vst [vmem:[#allocation19_spill] sm:$0xff] %v22793_v28  ;;  %v22799_v0 = vmax.f32 %v9145_v51, %v9153_v7  ;;  %v9801_v29 = vrot.slane %v22791_v19, %v22125_v34  ;;  %v6615_v1 = vadd.f32 %v22545_v33, %v22766_v23 }
 0x441   :  { %27712 = vst [vmem:[#allocation20_spill] sm:$0xff] %v22795_v26  ;;  %v9805_v43 = vrot.slane %v22793_v28, %v22125_v34  ;;  %v9149_v59 = vmax.f32 %v7492_v52, %v17027_v42  ;;  %v22809_v11 = vmax.f32 %v9139_v55, %v9147_v30  ;;  %v22811_v5 = vmax.f32 %v9140_v31, %v9148_v35  ;;  %v27718_v55 = vld [vmem:[#allocation23_spill] sm:$0xff]  ;;  %v22838_v42 = vpop.f32.mrb[60].mxu0 }
 0x442   :  { %27713 = vst [vmem:[#allocation21_spill] sm:$0xff] %v22799_v0  ;;  %v9781_v51 = vrot.slane %v22795_v26, %v22125_v34  ;;  %vm6679_vm9 = vcmp.gt.f32.partialorder %v6615_v1, 0.0  ;;  %v6743_v17 = vmul.f32 0.01, %v6615_v1  ;;  %v19258_v54 = vadd.f32 %v22400_v8, %v27716_v21  ;;  %v27720_v8 = vld [vmem:[#allocation25_spill] sm:$0xff] }
 0x443   :  { %27714 = vst [vmem:[#allocation105_spill] sm:$0xff] %v22809_v11  ;;  %27715 = vst [vmem:[#allocation106_spill] sm:$0xff] %v22811_v5  ;;  %v22817_v46 = vmax.f32 %v9141_v56, %v9149_v59  ;;  %v9785_v23 = vrot.slane %v22809_v11, %v22125_v34  ;;  %v9789_v52 = vrot.slane %v22811_v5, %v22125_v34 }
 0x444   :  { %v19259_v57 = vadd.f32 %v22415_v39, %v27718_v55  ;;  %v6807_v22 = vsel %vm6679_vm9, %v6615_v1, %v6743_v17  ;;  %v6614_v31 = vadd.f32 %v22545_v33, %v19258_v54  ;;  %v19260_v13 = vadd.f32 %v22425_v37, %v27719_v4 }
 0x445   :  { %27717 = vst [vmem:[#allocation22_spill] sm:$0xff] %v22817_v46  ;;  %v19261_v27 = vadd.f32 %v22442_v15, %v27720_v8  ;;  %v9793_v47 = vrot.slane %v22817_v46, %v22125_v34  ;;  %v10097_v63 = vsel %vm10034_vm8, %v9785_v23, %v9781_v51  ;;  %v7527_v3 = vcombine.high %v6807_v22, %v6807_v22 }
 0x446   :  { %v7534_v44 = vrot.slane %v6807_v22, %v22115_v18  ;;  %v10098_v39 = vsel %vm10036_vm10, %v9789_v52, %v10097_v63  ;;  %vm6678_vm0 = vcmp.gt.f32.partialorder %v6614_v31, 0.0  ;;  %v6742_v56 = vmul.f32 0.01, %v6614_v31 }
 0x447   :  { %v6617_v7 = vadd.f32 %v22545_v33, %v19259_v57  ;;  %v10099_v37 = vsel %vm10038_vm11, %v9793_v47, %v10098_v39  ;;  %v7541_v15 = vrot.slane %v7527_v3, %v22115_v18  ;;  %v9809_v1 = vrot.slane %v22799_v0, %v22125_v34 }
 0x448   :  { %v7542_v30 = vcombine.high %v7534_v44, %v7534_v44  ;;  %v17036_v35 = vrot.slane %v7534_v44, 9  ;;  %v10100_v59 = vsel %vm10040_vm12, %v9797_v41, %v10099_v37  ;;  %v6806_v51 = vsel %vm6678_vm0, %v6614_v31, %v6742_v56 }
 0x449   :  { %vm6681_vm1 = vcmp.gt.f32.partialorder %v6617_v7, 0.0  ;;  %v10101_v17 = vsel %vm10042_vm13, %v9801_v29, %v10100_v59  ;;  %v7543_v21 = vcombine.high %v7541_v15, %v7541_v15  ;;  %v6745_v23 = vmul.f32 0.01, %v6617_v7 }
 0x44a   :  { %v17037_v54 = vrot.slane %v7542_v30, 9  ;;  %v10102_v52 = vsel %vm10044_vm14, %v9805_v43, %v10101_v17  ;;  %v17038_v55 = vrot.slane %v7541_v15, 9  ;;  %v7510_v57 = vcombine.high %v6806_v51, %v6806_v51  ;;  %v22856_v17 = vpop.f32.mrb[61].mxu0 }
 0x44b   :  { %v7517_v22 = vrot.slane %v6806_v51, %v22115_v18  ;;  %v10103_v4 = vsel %vm10046_vm15, %v9809_v1, %v10102_v52  ;;  %v17039_v8 = vrot.slane %v7543_v21, 9  ;;  %v9158_v47 = vmax.f32 %v7534_v44, %v17036_v35 }
 0x44c   :  { %v10185_v63 = vsel %vm10169_vm3, %v10103_v4, 0.0  ;;  %v7524_v41 = vrot.slane %v7510_v57, %v22115_v18  ;;  %v9159_v39 = vmax.f32 %v7542_v30, %v17037_v54  ;;  %v6809_v43 = vsel %vm6681_vm1, %v6617_v7, %v6745_v23 }
 0x44d   :  { %v7525_v31 = vcombine.high %v7517_v22, %v7517_v22  ;;  %v17032_v3 = vrot.slane %v7517_v22, 9  ;;  %v22852_v29 = vadd.f32 %v10185_v63, %v22783_v20  ;;  %v6616_v56 = vadd.f32 %v22545_v33, %v19260_v13 }
 0x44e   :  { %v9160_v37 = vmax.f32 %v7541_v15, %v17038_v55  ;;  %v9161_v59 = vmax.f32 %v7543_v21, %v17039_v8  ;;  %v7526_v51 = vcombine.high %v7524_v41, %v7524_v41  ;;  %v7561_v44 = vcombine.high %v6809_v43, %v6809_v43 }
 0x44f   :  { %v17033_v1 = vrot.slane %v7525_v31, 9  ;;  %v7568_v35 = vrot.slane %v6809_v43, %v22115_v18  ;;  %vm6680_vm2 = vcmp.gt.f32.partialorder %v6616_v56, 0.0  ;;  %v6744_v52 = vmul.f32 0.01, %v6616_v56 }
 0x450   :  { %v17034_v57 = vrot.slane %v7524_v41, 9  ;;  %v17035_v4 = vrot.slane %v7526_v51, 9  ;;  %v9154_v20 = vmax.f32 %v7517_v22, %v17032_v3  ;;  %v6619_v30 = vadd.f32 %v22545_v33, %v19261_v27 }
 0x451   :  { %v7575_v7 = vrot.slane %v7561_v44, %v22115_v18  ;;  %v7576_v54 = vcombine.high %v7568_v35, %v7568_v35  ;;  %v17044_v13 = vrot.slane %v7568_v35, 9  ;;  %v6808_v15 = vsel %vm6680_vm2, %v6616_v56, %v6744_v52  ;;  %v22865_v56 = vpop.f32.mrb[62].mxu0 }
 0x452   :  { %v9155_v21 = vmax.f32 %v7525_v31, %v17033_v1  ;;  %v7544_v23 = vcombine.high %v6808_v15, %v6808_v15  ;;  %v7551_v55 = vrot.slane %v6808_v15, %v22115_v18  ;;  %vm6683_vm4 = vcmp.gt.f32.partialorder %v6619_v30, 0.0 }
 0x453   :  { %v7577_v8 = vcombine.high %v7575_v7, %v7575_v7  ;;  %v17045_v63 = vrot.slane %v7576_v54, 9  ;;  %v17046_v43 = vrot.slane %v7575_v7, 9  ;;  %v9166_v0 = vmax.f32 %v7568_v35, %v17044_v13 }
 0x454   :  { %v7558_v28 = vrot.slane %v7544_v23, %v22115_v18  ;;  %v7559_v19 = vcombine.high %v7551_v55, %v7551_v55  ;;  %v17040_v22 = vrot.slane %v7551_v55, 9  ;;  %v6747_v3 = vmul.f32 0.01, %v6619_v30 }
 0x455   :  { %v17047_v27 = vrot.slane %v7577_v8, 9  ;;  %v9167_v25 = vmax.f32 %v7576_v54, %v17045_v63  ;;  %v9168_v44 = vmax.f32 %v7575_v7, %v17046_v43  ;;  %v22863_v46 = vmax.f32 %v9158_v47, %v9166_v0 }
 0x456   :  { %v7560_v31 = vcombine.high %v7558_v28, %v7558_v28  ;;  %v17041_v1 = vrot.slane %v7559_v19, 9  ;;  %v17042_v52 = vrot.slane %v7558_v28, 9  ;;  %v9162_v15 = vmax.f32 %v7551_v55, %v17040_v22 }
 0x457   :  { %27721 = vst [vmem:[#allocation23_spill] sm:$0xff] %v22863_v46  ;;  %v9156_v5 = vmax.f32 %v7524_v41, %v17034_v57  ;;  %v9169_v11 = vmax.f32 %v7577_v8, %v17047_v27  ;;  %v22867_v26 = vmax.f32 %v9159_v39, %v9167_v25  ;;  %v22869_v35 = vmax.f32 %v9160_v37, %v9168_v44 }
 0x458   :  { %v17043_v13 = vrot.slane %v7560_v31, 9  ;;  %v9163_v23 = vmax.f32 %v7559_v19, %v17041_v1  ;;  %v9164_v16 = vmax.f32 %v7558_v28, %v17042_v52  ;;  %v22871_v61 = vmax.f32 %v9154_v20, %v9162_v15 }
 0x459   :  { %27722 = vst [vmem:[#allocation24_spill] sm:$0xff] %v22867_v26  ;;  %27723 = vst [vmem:[#allocation25_spill] sm:$0xff] %v22869_v35  ;;  %v9157_v7 = vmax.f32 %v7526_v51, %v17035_v4  ;;  %v22873_v0 = vmax.f32 %v9161_v59, %v9169_v11  ;;  %v9829_v47 = vrot.slane %v22863_v46, %v22125_v34  ;;  %v27725_v59 = vld [vmem:[#allocation26_spill] sm:$0xff] }
 0x45a   :  { %v6811_v54 = vsel %vm6683_vm4, %v6619_v30, %v6747_v3  ;;  %v9833_v41 = vrot.slane %v22867_v26, %v22125_v34  ;;  %v9165_v25 = vmax.f32 %v7560_v31, %v17043_v13  ;;  %v22880_v39 = vmax.f32 %v9155_v21, %v9163_v23  ;;  %v27726_v30 = vld [vmem:[#allocation27_spill] sm:$0xff]  ;;  %v27727_v3 = vld [vmem:[#allocation28_spill] sm:$0xff] }
 0x45b   :  { %27724 = vst [vmem:[#allocation107_spill] sm:$0xff] %v22873_v0  ;;  %v22882_v37 = vmax.f32 %v9156_v5, %v9164_v16  ;;  %v9813_v28 = vrot.slane %v22871_v61, %v22125_v34  ;;  %v7595_v19 = vcombine.high %v6811_v54, %v6811_v54  ;;  %v7602_v11 = vrot.slane %v6811_v54, %v22115_v18  ;;  %v22897_v5 = vpop.f32.mrb[63].mxu0 }
 0x45c   :  { %v19262_v51 = vadd.f32 %v22469_v24, %v27725_v59  ;;  %v22889_v57 = vmax.f32 %v9157_v7, %v9165_v25  ;;  %v9817_v4 = vrot.slane %v22880_v39, %v22125_v34  ;;  %v19263_v16 = vadd.f32 %v22493_v60, %v27726_v30 }
 0x45d   :  { %v9821_v20 = vrot.slane %v22882_v37, %v22125_v34  ;;  %v7609_v21 = vrot.slane %v7595_v19, %v22115_v18  ;;  %v7610_v55 = vcombine.high %v7602_v11, %v7602_v11  ;;  %v17052_v8 = vrot.slane %v7602_v11, 9 }
 0x45e   :  { %v6618_v63 = vadd.f32 %v22545_v33, %v19262_v51  ;;  %v9825_v24 = vrot.slane %v22889_v57, %v22125_v34  ;;  %v10104_v43 = vsel %vm10034_vm8, %v9817_v4, %v9813_v28  ;;  %v6621_v22 = vadd.f32 %v22545_v33, %v19263_v16 }
 0x45f   :  { %v19264_v27 = vadd.f32 %v22495_v53, %v27727_v3  ;;  %v9837_v60 = vrot.slane %v22869_v35, %v22125_v34  ;;  %v10105_v44 = vsel %vm10036_vm10, %v9821_v20, %v10104_v43  ;;  %v7611_v31 = vcombine.high %v7609_v21, %v7609_v21 }
 0x460   :  { %v17053_v1 = vrot.slane %v7610_v55, 9  ;;  %v9841_v52 = vrot.slane %v22873_v0, %v22125_v34  ;;  %v10106_v15 = vsel %vm10038_vm11, %v9825_v24, %v10105_v44  ;;  %vm6682_vm5 = vcmp.gt.f32.partialorder %v6618_v63, 0.0  ;;  %v27730_v0 = vld [vmem:[#allocation30_spill] sm:$0xff] }
 0x461   :  { %v6746_v13 = vmul.f32 0.01, %v6618_v63  ;;  %v10107_v23 = vsel %vm10040_vm12, %v9829_v47, %v10106_v15  ;;  %v17054_v7 = vrot.slane %v7609_v21, 9  ;;  %v17055_v54 = vrot.slane %v7611_v31, 9  ;;  %v27728_v47 = vld [vmem:[#allocation29_spill] sm:$0xff] }
 0x462   :  { %v9174_v25 = vmax.f32 %v7602_v11, %v17052_v8  ;;  %v10108_v53 = vsel %vm10042_vm13, %v9833_v41, %v10107_v23  ;;  %vm6685_vm6 = vcmp.gt.f32.partialorder %v6621_v22, 0.0  ;;  %v6749_v19 = vmul.f32 0.01, %v6621_v22 }
 0x463   :  { %v6810_v28 = vsel %vm6682_vm5, %v6618_v63, %v6746_v13  ;;  %v10109_v59 = vsel %vm10044_vm14, %v9837_v60, %v10108_v53  ;;  %v9175_v51 = vmax.f32 %v7610_v55, %v17053_v1  ;;  %v6620_v24 = vadd.f32 %v22545_v33, %v19264_v27 }
 0x464   :  { %v7578_v4 = vcombine.high %v6810_v28, %v6810_v28  ;;  %v7585_v20 = vrot.slane %v6810_v28, %v22115_v18  ;;  %v10110_v30 = vsel %vm10046_vm15, %v9841_v52, %v10109_v59  ;;  %v6813_v16 = vsel %vm6685_vm6, %v6621_v22, %v6749_v19 }
 0x465   :  { %v19265_v43 = vadd.f32 %v22539_v14, %v27728_v47  ;;  %v10187_v11 = vsel %vm10169_vm3, %v10110_v30, 0.0  ;;  %v9176_v55 = vmax.f32 %v7609_v21, %v17054_v7  ;;  %v7629_v60 = vcombine.high %v6813_v16, %v6813_v16 }
 0x466   :  { %v7592_v41 = vrot.slane %v7578_v4, %v22115_v18  ;;  %v7593_v8 = vcombine.high %v7585_v20, %v7585_v20  ;;  %v17048_v63 = vrot.slane %v7585_v20, 9  ;;  %v22924_v3 = vadd.f32 %v10187_v11, %v22852_v29  ;;  %v22931_v29 = vld [vmem:[%s27177_s2] ss:$0 sm:$0xff] }
 0x467   :  { %v7636_v44 = vrot.slane %v6813_v16, %v22115_v18  ;;  %v9177_v1 = vmax.f32 %v7611_v31, %v17055_v54  ;;  %vm6684_vm7 = vcmp.gt.f32.partialorder %v6620_v24, 0.0  ;;  %v7643_v33 = vrot.slane %v7629_v60, %v22115_v18 }
 0x468   :  { %v7594_v22 = vcombine.high %v7592_v41, %v7592_v41  ;;  %v17049_v52 = vrot.slane %v7593_v8, 9  ;;  %v6748_v15 = vmul.f32 0.01, %v6620_v24  ;;  %v17050_v13 = vrot.slane %v7592_v41, 9 }
 0x469   :  { %v7644_v14 = vcombine.high %v7636_v44, %v7636_v44  ;;  %v17060_v27 = vrot.slane %v7636_v44, 9  ;;  %v9170_v53 = vmax.f32 %v7585_v20, %v17048_v63  ;;  %v6623_v21 = vadd.f32 %v22931_v29, %v19265_v43 }
 0x46a   :  { %v17051_v23 = vrot.slane %v7594_v22, 9  ;;  %v7645_v7 = vcombine.high %v7643_v33, %v7643_v33  ;;  %v17062_v54 = vrot.slane %v7643_v33, 9  ;;  %v9171_v19 = vmax.f32 %v7593_v8, %v17049_v52 }
 0x46b   :  { %v17061_v31 = vrot.slane %v7644_v14, 9  ;;  %v9182_v28 = vmax.f32 %v7636_v44, %v17060_v27  ;;  %v6812_v59 = vsel %vm6684_vm7, %v6620_v24, %v6748_v15  ;;  %vm6687_vm9 = vcmp.gt.f32.partialorder %v6623_v21, 0.0 }
 0x46c   :  { %v6751_v4 = vmul.f32 0.01, %v6623_v21  ;;  %v17063_v30 = vrot.slane %v7645_v7, 9  ;;  %v9184_v47 = vmax.f32 %v7643_v33, %v17062_v54  ;;  %v7612_v20 = vcombine.high %v6812_v59, %v6812_v59 }
 0x46d   :  { %v9183_v16 = vmax.f32 %v7644_v14, %v17061_v31  ;;  %v22934_v11 = vmax.f32 %v9174_v25, %v9182_v28  ;;  %v7619_v63 = vrot.slane %v6812_v59, %v22115_v18  ;;  %v19266_v43 = vadd.f32 %v22551_v45, %v27730_v0 }
 0x46e   :  { %v6815_v60 = vsel %vm6687_vm9, %v6623_v21, %v6751_v4  ;;  %v9172_v35 = vmax.f32 %v7592_v41, %v17050_v13  ;;  %v9185_v26 = vmax.f32 %v7645_v7, %v17063_v30  ;;  %v22941_v8 = vmax.f32 %v9176_v55, %v9184_v47 }
 0x46f   :  { %27729 = vst [vmem:[#allocation26_spill] sm:$0xff] %v22934_v11  ;;  %v22939_v46 = vmax.f32 %v9175_v51, %v9183_v16  ;;  %v7626_v24 = vrot.slane %v7612_v20, %v22115_v18  ;;  %v7627_v44 = vcombine.high %v7619_v63, %v7619_v63  ;;  %v17056_v52 = vrot.slane %v7619_v63, 9 }
 0x470   :  { %27732 = vst [vmem:[#allocation28_spill] sm:$0xff] %v22941_v8  ;;  %v7663_v33 = vcombine.high %v6815_v60, %v6815_v60  ;;  %v9173_v25 = vmax.f32 %v7594_v22, %v17051_v23  ;;  %v22944_v14 = vmax.f32 %v9177_v1, %v9185_v26  ;;  %v9861_v27 = vrot.slane %v22934_v11, %v22125_v34 }
 0x471   :  { %27731 = vst [vmem:[#allocation27_spill] sm:$0xff] %v22939_v46  ;;  %v7670_v15 = vrot.slane %v6815_v60, %v22115_v18  ;;  %v7628_v45 = vcombine.high %v7626_v24, %v7626_v24  ;;  %v17057_v0 = vrot.slane %v7627_v44, 9  ;;  %v17058_v41 = vrot.slane %v7626_v24, 9 }
 0x472   :  { %27733 = vst [vmem:[#allocation29_spill] sm:$0xff] %v22944_v14  ;;  %v9178_v51 = vmax.f32 %v7619_v63, %v17056_v52  ;;  %v9865_v55 = vrot.slane %v22939_v46, %v22125_v34  ;;  %v7677_v13 = vrot.slane %v7663_v33, %v22115_v18  ;;  %v9869_v23 = vrot.slane %v22941_v8, %v22125_v34  ;;  %v27734_v52 = vld [vmem:[#allocation31_spill] sm:$0xff] }
 0x473   :  { %v7678_v21 = vcombine.high %v7670_v15, %v7670_v15  ;;  %v17068_v7 = vrot.slane %v7670_v15, 9  ;;  %v17059_v31 = vrot.slane %v7628_v45, 9  ;;  %v9179_v22 = vmax.f32 %v7627_v44, %v17057_v0  ;;  %v27735_v0 = vld [vmem:[#allocation32_spill] sm:$0xff] }
 0x474   :  { %v9180_v26 = vmax.f32 %v7626_v24, %v17058_v41  ;;  %v22952_v1 = vmax.f32 %v9170_v53, %v9178_v51  ;;  %v9873_v54 = vrot.slane %v22944_v14, %v22125_v34  ;;  %v7679_v28 = vcombine.high %v7677_v13, %v7677_v13  ;;  %v27736_v51 = vld [vmem:[#allocation33_spill] sm:$0xff] }
 0x475   :  { %v17069_v59 = vrot.slane %v7678_v21, 9  ;;  %v9181_v4 = vmax.f32 %v7628_v45, %v17059_v31  ;;  %v22958_v30 = vmax.f32 %v9171_v19, %v9179_v22  ;;  %v17070_v47 = vrot.slane %v7677_v13, 9  ;;  %v27737_v22 = vld [vmem:[#allocation34_spill] sm:$0xff] }
 0x476   :  { %v22960_v16 = vmax.f32 %v9172_v35, %v9180_v26  ;;  %v9845_v20 = vrot.slane %v22952_v1, %v22125_v34  ;;  %v17071_v63 = vrot.slane %v7679_v28, 9  ;;  %v22964_v53 = vmax.f32 %v7670_v15, %v17068_v7 }
 0x477   :  { %v6622_v60 = vadd.f32 %v22931_v29, %v19266_v43  ;;  %v22967_v24 = vmax.f32 %v9173_v25, %v9181_v4  ;;  %v9849_v44 = vrot.slane %v22958_v30, %v22125_v34  ;;  %v19267_v35 = vadd.f32 %v22581_v36, %v27734_v52 }
 0x478   :  { %v9853_v19 = vrot.slane %v22960_v16, %v22125_v34  ;;  %v22975_v33 = vmax.f32 %v7678_v21, %v17069_v59  ;;  %v19268_v15 = vadd.f32 %v22595_v40, %v27735_v0  ;;  %v19269_v7 = vadd.f32 %v22619_v58, %v27736_v51 }
 0x479   :  { %vm6686_vm0 = vcmp.gt.f32.partialorder %v6622_v60, 0.0  ;;  %v6750_v45 = vmul.f32 0.01, %v6622_v60  ;;  %v9857_v43 = vrot.slane %v22967_v24, %v22125_v34  ;;  %v10111_v25 = vsel %vm10034_vm8, %v9849_v44, %v9845_v20 }
 0x47a   :  { %v6625_v41 = vadd.f32 %v22931_v29, %v19267_v35  ;;  %v10112_v31 = vsel %vm10036_vm10, %v9853_v19, %v10111_v25  ;;  %v6624_v21 = vadd.f32 %v22931_v29, %v19268_v15  ;;  %v22989_v26 = vadd.f32 %v22634_v50, %v27737_v22 }
 0x47b   :  { %v6814_v36 = vsel %vm6686_vm0, %v6622_v60, %v6750_v45  ;;  %v10113_v40 = vsel %vm10038_vm11, %v9857_v43, %v10112_v31  ;;  %v9192_v45 = vmax.f32 %v7677_v13, %v17070_v47 }
 0x47c   :  { %v7646_v59 = vcombine.high %v6814_v36, %v6814_v36  ;;  %v7653_v4 = vrot.slane %v6814_v36, %v22115_v18  ;;  %vm6689_vm1 = vcmp.gt.f32.partialorder %v6625_v41, 0.0  ;;  %v10114_v20 = vsel %vm10040_vm12, %v9861_v27, %v10113_v40 }
 0x47d   :  { %v6753_v44 = vmul.f32 0.01, %v6625_v41  ;;  %vm6688_vm2 = vcmp.gt.f32.partialorder %v6624_v21, 0.0  ;;  %v6752_v58 = vmul.f32 0.01, %v6624_v21  ;;  %v10115_v19 = vsel %vm10042_vm13, %v9865_v55, %v10114_v20 }
 0x47e   :  { %v7660_v60 = vrot.slane %v7646_v59, %v22115_v18  ;;  %v7661_v52 = vcombine.high %v7653_v4, %v7653_v4  ;;  %v17064_v35 = vrot.slane %v7653_v4, 9  ;;  %v10116_v50 = vsel %vm10044_vm14, %v9869_v23, %v10115_v19 }
 0x47f   :  { %v6817_v0 = vsel %vm6689_vm1, %v6625_v41, %v6753_v44  ;;  %v6816_v15 = vsel %vm6688_vm2, %v6624_v21, %v6752_v58  ;;  %v10117_v43 = vsel %vm10046_vm15, %v9873_v54, %v10116_v50  ;;  %v6627_v27 = vadd.f32 %v22931_v29, %v19269_v7 }
 0x480   :  { %v7662_v25 = vcombine.high %v7660_v60, %v7660_v60  ;;  %v17065_v51 = vrot.slane %v7661_v52, 9  ;;  %v10189_v31 = vsel %vm10169_vm3, %v10117_v43, 0.0  ;;  %v9193_v36 = vmax.f32 %v7679_v28, %v17071_v63 }
 0x481   :  { %v7697_v22 = vcombine.high %v6817_v0, %v6817_v0  ;;  %v7704_v55 = vrot.slane %v6817_v0, %v22115_v18  ;;  %v23002_v40 = vadd.f32 %v10189_v31, %v22924_v3  ;;  %v17066_v59 = vrot.slane %v7660_v60, 9 }
 0x482   :  { %v17067_v23 = vrot.slane %v7662_v25, 9  ;;  %v9186_v13 = vmax.f32 %v7653_v4, %v17064_v35  ;;  %v7680_v21 = vcombine.high %v6816_v15, %v6816_v15  ;;  %v9187_v20 = vmax.f32 %v7661_v52, %v17065_v51 }
 0x483   :  { %v7711_v47 = vrot.slane %v7697_v22, %v22115_v18  ;;  %v7712_v41 = vcombine.high %v7704_v55, %v7704_v55  ;;  %v17076_v54 = vrot.slane %v7704_v55, 9  ;;  %v7687_v7 = vrot.slane %v6816_v15, %v22115_v18 }
 0x484   :  { %vm6691_vm4 = vcmp.gt.f32.partialorder %v6627_v27, 0.0  ;;  %v6755_v44 = vmul.f32 0.01, %v6627_v27  ;;  %v7694_v3 = vrot.slane %v7680_v21, %v22115_v18  ;;  %v9188_v8 = vmax.f32 %v7660_v60, %v17066_v59 }
 0x485   :  { %v7713_v28 = vcombine.high %v7711_v47, %v7711_v47  ;;  %v17077_v63 = vrot.slane %v7712_v41, 9  ;;  %v17078_v58 = vrot.slane %v7711_v47, 9  ;;  %v9198_v19 = vmax.f32 %v7704_v55, %v17076_v54 }
 0x486   :  { %v7695_v50 = vcombine.high %v7687_v7, %v7687_v7  ;;  %v17072_v0 = vrot.slane %v7687_v7, 9  ;;  %v6819_v43 = vsel %vm6691_vm4, %v6627_v27, %v6755_v44  ;;  %v7696_v52 = vcombine.high %v7694_v3, %v7694_v3 }
 0x487   :  { %v17079_v4 = vrot.slane %v7713_v28, 9  ;;  %v9199_v35 = vmax.f32 %v7712_v41, %v17077_v63  ;;  %v9200_v31 = vmax.f32 %v7711_v47, %v17078_v58  ;;  %v23008_v22 = vmax.f32 %v22964_v53, %v9198_v19 }
 0x488   :  { %v17073_v51 = vrot.slane %v7695_v50, 9  ;;  %v17074_v15 = vrot.slane %v7694_v3, 9  ;;  %v9194_v14 = vmax.f32 %v7687_v7, %v17072_v0  ;;  %v17075_v54 = vrot.slane %v7696_v52, 9 }
 0x489   :  { %v9201_v46 = vmax.f32 %v7713_v28, %v17079_v4  ;;  %v23011_v11 = vmax.f32 %v22975_v33, %v9199_v35  ;;  %v23013_v55 = vmax.f32 %v9192_v45, %v9200_v31  ;;  %v9189_v47 = vmax.f32 %v7662_v25, %v17067_v23 }
 0x48a   :  { %v9195_v21 = vmax.f32 %v7695_v50, %v17073_v51  ;;  %v9196_v27 = vmax.f32 %v7694_v3, %v17074_v15  ;;  %v23015_v44 = vmax.f32 %v9186_v13, %v9194_v14  ;;  %v9893_v53 = vrot.slane %v23008_v22, %v22125_v34 }
 0x48b   :  { %27738 = vst [vmem:[#allocation30_spill] sm:$0xff] %v23013_v55  ;;  %v23017_v41 = vmax.f32 %v9193_v36, %v9201_v46  ;;  %v7731_v63 = vcombine.high %v6819_v43, %v6819_v43  ;;  %v9897_v60 = vrot.slane %v23011_v11, %v22125_v34  ;;  %v9197_v59 = vmax.f32 %v7696_v52, %v17075_v54 }
 0x48c   :  { %v23023_v33 = vmax.f32 %v9187_v20, %v9195_v21  ;;  %v23025_v45 = vmax.f32 %v9188_v8, %v9196_v27  ;;  %v9877_v7 = vrot.slane %v23015_v44, %v22125_v34  ;;  %v7738_v14 = vrot.slane %v6819_v43, %v22115_v18  ;;  %v27740_v8 = vld [vmem:[#allocation35_spill] sm:$0xff] }
 0x48d   :  { %27739 = vst [vmem:[#allocation31_spill] sm:$0xff] %v23017_v41  ;;  %v7745_v46 = vrot.slane %v7731_v63, %v22115_v18  ;;  %v6626_v25 = vadd.f32 %v22931_v29, %v22989_v26  ;;  %v23033_v36 = vmax.f32 %v9189_v47, %v9197_v59  ;;  %v19271_v20 = vadd.f32 %v22649_v48, %v27740_v8  ;;  %v27741_v8 = vld [vmem:[#allocation36_spill] sm:$0xff] }
 0x48e   :  { %v9881_v23 = vrot.slane %v23023_v33, %v22125_v34  ;;  %v9885_v13 = vrot.slane %v23025_v45, %v22125_v34  ;;  %v7746_v28 = vcombine.high %v7738_v14, %v7738_v14  ;;  %v17084_v19 = vrot.slane %v7738_v14, 9 }
 0x48f   :  { %v7747_v58 = vcombine.high %v7745_v46, %v7745_v46  ;;  %v17086_v3 = vrot.slane %v7745_v46, 9  ;;  %v9889_v50 = vrot.slane %v23033_v36, %v22125_v34  ;;  %vm6690_vm5 = vcmp.gt.f32.partialorder %v6626_v25, 0.0 }
 0x490   :  { %v10118_v26 = vsel %vm10034_vm8, %v9881_v23, %v9877_v7  ;;  %v6754_v0 = vmul.f32 0.01, %v6626_v25  ;;  %v9901_v43 = vrot.slane %v23013_v55, %v22125_v34  ;;  %v9905_v4 = vrot.slane %v23017_v41, %v22125_v34 }
 0x491   :  { %v10119_v35 = vsel %vm10036_vm10, %v9885_v13, %v10118_v26  ;;  %v17085_v48 = vrot.slane %v7746_v28, 9  ;;  %v17087_v52 = vrot.slane %v7747_v58, 9  ;;  %v6629_v15 = vadd.f32 %v22931_v29, %v19271_v20 }
 0x492   :  { %v10120_v31 = vsel %vm10038_vm11, %v9889_v50, %v10119_v35  ;;  %v6818_v51 = vsel %vm6690_vm5, %v6626_v25, %v6754_v0  ;;  %v9206_v21 = vmax.f32 %v7738_v14, %v17084_v19  ;;  %v9208_v27 = vmax.f32 %v7745_v46, %v17086_v3  ;;  %v27742_v50 = vld [vmem:[#allocation37_spill] sm:$0xff] }
 0x493   :  { %v10121_v54 = vsel %vm10040_vm12, %v9893_v53, %v10120_v31  ;;  %v7714_v47 = vcombine.high %v6818_v51, %v6818_v51  ;;  %v7721_v59 = vrot.slane %v6818_v51, %v22115_v18  ;;  %vm6693_vm6 = vcmp.gt.f32.partialorder %v6629_v15, 0.0 }
 0x494   :  { %v10122_v63 = vsel %vm10042_vm13, %v9897_v60, %v10121_v54  ;;  %v6757_v7 = vmul.f32 0.01, %v6629_v15  ;;  %v19272_v25 = vadd.f32 %v22659_v32, %v27741_v8  ;;  %v19273_v20 = vadd.f32 %v22699_v49, %v27742_v50 }
 0x495   :  { %v10123_v23 = vsel %vm10044_vm14, %v9901_v43, %v10122_v63  ;;  %v7728_v13 = vrot.slane %v7714_v47, %v22115_v18  ;;  %v7729_v14 = vcombine.high %v7721_v59, %v7721_v59  ;;  %v17080_v46 = vrot.slane %v7721_v59, 9 }
 0x496   :  { %v10124_v53 = vsel %vm10046_vm15, %v9905_v4, %v10123_v23  ;;  %v6821_v19 = vsel %vm6693_vm6, %v6629_v15, %v6757_v7  ;;  %v9207_v35 = vmax.f32 %v7746_v28, %v17085_v48  ;;  %v9209_v31 = vmax.f32 %v7747_v58, %v17087_v52 }
 0x497   :  { %v10191_v60 = vsel %vm10169_vm3, %v10124_v53, 0.0  ;;  %v7730_v3 = vcombine.high %v7728_v13, %v7728_v13  ;;  %v17082_v26 = vrot.slane %v7728_v13, 9  ;;  %v7765_v0 = vcombine.high %v6821_v19, %v6821_v19  ;;  %v27743_v53 = vld [vmem:[#allocation38_spill] sm:$0xff] }
 0x498   :  { %v23063_v43 = vadd.f32 %v10191_v60, %v23002_v40  ;;  %v7772_v32 = vrot.slane %v6821_v19, %v22115_v18  ;;  %v17081_v51 = vrot.slane %v7729_v14, 9  ;;  %v9202_v54 = vmax.f32 %v7721_v59, %v17080_v46 }
 0x499   :  { %v7779_v49 = vrot.slane %v7765_v0, %v22115_v18  ;;  %v6628_v4 = vadd.f32 %v22931_v29, %v19272_v25  ;;  %v17083_v47 = vrot.slane %v7730_v3, 9  ;;  %v6631_v7 = vadd.f32 %v22931_v29, %v19273_v20  ;;  %v27745_v0 = vld [vmem:[#allocation39_spill] sm:$0xff] }
 0x49a   :  { %v7780_v15 = vcombine.high %v7772_v32, %v7772_v32  ;;  %v17092_v63 = vrot.slane %v7772_v32, 9  ;;  %v9204_v23 = vmax.f32 %v7728_v13, %v17082_v26  ;;  %v19274_v46 = vadd.f32 %v22703_v9, %v27743_v53 }
 0x49b   :  { %v7781_v8 = vcombine.high %v7779_v49, %v7779_v49  ;;  %v17094_v50 = vrot.slane %v7779_v49, 9  ;;  %vm6692_vm7 = vcmp.gt.f32.partialorder %v6628_v4, 0.0  ;;  %v6756_v58 = vmul.f32 0.01, %v6628_v4 }
 0x49c   :  { %v17093_v40 = vrot.slane %v7780_v15, 9  ;;  %v9214_v28 = vmax.f32 %v7772_v32, %v17092_v63  ;;  %vm6695_vm9 = vcmp.gt.f32.partialorder %v6631_v7, 0.0  ;;  %v6759_v59 = vmul.f32 0.01, %v6631_v7 }
 0x49d   :  { %v17095_v48 = vrot.slane %v7781_v8, 9  ;;  %v9216_v52 = vmax.f32 %v7779_v49, %v17094_v50  ;;  %v6820_v60 = vsel %vm6692_vm7, %v6628_v4, %v6756_v58  ;;  %v19275_v13 = vadd.f32 %v22722_v12, %v27745_v0 }
 0x49e   :  { %v9215_v25 = vmax.f32 %v7780_v15, %v17093_v40  ;;  %v23071_v19 = vmax.f32 %v9206_v21, %v9214_v28  ;;  %v7748_v41 = vcombine.high %v6820_v60, %v6820_v60  ;;  %v7755_v32 = vrot.slane %v6820_v60, %v22115_v18 }
 0x49f   :  { %v9217_v20 = vmax.f32 %v7781_v8, %v17095_v48  ;;  %v23075_v26 = vmax.f32 %v9208_v27, %v9216_v52  ;;  %v9203_v63 = vmax.f32 %v7729_v14, %v17081_v51  ;;  %v9205_v55 = vmax.f32 %v7730_v3, %v17083_v47 }
 0x4a0   :  { %27744 = vst [vmem:[#allocation32_spill] sm:$0xff] %v23071_v19  ;;  %v23078_v49 = vmax.f32 %v9207_v35, %v9215_v25  ;;  %v6823_v50 = vsel %vm6695_vm9, %v6631_v7, %v6759_v59  ;;  %v9925_v21 = vrot.slane %v23071_v19, %v22125_v34  ;;  %v7762_v4 = vrot.slane %v7748_v41, %v22115_v18 }
 0x4a1   :  { %27746 = vst [vmem:[#allocation33_spill] sm:$0xff] %v23075_v26  ;;  %v23081_v9 = vmax.f32 %v9209_v31, %v9217_v20  ;;  %v7763_v12 = vcombine.high %v7755_v32, %v7755_v32  ;;  %v17088_v15 = vrot.slane %v7755_v32, 9  ;;  %v7799_v27 = vcombine.high %v6823_v50, %v6823_v50 }
 0x4a2   :  { %27747 = vst [vmem:[#allocation34_spill] sm:$0xff] %v23078_v49  ;;  %v7806_v8 = vrot.slane %v6823_v50, %v22115_v18  ;;  %v6630_v40 = vadd.f32 %v22931_v29, %v19274_v46  ;;  %v9933_v14 = vrot.slane %v23075_v26, %v22125_v34  ;;  %v7764_v3 = vcombine.high %v7762_v4, %v7762_v4 }
 0x4a3   :  { %27748 = vst [vmem:[#allocation35_spill] sm:$0xff] %v23081_v9  ;;  %v17089_v35 = vrot.slane %v7763_v12, 9  ;;  %v17090_v51 = vrot.slane %v7762_v4, 9  ;;  %v9210_v31 = vmax.f32 %v7755_v32, %v17088_v15  ;;  %v7813_v47 = vrot.slane %v7799_v27, %v22115_v18 }
 0x4a4   :  { %v7814_v7 = vcombine.high %v7806_v8, %v7806_v8  ;;  %v17100_v28 = vrot.slane %v7806_v8, 9  ;;  %v9929_v41 = vrot.slane %v23078_v49, %v22125_v34  ;;  %v17091_v58 = vrot.slane %v7764_v3, 9 }
 0x4a5   :  { %v9211_v48 = vmax.f32 %v7763_v12, %v17089_v35  ;;  %v9212_v52 = vmax.f32 %v7762_v4, %v17090_v51  ;;  %v9937_v59 = vrot.slane %v23081_v9, %v22125_v34  ;;  %v23095_v53 = vmax.f32 %v9202_v54, %v9210_v31  ;;  %v27750_v35 = vld [vmem:[#allocation40_spill] sm:$0xff]  ;;  %v27751_v31 = vld [vmem:[#allocation41_spill] sm:$0xff] }
 0x4a6   :  { %v7815_v46 = vcombine.high %v7813_v47, %v7813_v47  ;;  %v17101_v25 = vrot.slane %v7814_v7, 9  ;;  %v9213_v60 = vmax.f32 %v7764_v3, %v17091_v58  ;;  %vm6694_vm0 = vcmp.gt.f32.partialorder %v6630_v40, 0.0 }
 0x4a7   :  { %v23097_v0 = vmax.f32 %v9203_v63, %v9211_v48  ;;  %v23099_v20 = vmax.f32 %v9204_v23, %v9212_v52  ;;  %v9909_v32 = vrot.slane %v23095_v53, %v22125_v34  ;;  %v17102_v50 = vrot.slane %v7813_v47, 9  ;;  %v27752_v48 = vld [vmem:[#allocation42_spill] sm:$0xff] }
 0x4a8   :  { %v17103_v15 = vrot.slane %v7815_v46, 9  ;;  %v9222_v12 = vmax.f32 %v7806_v8, %v17100_v28  ;;  %v23103_v4 = vmax.f32 %v9205_v55, %v9213_v60  ;;  %v6758_v3 = vmul.f32 0.01, %v6630_v40 }
 0x4a9   :  { %v9913_v54 = vrot.slane %v23097_v0, %v22125_v34  ;;  %v9917_v27 = vrot.slane %v23099_v20, %v22125_v34  ;;  %v9223_v63 = vmax.f32 %v7814_v7, %v17101_v25  ;;  %v6633_v23 = vadd.f32 %v22931_v29, %v19275_v13 }
 0x4aa   :  { %27749 = vst [vmem:[#allocation36_spill] sm:$0xff] %v23103_v4  ;;  %v19276_v51 = vadd.f32 %v22735_v38, %v27750_v35  ;;  %v19277_v58 = vadd.f32 %v22771_v6, %v27751_v31  ;;  %v9921_v55 = vrot.slane %v23103_v4, %v22125_v34  ;;  %v6822_v28 = vsel %vm6694_vm0, %v6630_v40, %v6758_v3 }
 0x4ab   :  { %v10125_v8 = vsel %vm10034_vm8, %v9913_v54, %v9909_v32  ;;  %v23119_v52 = vadd.f32 %v22777_v62, %v27752_v48  ;;  %v7782_v25 = vcombine.high %v6822_v28, %v6822_v28  ;;  %v7789_v13 = vrot.slane %v6822_v28, %v22115_v18 }
 0x4ac   :  { %v10126_v7 = vsel %vm10036_vm10, %v9917_v27, %v10125_v8  ;;  %vm6697_vm1 = vcmp.gt.f32.partialorder %v6633_v23, 0.0  ;;  %v9224_v60 = vmax.f32 %v7813_v47, %v17102_v50  ;;  %v6761_v6 = vmul.f32 0.01, %v6633_v23 }
 0x4ad   :  { %v10127_v38 = vsel %vm10038_vm11, %v9921_v55, %v10126_v7  ;;  %v6632_v35 = vadd.f32 %v22931_v29, %v19276_v51  ;;  %v7796_v40 = vrot.slane %v7782_v25, %v22115_v18  ;;  %v7797_v32 = vcombine.high %v7789_v13, %v7789_v13 }
 0x4ae   :  { %v10128_v31 = vsel %vm10040_vm12, %v9925_v21, %v10127_v38  ;;  %v17096_v54 = vrot.slane %v7789_v13, 9  ;;  %v9225_v3 = vmax.f32 %v7815_v46, %v17103_v15  ;;  %v6825_v27 = vsel %vm6697_vm1, %v6633_v23, %v6761_v6 }
 0x4af   :  { %v10129_v62 = vsel %vm10042_vm13, %v9929_v41, %v10128_v31  ;;  %v6635_v8 = vadd.f32 %v22931_v29, %v19277_v58  ;;  %v7798_v48 = vcombine.high %v7796_v40, %v7796_v40  ;;  %v17097_v55 = vrot.slane %v7797_v32, 9 }
 0x4b0   :  { %v10130_v28 = vsel %vm10044_vm14, %v9933_v14, %v10129_v62  ;;  %v6760_v47 = vmul.f32 0.01, %v6632_v35  ;;  %v7833_v51 = vcombine.high %v6825_v27, %v6825_v27  ;;  %v7840_v21 = vrot.slane %v6825_v27, %v22115_v18 }
 0x4b1   :  { %v10131_v50 = vsel %vm10046_vm15, %v9937_v59, %v10130_v28  ;;  %vm6696_vm2 = vcmp.gt.f32.partialorder %v6632_v35, 0.0  ;;  %v17098_v25 = vrot.slane %v7796_v40, 9  ;;  %v17099_v38 = vrot.slane %v7798_v48, 9 }
 0x4b2   :  { %v10193_v7 = vsel %vm10169_vm3, %v10131_v50, 0.0  ;;  %v9218_v41 = vmax.f32 %v7789_v13, %v17096_v54  ;;  %v7847_v15 = vrot.slane %v7833_v51, %v22115_v18  ;;  %v7848_v14 = vcombine.high %v7840_v21, %v7840_v21 }
 0x4b3   :  { %v23134_v46 = vadd.f32 %v10193_v7, %v23063_v43  ;;  %v17108_v23 = vrot.slane %v7840_v21, 9  ;;  %v9219_v58 = vmax.f32 %v7797_v32, %v17097_v55  ;;  %v6824_v6 = vsel %vm6696_vm2, %v6632_v35, %v6760_v47 }
 0x4b4   :  { %vm6699_vm4 = vcmp.gt.f32.partialorder %v6635_v8, 0.0  ;;  %v6763_v59 = vmul.f32 0.01, %v6635_v8  ;;  %v7849_v31 = vcombine.high %v7847_v15, %v7847_v15  ;;  %v17109_v62 = vrot.slane %v7848_v14, 9 }
 0x4b5   :  { %v17110_v27 = vrot.slane %v7847_v15, 9  ;;  %v9230_v28 = vmax.f32 %v7840_v21, %v17108_v23  ;;  %v9220_v9 = vmax.f32 %v7796_v40, %v17098_v25  ;;  %v7816_v50 = vcombine.high %v6824_v6, %v6824_v6 }
 0x4b6   :  { %v7823_v26 = vrot.slane %v6824_v6, %v22115_v18  ;;  %v6827_v13 = vsel %vm6699_vm4, %v6635_v8, %v6763_v59  ;;  %v17111_v54 = vrot.slane %v7849_v31, 9  ;;  %v9231_v43 = vmax.f32 %v7848_v14, %v17109_v62 }
 0x4b7   :  { %v9232_v7 = vmax.f32 %v7847_v15, %v17110_v27  ;;  %v23138_v49 = vmax.f32 %v9222_v12, %v9230_v28  ;;  %v9221_v51 = vmax.f32 %v7798_v48, %v17099_v38  ;;  %v7830_v32 = vrot.slane %v7816_v50, %v22115_v18 }
 0x4b8   :  { %v7831_v35 = vcombine.high %v7823_v26, %v7823_v26  ;;  %v17104_v55 = vrot.slane %v7823_v26, 9  ;;  %v9233_v47 = vmax.f32 %v7849_v31, %v17111_v54  ;;  %v23141_v19 = vmax.f32 %v9223_v63, %v9231_v43 }
 0x4b9   :  { %27753 = vst [vmem:[#allocation37_spill] sm:$0xff] %v23138_v49  ;;  %v23143_v4 = vmax.f32 %v9224_v60, %v9232_v7  ;;  %v7867_v40 = vcombine.high %v6827_v13, %v6827_v13  ;;  %v7832_v21 = vcombine.high %v7830_v32, %v7830_v32  ;;  %v17106_v23 = vrot.slane %v7830_v32, 9 }
 0x4ba   :  { %27754 = vst [vmem:[#allocation38_spill] sm:$0xff] %v23141_v19  ;;  %v17105_v25 = vrot.slane %v7831_v35, 9  ;;  %v9226_v8 = vmax.f32 %v7823_v26, %v17104_v55  ;;  %v23145_v6 = vmax.f32 %v9225_v3, %v9233_v47  ;;  %v9957_v12 = vrot.slane %v23138_v49, %v22125_v34 }
 0x4bb   :  { %27755 = vst [vmem:[#allocation39_spill] sm:$0xff] %v23143_v4  ;;  %v7874_v48 = vrot.slane %v6827_v13, %v22115_v18  ;;  %v6634_v38 = vadd.f32 %v22931_v29, %v23119_v52  ;;  %v17107_v15 = vrot.slane %v7832_v21, 9  ;;  %v9228_v14 = vmax.f32 %v7830_v32, %v17106_v23 }
 0x4bc   :  { %27756 = vst [vmem:[#allocation40_spill] sm:$0xff] %v23145_v6  ;;  %v9227_v63 = vmax.f32 %v7831_v35, %v17105_v25  ;;  %v23152_v60 = vmax.f32 %v9218_v41, %v9226_v8  ;;  %v9961_v59 = vrot.slane %v23141_v19, %v22125_v34  ;;  %v7881_v26 = vrot.slane %v7867_v40, %v22115_v18  ;;  %v27758_v25 = vld [vmem:[#allocation44_spill] sm:$0xff] }
 0x4bd   :  { %v7882_v3 = vcombine.high %v7874_v48, %v7874_v48  ;;  %v17116_v31 = vrot.slane %v7874_v48, 9  ;;  %v9965_v62 = vrot.slane %v23143_v4, %v22125_v34  ;;  %v9229_v27 = vmax.f32 %v7832_v21, %v17107_v15  ;;  %v27757_v21 = vld [vmem:[#allocation43_spill] sm:$0xff] }
 0x4be   :  { %v23159_v28 = vmax.f32 %v9219_v58, %v9227_v63  ;;  %v23161_v50 = vmax.f32 %v9220_v9, %v9228_v14  ;;  %v9969_v52 = vrot.slane %v23145_v6, %v22125_v34  ;;  %v9941_v41 = vrot.slane %v23152_v60, %v22125_v34  ;;  %v27759_v14 = vld [vmem:[#allocation45_spill] sm:$0xff] }
 0x4bf   :  { %v7883_v13 = vcombine.high %v7881_v26, %v7881_v26  ;;  %v17117_v54 = vrot.slane %v7882_v3, 9  ;;  %v23167_v43 = vmax.f32 %v9221_v51, %v9229_v27  ;;  %vm6698_vm5 = vcmp.gt.f32.partialorder %v6634_v38, 0.0 }
 0x4c0   :  { %v9945_v7 = vrot.slane %v23159_v28, %v22125_v34  ;;  %v9949_v32 = vrot.slane %v23161_v50, %v22125_v34  ;;  %v17118_v58 = vrot.slane %v7881_v26, 9  ;;  %v23173_v35 = vmax.f32 %v7874_v48, %v17116_v31 }
 0x4c1   :  { %v17119_v9 = vrot.slane %v7883_v13, 9  ;;  %v6762_v55 = vmul.f32 0.01, %v6634_v38  ;;  %v9953_v47 = vrot.slane %v23167_v43, %v22125_v34  ;;  %v19279_v51 = vadd.f32 %v22797_v2, %v27757_v21  ;;  %v27760_v21 = vld [vmem:[#allocation46_spill] sm:$0xff] }
 0x4c2   :  { %v10132_v40 = vsel %vm10034_vm8, %v9945_v7, %v9941_v41  ;;  %v19280_v23 = vadd.f32 %v22825_v10, %v27758_v25  ;;  %v23183_v15 = vmax.f32 %v7882_v3, %v17117_v54  ;;  %v19281_v48 = vadd.f32 %v22838_v42, %v27759_v14 }
 0x4c3   :  { %v10133_v8 = vsel %vm10036_vm10, %v9949_v32, %v10132_v40  ;;  %v6826_v63 = vsel %vm6698_vm5, %v6634_v38, %v6762_v55  ;;  %v6637_v41 = vadd.f32 %v22931_v29, %v19279_v51  ;;  %v9240_v7 = vmax.f32 %v7881_v26, %v17118_v58 }
 0x4c4   :  { %v10134_v31 = vsel %vm10038_vm11, %v9953_v47, %v10133_v8  ;;  %v7850_v27 = vcombine.high %v6826_v63, %v6826_v63  ;;  %v7857_v6 = vrot.slane %v6826_v63, %v22115_v18  ;;  %v6636_v10 = vadd.f32 %v22931_v29, %v19280_v23 }
 0x4c5   :  { %v10135_v2 = vsel %vm10040_vm12, %v9957_v12, %v10134_v31  ;;  %v19282_v3 = vadd.f32 %v22856_v17, %v27760_v21  ;;  %vm6701_vm6 = vcmp.gt.f32.partialorder %v6637_v41, 0.0  ;;  %v6765_v47 = vmul.f32 0.01, %v6637_v41 }
 0x4c6   :  { %v10136_v38 = vsel %vm10042_vm13, %v9961_v59, %v10135_v2  ;;  %v7864_v54 = vrot.slane %v7850_v27, %v22115_v18  ;;  %v7865_v42 = vcombine.high %v7857_v6, %v7857_v6  ;;  %v17112_v32 = vrot.slane %v7857_v6, 9 }
 0x4c7   :  { %v10137_v55 = vsel %vm10044_vm14, %v9965_v62, %v10136_v38  ;;  %v6639_v40 = vadd.f32 %v22931_v29, %v19281_v48  ;;  %vm6700_vm7 = vcmp.gt.f32.partialorder %v6636_v10, 0.0  ;;  %v6829_v25 = vsel %vm6701_vm6, %v6637_v41, %v6765_v47 }
 0x4c8   :  { %v10138_v12 = vsel %vm10046_vm15, %v9969_v52, %v10137_v55  ;;  %v7866_v26 = vcombine.high %v7864_v54, %v7864_v54  ;;  %v17113_v58 = vrot.slane %v7865_v42, 9  ;;  %v17114_v17 = vrot.slane %v7864_v54, 9 }
 0x4c9   :  { %v10195_v51 = vsel %vm10169_vm3, %v10138_v12, 0.0  ;;  %v6764_v59 = vmul.f32 0.01, %v6636_v10  ;;  %v9241_v8 = vmax.f32 %v7883_v13, %v17119_v9  ;;  %v9234_v62 = vmax.f32 %v7857_v6, %v17112_v32 }
 0x4ca   :  { %v23201_v23 = vadd.f32 %v10195_v51, %v23134_v46  ;;  %v17115_v63 = vrot.slane %v7866_v26, 9  ;;  %v7901_v14 = vcombine.high %v6829_v25, %v6829_v25  ;;  %v7908_v31 = vrot.slane %v6829_v25, %v22115_v18 }
 0x4cb   :  { %v6828_v48 = vsel %vm6700_vm7, %v6636_v10, %v6764_v59  ;;  %vm6703_vm9 = vcmp.gt.f32.partialorder %v6639_v40, 0.0  ;;  %v9235_v52 = vmax.f32 %v7865_v42, %v17113_v58  ;;  %v6767_v21 = vmul.f32 0.01, %v6639_v40 }
 0x4cc   :  { %v7884_v27 = vcombine.high %v6828_v48, %v6828_v48  ;;  %v7891_v2 = vrot.slane %v6828_v48, %v22115_v18  ;;  %v9236_v38 = vmax.f32 %v7864_v54, %v17114_v17  ;;  %v7915_v41 = vrot.slane %v7901_v14, %v22115_v18 }
 0x4cd   :  { %v7916_v55 = vcombine.high %v7908_v31, %v7908_v31  ;;  %v17124_v47 = vrot.slane %v7908_v31, 9  ;;  %v6831_v6 = vsel %vm6703_vm9, %v6639_v40, %v6767_v21  ;;  %vm11797_vm4 = vcmask 57344  }
 0x4ce   :  { %v7898_v46 = vrot.slane %v7884_v27, %v22115_v18  ;;  %v7899_v13 = vcombine.high %v7891_v2, %v7891_v2  ;;  %v17120_v9 = vrot.slane %v7891_v2, 9  ;;  %v7917_v32 = vcombine.high %v7915_v41, %v7915_v41 }
 0x4cf   :  { %v17125_v12 = vrot.slane %v7916_v55, 9  ;;  %v17126_v51 = vrot.slane %v7915_v41, 9  ;;  %v9246_v10 = vmax.f32 %v7908_v31, %v17124_v47  ;;  %v6638_v47 = vadd.f32 %v22931_v29, %v19282_v3 }
 0x4d0   :  { %v7900_v25 = vcombine.high %v7898_v46, %v7898_v46  ;;  %v17121_v42 = vrot.slane %v7899_v13, 9  ;;  %v17122_v58 = vrot.slane %v7898_v46, 9  ;;  %v9242_v59 = vmax.f32 %v7891_v2, %v17120_v9 }
 0x4d1   :  { %v17127_v48 = vrot.slane %v7917_v32, 9  ;;  %v9247_v4 = vmax.f32 %v7916_v55, %v17125_v12  ;;  %v9248_v54 = vmax.f32 %v7915_v41, %v17126_v51  ;;  %v23208_v17 = vmax.f32 %v23173_v35, %v9246_v10 }
 0x4d2   :  { %v17123_v14 = vrot.slane %v7900_v25, 9  ;;  %v9243_v19 = vmax.f32 %v7899_v13, %v17121_v42  ;;  %v9244_v27 = vmax.f32 %v7898_v46, %v17122_v58  ;;  %v23210_v49 = vmax.f32 %v9234_v62, %v9242_v59 }
 0x4d3   :  { %27761 = vst [vmem:[#allocation41_spill] sm:$0xff] %v23208_v17  ;;  %v9249_v40 = vmax.f32 %v7917_v32, %v17127_v48  ;;  %v23213_v21 = vmax.f32 %v23183_v15, %v9247_v4  ;;  %v23215_v31 = vmax.f32 %v9240_v7, %v9248_v54  ;;  %v9237_v2 = vmax.f32 %v7866_v26, %v17115_v63 }
 0x4d4   :  { %v9245_v9 = vmax.f32 %v7900_v25, %v17123_v14  ;;  %v23218_v55 = vmax.f32 %v9235_v52, %v9243_v19  ;;  %v23220_v41 = vmax.f32 %v9236_v38, %v9244_v27  ;;  %v7935_v13 = vcombine.high %v6831_v6, %v6831_v6 }
 0x4d5   :  { %27762 = vst [vmem:[#allocation42_spill] sm:$0xff] %v23213_v21  ;;  %27763 = vst [vmem:[#allocation43_spill] sm:$0xff] %v23215_v31  ;;  %v23222_v35 = vmax.f32 %v9241_v8, %v9249_v40  ;;  %v9973_v62 = vrot.slane %v23210_v49, %v22125_v34  ;;  %vm6702_vm0 = vcmp.gt.f32.partialorder %v6638_v47, 0.0  ;;  %v6766_v7 = vmul.f32 0.01, %v6638_v47 }
 0x4d6   :  { %v23224_v46 = vmax.f32 %v9237_v2, %v9245_v9  ;;  %v9977_v4 = vrot.slane %v23218_v55, %v22125_v34  ;;  %v9981_v15 = vrot.slane %v23220_v41, %v22125_v34  ;;  %v9989_v19 = vrot.slane %v23208_v17, %v22125_v34 }
 0x4d7   :  { %27764 = vst [vmem:[#allocation44_spill] sm:$0xff] %v23222_v35  ;;  %v7942_v63 = vrot.slane %v6831_v6, %v22115_v18  ;;  %v7949_v52 = vrot.slane %v7935_v13, %v22115_v18  ;;  %v6830_v38 = vsel %vm6702_vm0, %v6638_v47, %v6766_v7  ;;  %v9993_v32 = vrot.slane %v23213_v21, %v22125_v34  ;;  %v27766_v6 = vld [vmem:[#allocation47_spill] sm:$0xff]  ;;  %v27767_v13 = vld [vmem:[#allocation48_spill] sm:$0xff] }
 0x4d8   :  { %27765 = vst [vmem:[#allocation45_spill] sm:$0xff] %v23224_v46  ;;  %v9985_v3 = vrot.slane %v23224_v46, %v22125_v34  ;;  %v10139_v26 = vsel %vm10034_vm8, %v9977_v4, %v9973_v62  ;;  %v9997_v51 = vrot.slane %v23215_v31, %v22125_v34  ;;  %v7918_v25 = vcombine.high %v6830_v38, %v6830_v38 }
 0x4d9   :  { %v10140_v8 = vsel %vm10036_vm10, %v9981_v15, %v10139_v26  ;;  %v10001_v42 = vrot.slane %v23222_v35, %v22125_v34  ;;  %v19283_v59 = vadd.f32 %v22865_v56, %v27766_v6  ;;  %v7950_v54 = vcombine.high %v7942_v63, %v7942_v63 }
 0x4da   :  { %v10141_v12 = vsel %vm10038_vm11, %v9985_v3, %v10140_v8  ;;  %v7951_v14 = vcombine.high %v7949_v52, %v7949_v52  ;;  %v7925_v40 = vrot.slane %v6830_v38, %v22115_v18  ;;  %v7932_v9 = vrot.slane %v7918_v25, %v22115_v18 }
 0x4db   :  { %v10142_v10 = vsel %vm10040_vm12, %v9989_v19, %v10141_v12  ;;  %v6641_v47 = vadd.f32 %v22931_v29, %v19283_v59  ;;  %v19284_v62 = vadd.f32 %v22897_v5, %v27767_v13  ;;  %v17132_v56 = vrot.slane %v7942_v63, 9 }
 0x4dc   :  { %v10143_v58 = vsel %vm10042_vm13, %v9993_v32, %v10142_v10  ;;  %v17134_v15 = vrot.slane %v7949_v52, 9  ;;  %v17133_v7 = vrot.slane %v7950_v54, 9  ;;  %v17135_v19 = vrot.slane %v7951_v14, 9 }
 0x4dd   :  { %v10144_v48 = vsel %vm10044_vm14, %v9997_v51, %v10143_v58  ;;  %vm6705_vm1 = vcmp.gt.f32.partialorder %v6641_v47, 0.0  ;;  %v6769_v3 = vmul.f32 0.01, %v6641_v47  ;;  %v6640_v26 = vadd.f32 %v22931_v29, %v19284_v62 }
 0x4de   :  { %v10145_v27 = vsel %vm10046_vm15, %v10001_v42, %v10144_v48  ;;  %v7933_v8 = vcombine.high %v7925_v40, %v7925_v40  ;;  %v17128_v38 = vrot.slane %v7925_v40, 9  ;;  %v7934_v32 = vcombine.high %v7932_v9, %v7932_v9 }
 0x4df   :  { %v10197_v2 = vsel %vm10169_vm3, %v10145_v27, 0.0  ;;  %v6833_v12 = vsel %vm6705_vm1, %v6641_v47, %v6769_v3  ;;  %vm6704_vm2 = vcmp.gt.f32.partialorder %v6640_v26, 0.0  ;;  %v6768_v51 = vmul.f32 0.01, %v6640_v26 }
 0x4e0   :  { %v23260_v4 = vadd.f32 %v10197_v2, %v23201_v23  ;;  %v9254_v10 = vmax.f32 %v7942_v63, %v17132_v56  ;;  %v9256_v25 = vmax.f32 %v7949_v52, %v17134_v15  ;;  %v7969_v5 = vcombine.high %v6833_v12, %v6833_v12 }
 0x4e1   :  { %v7976_v23 = vrot.slane %v6833_v12, %v22115_v18  ;;  %v9255_v42 = vmax.f32 %v7950_v54, %v17133_v7  ;;  %v9257_v58 = vmax.f32 %v7951_v14, %v17135_v19  ;;  %v17130_v6 = vrot.slane %v7932_v9, 9 }
 0x4e2   :  { %v6832_v59 = vsel %vm6704_vm2, %v6640_v26, %v6768_v51  ;;  %v7983_v48 = vrot.slane %v7969_v5, %v22115_v18  ;;  %v17129_v13 = vrot.slane %v7933_v8, 9  ;;  %v17131_v62 = vrot.slane %v7934_v32, 9 }
 0x4e3   :  { %v7984_v27 = vcombine.high %v7976_v23, %v7976_v23  ;;  %v17140_v2 = vrot.slane %v7976_v23, 9  ;;  %v7952_v29 = vcombine.high %v6832_v59, %v6832_v59  ;;  %v9250_v35 = vmax.f32 %v7925_v40, %v17128_v38 }
 0x4e4   :  { %v7959_v47 = vrot.slane %v6832_v59, %v22115_v18  ;;  %v7985_v3 = vcombine.high %v7983_v48, %v7983_v48  ;;  %v17142_v52 = vrot.slane %v7983_v48, 9  ;;  %v9252_v15 = vmax.f32 %v7932_v9, %v17130_v6 }
 0x4e5   :  { %v17141_v63 = vrot.slane %v7984_v27, 9  ;;  %v9262_v56 = vmax.f32 %v7976_v23, %v17140_v2  ;;  %v7966_v54 = vrot.slane %v7952_v29, %v22115_v18  ;;  %v9251_v38 = vmax.f32 %v7933_v8, %v17129_v13 }
 0x4e6   :  { %v7967_v14 = vcombine.high %v7959_v47, %v7959_v47  ;;  %v17136_v7 = vrot.slane %v7959_v47, 9  ;;  %v17143_v19 = vrot.slane %v7985_v3, 9  ;;  %v9264_v12 = vmax.f32 %v7983_v48, %v17142_v52 }
 0x4e7   :  { %v9263_v26 = vmax.f32 %v7984_v27, %v17141_v63  ;;  %v23267_v51 = vmax.f32 %v9254_v10, %v9262_v56  ;;  %v7968_v5 = vcombine.high %v7966_v54, %v7966_v54  ;;  %v17138_v21 = vrot.slane %v7966_v54, 9 }
 0x4e8   :  { %v17137_v31 = vrot.slane %v7967_v14, 9  ;;  %v9258_v40 = vmax.f32 %v7959_v47, %v17136_v7  ;;  %v9265_v59 = vmax.f32 %v7985_v3, %v17143_v19  ;;  %v23271_v46 = vmax.f32 %v9256_v25, %v9264_v12 }
 0x4e9   :  { %v23269_v17 = vmax.f32 %v9255_v42, %v9263_v26  ;;  %v17139_v9 = vrot.slane %v7968_v5, 9  ;;  %v9260_v6 = vmax.f32 %v7966_v54, %v17138_v21  ;;  %v9253_v48 = vmax.f32 %v7934_v32, %v17131_v62 }
 0x4ea   :  { %v9259_v23 = vmax.f32 %v7967_v14, %v17137_v31  ;;  %v23273_v2 = vmax.f32 %v9250_v35, %v9258_v40  ;;  %v23275_v29 = vmax.f32 %v9257_v58, %v9265_v59  ;;  %v10021_v32 = vrot.slane %v23267_v51, %v22125_v34 }
 0x4eb   :  { %v9261_v10 = vmax.f32 %v7968_v5, %v17139_v9  ;;  %v23279_v63 = vmax.f32 %v9252_v15, %v9260_v6  ;;  %v10025_v58 = vrot.slane %v23269_v17, %v22125_v34  ;;  %v10029_v62 = vrot.slane %v23271_v46, %v22125_v34 }
 0x4ec   :  { %v23277_v27 = vmax.f32 %v9251_v38, %v9259_v23  ;;  %v10005_v8 = vrot.slane %v23273_v2, %v22125_v34  ;;  %v10033_v52 = vrot.slane %v23275_v29, %v22125_v34  ;;  %vm15555_vm0 = vcmask 130048  }
 0x4ed   :  { %v23281_v47 = vmax.f32 %v9253_v48, %v9261_v10  ;;  %v10013_v21 = vrot.slane %v23279_v63, %v22125_v34 }
 0x4ee   :  { %v10009_v25 = vrot.slane %v23277_v27, %v22125_v34 }
 0x4ef   :  { %v10017_v31 = vrot.slane %v23281_v47, %v22125_v34 }
 0x4f0   :  { %v10146_v35 = vsel %vm10034_vm8, %v10009_v25, %v10005_v8  ;;  %v27768_v8 = vld [vmem:[#allocation55_spill] sm:$0xff] }
 0x4f1   :  { %v10147_v42 = vsel %vm10036_vm10, %v10013_v21, %v10146_v35  ;;  %v27770_v21 = vld [vmem:[#allocation64_spill] sm:$0xff]  ;;  %v27772_v35 = vld [vmem:[#allocation75_spill] sm:$0xff] }
 0x4f2   :  { %v10148_v13 = vsel %vm10038_vm11, %v10017_v31, %v10147_v42  ;;  %v27774_v42 = vld [vmem:[#allocation84_spill] sm:$0xff] }
 0x4f3   :  { %v10149_v3 = vsel %vm10040_vm12, %v10021_v32, %v10148_v13  ;;  %v27776_v13 = vld [vmem:[#allocation92_spill] sm:$0xff] }
 0x4f4   :  { %v10150_v56 = vsel %vm10042_vm13, %v10025_v58, %v10149_v3 }
 0x4f5   :  { %v10151_v15 = vsel %vm10044_vm14, %v10029_v62, %v10150_v56 }
 0x4f6   :  { %v10152_v54 = vsel %vm10046_vm15, %v10033_v52, %v10151_v15  ;;  %v27778_v15 = vld [vmem:[#allocation56_spill] sm:$0xff] }
 0x4f7   :  { %v10199_v14 = vsel %vm10169_vm3, %v10152_v54, 0.0 }
 0x4f8   :  { %v10200_v7 = vadd.f32 %v10199_v14, %v23260_v4  ;;  %v27780_v14 = vld [vmem:[#allocation57_spill] sm:$0xff] }
 0x4fa   :  { %v10201_v19 = vrot.slane %v10200_v7, 4 }
 0x4fc   :  { %v10202_v26 = vadd.f32 %v10201_v19, %v10200_v7  ;;  %v27782_v19 = vld [vmem:[#allocation51_spill] sm:$0xff] }
 0x4fe   :  { %v10203_v12 = vrot.slane %v10202_v26, 2 }
 0x500   :  { %v10204_v5 = vadd.f32 %v10203_v12, %v10202_v26  ;;  %v27784_v12 = vld [vmem:[#allocation67_spill] sm:$0xff] }
 0x502   :  { %v10205_v40 = vrot.slane %v10204_v5, 1 }
 0x504   :  { %v10206_v38 = vadd.f32 %v10205_v40, %v10204_v5  ;;  %v27786_v40 = vld [vmem:[#allocation65_spill] sm:$0xff] }
 0x506   :  { %v10208_v59 = vmul.f32 0.0078125, %v10206_v38 }
 0x508   :  { %v10212_v9 = vrot.slane %v10208_v59, %v22125_v34  ;;  %v27804_v34 = vld [vmem:[#allocation66_spill] sm:$0xff] }
 0x50a   :  { %v10214_v23 = vcombine.high %v10212_v9, %v10212_v9  ;;  %v23310_v6 = vrot.slane %v10212_v9, %v22115_v18  ;;  %v27788_v9 = vld [vmem:[#allocation58_spill] sm:$0xff] }
 0x50c   :  { %v23313_v48 = vrot.slane %v10214_v23, %v22115_v18  ;;  %v23317_v10 = vcombine.high %v23310_v6, %v23310_v6  ;;  %v23320_v4 = vrot.slane %v23310_v6, 1  ;;  %v23324_v25 = vsub.f32 %v27768_v8, %v23310_v6  ;;  %v27790_v8 = vld [vmem:[#allocation53_spill] sm:$0xff]  ;;  %v27802_v18 = vld [vmem:[#allocation54_spill] sm:$0xff] }
 0x50d   :  { %v23328_v31 = vsub.f32 %v27770_v21, %v23310_v6  ;;  %v23332_v32 = vsub.f32 %v27772_v35, %v23310_v6  ;;  %v23336_v58 = vsub.f32 %v27774_v42, %v23310_v6  ;;  %v23340_v62 = vsub.f32 %v27776_v13, %v23310_v6  ;;  %v27792_v35 = vld [vmem:[#allocation52_spill] sm:$0xff] }
 0x50e   :  { %27769 = vst [vmem:[#allocation46_spill] sm:$0xff] %v23324_v25  ;;  %v23344_v3 = vcombine.high %v23313_v48, %v23313_v48  ;;  %v23347_v52 = vrot.slane %v23317_v10, 1  ;;  %v23350_v56 = vrot.slane %v23313_v48, 1  ;;  %v23354_v54 = vsub.f32 %v27778_v15, %v23320_v4  ;;  %v27794_v13 = vld [vmem:[#allocation68_spill] sm:$0xff] }
 0x50f   :  { %27771 = vst [vmem:[#allocation47_spill] sm:$0xff] %v23328_v31  ;;  %27773 = vst [vmem:[#allocation48_spill] sm:$0xff] %v23332_v32  ;;  %v23358_v7 = vsub.f32 %v27780_v14, %v23317_v10  ;;  %v23362_v26 = vsub.f32 %v27782_v19, %v23313_v48  ;;  %v23366_v5 = vsub.f32 %v27784_v12, %v23320_v4  ;;  %v27796_v14 = vld [vmem:[#allocation61_spill] sm:$0xff]  ;;  %v27798_v12 = vld [vmem:[#allocation62_spill] sm:$0xff] }
 0x510   :  { %27775 = vst [vmem:[#allocation55_spill] sm:$0xff] %v23336_v58  ;;  %27777 = vst [vmem:[#allocation64_spill] sm:$0xff] %v23340_v62  ;;  %v23370_v38 = vsub.f32 %v27786_v40, %v23317_v10  ;;  %v23373_v59 = vrot.slane %v23344_v3, 1  ;;  %v23377_v23 = vsub.f32 %v27788_v9, %v23347_v52  ;;  %v23381_v21 = vsub.f32 %v27790_v8, %v23350_v56  ;;  %v27800_v9 = vld [vmem:[#allocation63_spill] sm:$0xff]  ;;  %v27806_v62 = vld [vmem:[#allocation77_spill] sm:$0xff] }
 0x511   :  { %27779 = vst [vmem:[#allocation75_spill] sm:$0xff] %v23354_v54  ;;  %27781 = vst [vmem:[#allocation84_spill] sm:$0xff] %v23358_v7  ;;  %v23385_v42 = vsub.f32 %v27792_v35, %v23344_v3  ;;  %v23389_v15 = vsub.f32 %v27794_v13, %v23347_v52  ;;  %v23393_v19 = vsub.f32 %v27796_v14, %v23313_v48  ;;  %v27808_v58 = vld [vmem:[#allocation78_spill] sm:$0xff]  ;;  %v27810_v32 = vld [vmem:[#allocation79_spill] sm:$0xff] }
 0x512   :  { %27783 = vst [vmem:[#allocation92_spill] sm:$0xff] %v23362_v26  ;;  %27785 = vst [vmem:[#allocation56_spill] sm:$0xff] %v23366_v5  ;;  %v23397_v40 = vsub.f32 %v27798_v12, %v23350_v56  ;;  %v23401_v8 = vsub.f32 %v27800_v9, %v23344_v3  ;;  %v23405_v35 = vsub.f32 %v27802_v18, %v23373_v59 }
 0x513   :  { %27787 = vst [vmem:[#allocation57_spill] sm:$0xff] %v23370_v38  ;;  %27789 = vst [vmem:[#allocation51_spill] sm:$0xff] %v23377_v23  ;;  %v23409_v13 = vsub.f32 %v27804_v34, %v23373_v59  ;;  %v23413_v14 = vsub.f32 %v27806_v62, %v23320_v4  ;;  %v23417_v12 = vsub.f32 %v27808_v58, %v23317_v10 }
 0x514   :  { %27791 = vst [vmem:[#allocation67_spill] sm:$0xff] %v23381_v21  ;;  %27793 = vst [vmem:[#allocation65_spill] sm:$0xff] %v23385_v42  ;;  %v23421_v9 = vsub.f32 %v27810_v32, %v23347_v52 }
 0x515   :  { %27795 = vst [vmem:[#allocation58_spill] sm:$0xff] %v23389_v15  ;;  %27797 = vst [vmem:[#allocation53_spill] sm:$0xff] %v23393_v19 }
 0x516   :  { %27799 = vst [vmem:[#allocation52_spill] sm:$0xff] %v23397_v40  ;;  %27801 = vst [vmem:[#allocation68_spill] sm:$0xff] %v23401_v8  ;;  %v27812_v8 = vld [vmem:[#allocation72_spill] sm:$0xff]  ;;  %v27814_v40 = vld [vmem:[#allocation73_spill] sm:$0xff] }
 0x517   :  { %27803 = vst [vmem:[#allocation61_spill] sm:$0xff] %v23405_v35  ;;  %27805 = vst [vmem:[#allocation62_spill] sm:$0xff] %v23409_v13  ;;  %v23425_v18 = vsub.f32 %v27812_v8, %v23313_v48  ;;  %v23429_v34 = vsub.f32 %v27814_v40, %v23350_v56  ;;  %v27816_v13 = vld [vmem:[#allocation74_spill] sm:$0xff] }
 0x518   :  { %27807 = vst [vmem:[#allocation63_spill] sm:$0xff] %v23413_v14  ;;  %27809 = vst [vmem:[#allocation54_spill] sm:$0xff] %v23417_v12  ;;  %v23433_v62 = vsub.f32 %v27816_v13, %v23344_v3  ;;  %v27818_v14 = vld [vmem:[#allocation76_spill] sm:$0xff]  ;;  %v27820_v12 = vld [vmem:[#allocation85_spill] sm:$0xff] }
 0x519   :  { %27811 = vst [vmem:[#allocation66_spill] sm:$0xff] %v23421_v9  ;;  %27813 = vst [vmem:[#allocation77_spill] sm:$0xff] %v23425_v18  ;;  %v23437_v58 = vsub.f32 %v27818_v14, %v23373_v59  ;;  %v23441_v32 = vsub.f32 %v27820_v12, %v23320_v4  ;;  %v27822_v9 = vld [vmem:[#allocation86_spill] sm:$0xff]  ;;  %v27824_v18 = vld [vmem:[#allocation87_spill] sm:$0xff] }
 0x51a   :  { %27815 = vst [vmem:[#allocation78_spill] sm:$0xff] %v23429_v34  ;;  %27817 = vst [vmem:[#allocation79_spill] sm:$0xff] %v23433_v62  ;;  %v23445_v8 = vsub.f32 %v27822_v9, %v23317_v10  ;;  %v23449_v40 = vsub.f32 %v27824_v18, %v23347_v52  ;;  %v27826_v34 = vld [vmem:[#allocation80_spill] sm:$0xff]  ;;  %v27828_v62 = vld [vmem:[#allocation82_spill] sm:$0xff] }
 0x51b   :  { %27819 = vst [vmem:[#allocation72_spill] sm:$0xff] %v23437_v58  ;;  %27821 = vst [vmem:[#allocation73_spill] sm:$0xff] %v23441_v32  ;;  %v23453_v13 = vsub.f32 %v27826_v34, %v23313_v48  ;;  %v23457_v14 = vsub.f32 %v27828_v62, %v23350_v56  ;;  %v27830_v58 = vld [vmem:[#allocation81_spill] sm:$0xff]  ;;  %v27832_v32 = vld [vmem:[#allocation83_spill] sm:$0xff] }
 0x51c   :  { %27823 = vst [vmem:[#allocation74_spill] sm:$0xff] %v23445_v8  ;;  %27825 = vst [vmem:[#allocation76_spill] sm:$0xff] %v23449_v40  ;;  %v23461_v12 = vsub.f32 %v27830_v58, %v23344_v3  ;;  %v23465_v9 = vsub.f32 %v27832_v32, %v23373_v59  ;;  %v27834_v8 = vld [vmem:[#allocation93_spill] sm:$0xff]  ;;  %v27836_v40 = vld [vmem:[#allocation94_spill] sm:$0xff] }
 0x51d   :  { %27827 = vst [vmem:[#allocation85_spill] sm:$0xff] %v23453_v13  ;;  %27829 = vst [vmem:[#allocation86_spill] sm:$0xff] %v23457_v14  ;;  %v23469_v18 = vsub.f32 %v27834_v8, %v23320_v4  ;;  %v23473_v34 = vsub.f32 %v27836_v40, %v23317_v10  ;;  %v27838_v13 = vld [vmem:[#allocation95_spill] sm:$0xff]  ;;  %v27840_v14 = vld [vmem:[#allocation88_spill] sm:$0xff] }
 0x51e   :  { %27831 = vst [vmem:[#allocation87_spill] sm:$0xff] %v23461_v12  ;;  %27833 = vst [vmem:[#allocation80_spill] sm:$0xff] %v23465_v9  ;;  %v23477_v62 = vsub.f32 %v27838_v13, %v23347_v52  ;;  %v23481_v58 = vsub.f32 %v27840_v14, %v23313_v48  ;;  %v27842_v12 = vld [vmem:[#allocation89_spill] sm:$0xff]  ;;  %v27844_v9 = vld [vmem:[#allocation90_spill] sm:$0xff] }
 0x51f   :  { %27835 = vst [vmem:[#allocation82_spill] sm:$0xff] %v23469_v18  ;;  %27837 = vst [vmem:[#allocation81_spill] sm:$0xff] %v23473_v34  ;;  %v23485_v32 = vsub.f32 %v27842_v12, %v23350_v56  ;;  %v23489_v8 = vsub.f32 %v27844_v9, %v23344_v3  ;;  %v27846_v18 = vld [vmem:[#allocation91_spill] sm:$0xff] }
 0x520   :  { %27839 = vst [vmem:[#allocation83_spill] sm:$0xff] %v23477_v62  ;;  %27841 = vst [vmem:[#allocation93_spill] sm:$0xff] %v23481_v58  ;;  %v23493_v40 = vsub.f32 %v27846_v18, %v23373_v59  ;;  %v27848_v34 = vld [vmem:[#allocation59_spill] sm:$0xff]  ;;  %v27850_v62 = vld [vmem:[#allocation9_spill] sm:$0xff] }
 0x521   :  { %27843 = vst [vmem:[#allocation94_spill] sm:$0xff] %v23485_v32  ;;  %27845 = vst [vmem:[#allocation95_spill] sm:$0xff] %v23489_v8  ;;  %v23497_v13 = vsub.f32 %v27848_v34, %v23310_v6  ;;  %v23501_v14 = vsub.f32 %v27850_v62, %v23320_v4  ;;  %v27852_v58 = vld [vmem:[#allocation10_spill] sm:$0xff]  ;;  %v27854_v32 = vld [vmem:[#allocation97_spill] sm:$0xff] }
 0x522   :  { %27847 = vst [vmem:[#allocation88_spill] sm:$0xff] %v23493_v40  ;;  %v23505_v12 = vsub.f32 %v27852_v58, %v23317_v10  ;;  %v23509_v9 = vsub.f32 %v27854_v32, %v23347_v52  ;;  %v27856_v8 = vld [vmem:[#allocation7_spill] sm:$0xff]  ;;  %v27858_v40 = vld [vmem:[#allocation8_spill] sm:$0xff] }
 0x523   :  { %27849 = vst [vmem:[#allocation89_spill] sm:$0xff] %v23497_v13  ;;  %27851 = vst [vmem:[#allocation90_spill] sm:$0xff] %v23501_v14  ;;  %v23513_v18 = vsub.f32 %v27856_v8, %v23313_v48  ;;  %v23517_v34 = vsub.f32 %v27858_v40, %v23350_v56  ;;  %v27860_v13 = vld [vmem:[#allocation60_spill] sm:$0xff] }
 0x524   :  { %27853 = vst [vmem:[#allocation91_spill] sm:$0xff] %v23505_v12  ;;  %27855 = vst [vmem:[#allocation59_spill] sm:$0xff] %v23509_v9  ;;  %v23521_v62 = vsub.f32 %v27860_v13, %v23344_v3  ;;  %v27862_v14 = vld [vmem:[#allocation96_spill] sm:$0xff]  ;;  %v27864_v12 = vld [vmem:[#allocation98_spill] sm:$0xff] }
 0x525   :  { %27857 = vst [vmem:[#allocation9_spill] sm:$0xff] %v23513_v18  ;;  %27859 = vst [vmem:[#allocation10_spill] sm:$0xff] %v23517_v34  ;;  %v23525_v58 = vsub.f32 %v27862_v14, %v23373_v59  ;;  %v23529_v32 = vsub.f32 %v27864_v12, %v23310_v6  ;;  %v27866_v9 = vld [vmem:[#allocation100_spill] sm:$0xff]  ;;  %v27868_v18 = vld [vmem:[#allocation101_spill] sm:$0xff] }
 0x526   :  { %27861 = vst [vmem:[#allocation97_spill] sm:$0xff] %v23521_v62  ;;  %v23533_v8 = vsub.f32 %v27866_v9, %v23320_v4  ;;  %v23537_v40 = vsub.f32 %v27868_v18, %v23317_v10  ;;  %v27870_v34 = vld [vmem:[#allocation14_spill] sm:$0xff]  ;;  %v27872_v62 = vld [vmem:[#allocation11_spill] sm:$0xff] }
 0x527   :  { %27863 = vst [vmem:[#allocation7_spill] sm:$0xff] %v23525_v58  ;;  %27865 = vst [vmem:[#allocation8_spill] sm:$0xff] %v23529_v32  ;;  %v23541_v13 = vsub.f32 %v27870_v34, %v23347_v52  ;;  %v23545_v14 = vsub.f32 %v27872_v62, %v23313_v48  ;;  %v27874_v58 = vld [vmem:[#allocation12_spill] sm:$0xff]  ;;  %v27876_v32 = vld [vmem:[#allocation13_spill] sm:$0xff] }
 0x528   :  { %27867 = vst [vmem:[#allocation60_spill] sm:$0xff] %v23533_v8  ;;  %27869 = vst [vmem:[#allocation96_spill] sm:$0xff] %v23537_v40  ;;  %v23549_v12 = vsub.f32 %v27874_v58, %v23350_v56  ;;  %v23553_v9 = vsub.f32 %v27876_v32, %v23344_v3  ;;  %v27878_v8 = vld [vmem:[#allocation99_spill] sm:$0xff]  ;;  %v27880_v40 = vld [vmem:[#allocation17_spill] sm:$0xff] }
 0x529   :  { %27871 = vst [vmem:[#allocation98_spill] sm:$0xff] %v23541_v13  ;;  %27873 = vst [vmem:[#allocation100_spill] sm:$0xff] %v23545_v14  ;;  %v23557_v18 = vsub.f32 %v27878_v8, %v23373_v59  ;;  %v23561_v34 = vsub.f32 %v27880_v40, %v23310_v6  ;;  %v27882_v13 = vld [vmem:[#allocation103_spill] sm:$0xff]  ;;  %v27884_v14 = vld [vmem:[#allocation70_spill] sm:$0xff] }
 0x52a   :  { %27875 = vst [vmem:[#allocation101_spill] sm:$0xff] %v23549_v12  ;;  %27877 = vst [vmem:[#allocation14_spill] sm:$0xff] %v23553_v9  ;;  %v23565_v62 = vsub.f32 %v27882_v13, %v23320_v4  ;;  %v23569_v58 = vsub.f32 %v27884_v14, %v23317_v10  ;;  %v27886_v12 = vld [vmem:[#allocation104_spill] sm:$0xff]  ;;  %v27888_v9 = vld [vmem:[#allocation15_spill] sm:$0xff] }
 0x52b   :  { %27879 = vst [vmem:[#allocation11_spill] sm:$0xff] %v23557_v18  ;;  %27881 = vst [vmem:[#allocation12_spill] sm:$0xff] %v23561_v34  ;;  %v23573_v32 = vsub.f32 %v27886_v12, %v23347_v52  ;;  %v23577_v8 = vsub.f32 %v27888_v9, %v23313_v48  ;;  %v27890_v18 = vld [vmem:[#allocation16_spill] sm:$0xff]  ;;  %v27892_v34 = vld [vmem:[#allocation69_spill] sm:$0xff] }
 0x52c   :  { %27883 = vst [vmem:[#allocation13_spill] sm:$0xff] %v23565_v62  ;;  %27885 = vst [vmem:[#allocation99_spill] sm:$0xff] %v23569_v58  ;;  %v23581_v40 = vsub.f32 %v27890_v18, %v23350_v56  ;;  %v23585_v13 = vsub.f32 %v27892_v34, %v23344_v3  ;;  %v27894_v62 = vld [vmem:[#allocation102_spill] sm:$0xff]  ;;  %v27896_v58 = vld [vmem:[#allocation20_spill] sm:$0xff] }
 0x52d   :  { %27887 = vst [vmem:[#allocation17_spill] sm:$0xff] %v23573_v32  ;;  %27889 = vst [vmem:[#allocation103_spill] sm:$0xff] %v23577_v8  ;;  %v23589_v14 = vsub.f32 %v27894_v62, %v23373_v59  ;;  %v23593_v12 = vsub.f32 %v27896_v58, %v23310_v6  ;;  %v27898_v32 = vld [vmem:[#allocation105_spill] sm:$0xff]  ;;  %v27900_v8 = vld [vmem:[#allocation106_spill] sm:$0xff] }
 0x52e   :  { %27891 = vst [vmem:[#allocation70_spill] sm:$0xff] %v23581_v40  ;;  %27893 = vst [vmem:[#allocation104_spill] sm:$0xff] %v23585_v13  ;;  %v23597_v9 = vsub.f32 %v27898_v32, %v23320_v4  ;;  %v23601_v18 = vsub.f32 %v27900_v8, %v23317_v10  ;;  %v27902_v40 = vld [vmem:[#allocation22_spill] sm:$0xff] }
 0x52f   :  { %27895 = vst [vmem:[#allocation15_spill] sm:$0xff] %v23589_v14  ;;  %27897 = vst [vmem:[#allocation16_spill] sm:$0xff] %v23593_v12  ;;  %v23605_v34 = vsub.f32 %v27902_v40, %v23347_v52  ;;  %v27904_v13 = vld [vmem:[#allocation18_spill] sm:$0xff]  ;;  %v27906_v14 = vld [vmem:[#allocation71_spill] sm:$0xff]  ;;  %v23625_v40 = vsub.f32 %v22871_v61, %v23310_v6 }
 0x530   :  { %27899 = vst [vmem:[#allocation69_spill] sm:$0xff] %v23597_v9  ;;  %27901 = vst [vmem:[#allocation102_spill] sm:$0xff] %v23601_v18  ;;  %v23609_v62 = vsub.f32 %v27904_v13, %v23313_v48  ;;  %v23613_v58 = vsub.f32 %v27906_v14, %v23350_v56  ;;  %v27908_v12 = vld [vmem:[#allocation19_spill] sm:$0xff]  ;;  %v27910_v9 = vld [vmem:[#allocation21_spill] sm:$0xff]  ;;  %v23629_v13 = vsub.f32 %v22880_v39, %v23320_v4 }
 0x531   :  { %27903 = vst [vmem:[#allocation20_spill] sm:$0xff] %v23605_v34  ;;  %v23617_v32 = vsub.f32 %v27908_v12, %v23344_v3  ;;  %v23621_v8 = vsub.f32 %v27910_v9, %v23373_v59  ;;  %27912 = vst [vmem:[#allocation71_spill] sm:$0xff] %v23625_v40  ;;  %v23633_v14 = vsub.f32 %v22882_v37, %v23317_v10  ;;  %v27920_v40 = vld [vmem:[#allocation25_spill] sm:$0xff] }
 0x532   :  { %27905 = vst [vmem:[#allocation105_spill] sm:$0xff] %v23609_v62  ;;  %27907 = vst [vmem:[#allocation106_spill] sm:$0xff] %v23613_v58  ;;  %v23637_v12 = vsub.f32 %v22889_v57, %v23347_v52  ;;  %v23649_v39 = vsub.f32 %v27920_v40, %v23344_v3  ;;  %v23657_v57 = vsub.f32 %v22952_v1, %v23310_v6 }
 0x533   :  { %27909 = vst [vmem:[#allocation22_spill] sm:$0xff] %v23617_v32  ;;  %27911 = vst [vmem:[#allocation18_spill] sm:$0xff] %v23621_v8  ;;  %v27916_v32 = vld [vmem:[#allocation23_spill] sm:$0xff]  ;;  %v27918_v8 = vld [vmem:[#allocation24_spill] sm:$0xff]  ;;  %v23669_v40 = vsub.f32 %v22967_v24, %v23347_v52  ;;  %v23689_v24 = vsub.f32 %v23015_v44, %v23310_v6  ;;  %v23709_v44 = vsub.f32 %v23011_v11, %v23350_v56 }
 0x534   :  { %27913 = vst [vmem:[#allocation19_spill] sm:$0xff] %v23629_v13  ;;  %27914 = vst [vmem:[#allocation21_spill] sm:$0xff] %v23633_v14  ;;  %v23641_v9 = vsub.f32 %v27916_v32, %v23313_v48  ;;  %v23645_v61 = vsub.f32 %v27918_v8, %v23350_v56  ;;  %v27922_v13 = vld [vmem:[#allocation107_spill] sm:$0xff]  ;;  %v23661_v32 = vsub.f32 %v22958_v30, %v23320_v4 }
 0x535   :  { %27915 = vst [vmem:[#allocation108_spill] sm:$0xff] %v23637_v12  ;;  %27921 = vst [vmem:[#allocation25_spill] sm:$0xff] %v23649_v39  ;;  %v23653_v37 = vsub.f32 %v27922_v13, %v23373_v59  ;;  %v23665_v8 = vsub.f32 %v22960_v16, %v23317_v10  ;;  %v27928_v39 = vld [vmem:[#allocation26_spill] sm:$0xff]  ;;  %v23729_v11 = vsub.f32 %v23099_v20, %v23317_v10 }
 0x536   :  { %27917 = vst [vmem:[#allocation23_spill] sm:$0xff] %v23641_v9  ;;  %27919 = vst [vmem:[#allocation24_spill] sm:$0xff] %v23645_v61  ;;  %v23673_v13 = vsub.f32 %v27928_v39, %v23313_v48  ;;  %v23693_v39 = vsub.f32 %v23023_v33, %v23320_v4 }
 0x537   :  { %27923 = vst [vmem:[#allocation107_spill] sm:$0xff] %v23653_v37  ;;  %27924 = vst [vmem:[#allocation109_spill] sm:$0xff] %v23657_v57  ;;  %v27930_v37 = vld [vmem:[#allocation27_spill] sm:$0xff]  ;;  %v27932_v57 = vld [vmem:[#allocation28_spill] sm:$0xff] }
 0x538   :  { %27925 = vst [vmem:[#allocation110_spill] sm:$0xff] %v23661_v32  ;;  %27926 = vst [vmem:[#allocation111_spill] sm:$0xff] %v23665_v8  ;;  %v23677_v1 = vsub.f32 %v27930_v37, %v23350_v56  ;;  %v23681_v30 = vsub.f32 %v27932_v57, %v23344_v3  ;;  %v27934_v32 = vld [vmem:[#allocation29_spill] sm:$0xff]  ;;  %v23697_v37 = vsub.f32 %v23025_v45, %v23317_v10 }
 0x539   :  { %27927 = vst [vmem:[#allocation112_spill] sm:$0xff] %v23669_v40  ;;  %27929 = vst [vmem:[#allocation26_spill] sm:$0xff] %v23673_v13  ;;  %v23685_v16 = vsub.f32 %v27934_v32, %v23373_v59  ;;  %v23701_v57 = vsub.f32 %v23033_v36, %v23347_v52  ;;  %v23705_v32 = vsub.f32 %v23008_v22, %v23313_v48 }
 0x53a   :  { %27931 = vst [vmem:[#allocation27_spill] sm:$0xff] %v23677_v1  ;;  %27933 = vst [vmem:[#allocation28_spill] sm:$0xff] %v23681_v30  ;;  %v23721_v36 = vsub.f32 %v23095_v53, %v23310_v6  ;;  %v23725_v22 = vsub.f32 %v23097_v0, %v23320_v4 }
 0x53b   :  { %27935 = vst [vmem:[#allocation29_spill] sm:$0xff] %v23685_v16  ;;  %27936 = vst [vmem:[#allocation113_spill] sm:$0xff] %v23689_v24  ;;  %v27942_v24 = vld [vmem:[#allocation30_spill] sm:$0xff] }
 0x53c   :  { %27937 = vst [vmem:[#allocation114_spill] sm:$0xff] %v23693_v39  ;;  %27938 = vst [vmem:[#allocation115_spill] sm:$0xff] %v23697_v37  ;;  %v23713_v33 = vsub.f32 %v27942_v24, %v23344_v3  ;;  %v27944_v39 = vld [vmem:[#allocation31_spill] sm:$0xff] }
 0x53d   :  { %27939 = vst [vmem:[#allocation116_spill] sm:$0xff] %v23701_v57  ;;  %27940 = vst [vmem:[#allocation117_spill] sm:$0xff] %v23705_v32  ;;  %v23717_v45 = vsub.f32 %v27944_v39, %v23373_v59 }
 0x53e   :  { %27941 = vst [vmem:[#allocation118_spill] sm:$0xff] %v23709_v44  ;;  %27943 = vst [vmem:[#allocation30_spill] sm:$0xff] %v23713_v33  ;;  %v27949_v44 = vld [vmem:[#allocation36_spill] sm:$0xff] }
 0x53f   :  { %27945 = vst [vmem:[#allocation31_spill] sm:$0xff] %v23717_v45  ;;  %27946 = vst [vmem:[#allocation119_spill] sm:$0xff] %v23721_v36  ;;  %v23733_v24 = vsub.f32 %v27949_v44, %v23347_v52  ;;  %v27951_v33 = vld [vmem:[#allocation32_spill] sm:$0xff]  ;;  %v27953_v45 = vld [vmem:[#allocation34_spill] sm:$0xff]  ;;  %v23753_v44 = vsub.f32 %v23152_v60, %v23310_v6 }
 0x540   :  { %27947 = vst [vmem:[#allocation120_spill] sm:$0xff] %v23725_v22  ;;  %27948 = vst [vmem:[#allocation121_spill] sm:$0xff] %v23729_v11  ;;  %v23737_v39 = vsub.f32 %v27951_v33, %v23313_v48  ;;  %v23741_v53 = vsub.f32 %v27953_v45, %v23350_v56  ;;  %v27955_v36 = vld [vmem:[#allocation33_spill] sm:$0xff]  ;;  %v27957_v22 = vld [vmem:[#allocation35_spill] sm:$0xff]  ;;  %v23757_v33 = vsub.f32 %v23159_v28, %v23320_v4 }
 0x541   :  { %27950 = vst [vmem:[#allocation36_spill] sm:$0xff] %v23733_v24  ;;  %v23745_v0 = vsub.f32 %v27955_v36, %v23344_v3  ;;  %v23749_v20 = vsub.f32 %v27957_v22, %v23373_v59  ;;  %27959 = vst [vmem:[#allocation122_spill] sm:$0xff] %v23753_v44  ;;  %v23761_v45 = vsub.f32 %v23161_v50, %v23317_v10  ;;  %v27967_v44 = vld [vmem:[#allocation39_spill] sm:$0xff] }
 0x542   :  { %27952 = vst [vmem:[#allocation32_spill] sm:$0xff] %v23737_v39  ;;  %27954 = vst [vmem:[#allocation34_spill] sm:$0xff] %v23741_v53  ;;  %v23765_v36 = vsub.f32 %v23167_v43, %v23347_v52  ;;  %v23777_v28 = vsub.f32 %v27967_v44, %v23344_v3  ;;  %v23785_v43 = vsub.f32 %v23210_v49, %v23310_v6 }
 0x543   :  { %27956 = vst [vmem:[#allocation33_spill] sm:$0xff] %v23745_v0  ;;  %27958 = vst [vmem:[#allocation35_spill] sm:$0xff] %v23749_v20  ;;  %v27963_v0 = vld [vmem:[#allocation37_spill] sm:$0xff]  ;;  %v27965_v20 = vld [vmem:[#allocation38_spill] sm:$0xff] }
 0x544   :  { %27960 = vst [vmem:[#allocation123_spill] sm:$0xff] %v23757_v33  ;;  %27961 = vst [vmem:[#allocation124_spill] sm:$0xff] %v23761_v45  ;;  %v23769_v22 = vsub.f32 %v27963_v0, %v23313_v48  ;;  %v23773_v60 = vsub.f32 %v27965_v20, %v23350_v56  ;;  %v27969_v33 = vld [vmem:[#allocation40_spill] sm:$0xff]  ;;  %v23789_v0 = vsub.f32 %v23218_v55, %v23320_v4 }
 0x545   :  { %27962 = vst [vmem:[#allocation125_spill] sm:$0xff] %v23765_v36  ;;  %27968 = vst [vmem:[#allocation39_spill] sm:$0xff] %v23777_v28  ;;  %v23781_v50 = vsub.f32 %v27969_v33, %v23373_v59  ;;  %v23793_v20 = vsub.f32 %v23220_v41, %v23317_v10  ;;  %v27976_v28 = vld [vmem:[#allocation41_spill] sm:$0xff] }
 0x546   :  { %27964 = vst [vmem:[#allocation37_spill] sm:$0xff] %v23769_v22  ;;  %27966 = vst [vmem:[#allocation38_spill] sm:$0xff] %v23773_v60  ;;  %v27974_v60 = vld [vmem:[#allocation45_spill] sm:$0xff]  ;;  %v23801_v33 = vsub.f32 %v27976_v28, %v23313_v48  ;;  %v23821_v28 = vsub.f32 %v23277_v27, %v23320_v4  ;;  %v23841_v27 = vsub.f32 %v23271_v46, %v23344_v3 }
 0x547   :  { %27970 = vst [vmem:[#allocation40_spill] sm:$0xff] %v23781_v50  ;;  %27971 = vst [vmem:[#allocation126_spill] sm:$0xff] %v23785_v43  ;;  %v23797_v44 = vsub.f32 %v27974_v60, %v23347_v52  ;;  %v27978_v50 = vld [vmem:[#allocation42_spill] sm:$0xff]  ;;  %v27980_v43 = vld [vmem:[#allocation43_spill] sm:$0xff]  ;;  %v23817_v60 = vsub.f32 %v23273_v2, %v23310_v6  ;;  %v23837_v2 = vsub.f32 %v23269_v17, %v23350_v56 }
 0x548   :  { %27972 = vst [vmem:[#allocation127_spill] sm:$0xff] %v23789_v0  ;;  %27973 = vst [vmem:[#allocation128_spill] sm:$0xff] %v23793_v20  ;;  %v23805_v49 = vsub.f32 %v27978_v50, %v23350_v56  ;;  %v23809_v55 = vsub.f32 %v27980_v43, %v23344_v3  ;;  %v27982_v0 = vld [vmem:[#allocation44_spill] sm:$0xff]  ;;  %v23825_v50 = vsub.f32 %v23279_v63, %v23317_v10 }
 0x549   :  { %27975 = vst [vmem:[#allocation45_spill] sm:$0xff] %v23797_v44  ;;  %27977 = vst [vmem:[#allocation41_spill] sm:$0xff] %v23801_v33  ;;  %v23813_v41 = vsub.f32 %v27982_v0, %v23373_v59  ;;  %v23829_v43 = vsub.f32 %v23281_v47, %v23347_v52  ;;  %v23833_v0 = vsub.f32 %v23267_v51, %v23313_v48 }
 0x54a   :  { %27979 = vst [vmem:[#allocation42_spill] sm:$0xff] %v23805_v49  ;;  %27981 = vst [vmem:[#allocation43_spill] sm:$0xff] %v23809_v55  ;;  %v23845_v63 = vsub.f32 %v23275_v29, %v23373_v59  ;;  %v23849_v47 = vmul.f32 %v23324_v25, %v23324_v25  ;;  %v23853_v51 = vmul.f32 %v23354_v54, %v23354_v54  ;;  %v28005_v54 = vld [vmem:[#allocation54_spill] sm:$0xff]  ;;  %v28009_v25 = vld [vmem:[#allocation77_spill] sm:$0xff] }
 0x54b   :  { %27983 = vst [vmem:[#allocation44_spill] sm:$0xff] %v23813_v41  ;;  %27984 = vst [vmem:[#allocation129_spill] sm:$0xff] %v23817_v60  ;;  %v23857_v17 = vmul.f32 %v23358_v7, %v23358_v7  ;;  %v23861_v46 = vmul.f32 %v23377_v23, %v23377_v23  ;;  %v23865_v29 = vmul.f32 %v23362_v26, %v23362_v26  ;;  %v27999_v26 = vld [vmem:[#allocation62_spill] sm:$0xff]  ;;  %v28001_v23 = vld [vmem:[#allocation48_spill] sm:$0xff] }
 0x54c   :  { %27985 = vst [vmem:[#allocation130_spill] sm:$0xff] %v23821_v28  ;;  %27986 = vst [vmem:[#allocation131_spill] sm:$0xff] %v23825_v50  ;;  %v23869_v6 = vmul.f32 %v23381_v21, %v23381_v21  ;;  %v23873_v48 = vmul.f32 %v23385_v42, %v23385_v42  ;;  %v23877_v10 = vmul.f32 %v23405_v35, %v23405_v35  ;;  %v27995_v35 = vld [vmem:[#allocation52_spill] sm:$0xff]  ;;  %v28003_v7 = vld [vmem:[#allocation63_spill] sm:$0xff] }
 0x54d   :  { %27987 = vst [vmem:[#allocation132_spill] sm:$0xff] %v23829_v43  ;;  %27988 = vst [vmem:[#allocation133_spill] sm:$0xff] %v23833_v0  ;;  %v23881_v4 = vmul.f32 %v23328_v31, %v23328_v31  ;;  %v23885_v3 = vmul.f32 %v23366_v5, %v23366_v5  ;;  %v23889_v52 = vmul.f32 %v23370_v38, %v23370_v38  ;;  %v27997_v21 = vld [vmem:[#allocation68_spill] sm:$0xff]  ;;  %v28007_v31 = vld [vmem:[#allocation66_spill] sm:$0xff] }
 0x54e   :  { %27989 = vst [vmem:[#allocation134_spill] sm:$0xff] %v23837_v2  ;;  %27990 = vst [vmem:[#allocation135_spill] sm:$0xff] %v23841_v27  ;;  %v23893_v56 = vmul.f32 %v23389_v15, %v23389_v15  ;;  %v23897_v59 = vmul.f32 %v23393_v19, %v23393_v19  ;;  %v23901_v42 = vmul.f32 %v27995_v35, %v27995_v35 }
 0x54f   :  { %27991 = vst [vmem:[#allocation136_spill] sm:$0xff] %v23845_v63  ;;  %27992 = vst [vmem:[#allocation137_spill] sm:$0xff] %v23869_v6  ;;  %v23905_v5 = vmul.f32 %v27997_v21, %v27997_v21  ;;  %v23909_v38 = vmul.f32 %v27999_v26, %v27999_v26  ;;  %v23913_v15 = vmul.f32 %v28001_v23, %v28001_v23  ;;  %v28011_v63 = vld [vmem:[#allocation78_spill] sm:$0xff] }
 0x550   :  { %27993 = vst [vmem:[#allocation138_spill] sm:$0xff] %v23873_v48  ;;  %27994 = vst [vmem:[#allocation139_spill] sm:$0xff] %v23877_v10  ;;  %v23917_v19 = vmul.f32 %v28003_v7, %v28003_v7  ;;  %v23921_v35 = vmul.f32 %v28005_v54, %v28005_v54  ;;  %v23925_v21 = vmul.f32 %v28007_v31, %v28007_v31 }
 0x551   :  { %27996 = vst [vmem:[#allocation140_spill] sm:$0xff] %v23901_v42  ;;  %27998 = vst [vmem:[#allocation141_spill] sm:$0xff] %v23905_v5  ;;  %v23929_v26 = vmul.f32 %v28009_v25, %v28009_v25  ;;  %v23933_v23 = vmul.f32 %v28011_v63, %v28011_v63 }
 0x552   :  { %28000 = vst [vmem:[#allocation142_spill] sm:$0xff] %v23909_v38  ;;  %28002 = vst [vmem:[#allocation143_spill] sm:$0xff] %v23913_v15  ;;  %v28013_v15 = vld [vmem:[#allocation79_spill] sm:$0xff] }
 0x553   :  { %28004 = vst [vmem:[#allocation144_spill] sm:$0xff] %v23917_v19  ;;  %28006 = vst [vmem:[#allocation145_spill] sm:$0xff] %v23921_v35  ;;  %v23937_v7 = vmul.f32 %v28013_v15, %v28013_v15  ;;  %v28015_v19 = vld [vmem:[#allocation72_spill] sm:$0xff]  ;;  %v28017_v35 = vld [vmem:[#allocation55_spill] sm:$0xff] }
 0x554   :  { %28008 = vst [vmem:[#allocation146_spill] sm:$0xff] %v23925_v21  ;;  %28010 = vst [vmem:[#allocation147_spill] sm:$0xff] %v23929_v26  ;;  %v23941_v54 = vmul.f32 %v28015_v19, %v28015_v19  ;;  %v23945_v31 = vmul.f32 %v28017_v35, %v28017_v35  ;;  %v28019_v21 = vld [vmem:[#allocation73_spill] sm:$0xff]  ;;  %v28021_v26 = vld [vmem:[#allocation74_spill] sm:$0xff] }
 0x555   :  { %28012 = vst [vmem:[#allocation148_spill] sm:$0xff] %v23933_v23  ;;  %28014 = vst [vmem:[#allocation149_spill] sm:$0xff] %v23937_v7  ;;  %v23949_v25 = vmul.f32 %v28019_v21, %v28019_v21  ;;  %v23953_v63 = vmul.f32 %v28021_v26, %v28021_v26  ;;  %v28023_v23 = vld [vmem:[#allocation76_spill] sm:$0xff]  ;;  %v28025_v7 = vld [vmem:[#allocation85_spill] sm:$0xff] }
 0x556   :  { %28016 = vst [vmem:[#allocation150_spill] sm:$0xff] %v23941_v54  ;;  %28018 = vst [vmem:[#allocation151_spill] sm:$0xff] %v23945_v31  ;;  %v23957_v15 = vmul.f32 %v28023_v23, %v28023_v23  ;;  %v23961_v19 = vmul.f32 %v28025_v7, %v28025_v7  ;;  %v28027_v54 = vld [vmem:[#allocation86_spill] sm:$0xff]  ;;  %v28029_v31 = vld [vmem:[#allocation87_spill] sm:$0xff] }
 0x557   :  { %28020 = vst [vmem:[#allocation152_spill] sm:$0xff] %v23949_v25  ;;  %28022 = vst [vmem:[#allocation153_spill] sm:$0xff] %v23953_v63  ;;  %v23965_v35 = vmul.f32 %v28027_v54, %v28027_v54  ;;  %v23969_v21 = vmul.f32 %v28029_v31, %v28029_v31  ;;  %v28031_v25 = vld [vmem:[#allocation80_spill] sm:$0xff] }
 0x558   :  { %28024 = vst [vmem:[#allocation154_spill] sm:$0xff] %v23957_v15  ;;  %28026 = vst [vmem:[#allocation155_spill] sm:$0xff] %v23961_v19  ;;  %v23973_v26 = vmul.f32 %v28031_v25, %v28031_v25  ;;  %v28033_v63 = vld [vmem:[#allocation64_spill] sm:$0xff]  ;;  %v28035_v15 = vld [vmem:[#allocation82_spill] sm:$0xff] }
 0x559   :  { %28028 = vst [vmem:[#allocation156_spill] sm:$0xff] %v23965_v35  ;;  %28030 = vst [vmem:[#allocation157_spill] sm:$0xff] %v23969_v21  ;;  %v23977_v23 = vmul.f32 %v28033_v63, %v28033_v63  ;;  %v23981_v7 = vmul.f32 %v28035_v15, %v28035_v15  ;;  %v28037_v19 = vld [vmem:[#allocation81_spill] sm:$0xff]  ;;  %v28039_v35 = vld [vmem:[#allocation83_spill] sm:$0xff] }
 0x55a   :  { %28032 = vst [vmem:[#allocation158_spill] sm:$0xff] %v23973_v26  ;;  %v23985_v54 = vmul.f32 %v28037_v19, %v28037_v19  ;;  %v23989_v31 = vmul.f32 %v28039_v35, %v28039_v35  ;;  %v28041_v21 = vld [vmem:[#allocation93_spill] sm:$0xff]  ;;  %v28043_v26 = vld [vmem:[#allocation94_spill] sm:$0xff] }
 0x55b   :  { %28034 = vst [vmem:[#allocation159_spill] sm:$0xff] %v23977_v23  ;;  %28036 = vst [vmem:[#allocation160_spill] sm:$0xff] %v23981_v7  ;;  %v23993_v25 = vmul.f32 %v28041_v21, %v28041_v21  ;;  %v23997_v63 = vmul.f32 %v28043_v26, %v28043_v26  ;;  %v28045_v23 = vld [vmem:[#allocation95_spill] sm:$0xff]  ;;  %v28047_v7 = vld [vmem:[#allocation88_spill] sm:$0xff] }
 0x55c   :  { %28038 = vst [vmem:[#allocation161_spill] sm:$0xff] %v23985_v54  ;;  %28040 = vst [vmem:[#allocation162_spill] sm:$0xff] %v23989_v31  ;;  %v24001_v15 = vmul.f32 %v28045_v23, %v28045_v23  ;;  %v24005_v19 = vmul.f32 %v28047_v7, %v28047_v7  ;;  %v28049_v54 = vld [vmem:[#allocation89_spill] sm:$0xff]  ;;  %v28051_v31 = vld [vmem:[#allocation90_spill] sm:$0xff] }
 0x55d   :  { %28042 = vst [vmem:[#allocation163_spill] sm:$0xff] %v23993_v25  ;;  %28044 = vst [vmem:[#allocation164_spill] sm:$0xff] %v23997_v63  ;;  %v24009_v35 = vmul.f32 %v28049_v54, %v28049_v54  ;;  %v24013_v21 = vmul.f32 %v28051_v31, %v28051_v31  ;;  %v28053_v25 = vld [vmem:[#allocation91_spill] sm:$0xff] }
 0x55e   :  { %28046 = vst [vmem:[#allocation165_spill] sm:$0xff] %v24001_v15  ;;  %28048 = vst [vmem:[#allocation166_spill] sm:$0xff] %v24005_v19  ;;  %v24017_v26 = vmul.f32 %v28053_v25, %v28053_v25  ;;  %v28055_v63 = vld [vmem:[#allocation59_spill] sm:$0xff]  ;;  %v28057_v15 = vld [vmem:[#allocation9_spill] sm:$0xff] }
 0x55f   :  { %28050 = vst [vmem:[#allocation167_spill] sm:$0xff] %v24009_v35  ;;  %28052 = vst [vmem:[#allocation168_spill] sm:$0xff] %v24013_v21  ;;  %v24021_v23 = vmul.f32 %v28055_v63, %v28055_v63  ;;  %v24025_v7 = vmul.f32 %v28057_v15, %v28057_v15  ;;  %v28059_v19 = vld [vmem:[#allocation10_spill] sm:$0xff]  ;;  %v28061_v35 = vld [vmem:[#allocation97_spill] sm:$0xff] }
 0x560   :  { %28054 = vst [vmem:[#allocation169_spill] sm:$0xff] %v24017_v26  ;;  %v24029_v54 = vmul.f32 %v28059_v19, %v28059_v19  ;;  %v24033_v31 = vmul.f32 %v28061_v35, %v28061_v35  ;;  %v28063_v21 = vld [vmem:[#allocation7_spill] sm:$0xff]  ;;  %v28065_v26 = vld [vmem:[#allocation8_spill] sm:$0xff] }
 0x561   :  { %28056 = vst [vmem:[#allocation170_spill] sm:$0xff] %v24021_v23  ;;  %28058 = vst [vmem:[#allocation171_spill] sm:$0xff] %v24025_v7  ;;  %v24037_v25 = vmul.f32 %v28063_v21, %v28063_v21  ;;  %v24041_v63 = vmul.f32 %v28065_v26, %v28065_v26  ;;  %v28067_v23 = vld [vmem:[#allocation60_spill] sm:$0xff] }
 0x562   :  { %28060 = vst [vmem:[#allocation172_spill] sm:$0xff] %v24029_v54  ;;  %28062 = vst [vmem:[#allocation173_spill] sm:$0xff] %v24033_v31  ;;  %v24045_v15 = vmul.f32 %v28067_v23, %v28067_v23  ;;  %v28069_v7 = vld [vmem:[#allocation96_spill] sm:$0xff]  ;;  %v28071_v54 = vld [vmem:[#allocation98_spill] sm:$0xff] }
 0x563   :  { %28064 = vst [vmem:[#allocation174_spill] sm:$0xff] %v24037_v25  ;;  %28066 = vst [vmem:[#allocation175_spill] sm:$0xff] %v24041_v63  ;;  %v24049_v19 = vmul.f32 %v28069_v7, %v28069_v7  ;;  %v24053_v35 = vmul.f32 %v28071_v54, %v28071_v54  ;;  %v28073_v31 = vld [vmem:[#allocation100_spill] sm:$0xff]  ;;  %v28075_v25 = vld [vmem:[#allocation101_spill] sm:$0xff] }
 0x564   :  { %28068 = vst [vmem:[#allocation176_spill] sm:$0xff] %v24045_v15  ;;  %v24057_v21 = vmul.f32 %v28073_v31, %v28073_v31  ;;  %v24061_v26 = vmul.f32 %v28075_v25, %v28075_v25  ;;  %v28077_v63 = vld [vmem:[#allocation14_spill] sm:$0xff]  ;;  %v28079_v15 = vld [vmem:[#allocation11_spill] sm:$0xff]  ;;  %v28195_v5 = vld [vmem:[#allocation161_spill] sm:$0xff] }
 0x565   :  { %28070 = vst [vmem:[#allocation177_spill] sm:$0xff] %v24049_v19  ;;  %28072 = vst [vmem:[#allocation178_spill] sm:$0xff] %v24053_v35  ;;  %v24065_v23 = vmul.f32 %v28077_v63, %v28077_v63  ;;  %v24069_v7 = vmul.f32 %v28079_v15, %v28079_v15  ;;  %v28081_v19 = vld [vmem:[#allocation12_spill] sm:$0xff]  ;;  %v28083_v35 = vld [vmem:[#allocation13_spill] sm:$0xff] }
 0x566   :  { %28074 = vst [vmem:[#allocation179_spill] sm:$0xff] %v24057_v21  ;;  %28076 = vst [vmem:[#allocation180_spill] sm:$0xff] %v24061_v26  ;;  %v24073_v54 = vmul.f32 %v28081_v19, %v28081_v19  ;;  %v24077_v31 = vmul.f32 %v28083_v35, %v28083_v35  ;;  %v28085_v21 = vld [vmem:[#allocation99_spill] sm:$0xff]  ;;  %v28087_v26 = vld [vmem:[#allocation17_spill] sm:$0xff] }
 0x567   :  { %28078 = vst [vmem:[#allocation181_spill] sm:$0xff] %v24065_v23  ;;  %28080 = vst [vmem:[#allocation182_spill] sm:$0xff] %v24069_v7  ;;  %v24081_v25 = vmul.f32 %v28085_v21, %v28085_v21  ;;  %v24085_v63 = vmul.f32 %v28087_v26, %v28087_v26  ;;  %v28089_v23 = vld [vmem:[#allocation103_spill] sm:$0xff]  ;;  %v28091_v7 = vld [vmem:[#allocation70_spill] sm:$0xff] }
 0x568   :  { %28082 = vst [vmem:[#allocation183_spill] sm:$0xff] %v24073_v54  ;;  %28084 = vst [vmem:[#allocation184_spill] sm:$0xff] %v24077_v31  ;;  %v24089_v15 = vmul.f32 %v28089_v23, %v28089_v23  ;;  %v24093_v19 = vmul.f32 %v28091_v7, %v28091_v7  ;;  %v28093_v54 = vld [vmem:[#allocation104_spill] sm:$0xff]  ;;  %v28095_v31 = vld [vmem:[#allocation15_spill] sm:$0xff]  ;;  %v24113_v7 = vmul.f32 %v23601_v18, %v23601_v18 }
 0x569   :  { %28086 = vst [vmem:[#allocation185_spill] sm:$0xff] %v24081_v25  ;;  %28088 = vst [vmem:[#allocation186_spill] sm:$0xff] %v24085_v63  ;;  %v24097_v35 = vmul.f32 %v28093_v54, %v28093_v54  ;;  %v24101_v21 = vmul.f32 %v28095_v31, %v28095_v31  ;;  %v28097_v25 = vld [vmem:[#allocation16_spill] sm:$0xff]  ;;  %v28099_v63 = vld [vmem:[#allocation69_spill] sm:$0xff]  ;;  %v24117_v54 = vmul.f32 %v23605_v34, %v23605_v34 }
 0x56a   :  { %28090 = vst [vmem:[#allocation187_spill] sm:$0xff] %v24089_v15  ;;  %28092 = vst [vmem:[#allocation188_spill] sm:$0xff] %v24093_v19  ;;  %v24105_v26 = vmul.f32 %v28097_v25, %v28097_v25  ;;  %v24109_v23 = vmul.f32 %v28099_v63, %v28099_v63  ;;  %v24121_v31 = vmul.f32 %v23609_v62, %v23609_v62  ;;  %v28193_v10 = vld [vmem:[#allocation159_spill] sm:$0xff] }
 0x56b   :  { %28094 = vst [vmem:[#allocation189_spill] sm:$0xff] %v24097_v35  ;;  %28096 = vst [vmem:[#allocation190_spill] sm:$0xff] %v24101_v21  ;;  %v24125_v25 = vmul.f32 %v23613_v58, %v23613_v58  ;;  %v24145_v58 = vmul.f32 %v23633_v14, %v23633_v14 }
 0x56c   :  { %28098 = vst [vmem:[#allocation191_spill] sm:$0xff] %v24105_v26  ;;  %28100 = vst [vmem:[#allocation192_spill] sm:$0xff] %v24109_v23  ;;  %v28104_v26 = vld [vmem:[#allocation22_spill] sm:$0xff] }
 0x56d   :  { %28101 = vst [vmem:[#allocation193_spill] sm:$0xff] %v24113_v7  ;;  %28102 = vst [vmem:[#allocation194_spill] sm:$0xff] %v24117_v54  ;;  %v24129_v63 = vmul.f32 %v28104_v26, %v28104_v26  ;;  %v28106_v23 = vld [vmem:[#allocation18_spill] sm:$0xff]  ;;  %v28108_v7 = vld [vmem:[#allocation71_spill] sm:$0xff]  ;;  %v24149_v26 = vmul.f32 %v23637_v12, %v23637_v12 }
 0x56e   :  { %28103 = vst [vmem:[#allocation195_spill] sm:$0xff] %v24121_v31  ;;  %v24133_v18 = vmul.f32 %v28106_v23, %v28106_v23  ;;  %v24137_v34 = vmul.f32 %v28108_v7, %v28108_v7  ;;  %v28110_v54 = vld [vmem:[#allocation19_spill] sm:$0xff]  ;;  %28112 = vst [vmem:[#allocation200_spill] sm:$0xff] %v24145_v58  ;;  %v24153_v23 = vmul.f32 %v23641_v9, %v23641_v9  ;;  %v28119_v58 = vld [vmem:[#allocation109_spill] sm:$0xff] }
 0x56f   :  { %28105 = vst [vmem:[#allocation196_spill] sm:$0xff] %v24129_v63  ;;  %v24141_v62 = vmul.f32 %v28110_v54, %v28110_v54  ;;  %28113 = vst [vmem:[#allocation201_spill] sm:$0xff] %v24149_v26  ;;  %v24157_v7 = vmul.f32 %v23645_v61, %v23645_v61  ;;  %v24169_v12 = vmul.f32 %v28119_v58, %v28119_v58  ;;  %v28120_v26 = vld [vmem:[#allocation110_spill] sm:$0xff]  ;;  %v28217_v42 = vld [vmem:[#allocation183_spill] sm:$0xff] }
 0x570   :  { %28107 = vst [vmem:[#allocation197_spill] sm:$0xff] %v24133_v18  ;;  %28109 = vst [vmem:[#allocation198_spill] sm:$0xff] %v24137_v34  ;;  %v28115_v34 = vld [vmem:[#allocation25_spill] sm:$0xff]  ;;  %v24173_v9 = vmul.f32 %v28120_v26, %v28120_v26  ;;  %v24177_v61 = vmul.f32 %v23665_v8, %v23665_v8  ;;  %v24189_v58 = vmul.f32 %v23677_v1, %v23677_v1  ;;  %v28220_v38 = vld [vmem:[#allocation186_spill] sm:$0xff] }
 0x571   :  { %28111 = vst [vmem:[#allocation199_spill] sm:$0xff] %v24141_v62  ;;  %28114 = vst [vmem:[#allocation202_spill] sm:$0xff] %v24157_v7  ;;  %v24161_v54 = vmul.f32 %v28115_v34, %v28115_v34  ;;  %v28117_v62 = vld [vmem:[#allocation107_spill] sm:$0xff]  ;;  %v24181_v34 = vmul.f32 %v23669_v40, %v23669_v40  ;;  %v24193_v26 = vmul.f32 %v23681_v30, %v23681_v30 }
 0x572   :  { %v24165_v14 = vmul.f32 %v28117_v62, %v28117_v62  ;;  %28121 = vst [vmem:[#allocation205_spill] sm:$0xff] %v24177_v61  ;;  %v24185_v62 = vmul.f32 %v23673_v13, %v23673_v13  ;;  %28123 = vst [vmem:[#allocation207_spill] sm:$0xff] %v24189_v58  ;;  %v24197_v8 = vmul.f32 %v23685_v16, %v23685_v16  ;;  %v28126_v61 = vld [vmem:[#allocation113_spill] sm:$0xff] }
 0x573   :  { %28116 = vst [vmem:[#allocation203_spill] sm:$0xff] %v24161_v54  ;;  %28122 = vst [vmem:[#allocation206_spill] sm:$0xff] %v24181_v34  ;;  %v24201_v40 = vmul.f32 %v28126_v61, %v28126_v61  ;;  %v28128_v34 = vld [vmem:[#allocation114_spill] sm:$0xff]  ;;  %v24209_v1 = vmul.f32 %v23697_v37, %v23697_v37  ;;  %v24213_v30 = vmul.f32 %v23701_v57, %v23701_v57 }
 0x574   :  { %28118 = vst [vmem:[#allocation204_spill] sm:$0xff] %v24165_v14  ;;  %28124 = vst [vmem:[#allocation208_spill] sm:$0xff] %v24193_v26  ;;  %v24205_v13 = vmul.f32 %v28128_v34, %v28128_v34  ;;  %v24217_v16 = vmul.f32 %v23705_v32, %v23705_v32  ;;  %v28223_v48 = vld [vmem:[#allocation193_spill] sm:$0xff] }
 0x575   :  { %28125 = vst [vmem:[#allocation209_spill] sm:$0xff] %v24197_v8  ;;  %28127 = vst [vmem:[#allocation210_spill] sm:$0xff] %v24201_v40  ;;  %v28132_v8 = vld [vmem:[#allocation118_spill] sm:$0xff]  ;;  %v28227_v15 = vld [vmem:[#allocation200_spill] sm:$0xff] }
 0x576   :  { %28129 = vst [vmem:[#allocation211_spill] sm:$0xff] %v24205_v13  ;;  %28130 = vst [vmem:[#allocation212_spill] sm:$0xff] %v24209_v1  ;;  %v24221_v61 = vmul.f32 %v28132_v8, %v28132_v8  ;;  %v28133_v40 = vld [vmem:[#allocation30_spill] sm:$0xff]  ;;  %v28134_v13 = vld [vmem:[#allocation31_spill] sm:$0xff]  ;;  %v24241_v8 = vmul.f32 %v23729_v11, %v23729_v11 }
 0x577   :  { %28131 = vst [vmem:[#allocation213_spill] sm:$0xff] %v24213_v30  ;;  %v24225_v34 = vmul.f32 %v28133_v40, %v28133_v40  ;;  %v24229_v37 = vmul.f32 %v28134_v13, %v28134_v13  ;;  %v28136_v1 = vld [vmem:[#allocation119_spill] sm:$0xff]  ;;  %v28138_v30 = vld [vmem:[#allocation120_spill] sm:$0xff]  ;;  %v24245_v40 = vmul.f32 %v23733_v24, %v23733_v24  ;;  %v24249_v13 = vmul.f32 %v23737_v39, %v23737_v39  ;;  %v28228_v6 = vld [vmem:[#allocation201_spill] sm:$0xff] }
 0x578   :  { %v24233_v57 = vmul.f32 %v28136_v1, %v28136_v1  ;;  %v24237_v32 = vmul.f32 %v28138_v30, %v28138_v30  ;;  %28140 = vst [vmem:[#allocation217_spill] sm:$0xff] %v24241_v8  ;;  %v17146_v1 = vld [vmem:[%s27180_s5 + $0x8] sm:$0xff]  ;;  %v24256_v30 = vmul.f32 %v23741_v53, %v23741_v53  ;;  %v28146_v8 = vld [vmem:[#allocation35_spill] sm:$0xff] }
 0x579   :  { %28135 = vst [vmem:[#allocation214_spill] sm:$0xff] %v24229_v37  ;;  %28141 = vst [vmem:[#allocation218_spill] sm:$0xff] %v24245_v40  ;;  %v24264_v24 = vmul.f32 %v28146_v8, %v28146_v8  ;;  %v28148_v40 = vld [vmem:[#allocation122_spill] sm:$0xff]  ;;  %18985 = vmatprep.subr.mxu1 %v17146_v1  ;;  %v28151_v53 = vld [vmem:[#allocation123_spill] sm:$0xff]  ;;  %v24285_v8 = vmul.f32 %v23765_v36, %v23765_v36 }
 0x57a   :  { %28137 = vst [vmem:[#allocation215_spill] sm:$0xff] %v24233_v57  ;;  %28139 = vst [vmem:[#allocation216_spill] sm:$0xff] %v24237_v32  ;;  %v12658_v57 = vld [vmem:[#allocation3 + $0x8] sm:$0xff]  ;;  %v28144_v32 = vld [vmem:[#allocation33_spill] sm:$0xff]  ;;  %v24268_v39 = vmul.f32 %v28148_v40, %v28148_v40  ;;  %v24289_v40 = vmul.f32 %v23769_v22, %v23769_v22  ;;  %18986 = vmatpush3.msra.mxu1 %v17146_v1 }
 0x57b   :  { %28142 = vst [vmem:[#allocation219_spill] sm:$0xff] %v24249_v13  ;;  %28143 = vst [vmem:[#allocation220_spill] sm:$0xff] %v24256_v30  ;;  %v24260_v11 = vmul.f32 %v28144_v32, %v28144_v32  ;;  %v24273_v13 = vld [vmem:[%s27180_s5] sm:$0xff]  ;;  %v24277_v30 = vmul.f32 %v28151_v53, %v28151_v53  ;;  %v24281_v32 = vmul.f32 %v23761_v45, %v23761_v45  ;;  %18987 = vmatprep.mubr.msk.f32.mxu1 %vm10169_vm3, %v12658_v57  ;;  %v28229_v31 = vld [vmem:[#allocation205_spill] sm:$0xff] }
 0x57c   :  { %28147 = vst [vmem:[#allocation222_spill] sm:$0xff] %v24264_v24  ;;  %28149 = vst [vmem:[#allocation223_spill] sm:$0xff] %v24268_v39  ;;  %v28154_v39 = vld [vmem:[#allocation38_spill] sm:$0xff]  ;;  %v28161_v22 = vld [vmem:[#allocation127_spill] sm:$0xff]  ;;  %19011 = vmatprep.subr.mxu1 %v24273_v13  ;;  %v24327_v57 = vmul.f32 %v23805_v49, %v23805_v49  ;;  %v24347_v49 = vmul.f32 %v23825_v50, %v23825_v50 }
 0x57d   :  { %28145 = vst [vmem:[#allocation221_spill] sm:$0xff] %v24260_v11  ;;  %28150 = vst [vmem:[#allocation224_spill] sm:$0xff] %v24273_v13  ;;  %v24293_v24 = vmul.f32 %v28154_v39, %v28154_v39  ;;  %v28155_v11 = vld [vmem:[#allocation39_spill] sm:$0xff]  ;;  %v24310_v1 = vmul.f32 %v28161_v22, %v28161_v22  ;;  %v24314_v39 = vmul.f32 %v23793_v20, %v23793_v20  ;;  %v28232_v19 = vld [vmem:[#allocation210_spill] sm:$0xff] }
 0x57e   :  { %28152 = vst [vmem:[#allocation225_spill] sm:$0xff] %v24277_v30  ;;  %28153 = vst [vmem:[#allocation226_spill] sm:$0xff] %v24281_v32  ;;  %v24297_v53 = vmul.f32 %v28155_v11, %v28155_v11  ;;  %v28157_v30 = vld [vmem:[#allocation40_spill] sm:$0xff]  ;;  %v28159_v32 = vld [vmem:[#allocation126_spill] sm:$0xff]  ;;  %v24318_v11 = vmul.f32 %v23797_v44, %v23797_v44  ;;  %v24331_v22 = vmul.f32 %v23809_v55, %v23809_v55 }
 0x57f   :  { %v24301_v45 = vmul.f32 %v28157_v30, %v28157_v30  ;;  %v24305_v36 = vmul.f32 %v28159_v32, %v28159_v32  ;;  %28162 = vst [vmem:[#allocation230_spill] sm:$0xff] %v24310_v1  ;;  %28163 = vst [vmem:[#allocation231_spill] sm:$0xff] %v24314_v39  ;;  %v24322_v30 = vmul.f32 %v23801_v33, %v23801_v33  ;;  %v28201_v50 = vld [vmem:[#allocation167_spill] sm:$0xff]  ;;  %v28210_v1 = vld [vmem:[#allocation176_spill] sm:$0xff] }
 0x580   :  { %28156 = vst [vmem:[#allocation227_spill] sm:$0xff] %v24297_v53  ;;  %28164 = vst [vmem:[#allocation232_spill] sm:$0xff] %v24318_v11  ;;  %v24335_v20 = vmul.f32 %v23813_v41, %v23813_v41  ;;  %v24339_v44 = vmul.f32 %v23817_v60, %v23817_v60  ;;  %v24343_v33 = vmul.f32 %v23821_v28, %v23821_v28  ;;  %v28176_v28 = vld [vmem:[#allocation50_spill] sm:$0xff]  ;;  %v28209_v39 = vld [vmem:[#allocation175_spill] sm:$0xff] }
 0x581   :  { %28158 = vst [vmem:[#allocation228_spill] sm:$0xff] %v24301_v45  ;;  %28160 = vst [vmem:[#allocation229_spill] sm:$0xff] %v24305_v36  ;;  %v24351_v55 = vmul.f32 %v23829_v43, %v23829_v43  ;;  %v24355_v41 = vmul.f32 %v23833_v0, %v23833_v0  ;;  %v24359_v32 = vmul.f32 %v23837_v2, %v23837_v2  ;;  %v28177_v43 = vld [vmem:[#allocation143_spill] sm:$0xff]  ;;  %v28178_v0 = vld [vmem:[#allocation144_spill] sm:$0xff] }
 0x582   :  { %28165 = vst [vmem:[#allocation233_spill] sm:$0xff] %v24322_v30  ;;  %28166 = vst [vmem:[#allocation234_spill] sm:$0xff] %v24327_v57  ;;  %v24363_v13 = vmul.f32 %v23841_v27, %v23841_v27  ;;  %v28179_v2 = vld [vmem:[#allocation145_spill] sm:$0xff]  ;;  %v28185_v45 = vld [vmem:[#allocation151_spill] sm:$0xff]  ;;  %v28233_v18 = vrot.slane %v23849_v47, %v28176_v28  ;;  %v28234_v63 = vrot.slane %v23853_v51, %v28176_v28 }
 0x583   :  { %28167 = vst [vmem:[#allocation235_spill] sm:$0xff] %v24331_v22  ;;  %28168 = vst [vmem:[#allocation236_spill] sm:$0xff] %v24335_v20  ;;  %v28180_v20 = vld [vmem:[#allocation146_spill] sm:$0xff]  ;;  %v28186_v22 = vld [vmem:[#allocation152_spill] sm:$0xff]  ;;  %v28238_v54 = vrot.slane %v23881_v4, %v28176_v28  ;;  %v28239_v47 = vrot.slane %v23885_v3, %v28176_v28  ;;  %v28240_v51 = vrot.slane %v28177_v43, %v28176_v28 }
 0x584   :  { %28169 = vst [vmem:[#allocation237_spill] sm:$0xff] %v24339_v44  ;;  %28170 = vst [vmem:[#allocation238_spill] sm:$0xff] %v24343_v33  ;;  %v28188_v53 = vld [vmem:[#allocation154_spill] sm:$0xff]  ;;  %v28202_v44 = vld [vmem:[#allocation168_spill] sm:$0xff]  ;;  %v28241_v14 = vrot.slane %v28178_v0, %v28176_v28  ;;  %v28242_v4 = vrot.slane %v28185_v45, %v28176_v28  ;;  %v28258_v27 = vrot.slane %v23861_v46, %v28176_v28 }
 0x585   :  { %28171 = vst [vmem:[#allocation239_spill] sm:$0xff] %v24347_v49  ;;  %28172 = vst [vmem:[#allocation240_spill] sm:$0xff] %v24351_v55  ;;  %v28194_v55 = vld [vmem:[#allocation160_spill] sm:$0xff]  ;;  %v28219_v30 = vld [vmem:[#allocation185_spill] sm:$0xff]  ;;  %v11139_v49 = vsel %vm10034_vm8, %v28234_v63, %v28233_v18  ;;  %v11146_v35 = vsel %vm10034_vm8, %v28239_v47, %v28238_v54  ;;  %v28243_v54 = vrot.slane %v28186_v22, %v28176_v28 }
 0x586   :  { %28173 = vst [vmem:[#allocation241_spill] sm:$0xff] %v24355_v41  ;;  %28174 = vst [vmem:[#allocation242_spill] sm:$0xff] %v24359_v32  ;;  %v28187_v32 = vld [vmem:[#allocation153_spill] sm:$0xff]  ;;  %v28218_v41 = vld [vmem:[#allocation184_spill] sm:$0xff]  ;;  %v11153_v21 = vsel %vm10034_vm8, %v28241_v14, %v28240_v51  ;;  %v28245_v14 = vrot.slane %v23857_v17, %v28176_v28  ;;  %v28249_v63 = vrot.slane %v28193_v10, %v28176_v28 }
 0x587   :  { %28175 = vst [vmem:[#allocation243_spill] sm:$0xff] %v24363_v13  ;;  %v28221_v60 = vld [vmem:[#allocation191_spill] sm:$0xff]  ;;  %v28222_v13 = vld [vmem:[#allocation192_spill] sm:$0xff]  ;;  %v28224_v11 = vld [vmem:[#allocation194_spill] sm:$0xff]  ;;  %v11160_v3 = vsel %vm10034_vm8, %v28243_v54, %v28242_v4  ;;  %v28248_v54 = vrot.slane %v23889_v52, %v28176_v28  ;;  %v28250_v18 = vrot.slane %v28194_v55, %v28176_v28  ;;  %v28253_v4 = vrot.slane %v28179_v2, %v28176_v28 }
 0x588   :  { %v28225_v57 = vld [vmem:[#allocation198_spill] sm:$0xff]  ;;  %v28226_v33 = vld [vmem:[#allocation199_spill] sm:$0xff]  ;;  %v28236_v58 = vld [vmem:[#allocation212_spill] sm:$0xff]  ;;  %v11140_v0 = vsel %vm10036_vm10, %v28245_v14, %v11139_v49 }
 0x589   :  { %v28230_v36 = vld [vmem:[#allocation206_spill] sm:$0xff]  ;;  %v28235_v7 = vld [vmem:[#allocation211_spill] sm:$0xff]  ;;  %v28237_v26 = vld [vmem:[#allocation213_spill] sm:$0xff]  ;;  %v11147_v47 = vsel %vm10036_vm10, %v28248_v54, %v11146_v35  ;;  %v11167_v17 = vsel %vm10034_vm8, %v28250_v18, %v28249_v63  ;;  %v11154_v52 = vsel %vm10036_vm10, %v28253_v4, %v11153_v21  ;;  %v28254_v35 = vrot.slane %v28187_v32, %v28176_v28 }
 0x58a   :  { %v28244_v43 = vld [vmem:[#allocation215_spill] sm:$0xff]  ;;  %v28246_v45 = vld [vmem:[#allocation216_spill] sm:$0xff]  ;;  %v28247_v22 = vld [vmem:[#allocation217_spill] sm:$0xff]  ;;  %v11141_v2 = vsel %vm10038_vm11, %v28258_v27, %v11140_v0  ;;  %v28262_v63 = vrot.slane %v28195_v5, %v28176_v28  ;;  %v28264_v27 = vrot.slane %v28180_v20, %v28176_v28  ;;  %v28267_v5 = vrot.slane %v28202_v44, %v28176_v28 }
 0x58b   :  { %v28251_v49 = vld [vmem:[#allocation218_spill] sm:$0xff]  ;;  %v28252_v51 = vld [vmem:[#allocation219_spill] sm:$0xff]  ;;  %v11161_v10 = vsel %vm10036_vm10, %v28254_v35, %v11160_v3  ;;  %v28255_v55 = vld [vmem:[#allocation220_spill] sm:$0xff]  ;;  %v28261_v35 = vrot.slane %v23893_v56, %v28176_v28  ;;  %v28265_v3 = vrot.slane %v28188_v53, %v28176_v28 }
 0x58c   :  { %v28256_v18 = vld [vmem:[#allocation221_spill] sm:$0xff]  ;;  %v28259_v21 = vld [vmem:[#allocation223_spill] sm:$0xff]  ;;  %v11168_v37 = vsel %vm10036_vm10, %v28262_v63, %v11167_v17  ;;  %v28263_v46 = vld [vmem:[#allocation226_spill] sm:$0xff]  ;;  %v11155_v0 = vsel %vm10038_vm11, %v28264_v27, %v11154_v52  ;;  %v28268_v52 = vrot.slane %v23865_v29, %v28176_v28 }
 0x58d   :  { %v28260_v32 = vld [vmem:[#allocation225_spill] sm:$0xff]  ;;  %v11148_v54 = vsel %vm10038_vm11, %v28261_v35, %v11147_v47  ;;  %v11162_v56 = vsel %vm10038_vm11, %v28265_v3, %v11161_v10  ;;  %v28266_v47 = vrot.slane %v28201_v50, %v28176_v28  ;;  %v28269_v10 = vrot.slane %v28209_v39, %v28176_v28  ;;  %v28284_v3 = vld [vmem:[#allocation231_spill] sm:$0xff]  ;;  %v28305_v4 = vld [vmem:[#allocation178_spill] sm:$0xff] }
 0x58e   :  { %v11142_v53 = vsel %vm10040_vm12, %v28268_v52, %v11141_v2  ;;  %v28270_v50 = vrot.slane %v28210_v1, %v28176_v28  ;;  %v28271_v35 = vrot.slane %v23897_v59, %v28176_v28  ;;  %v28274_v39 = vrot.slane %v28217_v42, %v28176_v28  ;;  %v28276_v52 = vld [vmem:[#allocation229_spill] sm:$0xff] }
 0x58f   :  { %v11174_v17 = vsel %vm10034_vm8, %v28267_v5, %v28266_v47  ;;  %v28272_v47 = vld [vmem:[#allocation162_spill] sm:$0xff]  ;;  %v28275_v1 = vrot.slane %v28218_v41, %v28176_v28  ;;  %v28285_v63 = vld [vmem:[#allocation137_spill] sm:$0xff] }
 0x590   :  { %v11181_v44 = vsel %vm10034_vm8, %v28270_v50, %v28269_v10  ;;  %v11149_v27 = vsel %vm10040_vm12, %v28271_v35, %v11148_v54  ;;  %v28273_v29 = vrot.slane %v28272_v47, %v28176_v28  ;;  %v28277_v50 = vld [vmem:[#allocation147_spill] sm:$0xff]  ;;  %v28298_v10 = vld [vmem:[#allocation156_spill] sm:$0xff] }
 0x591   :  { %v11188_v5 = vsel %vm10034_vm8, %v28275_v1, %v28274_v39  ;;  %v28278_v59 = vrot.slane %v28277_v50, %v28176_v28  ;;  %v28279_v35 = vld [vmem:[#allocation155_spill] sm:$0xff]  ;;  %v28283_v39 = vld [vmem:[#allocation230_spill] sm:$0xff]  ;;  %v28286_v50 = vrot.slane %v28285_v63, %v28176_v28 }
 0x592   :  { %v11169_v2 = vsel %vm10038_vm11, %v28273_v29, %v11168_v37  ;;  %v28280_v47 = vrot.slane %v28279_v35, %v28176_v28  ;;  %v28281_v29 = vld [vmem:[#allocation169_spill] sm:$0xff]  ;;  %v28292_v1 = vld [vmem:[#allocation163_spill] sm:$0xff] }
 0x593   :  { %v11156_v54 = vsel %vm10040_vm12, %v28278_v59, %v11155_v0  ;;  %v28282_v42 = vrot.slane %v28281_v29, %v28176_v28  ;;  %v11143_v0 = vsel %vm10042_vm13, %v28286_v50, %v11142_v53  ;;  %v28287_v59 = vld [vmem:[#allocation177_spill] sm:$0xff]  ;;  %v28293_v20 = vrot.slane %v28292_v1, %v28176_v28 }
 0x594   :  { %v11163_v37 = vsel %vm10040_vm12, %v28280_v47, %v11162_v56  ;;  %v28288_v35 = vrot.slane %v28287_v59, %v28176_v28  ;;  %v28289_v47 = vld [vmem:[#allocation232_spill] sm:$0xff]  ;;  %v28294_v53 = vrot.slane %v28219_v30, %v28176_v28 }
 0x595   :  { %v11175_v41 = vsel %vm10036_vm10, %v28282_v42, %v11174_v17  ;;  %v28290_v17 = vld [vmem:[#allocation140_spill] sm:$0xff]  ;;  %v11170_v63 = vsel %vm10040_vm12, %v28293_v20, %v11169_v2  ;;  %v28302_v2 = vld [vmem:[#allocation238_spill] sm:$0xff] }
 0x596   :  { %v11182_v56 = vsel %vm10036_vm10, %v28288_v35, %v11181_v44  ;;  %v28291_v42 = vrot.slane %v28290_v17, %v28176_v28  ;;  %v11189_v50 = vsel %vm10036_vm10, %v28294_v53, %v11188_v5  ;;  %v28295_v44 = vld [vmem:[#allocation237_spill] sm:$0xff]  ;;  %v28296_v35 = vld [vmem:[#allocation148_spill] sm:$0xff]  ;;  %v11114_v5 = vrot.slane %v28302_v2, %v28176_v28  ;;  %v28303_v53 = vld [vmem:[#allocation138_spill] sm:$0xff] }
 0x597   :  { %v28297_v29 = vrot.slane %v28296_v35, %v28176_v28  ;;  %v28304_v59 = vrot.slane %v28303_v53, %v28176_v28  ;;  %v28315_v53 = vld [vmem:[#allocation149_spill] sm:$0xff] }
 0x598   :  { %v11150_v14 = vsel %vm10042_vm13, %v28291_v42, %v11149_v27  ;;  %v28299_v27 = vrot.slane %v28298_v10, %v28176_v28  ;;  %v28300_v42 = vld [vmem:[#allocation170_spill] sm:$0xff] }
 0x599   :  { %v11157_v17 = vsel %vm10042_vm13, %v28297_v29, %v11156_v54  ;;  %v28301_v20 = vrot.slane %v28300_v42, %v28176_v28  ;;  %v11144_v35 = vsel %vm10044_vm14, %v28304_v59, %v11143_v0  ;;  %v28306_v54 = vrot.slane %v28305_v4, %v28176_v28  ;;  %v28312_v59 = vld [vmem:[#allocation164_spill] sm:$0xff] }
 0x59a   :  { %v11164_v1 = vsel %vm10042_vm13, %v28299_v27, %v11163_v37  ;;  %v28307_v37 = vrot.slane %v28221_v60, %v28176_v28  ;;  %v28308_v29 = vrot.slane %v28222_v13, %v28176_v28  ;;  %v28309_v27 = vld [vmem:[#allocation239_spill] sm:$0xff]  ;;  %v28313_v4 = vrot.slane %v28312_v59, %v28176_v28 }
 0x59b   :  { %v11176_v30 = vsel %vm10038_vm11, %v28301_v20, %v11175_v41  ;;  %v11183_v10 = vsel %vm10038_vm11, %v28306_v54, %v11182_v56  ;;  %v11118_v42 = vrot.slane %v28309_v27, %v28176_v28  ;;  %v28310_v20 = vld [vmem:[#allocation141_spill] sm:$0xff]  ;;  %v28314_v60 = vrot.slane %v28220_v38, %v28176_v28 }
 0x59c   :  { %v11195_v41 = vsel %vm10034_vm8, %v28308_v29, %v28307_v37  ;;  %v28311_v2 = vrot.slane %v28310_v20, %v28176_v28  ;;  %v11171_v56 = vsel %vm10042_vm13, %v28313_v4, %v11170_v63  ;;  %v28316_v54 = vrot.slane %v28315_v53, %v28176_v28  ;;  %v28317_v29 = vld [vmem:[#allocation157_spill] sm:$0xff]  ;;  %v28324_v53 = vld [vmem:[#allocation139_spill] sm:$0xff] }
 0x59d   :  { %v11190_v13 = vsel %vm10038_vm11, %v28314_v60, %v11189_v50  ;;  %v28318_v20 = vrot.slane %v28317_v29, %v28176_v28  ;;  %v28321_v38 = vrot.slane %v28225_v57, %v28176_v28  ;;  %v28322_v50 = vrot.slane %v28226_v33, %v28176_v28  ;;  %v28326_v29 = vld [vmem:[#allocation179_spill] sm:$0xff] }
 0x59e   :  { %v11151_v0 = vsel %vm10044_vm14, %v28311_v2, %v11150_v14  ;;  %v11158_v37 = vsel %vm10044_vm14, %v28316_v54, %v11157_v17  ;;  %v28319_v2 = vld [vmem:[#allocation171_spill] sm:$0xff]  ;;  %v28323_v17 = vld [vmem:[#allocation240_spill] sm:$0xff]  ;;  %v28325_v54 = vrot.slane %v28324_v53, %v28176_v28  ;;  %v28328_v57 = vrot.slane %v28223_v48, %v28176_v28 }
 0x59f   :  { %v11165_v14 = vsel %vm10044_vm14, %v28318_v20, %v11164_v1  ;;  %v28320_v59 = vrot.slane %v28319_v2, %v28176_v28  ;;  %v11202_v4 = vsel %vm10034_vm8, %v28322_v50, %v28321_v38  ;;  %v11122_v60 = vrot.slane %v28323_v17, %v28176_v28  ;;  %v28329_v2 = vld [vmem:[#allocation142_spill] sm:$0xff]  ;;  %v28331_v50 = vld [vmem:[#allocation165_spill] sm:$0xff] }
 0x5a0   :  { %v11145_v1 = vsel %vm10046_vm15, %v28325_v54, %v11144_v35  ;;  %v28327_v20 = vrot.slane %v28326_v29, %v28176_v28  ;;  %v11196_v33 = vsel %vm10036_vm10, %v28328_v57, %v11195_v41  ;;  %v28332_v53 = vrot.slane %v28331_v50, %v28176_v28  ;;  %v28333_v54 = vld [vmem:[#allocation187_spill] sm:$0xff]  ;;  %v28337_v57 = vld [vmem:[#allocation150_spill] sm:$0xff] }
 0x5a1   :  { %v11177_v63 = vsel %vm10040_vm12, %v28320_v59, %v11176_v30  ;;  %v28330_v59 = vrot.slane %v28329_v2, %v28176_v28  ;;  %v28334_v29 = vrot.slane %v28333_v54, %v28176_v28  ;;  %v28335_v48 = vrot.slane %v24169_v12, %v28176_v28 }
 0x5a2   :  { %v11184_v30 = vsel %vm10040_vm12, %v28327_v20, %v11183_v10  ;;  %v11172_v35 = vsel %vm10044_vm14, %v28332_v53, %v11171_v56  ;;  %v28336_v41 = vrot.slane %v24173_v9, %v28176_v28  ;;  %v28341_v53 = vld [vmem:[#allocation172_spill] sm:$0xff]  ;;  %v28343_v9 = vrot.slane %v28227_v15, %v28176_v28 }
 0x5a3   :  { %v11152_v38 = vsel %vm10046_vm15, %v28330_v59, %v11151_v0  ;;  %v11191_v10 = vsel %vm10040_vm12, %v28334_v29, %v11190_v13  ;;  %v28338_v0 = vrot.slane %v28337_v57, %v28176_v28  ;;  %v28339_v59 = vld [vmem:[#allocation158_spill] sm:$0xff]  ;;  %v28342_v13 = vrot.slane %v28341_v53, %v28176_v28  ;;  %v28344_v29 = vld [vmem:[#allocation180_spill] sm:$0xff] }
 0x5a4   :  { %v11209_v20 = vsel %vm10034_vm8, %v28336_v41, %v28335_v48  ;;  %v28340_v56 = vrot.slane %v28339_v59, %v28176_v28  ;;  %v11203_v54 = vsel %vm10036_vm10, %v28343_v9, %v11202_v4  ;;  %v28345_v48 = vrot.slane %v28344_v29, %v28176_v28 }
 0x5a5   :  { %v11159_v2 = vsel %vm10046_vm15, %v28338_v0, %v11158_v37  ;;  %v11178_v12 = vsel %vm10042_vm13, %v28342_v13, %v11177_v63  ;;  %v28346_v41 = vrot.slane %v28224_v11, %v28176_v28  ;;  %v28347_v57 = vrot.slane %v28232_v19, %v28176_v28  ;;  %v28349_v0 = vld [vmem:[#allocation166_spill] sm:$0xff]  ;;  %v28354_v13 = vld [vmem:[#allocation173_spill] sm:$0xff] }
 0x5a6   :  { %v11166_v50 = vsel %vm10046_vm15, %v28340_v56, %v11165_v14  ;;  %v11185_v37 = vsel %vm10042_vm13, %v28345_v48, %v11184_v30  ;;  %v28348_v63 = vrot.slane %v28235_v7, %v28176_v28  ;;  %v11267_v4 = vsel %vm10169_vm3, %v11145_v1, 0.0  ;;  %v28351_v56 = vld [vmem:[#allocation188_spill] sm:$0xff] }
 0x5a7   :  { %v11197_v14 = vsel %vm10038_vm11, %v28346_v41, %v11196_v33  ;;  %v28350_v59 = vrot.slane %v28349_v0, %v28176_v28  ;;  %v28352_v11 = vrot.slane %v28351_v56, %v28176_v28  ;;  %v28353_v19 = vrot.slane %v28229_v31, %v28176_v28  ;;  %v28364_v0 = vld [vmem:[#allocation189_spill] sm:$0xff] }
 0x5a8   :  { %v11216_v15 = vsel %vm10034_vm8, %v28348_v63, %v28347_v57  ;;  %v11268_v7 = vsel %vm10169_vm3, %v11152_v38, 0.0  ;;  %v28355_v1 = vrot.slane %v28354_v13, %v28176_v28  ;;  %v28358_v31 = vrot.slane %v28246_v45, %v28176_v28  ;;  %v28359_v38 = vld [vmem:[#allocation181_spill] sm:$0xff] }
 0x5a9   :  { %v11173_v30 = vsel %vm10046_vm15, %v28350_v59, %v11172_v35  ;;  %v11192_v33 = vsel %vm10042_vm13, %v28352_v11, %v11191_v10  ;;  %v11210_v53 = vsel %vm10036_vm10, %v28353_v19, %v11209_v20  ;;  %v28356_v35 = vrot.slane %v28228_v6, %v28176_v28 }
 0x5aa   :  { %v11179_v9 = vsel %vm10044_vm14, %v28355_v1, %v11178_v12  ;;  %v28357_v10 = vrot.slane %v28244_v43, %v28176_v28  ;;  %v11269_v48 = vadd.f32 %v11268_v7, %v11267_v4  ;;  %v28360_v41 = vrot.slane %v28359_v38, %v28176_v28  ;;  %v28361_v12 = vld [vmem:[#allocation195_spill] sm:$0xff]  ;;  %v28381_v38 = vld [vmem:[#allocation202_spill] sm:$0xff] }
 0x5ab   :  { %v11204_v29 = vsel %vm10038_vm11, %v28356_v35, %v11203_v54  ;;  %v28362_v63 = vrot.slane %v28361_v12, %v28176_v28  ;;  %v28363_v54 = vrot.slane %v28236_v58, %v28176_v28  ;;  %v11270_v45 = vsel %vm10169_vm3, %v11159_v2, 0.0  ;;  %v28369_v2 = vld [vmem:[#allocation174_spill] sm:$0xff] }
 0x5ac   :  { %v11223_v20 = vsel %vm10034_vm8, %v28358_v31, %v28357_v10  ;;  %v11186_v57 = vsel %vm10044_vm14, %v28360_v41, %v11185_v37  ;;  %v28365_v4 = vrot.slane %v28364_v0, %v28176_v28  ;;  %v28366_v37 = vrot.slane %v28230_v36, %v28176_v28 }
 0x5ad   :  { %v11198_v6 = vsel %vm10040_vm12, %v28362_v63, %v11197_v14  ;;  %v11217_v43 = vsel %vm10036_vm10, %v28363_v54, %v11216_v15  ;;  %v28367_v14 = vrot.slane %v28259_v21, %v28176_v28  ;;  %v28368_v58 = vrot.slane %v28260_v32, %v28176_v28  ;;  %v28385_v54 = vld [vmem:[#allocation196_spill] sm:$0xff] }
 0x5ae   :  { %v11193_v59 = vsel %vm10044_vm14, %v28365_v4, %v11192_v33  ;;  %v11211_v56 = vsel %vm10038_vm11, %v28366_v37, %v11210_v53  ;;  %v11271_v11 = vadd.f32 %v11270_v45, %v11269_v48  ;;  %v28370_v19 = vrot.slane %v28369_v2, %v28176_v28  ;;  %v28389_v37 = vld [vmem:[#allocation190_spill] sm:$0xff]  ;;  %v28394_v2 = vld [vmem:[#allocation203_spill] sm:$0xff] }
 0x5af   :  { %v11230_v15 = vsel %vm10034_vm8, %v28368_v58, %v28367_v14  ;;  %v28371_v33 = vrot.slane %v24153_v23, %v28176_v28  ;;  %v28372_v53 = vrot.slane %v28247_v22, %v28176_v28  ;;  %v11272_v32 = vsel %vm10169_vm3, %v11166_v50, 0.0  ;;  %v28377_v50 = vld [vmem:[#allocation182_spill] sm:$0xff]  ;;  %v28391_v14 = vld [vmem:[#allocation207_spill] sm:$0xff] }
 0x5b0   :  { %v11180_v7 = vsel %vm10046_vm15, %v28370_v19, %v11179_v9  ;;  %v28373_v13 = vrot.slane %v24125_v25, %v28176_v28  ;;  %v28374_v9 = vrot.slane %v28237_v26, %v28176_v28  ;;  %v28375_v23 = vrot.slane %v28276_v52, %v28176_v28 }
 0x5b1   :  { %v11205_v36 = vsel %vm10040_vm12, %v28371_v33, %v11204_v29  ;;  %v11224_v21 = vsel %vm10036_vm10, %v28372_v53, %v11223_v20  ;;  %v28376_v22 = vrot.slane %v28283_v39, %v28176_v28  ;;  %v11273_v10 = vadd.f32 %v11272_v32, %v11271_v11  ;;  %v28397_v53 = vld [vmem:[#allocation197_spill] sm:$0xff] }
 0x5b2   :  { %v11199_v1 = vsel %vm10042_vm13, %v28373_v13, %v11198_v6  ;;  %v11218_v35 = vsel %vm10038_vm11, %v28374_v9, %v11217_v43  ;;  %v28378_v31 = vrot.slane %v28377_v50, %v28176_v28  ;;  %v28379_v20 = vrot.slane %v24185_v62, %v28176_v28 }
 0x5b3   :  { %v11237_v29 = vsel %vm10034_vm8, %v28376_v22, %v28375_v23  ;;  %v28380_v48 = vrot.slane %v28263_v46, %v28176_v28  ;;  %v11274_v39 = vsel %vm10169_vm3, %v11173_v30, 0.0  ;;  %v28382_v41 = vrot.slane %v28381_v38, %v28176_v28  ;;  %v28402_v23 = vld [vmem:[#allocation208_spill] sm:$0xff] }
 0x5b4   :  { %v11187_v25 = vsel %vm10046_vm15, %v28378_v31, %v11186_v57  ;;  %v11212_v26 = vsel %vm10040_vm12, %v28379_v20, %v11211_v56  ;;  %v28383_v57 = vrot.slane %v28251_v49, %v28176_v28  ;;  %v28384_v62 = vrot.slane %v28295_v44, %v28176_v28  ;;  %v28405_v31 = vld [vmem:[#allocation204_spill] sm:$0xff] }
 0x5b5   :  { %v11231_v52 = vsel %vm10036_vm10, %v28380_v48, %v11230_v15  ;;  %v11206_v12 = vsel %vm10042_vm13, %v28382_v41, %v11205_v36  ;;  %v11275_v46 = vadd.f32 %v11274_v39, %v11273_v10  ;;  %v28386_v43 = vrot.slane %v28385_v54, %v28176_v28  ;;  %v28414_v54 = vld [vmem:[#allocation227_spill] sm:$0xff] }
 0x5b6   :  { %v11225_v63 = vsel %vm10038_vm11, %v28383_v57, %v11224_v21  ;;  %v11244_v6 = vsel %vm10034_vm8, %v11114_v5, %v28384_v62  ;;  %v28387_v45 = vrot.slane %v24217_v16, %v28176_v28  ;;  %v28388_v49 = vrot.slane %v28284_v3, %v28176_v28  ;;  %v28410_v57 = vld [vmem:[#allocation234_spill] sm:$0xff]  ;;  %v28411_v62 = vld [vmem:[#allocation209_spill] sm:$0xff] }
 0x5b7   :  { %v11200_v30 = vsel %vm10044_vm14, %v28386_v43, %v11199_v1  ;;  %v11276_v44 = vsel %vm10169_vm3, %v11180_v7, 0.0  ;;  %v28390_v5 = vrot.slane %v28389_v37, %v28176_v28  ;;  %v28392_v58 = vrot.slane %v28391_v14, %v28176_v28  ;;  %v28417_v37 = vld [vmem:[#allocation214_spill] sm:$0xff] }
 0x5b8   :  { %v11219_v0 = vsel %vm10040_vm12, %v28387_v45, %v11218_v35  ;;  %v11238_v4 = vsel %vm10036_vm10, %v28388_v49, %v11237_v29  ;;  %v28393_v16 = vrot.slane %v24285_v8, %v28176_v28  ;;  %v11277_v3 = vadd.f32 %v11276_v44, %v11275_v46 }
 0x5b9   :  { %v11194_v56 = vsel %vm10046_vm15, %v28390_v5, %v11193_v59  ;;  %v11213_v15 = vsel %vm10042_vm13, %v28392_v58, %v11212_v26  ;;  %v28395_v19 = vrot.slane %v28394_v2, %v28176_v28  ;;  %v28396_v33 = vrot.slane %v28252_v51, %v28176_v28  ;;  %v28419_v58 = vld [vmem:[#allocation136_spill] sm:$0xff] }
 0x5ba   :  { %v11232_v11 = vsel %vm10038_vm11, %v28393_v16, %v11231_v52  ;;  %v11245_v36 = vsel %vm10036_vm10, %v11118_v42, %v11244_v6  ;;  %v11278_v8 = vsel %vm10169_vm3, %v11187_v25, 0.0  ;;  %v28398_v21 = vrot.slane %v28397_v53, %v28176_v28  ;;  %v28401_v42 = vld [vmem:[#allocation233_spill] sm:$0xff]  ;;  %v28421_v2 = vld [vmem:[#allocation228_spill] sm:$0xff]  ;;  %v28424_v53 = vld [vmem:[#allocation243_spill] sm:$0xff] }
 0x5bb   :  { %v11207_v7 = vsel %vm10044_vm14, %v28395_v19, %v11206_v12  ;;  %v11226_v59 = vsel %vm10040_vm12, %v28396_v33, %v11225_v63  ;;  %v28399_v13 = vrot.slane %v24221_v61, %v28176_v28  ;;  %v28400_v51 = vrot.slane %v28289_v47, %v28176_v28  ;;  %v28408_v52 = vld [vmem:[#allocation241_spill] sm:$0xff] }
 0x5bc   :  { %v11201_v32 = vsel %vm10046_vm15, %v28398_v21, %v11200_v30  ;;  %v11279_v27 = vadd.f32 %v11278_v8, %v11277_v3  ;;  %v11094_v35 = vrot.slane %v28401_v42, %v28176_v28  ;;  %v28403_v22 = vrot.slane %v28402_v23, %v28176_v28 }
 0x5bd   :  { %v11220_v1 = vsel %vm10042_vm13, %v28399_v13, %v11219_v0  ;;  %v11239_v9 = vsel %vm10038_vm11, %v28400_v51, %v11238_v4  ;;  %v28404_v10 = vrot.slane %v24289_v40, %v28176_v28  ;;  %v11280_v50 = vsel %vm10169_vm3, %v11194_v56, 0.0  ;;  %v28416_v4 = vld [vmem:[#allocation242_spill] sm:$0xff] }
 0x5be   :  { %v11214_v29 = vsel %vm10044_vm14, %v28403_v22, %v11213_v15  ;;  %v28406_v47 = vrot.slane %v28405_v31, %v28176_v28  ;;  %v28407_v20 = vrot.slane %v28255_v55, %v28176_v28  ;;  %v11246_v48 = vsel %vm10038_vm11, %v11122_v60, %v11245_v36  ;;  %v28420_v15 = vld [vmem:[#allocation235_spill] sm:$0xff] }
 0x5bf   :  { %v11233_v61 = vsel %vm10040_vm12, %v28404_v10, %v11232_v11  ;;  %v11281_v40 = vadd.f32 %v11280_v50, %v11279_v27  ;;  %v11126_v39 = vrot.slane %v28408_v52, %v28176_v28  ;;  %v28409_v38 = vrot.slane %v24225_v34, %v28176_v28 }
 0x5c0   :  { %v11208_v25 = vsel %vm10046_vm15, %v28406_v47, %v11207_v7  ;;  %v11227_v26 = vsel %vm10042_vm13, %v28407_v20, %v11226_v59  ;;  %v11240_v12 = vsel %vm10040_vm12, %v11094_v35, %v11239_v9  ;;  %v11282_v55 = vsel %vm10169_vm3, %v11201_v32, 0.0  ;;  %v28422_v7 = vld [vmem:[#allocation222_spill] sm:$0xff] }
 0x5c1   :  { %v11221_v41 = vsel %vm10044_vm14, %v28409_v38, %v11220_v1  ;;  %v11098_v63 = vrot.slane %v28410_v57, %v28176_v28  ;;  %v28412_v17 = vrot.slane %v28411_v62, %v28176_v28  ;;  %v28413_v6 = vrot.slane %v24293_v24, %v28176_v28  ;;  %v28425_v1 = vld [vmem:[#allocation236_spill] sm:$0xff]  ;;  %v17145_v57 = vld [vmem:[%s27179_s4] ss:$0 sm:$0xff] }
 0x5c2   :  { %v11283_v34 = vadd.f32 %v11282_v55, %v11281_v40  ;;  %v11070_v43 = vrot.slane %v28414_v54, %v28176_v28  ;;  %v28415_v30 = vrot.slane %v28256_v18, %v28176_v28  ;;  %v11247_v0 = vsel %vm10040_vm12, %v11126_v39, %v11246_v48  ;;  %v17144_v55 = vld [vmem:[%s27178_s3] ss:$0 sm:$0xff] }
 0x5c3   :  { %v11215_v60 = vsel %vm10046_vm15, %v28412_v17, %v11214_v29  ;;  %v11234_v46 = vsel %vm10042_vm13, %v28413_v6, %v11233_v61  ;;  %v11284_v49 = vsel %vm10169_vm3, %v11208_v25, 0.0  ;;  %v11130_v44 = vrot.slane %v28416_v4, %v28176_v28  ;;  %v28426_v17 = vld [vmem:[#allocation49_spill] sm:$0xff] }
 0x5c4   :  { %v11228_v45 = vsel %vm10044_vm14, %v28415_v30, %v11227_v26  ;;  %v28418_v24 = vrot.slane %v28417_v37, %v28176_v28  ;;  %v11241_v56 = vsel %vm10042_vm13, %v11098_v63, %v11240_v12  ;;  %v11285_v14 = vadd.f32 %v11284_v49, %v11283_v34 }
 0x5c5   :  { %v10498_v18 = vmul.f32 %v28419_v58, %v28419_v58  ;;  %v11102_v16 = vrot.slane %v28420_v15, %v28176_v28  ;;  %v11235_v11 = vsel %vm10044_vm14, %v11070_v43, %v11234_v46  ;;  %v11286_v3 = vsel %vm10169_vm3, %v11215_v60, 0.0 }
 0x5c6   :  { %v11222_v5 = vsel %vm10046_vm15, %v28418_v24, %v11221_v41  ;;  %v11074_v19 = vrot.slane %v28421_v2, %v28176_v28  ;;  %v28423_v33 = vrot.slane %v28422_v7, %v28176_v28  ;;  %v11248_v36 = vsel %vm10042_vm13, %v11130_v44, %v11247_v0 }
 0x5c7   :  { %v11287_v8 = vadd.f32 %v11286_v3, %v11285_v14  ;;  %v11134_v21 = vrot.slane %v28424_v53, %v28176_v28  ;;  %v11242_v32 = vsel %vm10044_vm14, %v11102_v16, %v11241_v56  ;;  %v11288_v13 = vsel %vm10169_vm3, %v11222_v5, 0.0  ;;  %v28427_v14 = vld [vmem:[#allocation129_spill] sm:$0xff] }
 0x5c8   :  { %v11229_v59 = vsel %vm10046_vm15, %v28423_v33, %v11228_v45  ;;  %v11106_v51 = vrot.slane %v28425_v1, %v28176_v28  ;;  %v11236_v9 = vsel %vm10046_vm15, %v11074_v19, %v11235_v11  ;;  %v11138_v23 = vrot.slane %v10498_v18, %v28176_v28  ;;  %v28428_v33 = vld [vmem:[#allocation130_spill] sm:$0xff] }
 0x5c9   :  { %v11289_v27 = vadd.f32 %v11288_v13, %v11287_v8  ;;  %v11249_v42 = vsel %vm10044_vm14, %v11134_v21, %v11248_v36  ;;  %v11290_v35 = vsel %vm10169_vm3, %v11229_v59, 0.0  ;;  %v11292_v10 = vsel %vm10169_vm3, %v11236_v9, 0.0  ;;  %v28429_v36 = vld [vmem:[#allocation131_spill] sm:$0xff]  ;;  %v28430_v13 = vld [vmem:[#allocation132_spill] sm:$0xff]  ;;  %v28431_v9 = vld [vmem:[#allocation46_spill] sm:$0xff] }
 0x5ca   :  { %v11243_v22 = vsel %vm10046_vm15, %v11106_v51, %v11242_v32  ;;  %v11250_v61 = vsel %vm10046_vm15, %v11138_v23, %v11249_v42  ;;  %v11475_v63 = vcombine.high %v17144_v55, %v17144_v55  ;;  %v11638_v62 = vcombine.high %v17145_v57, %v17145_v57 }
 0x5cb   :  { %v11291_v29 = vadd.f32 %v11290_v35, %v11289_v27  ;;  %v11294_v31 = vsel %vm10169_vm3, %v11243_v22, 0.0  ;;  %v11296_v25 = vsel %vm10169_vm3, %v11250_v61, 0.0  ;;  %v25108_v60 = vrot.slane %v17144_v55, %v28426_v17  ;;  %v28432_v35 = vld [vmem:[#allocation133_spill] sm:$0xff] }
 0x5cc   :  { %v25111_v6 = vrot.slane %v17145_v57, %v28426_v17  ;;  %v25114_v34 = vrot.slane %v11475_v63, %v28426_v17  ;;  %v25117_v54 = vrot.slane %v11638_v62, %v28426_v17  ;;  %v28438_v63 = vld [vmem:[#allocation84_spill] sm:$0xff] }
 0x5cd   :  { %v11293_v50 = vadd.f32 %v11292_v10, %v11291_v29  ;;  %v25122_v30 = vcombine.high %v25108_v60, %v25108_v60  ;;  %v25136_v44 = vrot.slane %v25108_v60, 1  ;;  %v28433_v10 = vld [vmem:[#allocation47_spill] sm:$0xff] }
 0x5ce   :  { %v25126_v45 = vcombine.high %v25111_v6, %v25111_v6  ;;  %v25133_v4 = vcombine.high %v25114_v34, %v25114_v34  ;;  %v25140_v37 = vcombine.high %v25117_v54, %v25117_v54  ;;  %v25158_v16 = vrot.slane %v25114_v34, 1 }
 0x5cf   :  { %v11295_v47 = vadd.f32 %v11294_v31, %v11293_v50  ;;  %v25155_v15 = vrot.slane %v25122_v30, 1  ;;  %v25161_v11 = vrot.slane %v25111_v6, 1  ;;  %v25182_v21 = vrot.slane %v25117_v54, 1  ;;  %v28434_v50 = vld [vmem:[#allocation134_spill] sm:$0xff] }
 0x5d0   :  { %v25164_v3 = vrot.slane %v25126_v45, 1  ;;  %v25185_v32 = vrot.slane %v25133_v4, 1  ;;  %v25193_v42 = vrot.slane %v25140_v37, 1 }
 0x5d1   :  { %v11297_v20 = vadd.f32 %v11296_v25, %v11295_v47  ;;  %v28435_v47 = vld [vmem:[#allocation135_spill] sm:$0xff] }
 0x5d3   :  { %v11298_v26 = vrot.slane %v11297_v20, 4 }
 0x5d5   :  { %v11299_v48 = vadd.f32 %v11298_v26, %v11297_v20 }
 0x5d7   :  { %v11300_v40 = vrot.slane %v11299_v48, 2 }
 0x5d9   :  { %v11301_v52 = vadd.f32 %v11300_v40, %v11299_v48 }
 0x5db   :  { %v11302_v39 = vrot.slane %v11301_v52, 1 }
 0x5dd   :  { %v11303_v38 = vadd.f32 %v11302_v39, %v11301_v52  ;;  %v28436_v52 = vld [vmem:[#allocation75_spill] sm:$0xff] }
 0x5df   :  { %v11304_v41 = vmul.f32 0.0078125, %v11303_v38  ;;  %v28437_v38 = vld [vmem:[#allocation48_spill] sm:$0xff] }
 0x5e1   :  { %v11305_v12 = vadd.f32 1e-05, %v11304_v41 }
 0x5e3   :  { %19866 = vrsqrt.f32 %v11305_v12 }
 0x5ed   :  { %v19867_v46 = vpop.eup %19866 }
 0x5ee   :  { %v11310_v43 = vrot.slane %v19867_v46, %v28176_v28 }
 0x5f0   :  { %v11312_v0 = vcombine.high %v11310_v43, %v11310_v43  ;;  %v25129_v49 = vrot.slane %v11310_v43, %v28426_v17 }
 0x5f2   :  { %v25143_v24 = vrot.slane %v11312_v0, %v28426_v17  ;;  %v25147_v5 = vcombine.high %v25129_v49, %v25129_v49  ;;  %v25150_v56 = vrot.slane %v25129_v49, 1  ;;  %v11461_v18 = vmul.f32 %v25129_v49, %v28427_v14  ;;  %v28439_v0 = vld [vmem:[#allocation51_spill] sm:$0xff] }
 0x5f3   :  { %v11341_v27 = vmul.f32 %v25129_v49, %v28431_v9  ;;  %v25201_v61 = vmul.f32 %v25129_v49, %v28433_v10  ;;  %v25217_v41 = vmul.f32 %v25129_v49, %v28437_v38 }
 0x5f4   :  { %v25168_v2 = vcombine.high %v25143_v24, %v25143_v24  ;;  %v25171_v19 = vrot.slane %v25147_v5, 1  ;;  %v25174_v7 = vrot.slane %v25143_v24, 1  ;;  %v11462_v59 = vmul.f32 %v25150_v56, %v28428_v33 }
 0x5f5   :  { %v11463_v8 = vmul.f32 %v25147_v5, %v28429_v36  ;;  %v11624_v53 = vmul.f32 %v25108_v60, %v11461_v18  ;;  %v11465_v23 = vmul.f32 %v25143_v24, %v28432_v35  ;;  %v11342_v39 = vmul.f32 %v25150_v56, %v28436_v52  ;;  %v28440_v18 = vld [vmem:[#allocation92_spill] sm:$0xff]  ;;  %v28443_v35 = vld [vmem:[#allocation65_spill] sm:$0xff] }
 0x5f6   :  { %v11464_v1 = vmul.f32 %v25171_v19, %v28430_v13  ;;  %v11625_v51 = vmul.f32 %v25136_v44, %v11462_v59  ;;  %v11466_v31 = vmul.f32 %v25174_v7, %v28434_v50  ;;  %v11467_v25 = vmul.f32 %v25168_v2, %v28435_v47 }
 0x5f7   :  { %v11626_v22 = vmul.f32 %v25122_v30, %v11463_v8  ;;  %v11787_v29 = vadd.f32 %v25111_v6, %v11624_v53  ;;  %v25211_v40 = vrot.slane %v25168_v2, 1  ;;  %v11343_v62 = vmul.f32 %v25147_v5, %v28438_v63  ;;  %v28441_v53 = vld [vmem:[#allocation55_spill] sm:$0xff] }
 0x5f8   :  { %v11627_v20 = vmul.f32 %v25155_v15, %v11464_v1  ;;  %v11788_v26 = vadd.f32 %v25161_v11, %v11625_v51  ;;  %v11628_v46 = vmul.f32 %v25114_v34, %v11465_v23  ;;  %v11344_v14 = vmul.f32 %v25171_v19, %v28439_v0  ;;  %v28442_v51 = vld [vmem:[#allocation67_spill] sm:$0xff] }
 0x5f9   :  { %v11789_v48 = vadd.f32 %v25126_v45, %v11626_v22  ;;  %v12467_v55 = vrot.slane %v11787_v29, %v28176_v28  ;;  %v11345_v33 = vmul.f32 %v25143_v24, %v28440_v18  ;;  %v11629_v59 = vmul.f32 %v25158_v16, %v11466_v31  ;;  %v28444_v22 = vld [vmem:[#allocation61_spill] sm:$0xff] }
 0x5fa   :  { %v11790_v12 = vadd.f32 %v25164_v3, %v11627_v20  ;;  %v12471_v57 = vrot.slane %v11788_v26, %v28176_v28  ;;  %v25232_v36 = vmul.f32 %v25133_v4, %v11467_v25  ;;  %v25237_v13 = vmul.f32 %v25129_v49, %v28441_v53 }
 0x5fb   :  { %v12475_v43 = vrot.slane %v11789_v48, %v28176_v28  ;;  %v11346_v9 = vmul.f32 %v25174_v7, %v28442_v51  ;;  %v11347_v23 = vmul.f32 %v25168_v2, %v28443_v35  ;;  %v11348_v29 = vmul.f32 %v25211_v40, %v28444_v22  ;;  %v28445_v35 = vld [vmem:[#allocation56_spill] sm:$0xff]  ;;  %v28446_v22 = vld [vmem:[#allocation57_spill] sm:$0xff] }
 0x5fc   :  { %v12601_v8 = vsel %vm10034_vm8, %v12471_v57, %v12467_v55  ;;  %v12479_v1 = vrot.slane %v11790_v12, %v28176_v28  ;;  %v11504_v50 = vmul.f32 %v25108_v60, %v11341_v27  ;;  %v11505_v31 = vmul.f32 %v25136_v44, %v11342_v39 }
 0x5fd   :  { %v12602_v10 = vsel %vm10036_vm10, %v12475_v43, %v12601_v8  ;;  %v11506_v47 = vmul.f32 %v25122_v30, %v11343_v62  ;;  %v25251_v25 = vadd.f32 %v25117_v54, %v11628_v46  ;;  %v11507_v20 = vmul.f32 %v25155_v15, %v11344_v14 }
 0x5fe   :  { %v11508_v26 = vmul.f32 %v25114_v34, %v11345_v33  ;;  %v11509_v48 = vmul.f32 %v25158_v16, %v11346_v9  ;;  %v25257_v52 = vadd.f32 %v25182_v21, %v11629_v59  ;;  %v11510_v38 = vmul.f32 %v25133_v4, %v11347_v23 }
 0x5ff   :  { %v11511_v27 = vmul.f32 %v25185_v32, %v11348_v29  ;;  %v11667_v39 = vadd.f32 %v25111_v6, %v11504_v50  ;;  %v25263_v12 = vsel %vm10038_vm11, %v12479_v1, %v12602_v10  ;;  %v11668_v55 = vadd.f32 %v25161_v11, %v11505_v31  ;;  %v28447_v10 = vld [vmem:[#allocation58_spill] sm:$0xff] }
 0x600   :  { %v11669_v57 = vadd.f32 %v25126_v45, %v11506_v47  ;;  %v11670_v63 = vadd.f32 %v25164_v3, %v11507_v20  ;;  %v11671_v62 = vadd.f32 %v25117_v54, %v11508_v26  ;;  %v11672_v46 = vadd.f32 %v25182_v21, %v11509_v48  ;;  %v28448_v47 = vld [vmem:[#allocation53_spill] sm:$0xff]  ;;  %v28449_v26 = vld [vmem:[#allocation52_spill] sm:$0xff] }
 0x601   :  { %v11673_v43 = vadd.f32 %v25140_v37, %v11510_v38  ;;  %v11674_v0 = vadd.f32 %v25193_v42, %v11511_v27  ;;  %v11987_v14 = vrot.slane %v11667_v39, %v28176_v28  ;;  %v11991_v18 = vrot.slane %v11668_v55, %v28176_v28  ;;  %v28450_v38 = vld [vmem:[#allocation68_spill] sm:$0xff]  ;;  %v28451_v55 = vld [vmem:[#allocation62_spill] sm:$0xff] }
 0x602   :  { %v11995_v33 = vrot.slane %v11669_v57, %v28176_v28  ;;  %v11999_v59 = vrot.slane %v11670_v63, %v28176_v28  ;;  %v12003_v8 = vrot.slane %v11671_v62, %v28176_v28  ;;  %v12007_v53 = vrot.slane %v11672_v46, %v28176_v28 }
 0x603   :  { %v12011_v1 = vrot.slane %v11673_v43, %v28176_v28  ;;  %v12015_v51 = vrot.slane %v11674_v0, %v28176_v28  ;;  %v12496_v9 = vsel %vm10034_vm8, %v11991_v18, %v11987_v14  ;;  %v11350_v23 = vmul.f32 %v25150_v56, %v28445_v35 }
 0x604   :  { %v11351_v29 = vmul.f32 %v25147_v5, %v28446_v22  ;;  %v11352_v50 = vmul.f32 %v25171_v19, %v28447_v10  ;;  %v12497_v31 = vsel %vm10036_vm10, %v11995_v33, %v12496_v9  ;;  %v11353_v20 = vmul.f32 %v25143_v24, %v28448_v47 }
 0x605   :  { %v11354_v48 = vmul.f32 %v25174_v7, %v28449_v26  ;;  %v11355_v27 = vmul.f32 %v25168_v2, %v28450_v38  ;;  %v12498_v39 = vsel %vm10038_vm11, %v11999_v59, %v12497_v31  ;;  %v11356_v57 = vmul.f32 %v25211_v40, %v28451_v55  ;;  %v28452_v55 = vld [vmem:[#allocation63_spill] sm:$0xff] }
 0x606   :  { %v11512_v63 = vmul.f32 %v25108_v60, %v25201_v61  ;;  %v11513_v62 = vmul.f32 %v25136_v44, %v11350_v23  ;;  %v12499_v46 = vsel %vm10040_vm12, %v12003_v8, %v12498_v39  ;;  %v11514_v43 = vmul.f32 %v25122_v30, %v11351_v29 }
 0x607   :  { %v11515_v0 = vmul.f32 %v25155_v15, %v11352_v50  ;;  %v11516_v14 = vmul.f32 %v25114_v34, %v11353_v20  ;;  %v12500_v18 = vsel %vm10042_vm13, %v12007_v53, %v12499_v46  ;;  %v11517_v33 = vmul.f32 %v25158_v16, %v11354_v48 }
 0x608   :  { %v11518_v59 = vmul.f32 %v25133_v4, %v11355_v27  ;;  %v11519_v9 = vmul.f32 %v25185_v32, %v11356_v57  ;;  %v12501_v61 = vsel %vm10044_vm14, %v12011_v1, %v12500_v18  ;;  %v11675_v35 = vadd.f32 %v25111_v6, %v11512_v63 }
 0x609   :  { %v11676_v8 = vadd.f32 %v25161_v11, %v11513_v62  ;;  %v11677_v23 = vadd.f32 %v25126_v45, %v11514_v43  ;;  %v12502_v22 = vsel %vm10046_vm15, %v12015_v51, %v12501_v61  ;;  %v11678_v29 = vadd.f32 %v25164_v3, %v11515_v0  ;;  %v28453_v62 = vld [vmem:[#allocation54_spill] sm:$0xff]  ;;  %v28457_v61 = vld [vmem:[#allocation79_spill] sm:$0xff] }
 0x60a   :  { %v11679_v53 = vadd.f32 %v25117_v54, %v11516_v14  ;;  %v11680_v10 = vadd.f32 %v25182_v21, %v11517_v33  ;;  %12625 = vst.msk [vmem:[#allocation3 + $0x20] sm:$0xff] %vm10169_vm3, %v12502_v22  ;;  %v11681_v50 = vadd.f32 %v25140_v37, %v11518_v59  ;;  %v11682_v1 = vadd.f32 %v25193_v42, %v11519_v9  ;;  %v28454_v43 = vld [vmem:[#allocation66_spill] sm:$0xff]  ;;  %v28455_v14 = vld [vmem:[#allocation77_spill] sm:$0xff] }
 0x60b   :  { %v12019_v31 = vrot.slane %v11675_v35, %v28176_v28  ;;  %v12023_v47 = vrot.slane %v11676_v8, %v28176_v28  ;;  %v12027_v20 = vrot.slane %v11677_v23, %v28176_v28  ;;  %v12031_v51 = vrot.slane %v11678_v29, %v28176_v28  ;;  %v28456_v59 = vld [vmem:[#allocation78_spill] sm:$0xff]  ;;  %v28458_v8 = vld [vmem:[#allocation72_spill] sm:$0xff] }
 0x60c   :  { %v12035_v26 = vrot.slane %v11679_v53, %v28176_v28  ;;  %v12039_v48 = vrot.slane %v11680_v10, %v28176_v28  ;;  %v12043_v38 = vrot.slane %v11681_v50, %v28176_v28  ;;  %v12047_v27 = vrot.slane %v11682_v1, %v28176_v28 }
 0x60d   :  { %v12503_v39 = vsel %vm10034_vm8, %v12023_v47, %v12019_v31  ;;  %v11358_v57 = vmul.f32 %v25150_v56, %v28452_v55  ;;  %v11359_v46 = vmul.f32 %v25147_v5, %v28453_v62  ;;  %v11360_v0 = vmul.f32 %v25171_v19, %v28454_v43  ;;  %v17179_v55 = vld [vmem:[%s27180_s5 + $0x10] sm:$0xff]  ;;  %v28459_v62 = vld [vmem:[#allocation224_spill] sm:$0xff] }
 0x60e   :  { %v12504_v63 = vsel %vm10036_vm10, %v12027_v20, %v12503_v39  ;;  %v11361_v18 = vmul.f32 %v25143_v24, %v28455_v14  ;;  %v11362_v9 = vmul.f32 %v25174_v7, %v28456_v59  ;;  %v11363_v35 = vmul.f32 %v25168_v2, %v28457_v61 }
 0x60f   :  { %v12505_v33 = vsel %vm10038_vm11, %v12031_v51, %v12504_v63  ;;  %v11364_v23 = vmul.f32 %v25211_v40, %v28458_v8  ;;  %v11520_v29 = vmul.f32 %v25108_v60, %v25217_v41  ;;  %v11521_v53 = vmul.f32 %v25136_v44, %v11358_v57 }
 0x610   :  { %v12506_v22 = vsel %vm10040_vm12, %v12035_v26, %v12505_v33  ;;  %v11522_v10 = vmul.f32 %v25122_v30, %v11359_v46  ;;  %v11523_v1 = vmul.f32 %v25155_v15, %v11360_v0  ;;  %v11524_v31 = vmul.f32 %v25114_v34, %v11361_v18 }
 0x611   :  { %v12507_v50 = vsel %vm10042_vm13, %v12039_v48, %v12506_v22  ;;  %v11525_v47 = vmul.f32 %v25158_v16, %v11362_v9  ;;  %v12659_v20 = vld [vmem:[#allocation3 + $0x20] sm:$0xff]  ;;  %v11526_v26 = vmul.f32 %v25133_v4, %v11363_v35  ;;  %v11527_v39 = vmul.f32 %v25185_v32, %v11364_v23  ;;  %v28460_v22 = vld [vmem:[#allocation73_spill] sm:$0xff] }
 0x612   :  { %v12508_v51 = vsel %vm10044_vm14, %v12043_v38, %v12507_v50  ;;  %v11683_v41 = vadd.f32 %v25111_v6, %v11520_v29  ;;  %18988 = vmatmul.mubr.msk.f32.vlgmr.msra.gmra.mrb[64].mxu1 %vm10169_vm3, %v12659_v20  ;;  %v11684_v57 = vadd.f32 %v25161_v11, %v11521_v53  ;;  %v11685_v63 = vadd.f32 %v25126_v45, %v11522_v10  ;;  %v28461_v53 = vld [vmem:[#allocation74_spill] sm:$0xff]  ;;  %v28462_v50 = vld [vmem:[#allocation76_spill] sm:$0xff] }
 0x613   :  { %v12509_v48 = vsel %vm10046_vm15, %v12047_v27, %v12508_v51  ;;  %v11686_v38 = vadd.f32 %v25164_v3, %v11523_v1  ;;  %19012 = vmatpush3.msra.mxu1 %v28459_v62  ;;  %v11687_v46 = vadd.f32 %v25117_v54, %v11524_v31  ;;  %v11688_v43 = vadd.f32 %v25182_v21, %v11525_v47  ;;  %v28463_v47 = vld [vmem:[#allocation85_spill] sm:$0xff]  ;;  %v28464_v51 = vld [vmem:[#allocation86_spill] sm:$0xff] }
 0x614   :  { %12626 = vst.msk [vmem:[#allocation3 + $0x38] sm:$0xff] %vm10169_vm3, %v12509_v48  ;;  %v11689_v0 = vadd.f32 %v25140_v37, %v11526_v26  ;;  %v11690_v14 = vadd.f32 %v25193_v42, %v11527_v39  ;;  %v12051_v27 = vrot.slane %v11683_v41, %v28176_v28  ;;  %v12055_v18 = vrot.slane %v11684_v57, %v28176_v28  ;;  %v28465_v39 = vld [vmem:[#allocation87_spill] sm:$0xff]  ;;  %v28466_v48 = vld [vmem:[#allocation80_spill] sm:$0xff] }
 0x615   :  { %v12059_v33 = vrot.slane %v11685_v63, %v28176_v28  ;;  %v12063_v59 = vrot.slane %v11686_v38, %v28176_v28  ;;  %19037 = vmatprep.subr.mxu1 %v17179_v55  ;;  %v12067_v9 = vrot.slane %v11687_v46, %v28176_v28  ;;  %v12071_v61 = vrot.slane %v11688_v43, %v28176_v28 }
 0x616   :  { %v12075_v35 = vrot.slane %v11689_v0, %v28176_v28  ;;  %v12079_v8 = vrot.slane %v11690_v14, %v28176_v28  ;;  %v12510_v23 = vsel %vm10034_vm8, %v12055_v18, %v12051_v27  ;;  %v11366_v29 = vmul.f32 %v25150_v56, %v28460_v22 }
 0x617   :  { %v11367_v10 = vmul.f32 %v25147_v5, %v28461_v53  ;;  %v11368_v1 = vmul.f32 %v25171_v19, %v28462_v50  ;;  %v12511_v31 = vsel %vm10036_vm10, %v12059_v33, %v12510_v23  ;;  %v11369_v20 = vmul.f32 %v25143_v24, %v28463_v47 }
 0x618   :  { %v11370_v26 = vmul.f32 %v25174_v7, %v28464_v51  ;;  %v11371_v41 = vmul.f32 %v25168_v2, %v28465_v39  ;;  %v12512_v55 = vsel %vm10038_vm11, %v12063_v59, %v12511_v31  ;;  %v11372_v57 = vmul.f32 %v25211_v40, %v28466_v48 }
 0x619   :  { %v11528_v63 = vmul.f32 %v25108_v60, %v25237_v13  ;;  %v11529_v38 = vmul.f32 %v25136_v44, %v11366_v29  ;;  %v12513_v62 = vsel %vm10040_vm12, %v12067_v9, %v12512_v55  ;;  %v11530_v46 = vmul.f32 %v25122_v30, %v11367_v10  ;;  %v28467_v55 = vld [vmem:[#allocation64_spill] sm:$0xff] }
 0x61a   :  { %v11531_v43 = vmul.f32 %v25155_v15, %v11368_v1  ;;  %v11532_v0 = vmul.f32 %v25114_v34, %v11369_v20  ;;  %v12514_v27 = vsel %vm10042_vm13, %v12071_v61, %v12513_v62  ;;  %v11533_v18 = vmul.f32 %v25158_v16, %v11370_v26  ;;  %v28469_v62 = vld [vmem:[#allocation81_spill] sm:$0xff] }
 0x61b   :  { %v12660_v14 = vld [vmem:[#allocation3 + $0x38] sm:$0xff]  ;;  %v11534_v33 = vmul.f32 %v25133_v4, %v11371_v41  ;;  %v11535_v59 = vmul.f32 %v25185_v32, %v11372_v57  ;;  %v12515_v13 = vsel %vm10044_vm14, %v12075_v35, %v12514_v27  ;;  %v11691_v9 = vadd.f32 %v25111_v6, %v11528_v63  ;;  %v28471_v27 = vld [vmem:[#allocation93_spill] sm:$0xff] }
 0x61c   :  { %18990 = vmatprep.mubr.msk.f32.mxu1 %vm10169_vm3, %v12660_v14  ;;  %v11692_v23 = vadd.f32 %v25161_v11, %v11529_v38  ;;  %v11693_v22 = vadd.f32 %v25126_v45, %v11530_v46  ;;  %v12516_v29 = vsel %vm10046_vm15, %v12079_v8, %v12515_v13  ;;  %v11694_v61 = vadd.f32 %v25164_v3, %v11531_v43  ;;  %v28468_v63 = vld [vmem:[#allocation82_spill] sm:$0xff]  ;;  %v28470_v43 = vld [vmem:[#allocation83_spill] sm:$0xff] }
 0x61d   :  { %v11695_v53 = vadd.f32 %v25117_v54, %v11532_v0  ;;  %v11696_v10 = vadd.f32 %v25182_v21, %v11533_v18  ;;  %12627 = vst.msk [vmem:[#allocation3 + $0x50] sm:$0xff] %vm10169_vm3, %v12516_v29  ;;  %v11697_v50 = vadd.f32 %v25140_v37, %v11534_v33  ;;  %v11698_v35 = vadd.f32 %v25193_v42, %v11535_v59  ;;  %v28472_v33 = vld [vmem:[#allocation94_spill] sm:$0xff]  ;;  %v28473_v13 = vld [vmem:[#allocation95_spill] sm:$0xff] }
 0x61e   :  { %v12083_v1 = vrot.slane %v11691_v9, %v28176_v28  ;;  %v12087_v31 = vrot.slane %v11692_v23, %v28176_v28  ;;  %v12091_v47 = vrot.slane %v11693_v22, %v28176_v28  ;;  %v12095_v8 = vrot.slane %v11694_v61, %v28176_v28  ;;  %v28474_v22 = vld [vmem:[#allocation88_spill] sm:$0xff] }
 0x61f   :  { %v12099_v20 = vrot.slane %v11695_v53, %v28176_v28  ;;  %v12103_v51 = vrot.slane %v11696_v10, %v28176_v28  ;;  %v12107_v26 = vrot.slane %v11697_v50, %v28176_v28  ;;  %v12111_v39 = vrot.slane %v11698_v35, %v28176_v28 }
 0x620   :  { %v12517_v41 = vsel %vm10034_vm8, %v12087_v31, %v12083_v1  ;;  %v11373_v48 = vmul.f32 %v25129_v49, %v28467_v55  ;;  %v11374_v38 = vmul.f32 %v25150_v56, %v28468_v63  ;;  %v11375_v46 = vmul.f32 %v25147_v5, %v28469_v62 }
 0x621   :  { %v12518_v57 = vsel %vm10036_vm10, %v12091_v47, %v12517_v41  ;;  %v11376_v0 = vmul.f32 %v25171_v19, %v28470_v43  ;;  %v11377_v18 = vmul.f32 %v25143_v24, %v28471_v27  ;;  %v11378_v59 = vmul.f32 %v25174_v7, %v28472_v33 }
 0x622   :  { %v12519_v14 = vsel %vm10038_vm11, %v12095_v8, %v12518_v57  ;;  %v11379_v9 = vmul.f32 %v25168_v2, %v28473_v13  ;;  %v11380_v29 = vmul.f32 %v25211_v40, %v28474_v22  ;;  %v11536_v61 = vmul.f32 %v25108_v60, %v11373_v48  ;;  %v28476_v22 = vld [vmem:[#allocation90_spill] sm:$0xff] }
 0x623   :  { %v12520_v23 = vsel %vm10040_vm12, %v12099_v20, %v12519_v14  ;;  %v11537_v53 = vmul.f32 %v25136_v44, %v11374_v38  ;;  %v11538_v50 = vmul.f32 %v25122_v30, %v11375_v46  ;;  %v11539_v35 = vmul.f32 %v25155_v15, %v11376_v0 }
 0x624   :  { %v12521_v10 = vsel %vm10042_vm13, %v12103_v51, %v12520_v23  ;;  %v11540_v1 = vmul.f32 %v25114_v34, %v11377_v18  ;;  %v12661_v31 = vld [vmem:[#allocation3 + $0x50] sm:$0xff]  ;;  %v11541_v8 = vmul.f32 %v25158_v16, %v11378_v59  ;;  %v11542_v20 = vmul.f32 %v25133_v4, %v11379_v9 }
 0x625   :  { %v12522_v47 = vsel %vm10044_vm14, %v12107_v26, %v12521_v10  ;;  %v11543_v41 = vmul.f32 %v25185_v32, %v11380_v29  ;;  %18991 = vmatmul.mubr.msk.f32.gmra.mrb[66].mxu1 %vm10169_vm3, %v12661_v31  ;;  %v11699_v51 = vadd.f32 %v25111_v6, %v11536_v61  ;;  %v11700_v48 = vadd.f32 %v25161_v11, %v11537_v53  ;;  %v28475_v9 = vld [vmem:[#allocation89_spill] sm:$0xff]  ;;  %v28477_v53 = vld [vmem:[#allocation91_spill] sm:$0xff] }
 0x626   :  { %v12523_v55 = vsel %vm10046_vm15, %v12111_v39, %v12522_v47  ;;  %v11701_v57 = vadd.f32 %v25126_v45, %v11538_v50  ;;  %v11702_v26 = vadd.f32 %v25164_v3, %v11539_v35  ;;  %v11703_v63 = vadd.f32 %v25117_v54, %v11540_v1  ;;  %v28478_v50 = vld [vmem:[#allocation59_spill] sm:$0xff]  ;;  %v28479_v1 = vld [vmem:[#allocation9_spill] sm:$0xff] }
 0x627   :  { %12628 = vst.msk [vmem:[#allocation3 + $0x68] sm:$0xff] %vm10169_vm3, %v12523_v55  ;;  %v11704_v38 = vadd.f32 %v25182_v21, %v11541_v8  ;;  %v11705_v62 = vadd.f32 %v25140_v37, %v11542_v20  ;;  %v11706_v46 = vadd.f32 %v25193_v42, %v11543_v41  ;;  %v12115_v39 = vrot.slane %v11699_v51, %v28176_v28  ;;  %v28480_v8 = vld [vmem:[#allocation10_spill] sm:$0xff]  ;;  %v28481_v41 = vld [vmem:[#allocation97_spill] sm:$0xff]  ;;  %v28482_v51 = vld [vmem:[#allocation7_spill] sm:$0xff] }
 0x628   :  { %v12119_v43 = vrot.slane %v11700_v48, %v28176_v28  ;;  %v12123_v0 = vrot.slane %v11701_v57, %v28176_v28  ;;  %v12127_v14 = vrot.slane %v11702_v26, %v28176_v28  ;;  %v12131_v27 = vrot.slane %v11703_v63, %v28176_v28 }
 0x629   :  { %v12135_v18 = vrot.slane %v11704_v38, %v28176_v28  ;;  %v12139_v33 = vrot.slane %v11705_v62, %v28176_v28  ;;  %v12143_v59 = vrot.slane %v11706_v46, %v28176_v28  ;;  %v11381_v23 = vmul.f32 %v25129_v49, %v28475_v9 }
 0x62a   :  { %v12524_v13 = vsel %vm10034_vm8, %v12119_v43, %v12115_v39  ;;  %v11382_v29 = vmul.f32 %v25150_v56, %v28476_v22  ;;  %v11383_v10 = vmul.f32 %v25147_v5, %v28477_v53  ;;  %v11384_v35 = vmul.f32 %v25171_v19, %v28478_v50 }
 0x62b   :  { %v12525_v61 = vsel %vm10036_vm10, %v12123_v0, %v12524_v13  ;;  %v11385_v31 = vmul.f32 %v25143_v24, %v28479_v1  ;;  %v11386_v20 = vmul.f32 %v25174_v7, %v28480_v8  ;;  %v11387_v55 = vmul.f32 %v25168_v2, %v28481_v41 }
 0x62c   :  { %v12526_v47 = vsel %vm10038_vm11, %v12127_v14, %v12525_v61  ;;  %v11388_v48 = vmul.f32 %v25211_v40, %v28482_v51  ;;  %v11544_v26 = vmul.f32 %v25108_v60, %v11381_v23  ;;  %v11545_v63 = vmul.f32 %v25136_v44, %v11382_v29 }
 0x62d   :  { %v12527_v57 = vsel %vm10040_vm12, %v12131_v27, %v12526_v47  ;;  %v11546_v38 = vmul.f32 %v25122_v30, %v11383_v10  ;;  %v11547_v39 = vmul.f32 %v25155_v15, %v11384_v35  ;;  %v11548_v43 = vmul.f32 %v25114_v34, %v11385_v31 }
 0x62e   :  { %v12662_v62 = vld [vmem:[#allocation3 + $0x68] sm:$0xff]  ;;  %v12528_v46 = vsel %vm10042_vm13, %v12135_v18, %v12527_v57  ;;  %v11549_v0 = vmul.f32 %v25158_v16, %v11386_v20  ;;  %v11550_v27 = vmul.f32 %v25133_v4, %v11387_v55  ;;  %v11551_v13 = vmul.f32 %v25185_v32, %v11388_v48 }
 0x62f   :  { %18993 = vmatprep.mubr.msk.f32.mxu1 %vm10169_vm3, %v12662_v62  ;;  %v12529_v14 = vsel %vm10044_vm14, %v12139_v33, %v12528_v46  ;;  %v11707_v9 = vadd.f32 %v25111_v6, %v11544_v26  ;;  %v11708_v18 = vadd.f32 %v25161_v11, %v11545_v63  ;;  %v11709_v22 = vadd.f32 %v25126_v45, %v11546_v38  ;;  %v28483_v55 = vld [vmem:[#allocation8_spill] sm:$0xff]  ;;  %v28486_v62 = vld [vmem:[#allocation98_spill] sm:$0xff] }
 0x630   :  { %v12530_v23 = vsel %vm10046_vm15, %v12143_v59, %v12529_v14  ;;  %v11710_v29 = vadd.f32 %v25164_v3, %v11547_v39  ;;  %v11711_v61 = vadd.f32 %v25117_v54, %v11548_v43  ;;  %v11712_v33 = vadd.f32 %v25182_v21, %v11549_v0  ;;  %v28484_v48 = vld [vmem:[#allocation60_spill] sm:$0xff]  ;;  %v28488_v0 = vld [vmem:[#allocation101_spill] sm:$0xff] }
 0x631   :  { %12629 = vst.msk [vmem:[#allocation3 + $0x80] sm:$0xff] %vm10169_vm3, %v12530_v23  ;;  %v11713_v53 = vadd.f32 %v25140_v37, %v11550_v27  ;;  %v11714_v10 = vadd.f32 %v25193_v42, %v11551_v13  ;;  %v12147_v50 = vrot.slane %v11707_v9, %v28176_v28  ;;  %v12151_v59 = vrot.slane %v11708_v18, %v28176_v28  ;;  %v28485_v26 = vld [vmem:[#allocation96_spill] sm:$0xff]  ;;  %v28489_v13 = vld [vmem:[#allocation14_spill] sm:$0xff]  ;;  %v28490_v23 = vld [vmem:[#allocation11_spill] sm:$0xff] }
 0x632   :  { %v12155_v35 = vrot.slane %v11709_v22, %v28176_v28  ;;  %v12159_v1 = vrot.slane %v11710_v29, %v28176_v28  ;;  %v12163_v31 = vrot.slane %v11711_v61, %v28176_v28  ;;  %v12167_v47 = vrot.slane %v11712_v33, %v28176_v28  ;;  %v28487_v39 = vld [vmem:[#allocation100_spill] sm:$0xff] }
 0x633   :  { %v12171_v8 = vrot.slane %v11713_v53, %v28176_v28  ;;  %v12175_v20 = vrot.slane %v11714_v10, %v28176_v28  ;;  %v12531_v41 = vsel %vm10034_vm8, %v12151_v59, %v12147_v50  ;;  %v11389_v51 = vmul.f32 %v25129_v49, %v28483_v55 }
 0x634   :  { %v11390_v57 = vmul.f32 %v25150_v56, %v28484_v48  ;;  %v11391_v63 = vmul.f32 %v25147_v5, %v28485_v26  ;;  %v12532_v38 = vsel %vm10036_vm10, %v12155_v35, %v12531_v41  ;;  %v11392_v46 = vmul.f32 %v25171_v19, %v28486_v62 }
 0x635   :  { %v11393_v43 = vmul.f32 %v25143_v24, %v28487_v39  ;;  %v11394_v14 = vmul.f32 %v25174_v7, %v28488_v0  ;;  %v12533_v27 = vsel %vm10038_vm11, %v12159_v1, %v12532_v38  ;;  %v11395_v9 = vmul.f32 %v25168_v2, %v28489_v13  ;;  %v28491_v13 = vld [vmem:[#allocation16_spill] sm:$0xff] }
 0x636   :  { %v11396_v18 = vmul.f32 %v25211_v40, %v28490_v23  ;;  %v11552_v22 = vmul.f32 %v25108_v60, %v11389_v51  ;;  %v12534_v29 = vsel %vm10040_vm12, %v12163_v31, %v12533_v27  ;;  %v11553_v61 = vmul.f32 %v25136_v44, %v11390_v57 }
 0x637   :  { %v11554_v33 = vmul.f32 %v25122_v30, %v11391_v63  ;;  %v11555_v53 = vmul.f32 %v25155_v15, %v11392_v46  ;;  %v12535_v50 = vsel %vm10042_vm13, %v12167_v47, %v12534_v29  ;;  %v11556_v59 = vmul.f32 %v25114_v34, %v11393_v43  ;;  %v28493_v29 = vld [vmem:[#allocation102_spill] sm:$0xff] }
 0x638   :  { %v12663_v10 = vld [vmem:[#allocation3 + $0x80] sm:$0xff]  ;;  %v11557_v35 = vmul.f32 %v25158_v16, %v11394_v14  ;;  %v11558_v1 = vmul.f32 %v25133_v4, %v11395_v9  ;;  %v12536_v41 = vsel %vm10044_vm14, %v12171_v8, %v12535_v50  ;;  %v11559_v31 = vmul.f32 %v25185_v32, %v11396_v18  ;;  %v28492_v18 = vld [vmem:[#allocation69_spill] sm:$0xff] }
 0x639   :  { %18994 = vmatmul.mubr.msk.f32.gmra.mrb[68].mxu1 %vm10169_vm3, %v12663_v10  ;;  %v11715_v55 = vadd.f32 %v25111_v6, %v11552_v22  ;;  %v11716_v51 = vadd.f32 %v25161_v11, %v11553_v61  ;;  %v12537_v48 = vsel %vm10046_vm15, %v12175_v20, %v12536_v41  ;;  %v11717_v47 = vadd.f32 %v25126_v45, %v11554_v33  ;;  %v28494_v33 = vld [vmem:[#allocation20_spill] sm:$0xff]  ;;  %v28495_v50 = vld [vmem:[#allocation105_spill] sm:$0xff]  ;;  %v28497_v41 = vld [vmem:[#allocation22_spill] sm:$0xff] }
 0x63a   :  { %v11718_v57 = vadd.f32 %v25164_v3, %v11555_v53  ;;  %v11719_v26 = vadd.f32 %v25117_v54, %v11556_v59  ;;  %12630 = vst.msk [vmem:[#allocation3 + $0x98] sm:$0xff] %vm10169_vm3, %v12537_v48  ;;  %v11720_v63 = vadd.f32 %v25182_v21, %v11557_v35  ;;  %v11721_v8 = vadd.f32 %v25140_v37, %v11558_v1  ;;  %v28496_v35 = vld [vmem:[#allocation106_spill] sm:$0xff] }
 0x63b   :  { %v11722_v38 = vadd.f32 %v25193_v42, %v11559_v31  ;;  %v12179_v62 = vrot.slane %v11715_v55, %v28176_v28  ;;  %v12183_v46 = vrot.slane %v11716_v51, %v28176_v28  ;;  %v12187_v20 = vrot.slane %v11717_v47, %v28176_v28  ;;  %v28498_v51 = vld [vmem:[#allocation18_spill] sm:$0xff] }
 0x63c   :  { %v12191_v39 = vrot.slane %v11718_v57, %v28176_v28  ;;  %v12195_v43 = vrot.slane %v11719_v26, %v28176_v28  ;;  %v12199_v0 = vrot.slane %v11720_v63, %v28176_v28  ;;  %v12203_v14 = vrot.slane %v11721_v8, %v28176_v28 }
 0x63d   :  { %v12207_v27 = vrot.slane %v11722_v38, %v28176_v28  ;;  %v11405_v9 = vmul.f32 %v25129_v49, %v28491_v13  ;;  %v12538_v23 = vsel %vm10034_vm8, %v12183_v46, %v12179_v62  ;;  %v11406_v22 = vmul.f32 %v25150_v56, %v28492_v18 }
 0x63e   :  { %v11407_v61 = vmul.f32 %v25147_v5, %v28493_v29  ;;  %v11408_v53 = vmul.f32 %v25171_v19, %v28494_v33  ;;  %v12539_v10 = vsel %vm10036_vm10, %v12187_v20, %v12538_v23  ;;  %v11409_v59 = vmul.f32 %v25143_v24, %v28495_v50 }
 0x63f   :  { %v11410_v1 = vmul.f32 %v25174_v7, %v28496_v35  ;;  %v11411_v31 = vmul.f32 %v25168_v2, %v28497_v41  ;;  %v12540_v55 = vsel %vm10038_vm11, %v12191_v39, %v12539_v10  ;;  %v11412_v48 = vmul.f32 %v25211_v40, %v28498_v51 }
 0x640   :  { %v11568_v47 = vmul.f32 %v25108_v60, %v11405_v9  ;;  %v11569_v57 = vmul.f32 %v25136_v44, %v11406_v22  ;;  %v12541_v26 = vsel %vm10040_vm12, %v12195_v43, %v12540_v55  ;;  %v11570_v63 = vmul.f32 %v25122_v30, %v11407_v61  ;;  %v28499_v55 = vld [vmem:[#allocation71_spill] sm:$0xff] }
 0x641   :  { %v11571_v8 = vmul.f32 %v25155_v15, %v11408_v53  ;;  %v11572_v38 = vmul.f32 %v25114_v34, %v11409_v59  ;;  %v12664_v62 = vld [vmem:[#allocation3 + $0x98] sm:$0xff]  ;;  %v12542_v46 = vsel %vm10042_vm13, %v12199_v0, %v12541_v26  ;;  %v11573_v20 = vmul.f32 %v25158_v16, %v11410_v1  ;;  %v28501_v26 = vld [vmem:[#allocation21_spill] sm:$0xff] }
 0x642   :  { %v11574_v39 = vmul.f32 %v25133_v4, %v11411_v31  ;;  %v11575_v13 = vmul.f32 %v25185_v32, %v11412_v48  ;;  %18996 = vmatprep.mubr.msk.f32.mxu1 %vm10169_vm3, %v12664_v62  ;;  %v12543_v9 = vsel %vm10044_vm14, %v12203_v14, %v12542_v46  ;;  %v11731_v43 = vadd.f32 %v25111_v6, %v11568_v47  ;;  %v28500_v47 = vld [vmem:[#allocation19_spill] sm:$0xff] }
 0x643   :  { %v11732_v23 = vadd.f32 %v25161_v11, %v11569_v57  ;;  %v11733_v18 = vadd.f32 %v25126_v45, %v11570_v63  ;;  %v12544_v22 = vsel %vm10046_vm15, %v12207_v27, %v12543_v9  ;;  %v11734_v0 = vadd.f32 %v25164_v3, %v11571_v8  ;;  %v28502_v8 = vld [vmem:[#allocation108_spill] sm:$0xff]  ;;  %v28503_v46 = vld [vmem:[#allocation23_spill] sm:$0xff]  ;;  %v28505_v9 = vld [vmem:[#allocation25_spill] sm:$0xff] }
 0x644   :  { %v11735_v29 = vadd.f32 %v25117_v54, %v11572_v38  ;;  %v11736_v61 = vadd.f32 %v25182_v21, %v11573_v20  ;;  %12631 = vst.msk [vmem:[#allocation3 + $0xb0] sm:$0xff] %vm10169_vm3, %v12544_v22  ;;  %v11737_v33 = vadd.f32 %v25140_v37, %v11574_v39  ;;  %v11738_v14 = vadd.f32 %v25193_v42, %v11575_v13  ;;  %v28504_v39 = vld [vmem:[#allocation24_spill] sm:$0xff] }
 0x645   :  { %v12243_v53 = vrot.slane %v11731_v43, %v28176_v28  ;;  %v12247_v10 = vrot.slane %v11732_v23, %v28176_v28  ;;  %v12251_v50 = vrot.slane %v11733_v18, %v28176_v28  ;;  %v12255_v27 = vrot.slane %v11734_v0, %v28176_v28  ;;  %v28506_v18 = vld [vmem:[#allocation107_spill] sm:$0xff] }
 0x646   :  { %v12259_v59 = vrot.slane %v11735_v29, %v28176_v28  ;;  %v12263_v35 = vrot.slane %v11736_v61, %v28176_v28  ;;  %v12267_v1 = vrot.slane %v11737_v33, %v28176_v28  ;;  %v12271_v41 = vrot.slane %v11738_v14, %v28176_v28  ;;  %v12666_v61 = vld [vmem:[#allocation3 + $0xf8] sm:$0xff] }
 0x647   :  { %v12552_v31 = vsel %vm10034_vm8, %v12247_v10, %v12243_v53  ;;  %v11413_v51 = vmul.f32 %v25129_v49, %v28499_v55  ;;  %v11414_v57 = vmul.f32 %v25150_v56, %v28500_v47  ;;  %v11415_v63 = vmul.f32 %v25147_v5, %v28501_v26 }
 0x648   :  { %v12553_v48 = vsel %vm10036_vm10, %v12251_v50, %v12552_v31  ;;  %v11416_v38 = vmul.f32 %v25171_v19, %v28502_v8  ;;  %v11417_v20 = vmul.f32 %v25143_v24, %v28503_v46  ;;  %v11418_v13 = vmul.f32 %v25174_v7, %v28504_v39 }
 0x649   :  { %v12554_v62 = vsel %vm10038_vm11, %v12255_v27, %v12553_v48  ;;  %v11419_v43 = vmul.f32 %v25168_v2, %v28505_v9  ;;  %v11420_v22 = vmul.f32 %v25211_v40, %v28506_v18  ;;  %v11576_v0 = vmul.f32 %v25108_v60, %v11413_v51 }
 0x64a   :  { %v12555_v23 = vsel %vm10040_vm12, %v12259_v59, %v12554_v62  ;;  %v11577_v29 = vmul.f32 %v25136_v44, %v11414_v57  ;;  %v11578_v14 = vmul.f32 %v25122_v30, %v11415_v63  ;;  %v11579_v53 = vmul.f32 %v25155_v15, %v11416_v38 }
 0x64b   :  { %v12556_v33 = vsel %vm10042_vm13, %v12263_v35, %v12555_v23  ;;  %v11580_v10 = vmul.f32 %v25114_v34, %v11417_v20  ;;  %v25649_v50 = vld [vmem:[#allocation3 + $0xb0] sm:$0xff]  ;;  %v11581_v59 = vmul.f32 %v25158_v16, %v11418_v13  ;;  %v11582_v31 = vmul.f32 %v25133_v4, %v11419_v43 }
 0x64c   :  { %v12557_v27 = vsel %vm10044_vm14, %v12267_v1, %v12556_v33  ;;  %v11583_v55 = vmul.f32 %v25185_v32, %v11420_v22  ;;  %18997 = vmatmul.mubr.msk.f32.gmra.mrb[70].mxu1 %vm10169_vm3, %v25649_v50  ;;  %v11739_v51 = vadd.f32 %v25111_v6, %v11576_v0  ;;  %v11740_v48 = vadd.f32 %v25161_v11, %v11577_v29  ;;  %v28507_v23 = vld [vmem:[#allocation109_spill] sm:$0xff]  ;;  %v28508_v22 = vld [vmem:[#allocation110_spill] sm:$0xff] }
 0x64d   :  { %v12558_v35 = vsel %vm10046_vm15, %v12271_v41, %v12557_v27  ;;  %v11741_v47 = vadd.f32 %v25126_v45, %v11578_v14  ;;  %18999 = vmatprep.mubr.msk.f32.mxu1 %vm10169_vm3, %v12666_v61  ;;  %v11742_v1 = vadd.f32 %v25164_v3, %v11579_v53  ;;  %v11743_v57 = vadd.f32 %v25117_v54, %v11580_v10  ;;  %v28509_v61 = vld [vmem:[#allocation111_spill] sm:$0xff]  ;;  %v28510_v14 = vld [vmem:[#allocation112_spill] sm:$0xff]  ;;  %v28511_v10 = vld [vmem:[#allocation26_spill] sm:$0xff] }
 0x64e   :  { %12633 = vst.msk [vmem:[#allocation3 + $0x110] sm:$0xff] %vm10169_vm3, %v12558_v35  ;;  %v11744_v26 = vadd.f32 %v25182_v21, %v11581_v59  ;;  %v11745_v63 = vadd.f32 %v25140_v37, %v11582_v31  ;;  %v11746_v41 = vadd.f32 %v25193_v42, %v11583_v55  ;;  %v12275_v8 = vrot.slane %v11739_v51, %v28176_v28  ;;  %v28512_v31 = vld [vmem:[#allocation27_spill] sm:$0xff]  ;;  %v28513_v35 = vld [vmem:[#allocation28_spill] sm:$0xff] }
 0x64f   :  { %v12279_v38 = vrot.slane %v11740_v48, %v28176_v28  ;;  %v12283_v62 = vrot.slane %v11741_v47, %v28176_v28  ;;  %v12287_v46 = vrot.slane %v11742_v1, %v28176_v28  ;;  %v12291_v20 = vrot.slane %v11743_v57, %v28176_v28  ;;  %v28514_v48 = vld [vmem:[#allocation29_spill] sm:$0xff] }
 0x650   :  { %v12295_v39 = vrot.slane %v11744_v26, %v28176_v28  ;;  %v12299_v13 = vrot.slane %v11745_v63, %v28176_v28  ;;  %v12303_v9 = vrot.slane %v11746_v41, %v28176_v28  ;;  %v11421_v18 = vmul.f32 %v25129_v49, %v28507_v23 }
 0x651   :  { %v12559_v43 = vsel %vm10034_vm8, %v12279_v38, %v12275_v8  ;;  %v11422_v0 = vmul.f32 %v25150_v56, %v28508_v22  ;;  %v11423_v33 = vmul.f32 %v25147_v5, %v28509_v61  ;;  %v11424_v53 = vmul.f32 %v25171_v19, %v28510_v14 }
 0x652   :  { %v12560_v29 = vsel %vm10036_vm10, %v12283_v62, %v12559_v43  ;;  %v11425_v27 = vmul.f32 %v25143_v24, %v28511_v10  ;;  %v11426_v55 = vmul.f32 %v25174_v7, %v28512_v31  ;;  %v11427_v51 = vmul.f32 %v25168_v2, %v28513_v35 }
 0x653   :  { %v12561_v59 = vsel %vm10038_vm11, %v12287_v46, %v12560_v29  ;;  %v11428_v47 = vmul.f32 %v25211_v40, %v28514_v48  ;;  %v11584_v57 = vmul.f32 %v25108_v60, %v11421_v18  ;;  %v11585_v26 = vmul.f32 %v25136_v44, %v11422_v0  ;;  %v28515_v48 = vld [vmem:[#allocation113_spill] sm:$0xff] }
 0x654   :  { %v12562_v1 = vsel %vm10040_vm12, %v12291_v20, %v12561_v59  ;;  %v11586_v63 = vmul.f32 %v25122_v30, %v11423_v33  ;;  %v11587_v38 = vmul.f32 %v25155_v15, %v11424_v53  ;;  %v11588_v62 = vmul.f32 %v25114_v34, %v11425_v27 }
 0x655   :  { %v25699_v41 = vld [vmem:[#allocation3 + $0x110] sm:$0xff]  ;;  %v12563_v8 = vsel %vm10042_vm13, %v12295_v39, %v12562_v1  ;;  %v11589_v46 = vmul.f32 %v25158_v16, %v11426_v55  ;;  %v11590_v43 = vmul.f32 %v25133_v4, %v11427_v51  ;;  %v11591_v23 = vmul.f32 %v25185_v32, %v11428_v47  ;;  %v28516_v1 = vld [vmem:[#allocation114_spill] sm:$0xff] }
 0x656   :  { %19000 = vmatmul.mubr.msk.f32.gmra.mrb[72].mxu1 %vm10169_vm3, %v25699_v41  ;;  %v12564_v20 = vsel %vm10044_vm14, %v12299_v13, %v12563_v8  ;;  %v11747_v18 = vadd.f32 %v25111_v6, %v11584_v57  ;;  %v11748_v39 = vadd.f32 %v25161_v11, %v11585_v26  ;;  %v11749_v0 = vadd.f32 %v25126_v45, %v11586_v63  ;;  %v28517_v26 = vld [vmem:[#allocation115_spill] sm:$0xff] }
 0x657   :  { %v12565_v22 = vsel %vm10046_vm15, %v12303_v9, %v12564_v20  ;;  %v11750_v29 = vadd.f32 %v25164_v3, %v11587_v38  ;;  %v11751_v61 = vadd.f32 %v25117_v54, %v11588_v62  ;;  %v11752_v13 = vadd.f32 %v25182_v21, %v11589_v46  ;;  %v28518_v38 = vld [vmem:[#allocation116_spill] sm:$0xff]  ;;  %v28519_v46 = vld [vmem:[#allocation117_spill] sm:$0xff] }
 0x658   :  { %12634 = vst.msk [vmem:[#allocation3 + $0x128] sm:$0xff] %vm10169_vm3, %v12565_v22  ;;  %v11753_v33 = vadd.f32 %v25140_v37, %v11590_v43  ;;  %v11754_v14 = vadd.f32 %v25193_v42, %v11591_v23  ;;  %v12307_v53 = vrot.slane %v11747_v18, %v28176_v28  ;;  %v12311_v9 = vrot.slane %v11748_v39, %v28176_v28  ;;  %v28520_v43 = vld [vmem:[#allocation118_spill] sm:$0xff] }
 0x659   :  { %v12315_v10 = vrot.slane %v11749_v0, %v28176_v28  ;;  %v12319_v27 = vrot.slane %v11750_v29, %v28176_v28  ;;  %v12323_v59 = vrot.slane %v11751_v61, %v28176_v28  ;;  %v12327_v31 = vrot.slane %v11752_v13, %v28176_v28  ;;  %v28521_v22 = vld [vmem:[#allocation30_spill] sm:$0xff]  ;;  %v28522_v0 = vld [vmem:[#allocation31_spill] sm:$0xff] }
 0x65a   :  { %v12331_v55 = vrot.slane %v11753_v33, %v28176_v28  ;;  %v12335_v35 = vrot.slane %v11754_v14, %v28176_v28  ;;  %v12566_v51 = vsel %vm10034_vm8, %v12311_v9, %v12307_v53  ;;  %v11429_v47 = vmul.f32 %v25129_v49, %v28515_v48 }
 0x65b   :  { %v11430_v57 = vmul.f32 %v25150_v56, %v28516_v1  ;;  %v11431_v63 = vmul.f32 %v25147_v5, %v28517_v26  ;;  %v12567_v8 = vsel %vm10036_vm10, %v12315_v10, %v12566_v51  ;;  %v11432_v62 = vmul.f32 %v25171_v19, %v28518_v38 }
 0x65c   :  { %v11433_v20 = vmul.f32 %v25143_v24, %v28519_v46  ;;  %v11434_v23 = vmul.f32 %v25174_v7, %v28520_v43  ;;  %v12568_v18 = vsel %vm10038_vm11, %v12319_v27, %v12567_v8  ;;  %v11435_v39 = vmul.f32 %v25168_v2, %v28521_v22 }
 0x65d   :  { %v11436_v29 = vmul.f32 %v25211_v40, %v28522_v0  ;;  %v11592_v61 = vmul.f32 %v25108_v60, %v11429_v47  ;;  %v12569_v13 = vsel %vm10040_vm12, %v12323_v59, %v12568_v18  ;;  %v11593_v33 = vmul.f32 %v25136_v44, %v11430_v57  ;;  %v28523_v0 = vld [vmem:[#allocation119_spill] sm:$0xff] }
 0x65e   :  { %v11594_v14 = vmul.f32 %v25122_v30, %v11431_v63  ;;  %v11595_v53 = vmul.f32 %v25155_v15, %v11432_v62  ;;  %v12570_v10 = vsel %vm10042_vm13, %v12327_v31, %v12569_v13  ;;  %v11596_v27 = vmul.f32 %v25114_v34, %v11433_v20  ;;  %v28524_v13 = vld [vmem:[#allocation120_spill] sm:$0xff] }
 0x65f   :  { %v25752_v9 = vld [vmem:[#allocation3 + $0x128] sm:$0xff]  ;;  %v11597_v51 = vmul.f32 %v25158_v16, %v11434_v23  ;;  %v11598_v48 = vmul.f32 %v25133_v4, %v11435_v39  ;;  %v12571_v59 = vsel %vm10044_vm14, %v12331_v55, %v12570_v10  ;;  %v11599_v47 = vmul.f32 %v25185_v32, %v11436_v29 }
 0x660   :  { %19002 = vmatprep.mubr.msk.f32.mxu1 %vm10169_vm3, %v25752_v9  ;;  %v11755_v1 = vadd.f32 %v25111_v6, %v11592_v61  ;;  %v11756_v57 = vadd.f32 %v25161_v11, %v11593_v33  ;;  %v12572_v26 = vsel %vm10046_vm15, %v12335_v35, %v12571_v59  ;;  %v11757_v31 = vadd.f32 %v25126_v45, %v11594_v14  ;;  %v28525_v14 = vld [vmem:[#allocation121_spill] sm:$0xff]  ;;  %v28526_v10 = vld [vmem:[#allocation36_spill] sm:$0xff] }
 0x661   :  { %v11758_v63 = vadd.f32 %v25164_v3, %v11595_v53  ;;  %v11759_v8 = vadd.f32 %v25117_v54, %v11596_v27  ;;  %12635 = vst.msk [vmem:[#allocation3 + $0x140] sm:$0xff] %vm10169_vm3, %v12572_v26  ;;  %v11760_v38 = vadd.f32 %v25182_v21, %v11597_v51  ;;  %v11761_v55 = vadd.f32 %v25140_v37, %v11598_v48  ;;  %v28527_v48 = vld [vmem:[#allocation32_spill] sm:$0xff] }
 0x662   :  { %v11762_v62 = vadd.f32 %v25193_v42, %v11599_v47  ;;  %v12339_v46 = vrot.slane %v11755_v1, %v28176_v28  ;;  %v12343_v20 = vrot.slane %v11756_v57, %v28176_v28  ;;  %v12347_v35 = vrot.slane %v11757_v31, %v28176_v28  ;;  %v28528_v47 = vld [vmem:[#allocation34_spill] sm:$0xff]  ;;  %v28529_v57 = vld [vmem:[#allocation33_spill] sm:$0xff] }
 0x663   :  { %v12351_v43 = vrot.slane %v11758_v63, %v28176_v28  ;;  %v12355_v23 = vrot.slane %v11759_v8, %v28176_v28  ;;  %v12359_v18 = vrot.slane %v11760_v38, %v28176_v28  ;;  %v12363_v22 = vrot.slane %v11761_v55, %v28176_v28  ;;  %v28530_v63 = vld [vmem:[#allocation35_spill] sm:$0xff] }
 0x664   :  { %v12367_v39 = vrot.slane %v11762_v62, %v28176_v28  ;;  %v11437_v29 = vmul.f32 %v25129_v49, %v28523_v0  ;;  %v12573_v61 = vsel %vm10034_vm8, %v12343_v20, %v12339_v46  ;;  %v11438_v33 = vmul.f32 %v25150_v56, %v28524_v13 }
 0x665   :  { %v11439_v53 = vmul.f32 %v25147_v5, %v28525_v14  ;;  %v11440_v27 = vmul.f32 %v25171_v19, %v28526_v10  ;;  %v12574_v51 = vsel %vm10036_vm10, %v12347_v35, %v12573_v61  ;;  %v11441_v59 = vmul.f32 %v25143_v24, %v28527_v48 }
 0x666   :  { %v11442_v1 = vmul.f32 %v25174_v7, %v28528_v47  ;;  %v11443_v26 = vmul.f32 %v25168_v2, %v28529_v57  ;;  %v12575_v31 = vsel %vm10038_vm11, %v12351_v43, %v12574_v51  ;;  %v11444_v8 = vmul.f32 %v25211_v40, %v28530_v63 }
 0x667   :  { %v11600_v38 = vmul.f32 %v25108_v60, %v11437_v29  ;;  %v11601_v55 = vmul.f32 %v25136_v44, %v11438_v33  ;;  %v12576_v62 = vsel %vm10040_vm12, %v12355_v23, %v12575_v31  ;;  %v11602_v46 = vmul.f32 %v25122_v30, %v11439_v53 }
 0x668   :  { %v11603_v20 = vmul.f32 %v25155_v15, %v11440_v27  ;;  %v11604_v35 = vmul.f32 %v25114_v34, %v11441_v59  ;;  %v25805_v0 = vld [vmem:[#allocation3 + $0x140] sm:$0xff]  ;;  %v12577_v61 = vsel %vm10042_vm13, %v12359_v18, %v12576_v62  ;;  %v11605_v43 = vmul.f32 %v25158_v16, %v11442_v1 }
 0x669   :  { %v11606_v13 = vmul.f32 %v25133_v4, %v11443_v26  ;;  %v11607_v29 = vmul.f32 %v25185_v32, %v11444_v8  ;;  %19003 = vmatmul.mubr.msk.f32.gmra.mrb[74].mxu1 %vm10169_vm3, %v25805_v0  ;;  %v12578_v23 = vsel %vm10044_vm14, %v12363_v22, %v12577_v61  ;;  %v11763_v33 = vadd.f32 %v25111_v6, %v11600_v38  ;;  %v28531_v38 = vld [vmem:[#allocation122_spill] sm:$0xff] }
 0x66a   :  { %v11764_v14 = vadd.f32 %v25161_v11, %v11601_v55  ;;  %v11765_v53 = vadd.f32 %v25126_v45, %v11602_v46  ;;  %v12579_v10 = vsel %vm10046_vm15, %v12367_v39, %v12578_v23  ;;  %v11766_v18 = vadd.f32 %v25164_v3, %v11603_v20  ;;  %v28532_v46 = vld [vmem:[#allocation123_spill] sm:$0xff]  ;;  %v28535_v23 = vld [vmem:[#allocation37_spill] sm:$0xff] }
 0x66b   :  { %v11767_v27 = vadd.f32 %v25117_v54, %v11604_v35  ;;  %v11768_v51 = vadd.f32 %v25182_v21, %v11605_v43  ;;  %12636 = vst.msk [vmem:[#allocation3 + $0x158] sm:$0xff] %vm10169_vm3, %v12579_v10  ;;  %v11769_v48 = vadd.f32 %v25140_v37, %v11606_v13  ;;  %v11770_v22 = vadd.f32 %v25193_v42, %v11607_v29  ;;  %v28533_v35 = vld [vmem:[#allocation124_spill] sm:$0xff]  ;;  %v28534_v43 = vld [vmem:[#allocation125_spill] sm:$0xff]  ;;  %v28537_v10 = vld [vmem:[#allocation39_spill] sm:$0xff] }
 0x66c   :  { %v12371_v59 = vrot.slane %v11763_v33, %v28176_v28  ;;  %v12375_v47 = vrot.slane %v11764_v14, %v28176_v28  ;;  %v12379_v1 = vrot.slane %v11765_v53, %v28176_v28  ;;  %v12383_v39 = vrot.slane %v11766_v18, %v28176_v28  ;;  %v28536_v14 = vld [vmem:[#allocation38_spill] sm:$0xff] }
 0x66d   :  { %v12387_v57 = vrot.slane %v11767_v27, %v28176_v28  ;;  %v12391_v26 = vrot.slane %v11768_v51, %v28176_v28  ;;  %v12395_v31 = vrot.slane %v11769_v48, %v28176_v28  ;;  %v12399_v63 = vrot.slane %v11770_v22, %v28176_v28  ;;  %v28538_v51 = vld [vmem:[#allocation40_spill] sm:$0xff] }
 0x66e   :  { %v12580_v8 = vsel %vm10034_vm8, %v12375_v47, %v12371_v59  ;;  %v11445_v55 = vmul.f32 %v25129_v49, %v28531_v38  ;;  %v11446_v20 = vmul.f32 %v25150_v56, %v28532_v46  ;;  %v11447_v61 = vmul.f32 %v25147_v5, %v28533_v35 }
 0x66f   :  { %v12581_v62 = vsel %vm10036_vm10, %v12379_v1, %v12580_v8  ;;  %v11448_v13 = vmul.f32 %v25171_v19, %v28534_v43  ;;  %v11449_v33 = vmul.f32 %v25143_v24, %v28535_v23  ;;  %v11450_v53 = vmul.f32 %v25174_v7, %v28536_v14 }
 0x670   :  { %v12582_v29 = vsel %vm10038_vm11, %v12383_v39, %v12581_v62  ;;  %v11451_v18 = vmul.f32 %v25168_v2, %v28537_v10  ;;  %v11452_v48 = vmul.f32 %v25211_v40, %v28538_v51  ;;  %v11608_v22 = vmul.f32 %v25108_v60, %v11445_v55 }
 0x671   :  { %v12583_v27 = vsel %vm10040_vm12, %v12387_v57, %v12582_v29  ;;  %v11609_v59 = vmul.f32 %v25136_v44, %v11446_v20  ;;  %v11610_v1 = vmul.f32 %v25122_v30, %v11447_v61  ;;  %v11611_v39 = vmul.f32 %v25155_v15, %v11448_v13 }
 0x672   :  { %v12584_v47 = vsel %vm10042_vm13, %v12391_v26, %v12583_v27  ;;  %v11612_v8 = vmul.f32 %v25114_v34, %v11449_v33  ;;  %v25858_v38 = vld [vmem:[#allocation3 + $0x158] sm:$0xff]  ;;  %v11613_v57 = vmul.f32 %v25158_v16, %v11450_v53  ;;  %v11614_v46 = vmul.f32 %v25133_v4, %v11451_v18 }
 0x673   :  { %v12585_v62 = vsel %vm10044_vm14, %v12395_v31, %v12584_v47  ;;  %v11615_v55 = vmul.f32 %v25185_v32, %v11452_v48  ;;  %19005 = vmatprep.mubr.msk.f32.mxu1 %vm10169_vm3, %v25858_v38  ;;  %v11771_v20 = vadd.f32 %v25111_v6, %v11608_v22  ;;  %v11772_v35 = vadd.f32 %v25161_v11, %v11609_v59  ;;  %v28539_v22 = vld [vmem:[#allocation126_spill] sm:$0xff]  ;;  %v28540_v47 = vld [vmem:[#allocation127_spill] sm:$0xff] }
 0x674   :  { %v12586_v26 = vsel %vm10046_vm15, %v12399_v63, %v12585_v62  ;;  %v11773_v61 = vadd.f32 %v25126_v45, %v11610_v1  ;;  %v11774_v31 = vadd.f32 %v25164_v3, %v11611_v39  ;;  %v11775_v43 = vadd.f32 %v25117_v54, %v11612_v8  ;;  %v28541_v8 = vld [vmem:[#allocation128_spill] sm:$0xff] }
 0x675   :  { %12637 = vst.msk [vmem:[#allocation3 + $0x170] sm:$0xff] %vm10169_vm3, %v12586_v26  ;;  %v11776_v13 = vadd.f32 %v25182_v21, %v11613_v57  ;;  %v11777_v29 = vadd.f32 %v25140_v37, %v11614_v46  ;;  %v11778_v23 = vadd.f32 %v25193_v42, %v11615_v55  ;;  %v12403_v63 = vrot.slane %v11771_v20, %v28176_v28  ;;  %v28542_v57 = vld [vmem:[#allocation45_spill] sm:$0xff] }
 0x676   :  { %v12407_v33 = vrot.slane %v11772_v35, %v28176_v28  ;;  %v12411_v14 = vrot.slane %v11773_v61, %v28176_v28  ;;  %v12415_v53 = vrot.slane %v11774_v31, %v28176_v28  ;;  %v12419_v10 = vrot.slane %v11775_v43, %v28176_v28  ;;  %v28543_v55 = vld [vmem:[#allocation41_spill] sm:$0xff]  ;;  %v28544_v35 = vld [vmem:[#allocation42_spill] sm:$0xff]  ;;  %v28545_v31 = vld [vmem:[#allocation43_spill] sm:$0xff] }
 0x677   :  { %v12423_v18 = vrot.slane %v11776_v13, %v28176_v28  ;;  %v12427_v27 = vrot.slane %v11777_v29, %v28176_v28  ;;  %v12431_v51 = vrot.slane %v11778_v23, %v28176_v28  ;;  %v11453_v59 = vmul.f32 %v25129_v49, %v28539_v22  ;;  %v28546_v13 = vld [vmem:[#allocation44_spill] sm:$0xff] }
 0x678   :  { %v12587_v48 = vsel %vm10034_vm8, %v12407_v33, %v12403_v63  ;;  %v11454_v1 = vmul.f32 %v25150_v56, %v28540_v47  ;;  %v11455_v62 = vmul.f32 %v25147_v5, %v28541_v8  ;;  %v11456_v46 = vmul.f32 %v25171_v19, %v28542_v57 }
 0x679   :  { %v12588_v39 = vsel %vm10036_vm10, %v12411_v14, %v12587_v48  ;;  %v11457_v26 = vmul.f32 %v25143_v24, %v28543_v55  ;;  %v11458_v61 = vmul.f32 %v25174_v7, %v28544_v35  ;;  %v11459_v43 = vmul.f32 %v25168_v2, %v28545_v31 }
 0x67a   :  { %v12589_v20 = vsel %vm10038_vm11, %v12415_v53, %v12588_v39  ;;  %v11460_v29 = vmul.f32 %v25211_v40, %v28546_v13  ;;  %v11616_v63 = vmul.f32 %v25108_v60, %v11453_v59  ;;  %v11617_v33 = vmul.f32 %v25136_v44, %v11454_v1 }
 0x67b   :  { %v12590_v23 = vsel %vm10040_vm12, %v12419_v10, %v12589_v20  ;;  %v11618_v14 = vmul.f32 %v25122_v30, %v11455_v62  ;;  %v11619_v22 = vmul.f32 %v25155_v15, %v11456_v46  ;;  %v11620_v47 = vmul.f32 %v25114_v34, %v11457_v26 }
 0x67c   :  { %v25907_v48 = vld [vmem:[#allocation3 + $0x170] sm:$0xff]  ;;  %v12591_v53 = vsel %vm10042_vm13, %v12423_v18, %v12590_v23  ;;  %v11621_v39 = vmul.f32 %v25158_v16, %v11458_v61  ;;  %v11622_v59 = vmul.f32 %v25133_v4, %v11459_v43  ;;  %v11623_v1 = vmul.f32 %v25185_v32, %v11460_v29 }
 0x67d   :  { %19006 = vmatmul.mubr.msk.f32.gmra.mrb[76].mxu1 %vm10169_vm3, %v25907_v48  ;;  %v12592_v10 = vsel %vm10044_vm14, %v12427_v27, %v12591_v53  ;;  %v11779_v8 = vadd.f32 %v25111_v6, %v11616_v63  ;;  %v11780_v18 = vadd.f32 %v25161_v11, %v11617_v33  ;;  %v11781_v57 = vadd.f32 %v25126_v45, %v11618_v14  ;;  %v28547_v33 = vld [vmem:[#allocation12_spill] sm:$0xff]  ;;  %v28548_v53 = vld [vmem:[#allocation13_spill] sm:$0xff] }
 0x67e   :  { %v12593_v62 = vsel %vm10046_vm15, %v12431_v51, %v12592_v10  ;;  %v11782_v46 = vadd.f32 %v25164_v3, %v11619_v22  ;;  %v11783_v55 = vadd.f32 %v25117_v54, %v11620_v47  ;;  %v11784_v27 = vadd.f32 %v25182_v21, %v11621_v39  ;;  %v28551_v10 = vld [vmem:[#allocation17_spill] sm:$0xff] }
 0x67f   :  { %12638 = vst.msk [vmem:[#allocation3 + $0x188] sm:$0xff] %vm10169_vm3, %v12593_v62  ;;  %v11785_v26 = vadd.f32 %v25140_v37, %v11622_v59  ;;  %v11786_v20 = vadd.f32 %v25193_v42, %v11623_v1  ;;  %v12435_v35 = vrot.slane %v11779_v8, %v28176_v28  ;;  %v12439_v51 = vrot.slane %v11780_v18, %v28176_v28  ;;  %v28552_v1 = vld [vmem:[#allocation103_spill] sm:$0xff]  ;;  %v28553_v18 = vld [vmem:[#allocation70_spill] sm:$0xff] }
 0x680   :  { %v12443_v61 = vrot.slane %v11781_v57, %v28176_v28  ;;  %v12447_v31 = vrot.slane %v11782_v46, %v28176_v28  ;;  %v12451_v43 = vrot.slane %v11783_v55, %v28176_v28  ;;  %v12455_v13 = vrot.slane %v11784_v27, %v28176_v28  ;;  %v28554_v46 = vld [vmem:[#allocation104_spill] sm:$0xff]  ;;  %v28555_v27 = vld [vmem:[#allocation15_spill] sm:$0xff] }
 0x681   :  { %v12459_v29 = vrot.slane %v11785_v26, %v28176_v28  ;;  %v12463_v23 = vrot.slane %v11786_v20, %v28176_v28  ;;  %v12594_v63 = vsel %vm10034_vm8, %v12439_v51, %v12435_v35  ;;  %v11397_v14 = vmul.f32 %v25129_v49, %v28547_v33  ;;  %v28550_v49 = vld [vmem:[#allocation99_spill] sm:$0xff] }
 0x682   :  { %v11398_v22 = vmul.f32 %v25150_v56, %v28548_v53  ;;  %v12595_v47 = vsel %vm10036_vm10, %v12443_v61, %v12594_v63  ;;  %v28549_v39 = vmov 0.0   ;;  %v11399_v56 = vmul.f32 %v25147_v5, %v28550_v49 }
 0x683   :  { %11798 = vst.msk [vmem:[#allocation3 + $0x10] sm:$0x1] %vm11797_vm4, %v28549_v39  ;;  %11801 = vst.msk [vmem:[#allocation3 + $0x28] sm:$0x1] %vm11797_vm4, %v28549_v39  ;;  %v11400_v59 = vmul.f32 %v25171_v19, %v28551_v10  ;;  %v11401_v8 = vmul.f32 %v25143_v24, %v28552_v1  ;;  %v12596_v62 = vsel %vm10038_vm11, %v12447_v31, %v12595_v47 }
 0x684   :  { %11804 = vst.msk [vmem:[#allocation3 + $0x40] sm:$0x1] %vm11797_vm4, %v28549_v39  ;;  %11807 = vst.msk [vmem:[#allocation3 + $0x58] sm:$0x1] %vm11797_vm4, %v28549_v39  ;;  %v11402_v57 = vmul.f32 %v25174_v7, %v28553_v18  ;;  %v11403_v55 = vmul.f32 %v25168_v2, %v28554_v46  ;;  %v11404_v26 = vmul.f32 %v25211_v40, %v28555_v27  ;;  %v26057_v18 = vld [vmem:[#allocation3 + $0x1f] sm:$0xff]  ;;  %v26065_v46 = vld [vmem:[#allocation3 + $0x37] sm:$0xff] }
 0x685   :  { %11810 = vst.msk [vmem:[#allocation3 + $0x70] sm:$0x1] %vm11797_vm4, %v28549_v39  ;;  %11813 = vst.msk [vmem:[#allocation3 + $0x88] sm:$0x1] %vm11797_vm4, %v28549_v39  ;;  %v12597_v20 = vsel %vm10040_vm12, %v12451_v43, %v12596_v62  ;;  %v11560_v5 = vmul.f32 %v25108_v60, %v11397_v14  ;;  %v11561_v19 = vmul.f32 %v25136_v44, %v11398_v22  ;;  %v26073_v27 = vld [vmem:[#allocation3 + $0x4f] sm:$0xff] }
 0x686   :  { %11816 = vst.msk [vmem:[#allocation3 + $0xa0] sm:$0x1] %vm11797_vm4, %v28549_v39  ;;  %11819 = vst.msk [vmem:[#allocation3 + $0xb8] sm:$0x1] %vm11797_vm4, %v28549_v39  ;;  %v11562_v35 = vmul.f32 %v25122_v30, %v11399_v56  ;;  %v25999_v24 = vld [vmem:[#allocation3 + $0x188] sm:$0xff]  ;;  %v12598_v51 = vsel %vm10042_vm13, %v12455_v13, %v12597_v20  ;;  %v11563_v7 = vmul.f32 %v25155_v15, %v11400_v59  ;;  %v26081_v20 = vld [vmem:[#allocation3 + $0x7f] sm:$0xff] }
 0x687   :  { %11822 = vst.msk [vmem:[#allocation3 + $0xd0] sm:$0x1] %vm11797_vm4, %v28549_v39  ;;  %11825 = vst.msk [vmem:[#allocation3 + $0xe8] sm:$0x1] %vm11797_vm4, %v28549_v39  ;;  %v11564_v61 = vmul.f32 %v25114_v34, %v11401_v8  ;;  %v11565_v2 = vmul.f32 %v25158_v16, %v11402_v57  ;;  %19008 = vmatprep.mubr.msk.f32.mxu1 %vm10169_vm3, %v25999_v24  ;;  %v12599_v31 = vsel %vm10044_vm14, %v12459_v29, %v12598_v51  ;;  %v12650_v51 = vld [vmem:[#allocation3 + $0x10f] sm:$0xff] }
 0x688   :  { %11828 = vst.msk [vmem:[#allocation3 + $0x100] sm:$0x1] %vm11797_vm4, %v28549_v39  ;;  %11831 = vst.msk [vmem:[#allocation3 + $0x118] sm:$0x1] %vm11797_vm4, %v28549_v39  ;;  %v11566_v60 = vmul.f32 %v25133_v4, %v11403_v55  ;;  %v11567_v44 = vmul.f32 %v25185_v32, %v11404_v26  ;;  %v11723_v30 = vadd.f32 %v25111_v6, %v11560_v5  ;;  %v19873_v55 = vld [vmem:[%s27180_s5 + $0x10] sm:$0xff]  ;;  %v26077_v26 = vld [vmem:[#allocation3 + $0x67] sm:$0xff] }
 0x689   :  { %11834 = vst.msk [vmem:[#allocation3 + $0x130] sm:$0x1] %vm11797_vm4, %v28549_v39  ;;  %11837 = vst.msk [vmem:[#allocation3 + $0x148] sm:$0x1] %vm11797_vm4, %v28549_v39  ;;  %v12600_v43 = vsel %vm10046_vm15, %v12463_v23, %v12599_v31  ;;  %v11724_v13 = vadd.f32 %v25161_v11, %v11561_v19  ;;  %v11725_v15 = vadd.f32 %v25126_v45, %v11562_v35  ;;  %v26085_v5 = vld [vmem:[#allocation3 + $0x97] sm:$0xff]  ;;  %v26089_v35 = vld [vmem:[#allocation3 + $0xaf] sm:$0xff] }
 0x68a   :  { %11840 = vst.msk [vmem:[#allocation3 + $0x160] sm:$0x1] %vm11797_vm4, %v28549_v39  ;;  %11843 = vst.msk [vmem:[#allocation3 + $0x178] sm:$0x1] %vm11797_vm4, %v28549_v39  ;;  %v11726_v34 = vadd.f32 %v25164_v3, %v11563_v7  ;;  %v12483_v16 = vrot.slane %v25251_v25, %v28176_v28  ;;  %v11727_v29 = vadd.f32 %v25117_v54, %v11564_v61  ;;  %v12649_v19 = vld [vmem:[#allocation3 + $0xf7] sm:$0xff]  ;;  %v26095_v7 = vld [vmem:[#allocation3 + $0x127] sm:$0xff] }
 0x68b   :  { %11846 = vst.msk [vmem:[#allocation3 + $0x190] sm:$0x1] %vm11797_vm4, %v28549_v39  ;;  %11849 = vst.msk [vmem:[#allocation3 + $0x1a8] sm:$0x1] %vm11797_vm4, %v28549_v39  ;;  %v11728_v4 = vadd.f32 %v25182_v21, %v11565_v2  ;;  %v12211_v63 = vrot.slane %v11723_v30, %v28176_v28  ;;  %v12215_v6 = vrot.slane %v11724_v13, %v28176_v28  ;;  %v26099_v61 = vld [vmem:[#allocation3 + $0x13f] sm:$0xff]  ;;  %v26103_v2 = vld [vmem:[#allocation3 + $0x157] sm:$0xff] }
 0x68c   :  { %11852 = vst.msk [vmem:[#allocation3 + $0x1c0] sm:$0x1] %vm11797_vm4, %v28549_v39  ;;  %11855 = vst.msk [vmem:[#allocation3 + $0x1d8] sm:$0x1] %vm11797_vm4, %v28549_v39  ;;  %v12219_v23 = vrot.slane %v11725_v15, %v28176_v28  ;;  %v12223_v11 = vrot.slane %v11726_v34, %v28176_v28  ;;  %v11793_v45 = vadd.f32 %v25140_v37, %v25232_v36  ;;  %v12641_v39 = vld [vmem:[#allocation3 + $0x7] sm:$0xff]  ;;  %v26107_v31 = vld [vmem:[#allocation3 + $0x16f] sm:$0xff] }
 0x68d   :  { %12639 = vst.msk [vmem:[#allocation3 + $0x1a0] sm:$0xff] %vm10169_vm3, %v12600_v43  ;;  %v12604_v3 = vsel %vm10040_vm12, %v12483_v16, %v25263_v12  ;;  %v11729_v25 = vadd.f32 %v25140_v37, %v11566_v60  ;;  %v12487_v54 = vrot.slane %v25257_v52, %v28176_v28  ;;  %v11730_v21 = vadd.f32 %v25193_v42, %v11567_v44  ;;  %v26111_v60 = vld [vmem:[#allocation3 + $0x187] sm:$0xff]  ;;  %v26127_v15 = vld [vmem:[#allocation3 + $0x39] sm:$0xff]  ;;  %v26131_v34 = vld [vmem:[#allocation3 + $0x51] sm:$0xff] }
 0x68e   :  { %v12545_v33 = vsel %vm10034_vm8, %v12215_v6, %v12211_v63  ;;  %v11468_v14 = vmul.f32 %v25211_v40, %v28419_v58  ;;  %v12227_v53 = vrot.slane %v11727_v29, %v28176_v28  ;;  %v12231_v12 = vrot.slane %v11728_v4, %v28176_v28  ;;  %v13062_v44 = vld [vmem:[#allocation3 + $0x9] sm:$0xff]  ;;  %v26120_v43 = vld [vmem:[#allocation3 + $0x21] sm:$0xff]  ;;  %v26143_v4 = vld [vmem:[#allocation3 + $0x99] sm:$0xff] }
 0x68f   :  { %v12546_v22 = vsel %vm10036_vm10, %v12219_v23, %v12545_v33  ;;  %v12605_v36 = vsel %vm10042_vm13, %v12487_v54, %v12604_v3  ;;  %v12491_v52 = vrot.slane %v11793_v45, %v28176_v28  ;;  %v12235_v49 = vrot.slane %v11729_v25, %v28176_v28  ;;  %v17213_v13 = vld [vmem:[%s27180_s5 + $0x20] sm:$0xff]  ;;  %v26135_v16 = vld [vmem:[#allocation3 + $0x69] sm:$0xff]  ;;  %v26147_v6 = vld [vmem:[#allocation3 + $0xb1] sm:$0xff] }
 0x690   :  { %v12547_v37 = vsel %vm10038_vm11, %v12223_v11, %v12546_v22  ;;  %v11631_v47 = vmul.f32 %v25185_v32, %v11468_v14  ;;  %v12239_v40 = vrot.slane %v11730_v21, %v28176_v28  ;;  %v26139_v29 = vld [vmem:[#allocation3 + $0x81] sm:$0xff]  ;;  %v13070_v63 = vld [vmem:[#allocation3 + $0xf9] sm:$0xff]  ;;  %v26152_v23 = vld [vmem:[#allocation3 + $0x111] sm:$0xff] }
 0x691   :  { %v12548_v56 = vsel %vm10040_vm12, %v12227_v53, %v12547_v37  ;;  %v12606_v1 = vsel %vm10044_vm14, %v12491_v52, %v12605_v36  ;;  %v26156_v11 = vld [vmem:[#allocation3 + $0x129] sm:$0xff]  ;;  %v26160_v45 = vld [vmem:[#allocation3 + $0x141] sm:$0xff]  ;;  %v26164_v3 = vld [vmem:[#allocation3 + $0x159] sm:$0xff] }
 0x692   :  { %v12549_v10 = vsel %vm10042_vm13, %v12231_v12, %v12548_v56  ;;  %v11794_v59 = vadd.f32 %v25193_v42, %v11631_v47  ;;  %v17196_v42 = vld [vmem:[%s27180_s5 + $0x18] sm:$0xff]  ;;  %v26172_v54 = vld [vmem:[#allocation3 + $0x189] sm:$0xff]  ;;  %v13516_v22 = vld [vmem:[#allocation3 + $0x20] sm:$0xff] }
 0x693   :  { %v12550_v32 = vsel %vm10044_vm14, %v12235_v49, %v12549_v10  ;;  %v26168_v25 = vld [vmem:[#allocation3 + $0x171] sm:$0xff]  ;;  %v17230_v33 = vld [vmem:[%s27180_s5 + $0x28] sm:$0xff]  ;;  %v13520_v52 = vld [vmem:[#allocation3 + $0x80] sm:$0xff] }
 0x694   :  { %v26044_v58 = vld [vmem:[#allocation3 + $0x1a0] sm:$0xff]  ;;  %v12551_v8 = vsel %vm10046_vm15, %v12239_v40, %v12550_v32  ;;  %v12495_v62 = vrot.slane %v11794_v59, %v28176_v28  ;;  %v26219_v36 = vld [vmem:[#allocation3 + $0x38] sm:$0xff]  ;;  %v17247_v12 = vld [vmem:[%s27180_s5 + $0x30] sm:$0xff] }
 0x695   :  { %19009 = vmatmul.mubr.msk.f32.gmra.mrb[78].mxu1 %vm10169_vm3, %v26044_v58  ;;  %12632 = vst.msk [vmem:[#allocation3 + $0xc8] sm:$0xff] %vm10169_vm3, %v12551_v8  ;;  %v26115_v30 = vld [vmem:[#allocation3 + $0x19f] sm:$0xff]  ;;  %v26226_v37 = vld [vmem:[#allocation3 + $0x50] sm:$0xff]  ;;  %v26230_v47 = vld [vmem:[#allocation3 + $0x68] sm:$0xff] }
 0x696   :  { %19013 = vmatprep.mubr.msk.f32.mxu1 %vm10169_vm3, %v12641_v39  ;;  %v12607_v57 = vsel %vm10046_vm15, %v12495_v62, %v12606_v1  ;;  %v26176_v21 = vld [vmem:[#allocation3 + $0x1a1] sm:$0xff]  ;;  %v13521_v39 = vld [vmem:[#allocation3 + $0x98] sm:$0xff]  ;;  %v13986_v1 = vld [vmem:[#allocation3 + $0x1cf] sm:$0xff] }
 0x697   :  { %12640 = vst.msk [vmem:[#allocation3 + $0x1b8] sm:$0xff] %vm10169_vm3, %v12607_v57  ;;  %v17281_v10 = vld [vmem:[%s27180_s5 + $0x40] sm:$0xff]  ;;  %v14203_v32 = vld [vmem:[#allocation3 + $0xb0] sm:$0xff] }
 0x698   :  { %v13978_v59 = vld [vmem:[#allocation3 + $0xdf] sm:$0xff]  ;;  %v14213_v62 = vld [vmem:[#allocation3 + $0x1d0] sm:$0xff] }
 0x699   :  { %19014 = vmatmul.mubr.msk.f32.vlgmr.msra.gmra.mrb[64].mxu1 %vm10169_vm3, %v26057_v18  ;;  %v14205_v8 = vld [vmem:[#allocation3 + $0xe0] sm:$0xff] }
 0x69a   :  { %19038 = vmatpush3.msra.mxu1 %v19873_v55  ;;  %19016 = vmatprep.mubr.msk.f32.mxu1 %vm10169_vm3, %v26065_v46 }
 0x69b   :  { %19063 = vmatprep.subr.mxu1 %v17196_v42 }
 0x69c   :  { %v26197_v14 = vld [vmem:[#allocation3 + $0xc7] sm:$0xff] }
 0x69d   :  { %19017 = vmatmul.mubr.msk.f32.gmra.mrb[66].mxu1 %vm10169_vm3, %v26073_v27  ;;  %v13523_v49 = vld [vmem:[#allocation3 + $0xc8] sm:$0xff] }
 0x69e   :  { %19019 = vmatprep.mubr.msk.f32.mxu1 %vm10169_vm3, %v26077_v26  ;;  %v26214_v53 = vld [vmem:[#allocation3 + $0x1b7] sm:$0xff]  ;;  %v13750_v56 = vld [vmem:[#allocation3 + $0xc9] sm:$0xff] }
 0x69f   :  { %v13758_v40 = vld [vmem:[#allocation3 + $0x1b9] sm:$0xff] }
 0x6a1   :  { %19020 = vmatmul.mubr.msk.f32.gmra.mrb[68].mxu1 %vm10169_vm3, %v26081_v20 }
 0x6a2   :  { %19022 = vmatprep.mubr.msk.f32.mxu1 %vm10169_vm3, %v26085_v5 }
 0x6a5   :  { %19023 = vmatmul.mubr.msk.f32.gmra.mrb[70].mxu1 %vm10169_vm3, %v26089_v35 }
 0x6a6   :  { %19025 = vmatprep.mubr.msk.f32.mxu1 %vm10169_vm3, %v12649_v19 }
 0x6a9   :  { %19026 = vmatmul.mubr.msk.f32.gmra.mrb[72].mxu1 %vm10169_vm3, %v12650_v51 }
 0x6aa   :  { %19028 = vmatprep.mubr.msk.f32.mxu1 %vm10169_vm3, %v26095_v7 }
 0x6ad   :  { %19029 = vmatmul.mubr.msk.f32.gmra.mrb[74].mxu1 %vm10169_vm3, %v26099_v61 }
 0x6ae   :  { %19031 = vmatprep.mubr.msk.f32.mxu1 %vm10169_vm3, %v26103_v2 }
 0x6b1   :  { %19032 = vmatmul.mubr.msk.f32.gmra.mrb[76].mxu1 %vm10169_vm3, %v26107_v31 }
 0x6b2   :  { %19034 = vmatprep.mubr.msk.f32.mxu1 %vm10169_vm3, %v26111_v60 }
 0x6b5   :  { %19035 = vmatmul.mubr.msk.f32.gmra.mrb[78].mxu1 %vm10169_vm3, %v26115_v30 }
 0x6b6   :  { %19039 = vmatprep.mubr.msk.f32.mxu1 %vm10169_vm3, %v13062_v44 }
 0x6b9   :  { %19040 = vmatmul.mubr.msk.f32.vlgmr.msra.gmra.mrb[64].mxu1 %vm10169_vm3, %v26120_v43 }
 0x6ba   :  { %19064 = vmatpush3.msra.mxu1 %v17196_v42  ;;  %19042 = vmatprep.mubr.msk.f32.mxu1 %vm10169_vm3, %v26127_v15 }
 0x6bb   :  { %19089 = vmatprep.subr.mxu1 %v17213_v13 }
 0x6bd   :  { %19043 = vmatmul.mubr.msk.f32.gmra.mrb[66].mxu1 %vm10169_vm3, %v26131_v34 }
 0x6be   :  { %19045 = vmatprep.mubr.msk.f32.mxu1 %vm10169_vm3, %v26135_v16 }
 0x6c1   :  { %19046 = vmatmul.mubr.msk.f32.gmra.mrb[68].mxu1 %vm10169_vm3, %v26139_v29 }
 0x6c2   :  { %19048 = vmatprep.mubr.msk.f32.mxu1 %vm10169_vm3, %v26143_v4 }
 0x6c5   :  { %19049 = vmatmul.mubr.msk.f32.gmra.mrb[70].mxu1 %vm10169_vm3, %v26147_v6 }
 0x6c6   :  { %19051 = vmatprep.mubr.msk.f32.mxu1 %vm10169_vm3, %v13070_v63 }
 0x6c9   :  { %19052 = vmatmul.mubr.msk.f32.gmra.mrb[72].mxu1 %vm10169_vm3, %v26152_v23 }
 0x6ca   :  { %19054 = vmatprep.mubr.msk.f32.mxu1 %vm10169_vm3, %v26156_v11 }
 0x6cd   :  { %19055 = vmatmul.mubr.msk.f32.gmra.mrb[74].mxu1 %vm10169_vm3, %v26160_v45 }
 0x6ce   :  { %19057 = vmatprep.mubr.msk.f32.mxu1 %vm10169_vm3, %v26164_v3 }
 0x6d1   :  { %19058 = vmatmul.mubr.msk.f32.gmra.mrb[76].mxu1 %vm10169_vm3, %v26168_v25 }
 0x6d2   :  { %19060 = vmatprep.mubr.msk.f32.mxu1 %vm10169_vm3, %v26172_v54 }
 0x6d5   :  { %19061 = vmatmul.mubr.msk.f32.gmra.mrb[78].mxu1 %vm10169_vm3, %v26176_v21 }
 0x6d6   :  { %19065 = vmatprep.mubr.msk.f32.mxu1 %vm10169_vm3, %v26057_v18 }
 0x6d9   :  { %19066 = vmatmul.mubr.msk.f32.vlgmr.msra.gmra.mrb[64].mxu1 %vm10169_vm3, %v26065_v46 }
 0x6da   :  { %19090 = vmatpush3.msra.mxu1 %v17213_v13  ;;  %19068 = vmatprep.mubr.msk.f32.mxu1 %vm10169_vm3, %v26073_v27 }
 0x6db   :  { %19115 = vmatprep.subr.mxu1 %v17230_v33 }
 0x6dd   :  { %19069 = vmatmul.mubr.msk.f32.gmra.mrb[66].mxu1 %vm10169_vm3, %v26077_v26 }
 0x6de   :  { %19071 = vmatprep.mubr.msk.f32.mxu1 %vm10169_vm3, %v26081_v20 }
 0x6e1   :  { %19072 = vmatmul.mubr.msk.f32.gmra.mrb[68].mxu1 %vm10169_vm3, %v26085_v5 }
 0x6e2   :  { %19074 = vmatprep.mubr.msk.f32.mxu1 %vm10169_vm3, %v26089_v35 }
 0x6e5   :  { %19075 = vmatmul.mubr.msk.f32.gmra.mrb[70].mxu1 %vm10169_vm3, %v26197_v14 }
 0x6e6   :  { %19077 = vmatprep.mubr.msk.f32.mxu1 %vm10169_vm3, %v12650_v51 }
 0x6e9   :  { %19078 = vmatmul.mubr.msk.f32.gmra.mrb[72].mxu1 %vm10169_vm3, %v26095_v7 }
 0x6ea   :  { %19080 = vmatprep.mubr.msk.f32.mxu1 %vm10169_vm3, %v26099_v61 }
 0x6ed   :  { %19081 = vmatmul.mubr.msk.f32.gmra.mrb[74].mxu1 %vm10169_vm3, %v26103_v2 }
 0x6ee   :  { %19083 = vmatprep.mubr.msk.f32.mxu1 %vm10169_vm3, %v26107_v31 }
 0x6f1   :  { %19084 = vmatmul.mubr.msk.f32.gmra.mrb[76].mxu1 %vm10169_vm3, %v26111_v60 }
 0x6f2   :  { %19086 = vmatprep.mubr.msk.f32.mxu1 %vm10169_vm3, %v26115_v30 }
 0x6f5   :  { %19087 = vmatmul.mubr.msk.f32.gmra.mrb[78].mxu1 %vm10169_vm3, %v26214_v53 }
 0x6f6   :  { %19091 = vmatprep.mubr.msk.f32.mxu1 %vm10169_vm3, %v13516_v22 }
 0x6f9   :  { %19092 = vmatmul.mubr.msk.f32.vlgmr.msra.gmra.mrb[64].mxu1 %vm10169_vm3, %v26219_v36 }
 0x6fa   :  { %19116 = vmatpush3.msra.mxu1 %v17230_v33  ;;  %19094 = vmatprep.mubr.msk.f32.mxu1 %vm10169_vm3, %v26226_v37 }
 0x6fb   :  { %19141 = vmatprep.subr.mxu1 %v17247_v12 }
 0x6fd   :  { %19095 = vmatmul.mubr.msk.f32.gmra.mrb[66].mxu1 %vm10169_vm3, %v26230_v47 }
 0x6fe   :  { %19097 = vmatprep.mubr.msk.f32.mxu1 %vm10169_vm3, %v13520_v52 }
 0x701   :  { %19098 = vmatmul.mubr.msk.f32.gmra.mrb[68].mxu1 %vm10169_vm3, %v13521_v39 }
 0x702   :  { %19100 = vmatprep.mubr.msk.f32.mxu1 %vm10169_vm3, %v25649_v50  ;;  %v13531_v50 = vld [vmem:[#allocation3 + $0x1b8] sm:$0xff] }
 0x705   :  { %19101 = vmatmul.mubr.msk.f32.gmra.mrb[70].mxu1 %vm10169_vm3, %v13523_v49 }
 0x706   :  { %19103 = vmatprep.mubr.msk.f32.mxu1 %vm10169_vm3, %v25699_v41  ;;  %v17264_v41 = vld [vmem:[%s27180_s5 + $0x38] sm:$0xff] }
 0x709   :  { %19104 = vmatmul.mubr.msk.f32.gmra.mrb[72].mxu1 %vm10169_vm3, %v25752_v9 }
 0x70a   :  { %19106 = vmatprep.mubr.msk.f32.mxu1 %vm10169_vm3, %v25805_v0 }
 0x70d   :  { %19107 = vmatmul.mubr.msk.f32.gmra.mrb[74].mxu1 %vm10169_vm3, %v25858_v38 }
 0x70e   :  { %19109 = vmatprep.mubr.msk.f32.mxu1 %vm10169_vm3, %v25907_v48 }
 0x711   :  { %19110 = vmatmul.mubr.msk.f32.gmra.mrb[76].mxu1 %vm10169_vm3, %v25999_v24 }
 0x712   :  { %19112 = vmatprep.mubr.msk.f32.mxu1 %vm10169_vm3, %v26044_v58 }
 0x715   :  { %19113 = vmatmul.mubr.msk.f32.gmra.mrb[78].mxu1 %vm10169_vm3, %v13531_v50 }
 0x716   :  { %19117 = vmatprep.mubr.msk.f32.mxu1 %vm10169_vm3, %v26120_v43 }
 0x719   :  { %19118 = vmatmul.mubr.msk.f32.vlgmr.msra.gmra.mrb[64].mxu1 %vm10169_vm3, %v26127_v15 }
 0x71a   :  { %19142 = vmatpush3.msra.mxu1 %v17247_v12  ;;  %19120 = vmatprep.mubr.msk.f32.mxu1 %vm10169_vm3, %v26131_v34 }
 0x71b   :  { %19167 = vmatprep.subr.mxu1 %v17264_v41 }
 0x71d   :  { %19121 = vmatmul.mubr.msk.f32.gmra.mrb[66].mxu1 %vm10169_vm3, %v26135_v16 }
 0x71e   :  { %19123 = vmatprep.mubr.msk.f32.mxu1 %vm10169_vm3, %v26139_v29 }
 0x721   :  { %19124 = vmatmul.mubr.msk.f32.gmra.mrb[68].mxu1 %vm10169_vm3, %v26143_v4 }
 0x722   :  { %19126 = vmatprep.mubr.msk.f32.mxu1 %vm10169_vm3, %v26147_v6 }
 0x725   :  { %19127 = vmatmul.mubr.msk.f32.gmra.mrb[70].mxu1 %vm10169_vm3, %v13750_v56 }
 0x726   :  { %19129 = vmatprep.mubr.msk.f32.mxu1 %vm10169_vm3, %v26152_v23 }
 0x729   :  { %19130 = vmatmul.mubr.msk.f32.gmra.mrb[72].mxu1 %vm10169_vm3, %v26156_v11 }
 0x72a   :  { %19132 = vmatprep.mubr.msk.f32.mxu1 %vm10169_vm3, %v26160_v45 }
 0x72d   :  { %19133 = vmatmul.mubr.msk.f32.gmra.mrb[74].mxu1 %vm10169_vm3, %v26164_v3 }
 0x72e   :  { %19135 = vmatprep.mubr.msk.f32.mxu1 %vm10169_vm3, %v26168_v25 }
 0x731   :  { %19136 = vmatmul.mubr.msk.f32.gmra.mrb[76].mxu1 %vm10169_vm3, %v26172_v54 }
 0x732   :  { %19138 = vmatprep.mubr.msk.f32.mxu1 %vm10169_vm3, %v26176_v21 }
 0x735   :  { %19139 = vmatmul.mubr.msk.f32.gmra.mrb[78].mxu1 %vm10169_vm3, %v13758_v40 }
 0x736   :  { %19143 = vmatprep.mubr.msk.f32.mxu1 %vm10169_vm3, %v26065_v46 }
 0x739   :  { %19144 = vmatmul.mubr.msk.f32.vlgmr.msra.gmra.mrb[64].mxu1 %vm10169_vm3, %v26073_v27 }
 0x73a   :  { %19168 = vmatpush3.msra.mxu1 %v17264_v41  ;;  %19146 = vmatprep.mubr.msk.f32.mxu1 %vm10169_vm3, %v26077_v26 }
 0x73b   :  { %19193 = vmatprep.subr.mxu1 %v17281_v10 }
 0x73d   :  { %19147 = vmatmul.mubr.msk.f32.gmra.mrb[66].mxu1 %vm10169_vm3, %v26081_v20 }
 0x73e   :  { %19149 = vmatprep.mubr.msk.f32.mxu1 %vm10169_vm3, %v26085_v5 }
 0x741   :  { %19150 = vmatmul.mubr.msk.f32.gmra.mrb[68].mxu1 %vm10169_vm3, %v26089_v35 }
 0x742   :  { %19152 = vmatprep.mubr.msk.f32.mxu1 %vm10169_vm3, %v26197_v14 }
 0x745   :  { %19153 = vmatmul.mubr.msk.f32.gmra.mrb[70].mxu1 %vm10169_vm3, %v13978_v59 }
 0x746   :  { %19155 = vmatprep.mubr.msk.f32.mxu1 %vm10169_vm3, %v26095_v7 }
 0x749   :  { %19156 = vmatmul.mubr.msk.f32.gmra.mrb[72].mxu1 %vm10169_vm3, %v26099_v61 }
 0x74a   :  { %19158 = vmatprep.mubr.msk.f32.mxu1 %vm10169_vm3, %v26103_v2 }
 0x74d   :  { %19159 = vmatmul.mubr.msk.f32.gmra.mrb[74].mxu1 %vm10169_vm3, %v26107_v31 }
 0x74e   :  { %19161 = vmatprep.mubr.msk.f32.mxu1 %vm10169_vm3, %v26111_v60 }
 0x751   :  { %19162 = vmatmul.mubr.msk.f32.gmra.mrb[76].mxu1 %vm10169_vm3, %v26115_v30 }
 0x752   :  { %19164 = vmatprep.mubr.msk.f32.mxu1 %vm10169_vm3, %v26214_v53 }
 0x755   :  { %19165 = vmatmul.mubr.msk.f32.gmra.mrb[78].mxu1 %vm10169_vm3, %v13986_v1 }
 0x756   :  { %19169 = vmatprep.mubr.msk.f32.mxu1 %vm10169_vm3, %v26219_v36 }
 0x759   :  { %19170 = vmatmul.mubr.msk.f32.vlgmr.msra.gmra.mrb[64].mxu1 %vm10169_vm3, %v26226_v37 }
 0x75a   :  { %19194 = vmatpush3.msra.mxu1 %v17281_v10  ;;  %19172 = vmatprep.mubr.msk.f32.mxu1 %vm10169_vm3, %v26230_v47 }
 0x75d   :  { %19173 = vmatmul.mubr.msk.f32.gmra.mrb[66].mxu1 %vm10169_vm3, %v13520_v52 }
 0x75e   :  { %19175 = vmatprep.mubr.msk.f32.mxu1 %vm10169_vm3, %v13521_v39 }
 0x761   :  { %19176 = vmatmul.mubr.msk.f32.gmra.mrb[68].mxu1 %vm10169_vm3, %v14203_v32 }
 0x762   :  { %19178 = vmatprep.mubr.msk.f32.mxu1 %vm10169_vm3, %v13523_v49 }
 0x765   :  { %19179 = vmatmul.mubr.msk.f32.gmra.mrb[70].mxu1 %vm10169_vm3, %v14205_v8 }
 0x766   :  { %19181 = vmatprep.mubr.msk.f32.mxu1 %vm10169_vm3, %v25752_v9  ;;  %v14432_v9 = vld [vmem:[#allocation3 + $0xe1] sm:$0xff] }
 0x769   :  { %19182 = vmatmul.mubr.msk.f32.gmra.mrb[72].mxu1 %vm10169_vm3, %v25805_v0  ;;  %v14440_v0 = vld [vmem:[#allocation3 + $0x1d1] sm:$0xff] }
 0x76a   :  { %19184 = vmatprep.mubr.msk.f32.mxu1 %vm10169_vm3, %v25858_v38  ;;  %v26376_v38 = vld [vmem:[%s27181_s6] ss:$0 sm:$0xff] }
 0x76d   :  { %19185 = vmatmul.mubr.msk.f32.gmra.mrb[74].mxu1 %vm10169_vm3, %v25907_v48 }
 0x76e   :  { %19187 = vmatprep.mubr.msk.f32.mxu1 %vm10169_vm3, %v25999_v24 }
 0x771   :  { %19188 = vmatmul.mubr.msk.f32.gmra.mrb[76].mxu1 %vm10169_vm3, %v26044_v58 }
 0x772   :  { %19190 = vmatprep.mubr.msk.f32.mxu1 %vm10169_vm3, %v13531_v50 }
 0x775   :  { %19191 = vmatmul.mubr.msk.f32.gmra.mrb[78].mxu1 %vm10169_vm3, %v14213_v62 }
 0x776   :  { %19195 = vmatprep.mubr.msk.f32.mxu1 %vm10169_vm3, %v26127_v15 }
 0x779   :  { %19196 = vmatmul.mubr.msk.f32.vlgmr.msra.gmra.mrb[64].mxu1 %vm10169_vm3, %v26131_v34 }
 0x77a   :  { %19198 = vmatprep.mubr.msk.f32.mxu1 %vm10169_vm3, %v26135_v16 }
 0x77d   :  { %19199 = vmatmul.mubr.msk.f32.gmra.mrb[66].mxu1 %vm10169_vm3, %v26139_v29 }
 0x77e   :  { %19201 = vmatprep.mubr.msk.f32.mxu1 %vm10169_vm3, %v26143_v4 }
 0x781   :  { %19202 = vmatmul.mubr.msk.f32.gmra.mrb[68].mxu1 %vm10169_vm3, %v26147_v6 }
 0x782   :  { %19204 = vmatprep.mubr.msk.f32.mxu1 %vm10169_vm3, %v13750_v56 }
 0x785   :  { %19205 = vmatmul.mubr.msk.f32.gmra.mrb[70].mxu1 %vm10169_vm3, %v14432_v9 }
 0x786   :  { %19207 = vmatprep.mubr.msk.f32.mxu1 %vm10169_vm3, %v26156_v11 }
 0x789   :  { %19208 = vmatmul.mubr.msk.f32.gmra.mrb[72].mxu1 %vm10169_vm3, %v26160_v45 }
 0x78a   :  { %19210 = vmatprep.mubr.msk.f32.mxu1 %vm10169_vm3, %v26164_v3 }
 0x78d   :  { %19211 = vmatmul.mubr.msk.f32.gmra.mrb[74].mxu1 %vm10169_vm3, %v26168_v25 }
 0x78e   :  { %19213 = vmatprep.mubr.msk.f32.mxu1 %vm10169_vm3, %v26172_v54 }
 0x791   :  { %19214 = vmatmul.mubr.msk.f32.gmra.mrb[76].mxu1 %vm10169_vm3, %v26176_v21 }
 0x792   :  { %19216 = vmatprep.mubr.msk.f32.mxu1 %vm10169_vm3, %v13758_v40 }
 0x795   :  { %19217 = vmatmul.mubr.msk.f32.gmra.mrb[78].mxu1 %vm10169_vm3, %v14440_v0 }
 0x84c   :  { %v19197_v48 = vpop.f32.mrb[64].mxu1 }
 0x84d   :  { %v14660_v24 = vadd.f32 %v19197_v48, %v26376_v38  ;;  %v14557_v58 = vpop.f32.mrb[65].mxu1 }
 0x84e   :  { %v14659_v18 = vadd.f32 %v26376_v38, %v14557_v58 }
 0x84f   :  { %vm14676_vm5 = vcmp.gt.f32.partialorder %v14660_v24, 0.0  ;;  %v14692_v42 = vmul.f32 0.01, %v14660_v24 }
 0x850   :  { %vm14675_vm6 = vcmp.gt.f32.partialorder %v14659_v18, 0.0  ;;  %v14691_v57 = vmul.f32 0.01, %v14659_v18  ;;  %v19200_v46 = vpop.f32.mrb[66].mxu1 }
 0x851   :  { %v14708_v55 = vsel %vm14676_vm5, %v14660_v24, %v14692_v42  ;;  %v14662_v27 = vadd.f32 %v19200_v46, %v26376_v38  ;;  %v14567_v26 = vpop.f32.mrb[67].mxu1 }
 0x852   :  { %v14756_v20 = vcombine.high %v14708_v55, %v14708_v55  ;;  %v14763_v5 = vrot.slane %v14708_v55, %v28426_v17  ;;  %v14707_v19 = vsel %vm14675_vm6, %v14659_v18, %v14691_v57  ;;  %v14661_v35 = vadd.f32 %v26376_v38, %v14567_v26 }
 0x853   :  { %v14739_v51 = vcombine.high %v14707_v19, %v14707_v19  ;;  %v14746_v7 = vrot.slane %v14707_v19, %v28426_v17  ;;  %vm14678_vm3 = vcmp.gt.f32.partialorder %v14662_v27, 0.0  ;;  %v14694_v61 = vmul.f32 0.01, %v14662_v27 }
 0x854   :  { %v14770_v2 = vrot.slane %v14756_v20, %v28426_v17  ;;  %v14771_v31 = vcombine.high %v14763_v5, %v14763_v5  ;;  %v17303_v60 = vrot.slane %v14763_v5, 9  ;;  %vm14677_vm7 = vcmp.gt.f32.partialorder %v14661_v35, 0.0  ;;  %v19203_v44 = vpop.f32.mrb[68].mxu1 }
 0x855   :  { %v14753_v30 = vrot.slane %v14739_v51, %v28426_v17  ;;  %v14754_v43 = vcombine.high %v14746_v7, %v14746_v7  ;;  %v17299_v13 = vrot.slane %v14746_v7, 9  ;;  %v14710_v15 = vsel %vm14678_vm3, %v14662_v27, %v14694_v61  ;;  %v14577_v34 = vpop.f32.mrb[69].mxu1 }
 0x856   :  { %v14772_v16 = vcombine.high %v14770_v2, %v14770_v2  ;;  %v17304_v29 = vrot.slane %v14771_v31, 9  ;;  %v17305_v4 = vrot.slane %v14770_v2, 9  ;;  %v15271_v63 = vmax.f32 %v14763_v5, %v17303_v60 }
 0x857   :  { %v14755_v6 = vcombine.high %v14753_v30, %v14753_v30  ;;  %v17300_v23 = vrot.slane %v14754_v43, 9  ;;  %v17301_v11 = vrot.slane %v14753_v30, 9  ;;  %v15267_v45 = vmax.f32 %v14746_v7, %v17299_v13 }
 0x858   :  { %v17306_v3 = vrot.slane %v14772_v16, 9  ;;  %v15272_v25 = vmax.f32 %v14771_v31, %v17304_v29  ;;  %v15273_v54 = vmax.f32 %v14770_v2, %v17305_v4  ;;  %v14790_v21 = vcombine.high %v14710_v15, %v14710_v15  ;;  %v19206_v33 = vpop.f32.mrb[70].mxu1 }
 0x859   :  { %v17302_v14 = vrot.slane %v14755_v6, 9  ;;  %v15268_v53 = vmax.f32 %v14754_v43, %v17300_v23  ;;  %v15269_v22 = vmax.f32 %v14753_v30, %v17301_v11  ;;  %v26386_v36 = vmax.f32 %v15267_v45, %v15271_v63  ;;  %v26388_v12 = vpop.f32.mrb[71].mxu1 }
 0x85a   :  { %v15274_v37 = vmax.f32 %v14772_v16, %v17306_v3  ;;  %v14797_v47 = vrot.slane %v14710_v15, %v28426_v17  ;;  %v14804_v52 = vrot.slane %v14790_v21, %v28426_v17  ;;  %v14693_v39 = vmul.f32 0.01, %v14661_v35 }
 0x85b   :  { %v15270_v49 = vmax.f32 %v14755_v6, %v17302_v14  ;;  %v26392_v50 = vmax.f32 %v15268_v53, %v15272_v25  ;;  %v26394_v41 = vmax.f32 %v15269_v22, %v15273_v54  ;;  %v15398_v56 = vrot.slane %v26386_v36, %v28176_v28 }
 0x85c   :  { %v14805_v40 = vcombine.high %v14797_v47, %v14797_v47  ;;  %v14806_v10 = vcombine.high %v14804_v52, %v14804_v52  ;;  %v17311_v59 = vrot.slane %v14797_v47, 9  ;;  %v17313_v1 = vrot.slane %v14804_v52, 9  ;;  %v26398_v32 = vpop.f32.mrb[72].mxu1 }
 0x85d   :  { %v26400_v8 = vmax.f32 %v15270_v49, %v15274_v37  ;;  %v15402_v62 = vrot.slane %v26392_v50, %v28176_v28  ;;  %v15406_v9 = vrot.slane %v26394_v41, %v28176_v28  ;;  %v14709_v0 = vsel %vm14677_vm7, %v14661_v35, %v14693_v39  ;;  %v26407_v48 = vpop.f32.mrb[73].mxu1 }
 0x85e   :  { %v17312_v24 = vrot.slane %v14805_v40, 9  ;;  %v17314_v58 = vrot.slane %v14806_v10, 9  ;;  %v15279_v18 = vmax.f32 %v14797_v47, %v17311_v59  ;;  %v15281_v42 = vmax.f32 %v14804_v52, %v17313_v1 }
 0x85f   :  { %v15410_v57 = vrot.slane %v26400_v8, %v28176_v28  ;;  %v15523_v46 = vsel %vm10034_vm8, %v15402_v62, %v15398_v56  ;;  %v14773_v55 = vcombine.high %v14709_v0, %v14709_v0  ;;  %v14780_v27 = vrot.slane %v14709_v0, %v28426_v17 }
 0x860   :  { %v15524_v26 = vsel %vm10036_vm10, %v15406_v9, %v15523_v46  ;;  %v15280_v20 = vmax.f32 %v14805_v40, %v17312_v24  ;;  %v15282_v5 = vmax.f32 %v14806_v10, %v17314_v58  ;;  %v14664_v19 = vadd.f32 %v19203_v44, %v26376_v38  ;;  %v26415_v35 = vpop.f32.mrb[74].mxu1 }
 0x861   :  { %v14787_v51 = vrot.slane %v14773_v55, %v28426_v17  ;;  %v14788_v7 = vcombine.high %v14780_v27, %v14780_v27  ;;  %v17307_v61 = vrot.slane %v14780_v27, 9  ;;  %v15525_v2 = vsel %vm10038_vm11, %v15410_v57, %v15524_v26  ;;  %v26419_v31 = vpop.f32.mrb[75].mxu1 }
 0x862   :  { %vm14680_vm9 = vcmp.gt.f32.partialorder %v14664_v19, 0.0  ;;  %v14696_v60 = vmul.f32 0.01, %v14664_v19  ;;  %v14663_v30 = vadd.f32 %v26376_v38, %v14577_v34  ;;  %v14666_v43 = vadd.f32 %v19206_v33, %v26376_v38 }
 0x863   :  { %v14789_v13 = vcombine.high %v14787_v51, %v14787_v51  ;;  %v17308_v15 = vrot.slane %v14788_v7, 9  ;;  %v17309_v16 = vrot.slane %v14787_v51, 9  ;;  %v15275_v44 = vmax.f32 %v14780_v27, %v17307_v61 }
 0x864   :  { %v14712_v29 = vsel %vm14680_vm9, %v14664_v19, %v14696_v60  ;;  %vm14679_vm1 = vcmp.gt.f32.partialorder %v14663_v30, 0.0  ;;  %v14695_v4 = vmul.f32 0.01, %v14663_v30  ;;  %vm14682_vm2 = vcmp.gt.f32.partialorder %v14666_v43, 0.0  ;;  %v26423_v63 = vpop.f32.mrb[76].mxu1 }
 0x865   :  { %v17310_v6 = vrot.slane %v14789_v13, 9  ;;  %v15276_v23 = vmax.f32 %v14788_v7, %v17308_v15  ;;  %v15277_v11 = vmax.f32 %v14787_v51, %v17309_v16  ;;  %v26425_v45 = vmax.f32 %v15275_v44, %v15279_v18  ;;  %v26427_v3 = vpop.f32.mrb[77].mxu1 }
 0x866   :  { %v14824_v34 = vcombine.high %v14712_v29, %v14712_v29  ;;  %v14831_v25 = vrot.slane %v14712_v29, %v28426_v17  ;;  %v14711_v54 = vsel %vm14679_vm1, %v14663_v30, %v14695_v4  ;;  %v14698_v21 = vmul.f32 0.01, %v14666_v43 }
 0x867   :  { %v15278_v33 = vmax.f32 %v14789_v13, %v17310_v6  ;;  %v26430_v14 = vmax.f32 %v15276_v23, %v15280_v20  ;;  %v26432_v53 = vmax.f32 %v15277_v11, %v15281_v42  ;;  %v15414_v22 = vrot.slane %v26425_v45, %v28176_v28 }
 0x868   :  { %v14838_v37 = vrot.slane %v14824_v34, %v28426_v17  ;;  %v14839_v47 = vcombine.high %v14831_v25, %v14831_v25  ;;  %v17319_v52 = vrot.slane %v14831_v25, 9  ;;  %v14807_v39 = vcombine.high %v14711_v54, %v14711_v54  ;;  %v26437_v49 = vpop.f32.mrb[78].mxu1 }
 0x869   :  { %v26439_v56 = vmax.f32 %v15278_v33, %v15282_v5  ;;  %v15418_v40 = vrot.slane %v26430_v14, %v28176_v28  ;;  %v15422_v10 = vrot.slane %v26432_v53, %v28176_v28  ;;  %v15526_v59 = vsel %vm10040_vm12, %v15414_v22, %v15525_v2  ;;  %v26446_v1 = vpop.f32.mrb[79].mxu1 }
 0x86a   :  { %v14840_v62 = vcombine.high %v14838_v37, %v14838_v37  ;;  %v17320_v9 = vrot.slane %v14839_v47, 9  ;;  %v17321_v0 = vrot.slane %v14838_v37, 9  ;;  %v15287_v24 = vmax.f32 %v14831_v25, %v17319_v52 }
 0x86b   :  { %v15426_v58 = vrot.slane %v26439_v56, %v28176_v28  ;;  %v15527_v18 = vsel %vm10042_vm13, %v15418_v40, %v15526_v59  ;;  %v14814_v42 = vrot.slane %v14711_v54, %v28426_v17  ;;  %v14821_v57 = vrot.slane %v14807_v39, %v28426_v17 }
 0x86c   :  { %v15528_v46 = vsel %vm10044_vm14, %v15422_v10, %v15527_v18  ;;  %v17322_v55 = vrot.slane %v14840_v62, 9  ;;  %v15288_v27 = vmax.f32 %v14839_v47, %v17320_v9  ;;  %v15289_v26 = vmax.f32 %v14838_v37, %v17321_v0 }
 0x86d   :  { %v15529_v20 = vsel %vm10046_vm15, %v15426_v58, %v15528_v46  ;;  %v14822_v5 = vcombine.high %v14814_v42, %v14814_v42  ;;  %v14823_v19 = vcombine.high %v14821_v57, %v14821_v57  ;;  %v17315_v51 = vrot.slane %v14814_v42, 9 }
 0x86e   :  { %v26456_v7 = vsel %vm15555_vm0, %v15529_v20, 0.0  ;;  %v15290_v61 = vmax.f32 %v14840_v62, %v17322_v55  ;;  %v17317_v2 = vrot.slane %v14821_v57, 9  ;;  %v14714_v60 = vsel %vm14682_vm2, %v14666_v43, %v14698_v21 }
 0x86f   :  { %v17316_v30 = vrot.slane %v14822_v5, 9  ;;  %v17318_v13 = vrot.slane %v14823_v19, 9  ;;  %v15283_v15 = vmax.f32 %v14814_v42, %v17315_v51  ;;  %v14858_v16 = vcombine.high %v14714_v60, %v14714_v60 }
 0x870   :  { %v15285_v44 = vmax.f32 %v14821_v57, %v17317_v2  ;;  %v14865_v29 = vrot.slane %v14714_v60, %v28426_v17  ;;  %v14665_v4 = vadd.f32 %v26376_v38, %v26388_v12  ;;  %v14668_v6 = vadd.f32 %v26398_v32, %v26376_v38 }
 0x871   :  { %v15284_v23 = vmax.f32 %v14822_v5, %v17316_v30  ;;  %v15286_v11 = vmax.f32 %v14823_v19, %v17318_v13  ;;  %v26464_v34 = vmax.f32 %v15283_v15, %v15287_v24  ;;  %v14872_v25 = vrot.slane %v14858_v16, %v28426_v17 }
 0x872   :  { %v26467_v43 = vmax.f32 %v15285_v44, %v15289_v26  ;;  %v14873_v54 = vcombine.high %v14865_v29, %v14865_v29  ;;  %v17327_v21 = vrot.slane %v14865_v29, 9  ;;  %vm14681_vm4 = vcmp.gt.f32.partialorder %v14665_v4, 0.0 }
 0x873   :  { %v26469_v33 = vmax.f32 %v15284_v23, %v15288_v27  ;;  %v26471_v22 = vmax.f32 %v15286_v11, %v15290_v61  ;;  %v15430_v12 = vrot.slane %v26464_v34, %v28176_v28  ;;  %v14874_v37 = vcombine.high %v14872_v25, %v14872_v25 }
 0x874   :  { %v15438_v32 = vrot.slane %v26467_v43, %v28176_v28  ;;  %v17328_v47 = vrot.slane %v14873_v54, 9  ;;  %v17329_v52 = vrot.slane %v14872_v25, 9  ;;  %v15295_v39 = vmax.f32 %v14865_v29, %v17327_v21 }
 0x875   :  { %v15434_v40 = vrot.slane %v26469_v33, %v28176_v28  ;;  %v15442_v10 = vrot.slane %v26471_v22, %v28176_v28  ;;  %v17330_v59 = vrot.slane %v14874_v37, 9  ;;  %v14697_v62 = vmul.f32 0.01, %v14665_v4 }
 0x876   :  { %v15296_v9 = vmax.f32 %v14873_v54, %v17328_v47  ;;  %v15297_v0 = vmax.f32 %v14872_v25, %v17329_v52  ;;  %vm14684_vm5 = vcmp.gt.f32.partialorder %v14668_v6, 0.0  ;;  %v14700_v24 = vmul.f32 0.01, %v14668_v6 }
 0x877   :  { %v15530_v58 = vsel %vm10034_vm8, %v15434_v40, %v15430_v12  ;;  %v15298_v18 = vmax.f32 %v14874_v37, %v17330_v59  ;;  %v14713_v42 = vsel %vm14681_vm4, %v14665_v4, %v14697_v62  ;;  %v14667_v57 = vadd.f32 %v26376_v38, %v26407_v48 }
 0x878   :  { %v15531_v46 = vsel %vm10036_vm10, %v15438_v32, %v15530_v58  ;;  %v14841_v55 = vcombine.high %v14713_v42, %v14713_v42  ;;  %v14848_v27 = vrot.slane %v14713_v42, %v28426_v17  ;;  %v14716_v26 = vsel %vm14684_vm5, %v14668_v6, %v14700_v24 }
 0x879   :  { %v15532_v20 = vsel %vm10038_vm11, %v15442_v10, %v15531_v46  ;;  %v14892_v5 = vcombine.high %v14716_v26, %v14716_v26  ;;  %v14899_v19 = vrot.slane %v14716_v26, %v28426_v17  ;;  %vm14683_vm6 = vcmp.gt.f32.partialorder %v14667_v57, 0.0 }
 0x87a   :  { %v14855_v51 = vrot.slane %v14841_v55, %v28426_v17  ;;  %v14856_v61 = vcombine.high %v14848_v27, %v14848_v27  ;;  %v17323_v2 = vrot.slane %v14848_v27, 9  ;;  %v14699_v60 = vmul.f32 0.01, %v14667_v57 }
 0x87b   :  { %v14906_v30 = vrot.slane %v14892_v5, %v28426_v17  ;;  %v14907_v48 = vcombine.high %v14899_v19, %v14899_v19  ;;  %v17335_v13 = vrot.slane %v14899_v19, 9  ;;  %v14670_v15 = vadd.f32 %v26415_v35, %v26376_v38 }
 0x87c   :  { %v14857_v16 = vcombine.high %v14855_v51, %v14855_v51  ;;  %v17324_v44 = vrot.slane %v14856_v61, 9  ;;  %v17325_v29 = vrot.slane %v14855_v51, 9  ;;  %v15291_v4 = vmax.f32 %v14848_v27, %v17323_v2 }
 0x87d   :  { %v14908_v6 = vcombine.high %v14906_v30, %v14906_v30  ;;  %v17336_v23 = vrot.slane %v14907_v48, 9  ;;  %v17337_v11 = vrot.slane %v14906_v30, 9  ;;  %v15303_v25 = vmax.f32 %v14899_v19, %v17335_v13 }
 0x87e   :  { %v17326_v54 = vrot.slane %v14857_v16, 9  ;;  %v15292_v21 = vmax.f32 %v14856_v61, %v17324_v44  ;;  %v15293_v12 = vmax.f32 %v14855_v51, %v17325_v29  ;;  %v26493_v37 = vmax.f32 %v15291_v4, %v15295_v39 }
 0x87f   :  { %v17338_v32 = vrot.slane %v14908_v6, 9  ;;  %v15304_v47 = vmax.f32 %v14907_v48, %v17336_v23  ;;  %v15305_v52 = vmax.f32 %v14906_v30, %v17337_v11  ;;  %v14715_v40 = vsel %vm14683_vm6, %v14667_v57, %v14699_v60 }
 0x880   :  { %v15294_v10 = vmax.f32 %v14857_v16, %v17326_v54  ;;  %v26496_v35 = vmax.f32 %v15292_v21, %v15296_v9  ;;  %v26498_v59 = vmax.f32 %v15293_v12, %v15297_v0  ;;  %v15446_v62 = vrot.slane %v26493_v37, %v28176_v28 }
 0x881   :  { %v15306_v24 = vmax.f32 %v14908_v6, %v17338_v32  ;;  %v14875_v58 = vcombine.high %v14715_v40, %v14715_v40  ;;  %v14882_v42 = vrot.slane %v14715_v40, %v28426_v17  ;;  %vm14686_vm3 = vcmp.gt.f32.partialorder %v14670_v15, 0.0 }
 0x882   :  { %v26503_v39 = vmax.f32 %v15294_v10, %v15298_v18  ;;  %v15450_v46 = vrot.slane %v26496_v35, %v28176_v28  ;;  %v15454_v57 = vrot.slane %v26498_v59, %v28176_v28  ;;  %v15533_v9 = vsel %vm10040_vm12, %v15446_v62, %v15532_v20 }
 0x883   :  { %v14889_v0 = vrot.slane %v14875_v58, %v28426_v17  ;;  %v14890_v55 = vcombine.high %v14882_v42, %v14882_v42  ;;  %v17331_v27 = vrot.slane %v14882_v42, 9  ;;  %v14702_v26 = vmul.f32 0.01, %v14670_v15 }
 0x884   :  { %v15458_v5 = vrot.slane %v26503_v39, %v28176_v28  ;;  %v15534_v19 = vsel %vm10042_vm13, %v15450_v46, %v15533_v9  ;;  %v14669_v18 = vadd.f32 %v26376_v38, %v26419_v31  ;;  %v14672_v51 = vadd.f32 %v26423_v63, %v26376_v38 }
 0x885   :  { %v15535_v61 = vsel %vm10044_vm14, %v15454_v57, %v15534_v19  ;;  %v14891_v2 = vcombine.high %v14889_v0, %v14889_v0  ;;  %v17332_v20 = vrot.slane %v14890_v55, 9  ;;  %v17333_v60 = vrot.slane %v14889_v0, 9 }
 0x886   :  { %v15536_v30 = vsel %vm10046_vm15, %v15458_v5, %v15535_v61  ;;  %v15299_v48 = vmax.f32 %v14882_v42, %v17331_v27  ;;  %v14718_v13 = vsel %vm14686_vm3, %v14670_v15, %v14702_v26  ;;  %vm14685_vm7 = vcmp.gt.f32.partialorder %v14669_v18, 0.0 }
 0x887   :  { %v15557_v16 = vsel %vm15555_vm0, %v15536_v30, 0.0  ;;  %v17334_v44 = vrot.slane %v14891_v2, 9  ;;  %v15300_v29 = vmax.f32 %v14890_v55, %v17332_v20  ;;  %v15301_v4 = vmax.f32 %v14889_v0, %v17333_v60 }
 0x888   :  { %v26523_v31 = vadd.f32 %v15557_v16, %v26456_v7  ;;  %v26525_v63 = vmax.f32 %v15299_v48, %v15303_v25  ;;  %v14926_v6 = vcombine.high %v14718_v13, %v14718_v13  ;;  %v14933_v23 = vrot.slane %v14718_v13, %v28426_v17 }
 0x889   :  { %v15302_v11 = vmax.f32 %v14891_v2, %v17334_v44  ;;  %v26528_v54 = vmax.f32 %v15300_v29, %v15304_v47  ;;  %v26530_v21 = vmax.f32 %v15301_v4, %v15305_v52  ;;  %v14701_v15 = vmul.f32 0.01, %v14669_v18 }
 0x88a   :  { %v15462_v12 = vrot.slane %v26525_v63, %v28176_v28  ;;  %v14940_v32 = vrot.slane %v14926_v6, %v28426_v17  ;;  %v14941_v40 = vcombine.high %v14933_v23, %v14933_v23  ;;  %v17343_v10 = vrot.slane %v14933_v23, 9 }
 0x88b   :  { %v26535_v7 = vmax.f32 %v15302_v11, %v15306_v24  ;;  %v15466_v25 = vrot.slane %v26528_v54, %v28176_v28  ;;  %v15470_v62 = vrot.slane %v26530_v21, %v28176_v28  ;;  %v14717_v47 = vsel %vm14685_vm7, %v14669_v18, %v14701_v15 }
 0x88c   :  { %v14942_v52 = vcombine.high %v14940_v32, %v14940_v32  ;;  %v17344_v58 = vrot.slane %v14941_v40, 9  ;;  %v17345_v42 = vrot.slane %v14940_v32, 9  ;;  %v15311_v46 = vmax.f32 %v14933_v23, %v17343_v10 }
 0x88d   :  { %v15474_v57 = vrot.slane %v26535_v7, %v28176_v28  ;;  %v15537_v9 = vsel %vm10034_vm8, %v15466_v25, %v15462_v12  ;;  %v14909_v0 = vcombine.high %v14717_v47, %v14717_v47  ;;  %v14916_v24 = vrot.slane %v14717_v47, %v28426_v17 }
 0x88e   :  { %v15538_v55 = vsel %vm10036_vm10, %v15470_v62, %v15537_v9  ;;  %v17346_v27 = vrot.slane %v14942_v52, 9  ;;  %v15312_v26 = vmax.f32 %v14941_v40, %v17344_v58  ;;  %v15313_v5 = vmax.f32 %v14940_v32, %v17345_v42 }
 0x88f   :  { %v14923_v19 = vrot.slane %v14909_v0, %v28426_v17  ;;  %v14924_v18 = vcombine.high %v14916_v24, %v14916_v24  ;;  %v17339_v61 = vrot.slane %v14916_v24, 9  ;;  %v15539_v2 = vsel %vm10038_vm11, %v15474_v57, %v15538_v55 }
 0x890   :  { %v15314_v20 = vmax.f32 %v14942_v52, %v17346_v27  ;;  %vm14688_vm9 = vcmp.gt.f32.partialorder %v14672_v51, 0.0  ;;  %v14704_v60 = vmul.f32 0.01, %v14672_v51  ;;  %v14671_v30 = vadd.f32 %v26376_v38, %v26427_v3 }
 0x891   :  { %v14925_v48 = vcombine.high %v14923_v19, %v14923_v19  ;;  %v17340_v13 = vrot.slane %v14924_v18, 9  ;;  %v17341_v16 = vrot.slane %v14923_v19, 9  ;;  %v15307_v44 = vmax.f32 %v14916_v24, %v17339_v61 }
 0x892   :  { %v14720_v29 = vsel %vm14688_vm9, %v14672_v51, %v14704_v60  ;;  %vm14687_vm1 = vcmp.gt.f32.partialorder %v14671_v30, 0.0  ;;  %v14703_v4 = vmul.f32 0.01, %v14671_v30  ;;  %v14674_v6 = vadd.f32 %v26437_v49, %v26376_v38 }
 0x893   :  { %v17342_v23 = vrot.slane %v14925_v48, 9  ;;  %v15308_v11 = vmax.f32 %v14924_v18, %v17340_v13  ;;  %v15309_v15 = vmax.f32 %v14923_v19, %v17341_v16  ;;  %v26553_v12 = vmax.f32 %v15307_v44, %v15311_v46 }
 0x894   :  { %v14960_v32 = vcombine.high %v14720_v29, %v14720_v29  ;;  %v14967_v40 = vrot.slane %v14720_v29, %v28426_v17  ;;  %v14719_v10 = vsel %vm14687_vm1, %v14671_v30, %v14703_v4  ;;  %vm14690_vm2 = vcmp.gt.f32.partialorder %v14674_v6, 0.0 }
 0x895   :  { %v15310_v3 = vmax.f32 %v14925_v48, %v17342_v23  ;;  %v26556_v25 = vmax.f32 %v15308_v11, %v15312_v26  ;;  %v26558_v62 = vmax.f32 %v15309_v15, %v15313_v5  ;;  %v15478_v51 = vrot.slane %v26553_v12, %v28176_v28 }
 0x896   :  { %v14974_v49 = vrot.slane %v14960_v32, %v28426_v17  ;;  %v14975_v47 = vcombine.high %v14967_v40, %v14967_v40  ;;  %v17351_v52 = vrot.slane %v14967_v40, 9  ;;  %v14943_v58 = vcombine.high %v14719_v10, %v14719_v10 }
 0x897   :  { %v26563_v42 = vmax.f32 %v15310_v3, %v15314_v20  ;;  %v15482_v46 = vrot.slane %v26556_v25, %v28176_v28  ;;  %v15486_v57 = vrot.slane %v26558_v62, %v28176_v28  ;;  %v15540_v9 = vsel %vm10040_vm12, %v15478_v51, %v15539_v2 }
 0x898   :  { %v14976_v0 = vcombine.high %v14974_v49, %v14974_v49  ;;  %v17352_v24 = vrot.slane %v14975_v47, 9  ;;  %v17353_v55 = vrot.slane %v14974_v49, 9  ;;  %v15319_v27 = vmax.f32 %v14967_v40, %v17351_v52 }
 0x899   :  { %v15490_v26 = vrot.slane %v26563_v42, %v28176_v28  ;;  %v15541_v5 = vsel %vm10042_vm13, %v15482_v46, %v15540_v9  ;;  %v14950_v19 = vrot.slane %v14719_v10, %v28426_v17  ;;  %v14957_v18 = vrot.slane %v14943_v58, %v28426_v17 }
 0x89a   :  { %v15542_v61 = vsel %vm10044_vm14, %v15486_v57, %v15541_v5  ;;  %v17354_v20 = vrot.slane %v14976_v0, 9  ;;  %v15320_v60 = vmax.f32 %v14975_v47, %v17352_v24  ;;  %v15321_v30 = vmax.f32 %v14974_v49, %v17353_v55 }
 0x89b   :  { %v15543_v2 = vsel %vm10046_vm15, %v15490_v26, %v15542_v61  ;;  %v14958_v48 = vcombine.high %v14950_v19, %v14950_v19  ;;  %v14959_v13 = vcombine.high %v14957_v18, %v14957_v18  ;;  %v17347_v16 = vrot.slane %v14950_v19, 9 }
 0x89c   :  { %v15559_v44 = vsel %vm15555_vm0, %v15543_v2, 0.0  ;;  %v15322_v29 = vmax.f32 %v14976_v0, %v17354_v20  ;;  %v17349_v4 = vrot.slane %v14957_v18, 9  ;;  %v14706_v23 = vmul.f32 0.01, %v14674_v6 }
 0x89d   :  { %v15560_v11 = vadd.f32 %v15559_v44, %v26523_v31  ;;  %v17348_v15 = vrot.slane %v14958_v48, 9  ;;  %v17350_v32 = vrot.slane %v14959_v13, 9  ;;  %v15315_v40 = vmax.f32 %v14950_v19, %v17347_v16 }
 0x89e   :  { %v15317_v10 = vmax.f32 %v14957_v18, %v17349_v4  ;;  %v14722_v3 = vsel %vm14690_vm2, %v14674_v6, %v14706_v23  ;;  %v14673_v51 = vadd.f32 %v26376_v38, %v26446_v1 }
 0x89f   :  { %v15316_v49 = vmax.f32 %v14958_v48, %v17348_v15  ;;  %v15318_v47 = vmax.f32 %v14959_v13, %v17350_v32  ;;  %v26582_v52 = vmax.f32 %v15315_v40, %v15319_v27  ;;  %v14994_v58 = vcombine.high %v14722_v3, %v14722_v3 }
 0x8a0   :  { %v26584_v46 = vmax.f32 %v15317_v10, %v15321_v30  ;;  %v15001_v57 = vrot.slane %v14722_v3, %v28426_v17  ;;  %vm14689_vm4 = vcmp.gt.f32.partialorder %v14673_v51, 0.0  ;;  %v14705_v31 = vmul.f32 0.01, %v14673_v51 }
 0x8a1   :  { %v26587_v9 = vmax.f32 %v15316_v49, %v15320_v60  ;;  %v26589_v0 = vmax.f32 %v15318_v47, %v15322_v29  ;;  %v15494_v6 = vrot.slane %v26582_v52, %v28176_v28  ;;  %v15008_v38 = vrot.slane %v14994_v58, %v28426_v17 }
 0x8a2   :  { %v15502_v1 = vrot.slane %v26584_v46, %v28176_v28  ;;  %v15009_v24 = vcombine.high %v15001_v57, %v15001_v57  ;;  %v17359_v55 = vrot.slane %v15001_v57, 9  ;;  %v14721_v27 = vsel %vm14689_vm4, %v14673_v51, %v14705_v31 }
 0x8a3   :  { %v15498_v26 = vrot.slane %v26587_v9, %v28176_v28  ;;  %v15506_v5 = vrot.slane %v26589_v0, %v28176_v28  ;;  %v15010_v19 = vcombine.high %v15008_v38, %v15008_v38  ;;  %v17361_v18 = vrot.slane %v15008_v38, 9 }
 0x8a4   :  { %v17360_v61 = vrot.slane %v15009_v24, 9  ;;  %v14977_v20 = vcombine.high %v14721_v27, %v14721_v27  ;;  %v14984_v60 = vrot.slane %v14721_v27, %v28426_v17  ;;  %v15327_v44 = vmax.f32 %v15001_v57, %v17359_v55 }
 0x8a5   :  { %v15544_v30 = vsel %vm10034_vm8, %v15498_v26, %v15494_v6  ;;  %v17362_v48 = vrot.slane %v15010_v19, 9  ;;  %v15329_v29 = vmax.f32 %v15008_v38, %v17361_v18 }
 0x8a6   :  { %v15545_v2 = vsel %vm10036_vm10, %v15502_v1, %v15544_v30  ;;  %v14991_v13 = vrot.slane %v14977_v20, %v28426_v17  ;;  %v14992_v16 = vcombine.high %v14984_v60, %v14984_v60  ;;  %v17355_v4 = vrot.slane %v14984_v60, 9 }
 0x8a7   :  { %v15546_v23 = vsel %vm10038_vm11, %v15506_v5, %v15545_v2  ;;  %v15328_v15 = vmax.f32 %v15009_v24, %v17360_v61  ;;  %v15330_v51 = vmax.f32 %v15010_v19, %v17362_v48 }
 0x8a8   :  { %v14993_v32 = vcombine.high %v14991_v13, %v14991_v13  ;;  %v17356_v40 = vrot.slane %v14992_v16, 9  ;;  %v17357_v10 = vrot.slane %v14991_v13, 9  ;;  %v15323_v3 = vmax.f32 %v14984_v60, %v17355_v4 }
 0x8aa   :  { %v17358_v49 = vrot.slane %v14993_v32, 9  ;;  %v15324_v47 = vmax.f32 %v14992_v16, %v17356_v40  ;;  %v15325_v58 = vmax.f32 %v14991_v13, %v17357_v10  ;;  %v15359_v31 = vmax.f32 %v15323_v3, %v15327_v44 }
 0x8ac   :  { %v15326_v6 = vmax.f32 %v14993_v32, %v17358_v49  ;;  %v15360_v1 = vmax.f32 %v15324_v47, %v15328_v15  ;;  %v15361_v27 = vmax.f32 %v15325_v58, %v15329_v29  ;;  %v15510_v26 = vrot.slane %v15359_v31, %v28176_v28 }
 0x8ae   :  { %v15362_v57 = vmax.f32 %v15326_v6, %v15330_v51  ;;  %v15514_v38 = vrot.slane %v15360_v1, %v28176_v28  ;;  %v15518_v55 = vrot.slane %v15361_v27, %v28176_v28  ;;  %v15547_v24 = vsel %vm10040_vm12, %v15510_v26, %v15546_v23 }
 0x8b0   :  { %v15522_v5 = vrot.slane %v15362_v57, %v28176_v28  ;;  %v15548_v19 = vsel %vm10042_vm13, %v15514_v38, %v15547_v24 }
 0x8b1   :  { %v15549_v18 = vsel %vm10044_vm14, %v15518_v55, %v15548_v19 }
 0x8b2   :  { %v15550_v61 = vsel %vm10046_vm15, %v15522_v5, %v15549_v18 }
 0x8b3   :  { %v15561_v20 = vsel %vm15555_vm0, %v15550_v61, 0.0 }
 0x8b4   :  { %v15562_v60 = vadd.f32 %v15561_v20, %v15560_v11 }
 0x8b6   :  { %v15563_v30 = vrot.slane %v15562_v60, 4 }
 0x8b8   :  { %v15564_v2 = vadd.f32 %v15563_v30, %v15562_v60 }
 0x8ba   :  { %v15565_v48 = vrot.slane %v15564_v2, 2 }
 0x8bc   :  { %v15566_v13 = vadd.f32 %v15565_v48, %v15564_v2 }
 0x8be   :  { %v15567_v16 = vrot.slane %v15566_v13, 1 }
 0x8c0   :  { %v15568_v44 = vadd.f32 %v15567_v16, %v15566_v13 }
 0x8c2   :  { %v15570_v29 = vmul.f32 0.03125, %v15568_v44 }
 0x8c4   :  { %v15574_v4 = vrot.slane %v15570_v29, %v28176_v28 }
 0x8c6   :  { %v15576_v23 = vcombine.high %v15574_v4, %v15574_v4  ;;  %v15583_v15 = vrot.slane %v15574_v4, %v28426_v17 }
 0x8c8   :  { %v15590_v32 = vrot.slane %v15576_v23, %v28426_v17  ;;  %v15591_v40 = vcombine.high %v15583_v15, %v15583_v15  ;;  %v15593_v10 = vrot.slane %v15583_v15, 1  ;;  %v26618_v3 = vsub.f32 %v26386_v36, %v15583_v15 }
 0x8c9   :  { %v26621_v11 = vsub.f32 %v26464_v34, %v15583_v15  ;;  %v26624_v51 = vsub.f32 %v26525_v63, %v15583_v15  ;;  %v26627_v49 = vsub.f32 %v26582_v52, %v15583_v15 }
 0x8ca   :  { %v15592_v47 = vcombine.high %v15590_v32, %v15590_v32  ;;  %v15594_v58 = vrot.slane %v15591_v40, 1  ;;  %v15595_v6 = vrot.slane %v15590_v32, 1  ;;  %v26630_v26 = vsub.f32 %v26392_v50, %v15593_v10 }
 0x8cb   :  { %v26633_v38 = vsub.f32 %v26394_v41, %v15591_v40  ;;  %v26636_v36 = vsub.f32 %v26425_v45, %v15590_v32  ;;  %v26639_v34 = vsub.f32 %v26469_v33, %v15593_v10  ;;  %v26642_v63 = vsub.f32 %v26467_v43, %v15591_v40 }
 0x8cc   :  { %28556 = vst [vmem:[#allocation50_spill] sm:$0xff] %v26630_v26  ;;  %v15596_v52 = vrot.slane %v15592_v47, 1  ;;  %v26645_v55 = vsub.f32 %v26400_v8, %v15594_v58  ;;  %v26648_v24 = vsub.f32 %v26430_v14, %v15595_v6  ;;  %v26651_v50 = vsub.f32 %v26432_v53, %v15592_v47 }
 0x8cd   :  { %28557 = vst [vmem:[#allocation143_spill] sm:$0xff] %v26633_v38  ;;  %28558 = vst [vmem:[#allocation144_spill] sm:$0xff] %v26636_v36  ;;  %v26654_v41 = vsub.f32 %v26471_v22, %v15594_v58  ;;  %v26657_v45 = vsub.f32 %v26493_v37, %v15590_v32  ;;  %v26660_v33 = vsub.f32 %v26496_v35, %v15595_v6 }
 0x8ce   :  { %28559 = vst [vmem:[#allocation145_spill] sm:$0xff] %v26639_v34  ;;  %28560 = vst [vmem:[#allocation146_spill] sm:$0xff] %v26642_v63  ;;  %v26663_v43 = vsub.f32 %v26498_v59, %v15592_v47  ;;  %v26666_v8 = vsub.f32 %v26439_v56, %v15596_v52  ;;  %v26669_v14 = vsub.f32 %v26503_v39, %v15596_v52 }
 0x8cf   :  { %28561 = vst [vmem:[#allocation151_spill] sm:$0xff] %v26645_v55  ;;  %28562 = vst [vmem:[#allocation152_spill] sm:$0xff] %v26654_v41  ;;  %v26672_v53 = vsub.f32 %v26528_v54, %v15593_v10  ;;  %v26675_v22 = vsub.f32 %v26530_v21, %v15591_v40  ;;  %v26678_v37 = vsub.f32 %v26535_v7, %v15594_v58 }
 0x8d0   :  { %28563 = vst [vmem:[#allocation153_spill] sm:$0xff] %v26657_v45  ;;  %v26681_v35 = vsub.f32 %v26553_v12, %v15590_v32  ;;  %v26684_v59 = vsub.f32 %v26556_v25, %v15595_v6  ;;  %v26687_v56 = vsub.f32 %v26558_v62, %v15592_v47  ;;  %v26690_v39 = vsub.f32 %v26563_v42, %v15596_v52 }
 0x8d1   :  { %28564 = vst [vmem:[#allocation154_spill] sm:$0xff] %v26672_v53  ;;  %28565 = vst [vmem:[#allocation159_spill] sm:$0xff] %v26675_v22  ;;  %v26693_v54 = vsub.f32 %v26587_v9, %v15593_v10  ;;  %v26696_v21 = vsub.f32 %v26584_v46, %v15591_v40  ;;  %v26699_v7 = vsub.f32 %v26589_v0, %v15594_v58 }
 0x8d2   :  { %28566 = vst [vmem:[#allocation160_spill] sm:$0xff] %v26678_v37  ;;  %v26701_v12 = vsub.f32 %v15359_v31, %v15590_v32  ;;  %v26703_v5 = vsub.f32 %v15360_v1, %v15595_v6  ;;  %v26705_v25 = vsub.f32 %v15361_v27, %v15592_v47  ;;  %v26707_v62 = vsub.f32 %v15362_v57, %v15596_v52 }
 0x8d3   :  { %v26711_v42 = vmul.f32 %v26618_v3, %v26618_v3  ;;  %v26715_v9 = vmul.f32 %v26630_v26, %v26630_v26  ;;  %v26719_v46 = vmul.f32 %v26633_v38, %v26633_v38  ;;  %v26723_v0 = vmul.f32 %v26645_v55, %v26645_v55 }
 0x8d4   :  { %28567 = vst [vmem:[#allocation161_spill] sm:$0xff] %v26707_v62  ;;  %v26727_v31 = vmul.f32 %v26636_v36, %v26636_v36  ;;  %v26731_v1 = vmul.f32 %v26648_v24, %v26648_v24  ;;  %v26735_v27 = vmul.f32 %v26651_v50, %v26651_v50  ;;  %v26739_v57 = vmul.f32 %v26666_v8, %v26666_v8 }
 0x8d5   :  { %v15645_v19 = vmul.f32 %v26621_v11, %v26621_v11  ;;  %v15646_v18 = vmul.f32 %v26639_v34, %v26639_v34  ;;  %v15647_v61 = vmul.f32 %v26642_v63, %v26642_v63  ;;  %v26749_v20 = vmul.f32 %v26654_v41, %v26654_v41 }
 0x8d6   :  { %v26753_v60 = vmul.f32 %v26657_v45, %v26657_v45  ;;  %v26757_v30 = vmul.f32 %v26660_v33, %v26660_v33  ;;  %v26761_v2 = vmul.f32 %v26663_v43, %v26663_v43  ;;  %v26765_v48 = vmul.f32 %v26669_v14, %v26669_v14 }
 0x8d7   :  { %v15653_v13 = vmul.f32 %v26624_v51, %v26624_v51  ;;  %v15654_v16 = vmul.f32 %v26672_v53, %v26672_v53  ;;  %v15655_v44 = vmul.f32 %v26675_v22, %v26675_v22  ;;  %v15656_v29 = vmul.f32 %v26678_v37, %v26678_v37 }
 0x8d8   :  { %v15657_v4 = vmul.f32 %v26681_v35, %v26681_v35  ;;  %v26779_v23 = vmul.f32 %v26684_v59, %v26684_v59  ;;  %v26783_v15 = vmul.f32 %v26687_v56, %v26687_v56  ;;  %v26787_v32 = vmul.f32 %v26690_v39, %v26690_v39 }
 0x8d9   :  { %v15661_v40 = vmul.f32 %v26627_v49, %v26627_v49  ;;  %v15662_v10 = vmul.f32 %v26693_v54, %v26693_v54  ;;  %v15663_v47 = vmul.f32 %v26696_v21, %v26696_v21  ;;  %v15664_v58 = vmul.f32 %v26699_v7, %v26699_v7 }
 0x8da   :  { %v15665_v6 = vmul.f32 %v26701_v12, %v26701_v12  ;;  %v15666_v52 = vmul.f32 %v26703_v5, %v26703_v5  ;;  %v15667_v37 = vmul.f32 %v26705_v25, %v26705_v25  ;;  %v15668_v22 = vmul.f32 %v26707_v62, %v26707_v62 }
 0x8db   :  { %v15704_v53 = vrot.slane %v26711_v42, %v28176_v28  ;;  %v15708_v45 = vrot.slane %v26715_v9, %v28176_v28  ;;  %v15712_v41 = vrot.slane %v26719_v46, %v28176_v28  ;;  %v15716_v63 = vrot.slane %v26723_v0, %v28176_v28 }
 0x8dc   :  { %v15720_v34 = vrot.slane %v26727_v31, %v28176_v28  ;;  %v15724_v36 = vrot.slane %v26731_v1, %v28176_v28  ;;  %v15728_v55 = vrot.slane %v26735_v27, %v28176_v28  ;;  %v15732_v42 = vrot.slane %v26739_v57, %v28176_v28 }
 0x8dd   :  { %v15736_v9 = vrot.slane %v15645_v19, %v28176_v28  ;;  %v15740_v38 = vrot.slane %v15646_v18, %v28176_v28  ;;  %v15744_v46 = vrot.slane %v15647_v61, %v28176_v28  ;;  %v15748_v0 = vrot.slane %v26749_v20, %v28176_v28 }
 0x8de   :  { %v15752_v31 = vrot.slane %v26753_v60, %v28176_v28  ;;  %v15756_v1 = vrot.slane %v26757_v30, %v28176_v28  ;;  %v15760_v27 = vrot.slane %v26761_v2, %v28176_v28  ;;  %v15764_v57 = vrot.slane %v26765_v48, %v28176_v28 }
 0x8df   :  { %v15768_v19 = vrot.slane %v15653_v13, %v28176_v28  ;;  %v15772_v18 = vrot.slane %v15654_v16, %v28176_v28  ;;  %v15776_v61 = vrot.slane %v15655_v44, %v28176_v28  ;;  %v15780_v20 = vrot.slane %v15656_v29, %v28176_v28 }
 0x8e0   :  { %v15784_v26 = vrot.slane %v15657_v4, %v28176_v28  ;;  %v15788_v60 = vrot.slane %v26779_v23, %v28176_v28  ;;  %v15792_v30 = vrot.slane %v26783_v15, %v28176_v28  ;;  %v15796_v2 = vrot.slane %v26787_v32, %v28176_v28 }
 0x8e1   :  { %v15800_v48 = vrot.slane %v15661_v40, %v28176_v28  ;;  %v15804_v13 = vrot.slane %v15662_v10, %v28176_v28  ;;  %v15808_v16 = vrot.slane %v15663_v47, %v28176_v28  ;;  %v15812_v44 = vrot.slane %v15664_v58, %v28176_v28 }
 0x8e2   :  { %v15816_v29 = vrot.slane %v15665_v6, %v28176_v28  ;;  %v15820_v4 = vrot.slane %v15666_v52, %v28176_v28  ;;  %v15824_v23 = vrot.slane %v15667_v37, %v28176_v28  ;;  %v15828_v62 = vrot.slane %v15668_v22, %v28176_v28 }
 0x8e3   :  { %v15829_v15 = vsel %vm10034_vm8, %v15708_v45, %v15704_v53  ;;  %v15836_v32 = vsel %vm10034_vm8, %v15740_v38, %v15736_v9  ;;  %v15843_v40 = vsel %vm10034_vm8, %v15772_v18, %v15768_v19  ;;  %v15850_v10 = vsel %vm10034_vm8, %v15804_v13, %v15800_v48 }
 0x8e4   :  { %v15830_v47 = vsel %vm10036_vm10, %v15712_v41, %v15829_v15  ;;  %v15837_v58 = vsel %vm10036_vm10, %v15744_v46, %v15836_v32  ;;  %v15844_v6 = vsel %vm10036_vm10, %v15776_v61, %v15843_v40  ;;  %v15851_v52 = vsel %vm10036_vm10, %v15808_v16, %v15850_v10  ;;  %v17364_v40 = vld [vmem:[%s27183_s8] ss:$0 sm:$0xff] }
 0x8e5   :  { %v15831_v37 = vsel %vm10038_vm11, %v15716_v63, %v15830_v47  ;;  %v15838_v22 = vsel %vm10038_vm11, %v15748_v0, %v15837_v58  ;;  %v15845_v45 = vsel %vm10038_vm11, %v15780_v20, %v15844_v6  ;;  %v15852_v38 = vsel %vm10038_vm11, %v15812_v44, %v15851_v52 }
 0x8e6   :  { %v15832_v53 = vsel %vm10040_vm12, %v15720_v34, %v15831_v37  ;;  %v15839_v9 = vsel %vm10040_vm12, %v15752_v31, %v15838_v22  ;;  %v15846_v41 = vsel %vm10040_vm12, %v15784_v26, %v15845_v45  ;;  %v15853_v46 = vsel %vm10040_vm12, %v15816_v29, %v15852_v38 }
 0x8e7   :  { %v15833_v19 = vsel %vm10042_vm13, %v15724_v36, %v15832_v53  ;;  %v15840_v18 = vsel %vm10042_vm13, %v15756_v1, %v15839_v9  ;;  %v15847_v63 = vsel %vm10042_vm13, %v15788_v60, %v15846_v41  ;;  %v15854_v0 = vsel %vm10042_vm13, %v15820_v4, %v15853_v46 }
 0x8e8   :  { %v15834_v61 = vsel %vm10044_vm14, %v15728_v55, %v15833_v19  ;;  %v15841_v20 = vsel %vm10044_vm14, %v15760_v27, %v15840_v18  ;;  %v15848_v34 = vsel %vm10044_vm14, %v15792_v30, %v15847_v63  ;;  %v15855_v31 = vsel %vm10044_vm14, %v15824_v23, %v15854_v0 }
 0x8e9   :  { %v15835_v26 = vsel %vm10046_vm15, %v15732_v42, %v15834_v61  ;;  %v15842_v48 = vsel %vm10046_vm15, %v15764_v57, %v15841_v20  ;;  %v15849_v36 = vsel %vm10046_vm15, %v15796_v2, %v15848_v34  ;;  %v15856_v1 = vsel %vm10046_vm15, %v15828_v62, %v15855_v31  ;;  %v17363_v62 = vld [vmem:[%s27182_s7] ss:$0 sm:$0xff]  ;;  %s19900_s7 = smov [#allocation4]  }
 0x8ea   :  { %v15861_v60 = vsel %vm15555_vm0, %v15835_v26, 0.0  ;;  %v15862_v13 = vsel %vm15555_vm0, %v15842_v48, 0.0  ;;  %v15864_v55 = vsel %vm15555_vm0, %v15849_v36, 0.0  ;;  %v15866_v30 = vsel %vm15555_vm0, %v15856_v1, 0.0  ;;  %s16283_s8 = sshll.u32 %s19900_s7, 4  ;;  %s16284_s8 = int_to_ptr.vmem [resolvable:$true] %s16283_s8 }
 0x8eb   :  { %v15863_v16 = vadd.f32 %v15862_v13, %v15861_v60  ;;  %v15949_v10 = vcombine.high %v17363_v62, %v17363_v62  ;;  %v16016_v47 = vcombine.high %v17364_v40, %v17364_v40  ;;  %v26892_v58 = vrot.slane %v17363_v62, %v28426_v17  ;;  %s19874_s15 = scalar_lea.vmem %s16284_s8, 512  ;;  %p19879_p1 = scmp.lt.s32.totalorder %s16284_s8, %s16284_s8 }
 0x8ec   :  { %v26898_v52 = vrot.slane %v17364_v40, %v28426_v17  ;;  %vm16269_vm12 = vcmask 125952   ;;  %p19875_p0 = scmp.ne.s32.totalorder %s16284_s8, %s19874_s15  ;;  %p19880_p2 = scmp.lt.s32.totalorder %s19874_s15, %s19874_s15 }
 0x8ed   :  { %v15865_v27 = vadd.f32 %v15864_v55, %v15863_v16  ;;  %v26895_v6 = vrot.slane %v15949_v10, %v28426_v17  ;;  %v26901_v37 = vrot.slane %v16016_v47, %v28426_v17  ;;  %v26905_v22 = vcombine.high %v26892_v58, %v26892_v58 }
 0x8ee   :  { %v26911_v53 = vcombine.high %v26898_v52, %v26898_v52  ;;  %v26915_v41 = vrot.slane %v26892_v58, 1  ;;  %v26927_v20 = vrot.slane %v26898_v52, 1  ;;  %p19881_p3 = por %p19880_p2, %p19879_p1 }
 0x8ef   :  { %v15867_v44 = vadd.f32 %v15866_v30, %v15865_v27  ;;  %v15965_v38 = vcombine.high %v26895_v6, %v26895_v6  ;;  %v26919_v46 = vcombine.high %v26901_v37, %v26901_v37  ;;  %v26923_v63 = vrot.slane %v26905_v22, 1 }
 0x8f0   :  { %v15968_v0 = vrot.slane %v26895_v6, 1  ;;  %v26930_v34 = vrot.slane %v26911_v53, 1  ;;  %v16035_v31 = vrot.slane %v26901_v37, 1  ;;  %p19882_p4 = pnand %p19881_p3, %p19875_p0 }
 0x8f1   :  { %v15868_v29 = vrot.slane %v15867_v44, 4  ;;  %v15969_v61 = vrot.slane %v15965_v38, 1  ;;  %v16036_v60 = vrot.slane %v26919_v46, 1 }
 0x8f3   :  { %v15869_v4 = vadd.f32 %v15868_v29, %v15867_v44 }
 0x8f5   :  { %v15870_v42 = vrot.slane %v15869_v4, 2 }
 0x8f7   :  { %v15871_v23 = vadd.f32 %v15870_v42, %v15869_v4 }
 0x8f9   :  { %v15872_v57 = vrot.slane %v15871_v23, 1 }
 0x8fb   :  { %v15873_v15 = vadd.f32 %v15872_v57, %v15871_v23 }
 0x8fd   :  { %v15874_v2 = vmul.f32 0.03125, %v15873_v15 }
 0x8ff   :  { %v15875_v32 = vadd.f32 1e-05, %v15874_v2 }
 0x901   :  { %19868 = vrsqrt.f32 %v15875_v32 }
 0x90b   :  { %v19869_v45 = vpop.eup %19868 }
 0x90c   :  { %v15880_v9 = vrot.slane %v19869_v45, %v28176_v28 }
 0x90e   :  { %v15882_v19 = vcombine.high %v15880_v9, %v15880_v9  ;;  %v15889_v18 = vrot.slane %v15880_v9, %v28426_v17 }
 0x910   :  { %v26934_v26 = vrot.slane %v15882_v19, %v28426_v17  ;;  %v26936_v48 = vcombine.high %v15889_v18, %v15889_v18  ;;  %v26938_v36 = vrot.slane %v15889_v18, 1  ;;  %v15935_v1 = vmul.f32 %v15889_v18, %v26627_v49 }
 0x911   :  { %v26943_v13 = vmul.f32 %v15889_v18, %v26618_v3  ;;  %v26946_v16 = vmul.f32 %v15889_v18, %v26621_v11  ;;  %v26949_v55 = vmul.f32 %v15889_v18, %v26624_v51 }
 0x912   :  { %v15898_v17 = vcombine.high %v26934_v26, %v26934_v26  ;;  %v26954_v27 = vrot.slane %v26936_v48, 1  ;;  %v15901_v30 = vrot.slane %v26934_v26, 1  ;;  %v26959_v49 = vmul.f32 %v26934_v26, %v26681_v35 }
 0x913   :  { %v15936_v3 = vmul.f32 %v26938_v36, %v26693_v54  ;;  %v15937_v11 = vmul.f32 %v26936_v48, %v26696_v21  ;;  %v15939_v51 = vmul.f32 %v26934_v26, %v26701_v12  ;;  %v16002_v44 = vmul.f32 %v26892_v58, %v15935_v1 }
 0x914   :  { %v15902_v29 = vrot.slane %v15898_v17, 1  ;;  %v15916_v4 = vmul.f32 %v15901_v30, %v26648_v24  ;;  %v15917_v42 = vmul.f32 %v15898_v17, %v26651_v50  ;;  %v15924_v23 = vmul.f32 %v15901_v30, %v26660_v33  ;;  %v28568_v33 = vld [vmem:[#allocation161_spill] sm:$0xff] }
 0x915   :  { %v15925_v35 = vmul.f32 %v15898_v17, %v26663_v43  ;;  %v15932_v57 = vmul.f32 %v15901_v30, %v26684_v59  ;;  %v15933_v54 = vmul.f32 %v15898_v17, %v26687_v56  ;;  %v15938_v21 = vmul.f32 %v26954_v27, %v26699_v7 }
 0x916   :  { %v15918_v12 = vmul.f32 %v15902_v29, %v26666_v8  ;;  %v15926_v15 = vmul.f32 %v15902_v29, %v26669_v14  ;;  %v15934_v2 = vmul.f32 %v15902_v29, %v26690_v39  ;;  %v15940_v24 = vmul.f32 %v15901_v30, %v26703_v5 }
 0x917   :  { %v15941_v50 = vmul.f32 %v15898_v17, %v26705_v25  ;;  %v15942_v32 = vmul.f32 %v15902_v29, %v28568_v33  ;;  %v15983_v43 = vmul.f32 %v15968_v0, %v15916_v4  ;;  %v26982_v62 = vmul.f32 %v15965_v38, %v15917_v42 }
 0x918   :  { %v15985_v59 = vmul.f32 %v15969_v61, %v15918_v12  ;;  %v15991_v56 = vmul.f32 %v15968_v0, %v15924_v23  ;;  %v26984_v40 = vmul.f32 %v15965_v38, %v15925_v35  ;;  %v15993_v7 = vmul.f32 %v15969_v61, %v15926_v15 }
 0x919   :  { %v15999_v10 = vmul.f32 %v15968_v0, %v15932_v57  ;;  %v26986_v8 = vmul.f32 %v15965_v38, %v15933_v54  ;;  %v16001_v14 = vmul.f32 %v15969_v61, %v15934_v2  ;;  %v16003_v39 = vmul.f32 %v26915_v41, %v15936_v3  ;;  %v28569_v54 = vld [vmem:[#allocation50_spill] sm:$0xff]  ;;  %v28570_v2 = vld [vmem:[#allocation143_spill] sm:$0xff] }
 0x91a   :  { %v16004_v5 = vmul.f32 %v26905_v22, %v15937_v11  ;;  %v16005_v25 = vmul.f32 %v26923_v63, %v15938_v21  ;;  %v16006_v47 = vmul.f32 %v26895_v6, %v15939_v51  ;;  %v16007_v45 = vmul.f32 %v15968_v0, %v15940_v24 }
 0x91b   :  { %v16008_v9 = vmul.f32 %v15965_v38, %v15941_v50  ;;  %v16009_v19 = vmul.f32 %v15969_v61, %v15942_v32  ;;  %v26992_v18 = vadd.f32 %v16035_v31, %v15983_v43  ;;  %v26994_v1 = vadd.f32 %v16036_v60, %v15985_v59  ;;  %v28571_v50 = vld [vmem:[#allocation151_spill] sm:$0xff]  ;;  %v28572_v32 = vld [vmem:[#allocation144_spill] sm:$0xff]  ;;  %v28573_v59 = vld [vmem:[#allocation145_spill] sm:$0xff] }
 0x91c   :  { %v26996_v17 = vadd.f32 %v16035_v31, %v15991_v56  ;;  %v26998_v30 = vadd.f32 %v16036_v60, %v15993_v7  ;;  %v27000_v29 = vadd.f32 %v16035_v31, %v15999_v10  ;;  %v27002_v3 = vadd.f32 %v16036_v60, %v16001_v14  ;;  %v28574_v10 = vld [vmem:[#allocation146_spill] sm:$0xff] }
 0x91d   :  { %v27005_v11 = vadd.f32 %v26898_v52, %v16002_v44  ;;  %v27008_v0 = vadd.f32 %v26927_v20, %v16003_v39  ;;  %v27011_v38 = vadd.f32 %v26911_v53, %v16004_v5  ;;  %v27014_v61 = vadd.f32 %v26930_v34, %v16005_v25  ;;  %v28575_v39 = vld [vmem:[#allocation152_spill] sm:$0xff]  ;;  %v28576_v25 = vld [vmem:[#allocation153_spill] sm:$0xff] }
 0x91e   :  { %v16073_v51 = vadd.f32 %v26901_v37, %v16006_v47  ;;  %v16074_v4 = vadd.f32 %v16035_v31, %v16007_v45  ;;  %v16075_v42 = vadd.f32 %v26919_v46, %v16008_v9  ;;  %v16076_v23 = vadd.f32 %v16036_v60, %v16009_v19  ;;  %v28577_v9 = vld [vmem:[#allocation154_spill] sm:$0xff] }
 0x91f   :  { %v16132_v35 = vrot.slane %v26992_v18, %v28176_v28  ;;  %v16164_v44 = vrot.slane %v26996_v17, %v28176_v28  ;;  %v16196_v57 = vrot.slane %v27000_v29, %v28176_v28  ;;  %v15912_v21 = vmul.f32 %v26938_v36, %v28569_v54 }
 0x920   :  { %v16224_v12 = vrot.slane %v16073_v51, %v28176_v28  ;;  %v16228_v15 = vrot.slane %v16074_v4, %v28176_v28  ;;  %v16232_v31 = vrot.slane %v16075_v42, %v28176_v28  ;;  %v16236_v60 = vrot.slane %v16076_v23, %v28176_v28  ;;  %v28578_v51 = vld [vmem:[#allocation159_spill] sm:$0xff]  ;;  %v28579_v42 = vld [vmem:[#allocation160_spill] sm:$0xff] }
 0x921   :  { %v15913_v24 = vmul.f32 %v26936_v48, %v28570_v2  ;;  %v15914_v33 = vmul.f32 %v26954_v27, %v28571_v50  ;;  %v15915_v43 = vmul.f32 %v26934_v26, %v28572_v32  ;;  %v15920_v56 = vmul.f32 %v26938_v36, %v28573_v59 }
 0x922   :  { %v16258_v7 = vsel %vm10034_vm8, %v16228_v15, %v16224_v12  ;;  %v15921_v14 = vmul.f32 %v26936_v48, %v28574_v10  ;;  %v15922_v5 = vmul.f32 %v26954_v27, %v28575_v39  ;;  %v15923_v47 = vmul.f32 %v26934_v26, %v28576_v25 }
 0x923   :  { %v16259_v45 = vsel %vm10036_vm10, %v16232_v31, %v16258_v7  ;;  %v15928_v19 = vmul.f32 %v26938_v36, %v28577_v9  ;;  %v15929_v4 = vmul.f32 %v26936_v48, %v28578_v51  ;;  %v15930_v23 = vmul.f32 %v26954_v27, %v28579_v42 }
 0x924   :  { %v16260_v54 = vsel %vm10038_vm11, %v16236_v60, %v16259_v45  ;;  %v15978_v12 = vmul.f32 %v26892_v58, %v26943_v13  ;;  %v15979_v15 = vmul.f32 %v26915_v41, %v15912_v21  ;;  %v15980_v26 = vmul.f32 %v26905_v22, %v15913_v24 }
 0x925   :  { %16277 = vst.msk [vmem:[#allocation4 + $0x1c] sm:$0xf] %vm16269_vm12, %v16260_v54  ;;  %v15981_v31 = vmul.f32 %v26923_v63, %v15914_v33  ;;  %v15982_v36 = vmul.f32 %v26895_v6, %v15915_v43  ;;  %v15986_v48 = vmul.f32 %v26892_v58, %v26946_v16  ;;  %v15987_v27 = vmul.f32 %v26915_v41, %v15920_v56 }
 0x926   :  { %v15988_v60 = vmul.f32 %v26905_v22, %v15921_v14  ;;  %v15989_v2 = vmul.f32 %v26923_v63, %v15922_v5  ;;  %v15990_v13 = vmul.f32 %v26895_v6, %v15923_v47  ;;  %v15994_v21 = vmul.f32 %v26892_v58, %v26949_v55 }
 0x927   :  { %v15995_v24 = vmul.f32 %v26915_v41, %v15928_v19  ;;  %v15996_v50 = vmul.f32 %v26905_v22, %v15929_v4  ;;  %v15997_v33 = vmul.f32 %v26923_v63, %v15930_v23  ;;  %v15998_v16 = vmul.f32 %v26895_v6, %v26959_v49 }
 0x928   :  { %v16045_v32 = vadd.f32 %v26898_v52, %v15978_v12  ;;  %v16046_v43 = vadd.f32 %v26927_v20, %v15979_v15  ;;  %v16047_v59 = vadd.f32 %v26911_v53, %v15980_v26  ;;  %v16048_v56 = vadd.f32 %v26930_v34, %v15981_v31 }
 0x929   :  { %v16049_v7 = vadd.f32 %v26901_v37, %v15982_v36  ;;  %v16051_v58 = vadd.f32 %v26919_v46, %v26982_v62  ;;  %v16053_v22 = vadd.f32 %v26898_v52, %v15986_v48  ;;  %v16054_v41 = vadd.f32 %v26927_v20, %v15987_v27 }
 0x92a   :  { %v16055_v63 = vadd.f32 %v26911_v53, %v15988_v60  ;;  %v16056_v6 = vadd.f32 %v26930_v34, %v15989_v2  ;;  %v16057_v55 = vadd.f32 %v26901_v37, %v15990_v13  ;;  %v16059_v49 = vadd.f32 %v26919_v46, %v26984_v40 }
 0x92b   :  { %v16061_v10 = vadd.f32 %v26898_v52, %v15994_v21  ;;  %v16062_v14 = vadd.f32 %v26927_v20, %v15995_v24  ;;  %v16063_v39 = vadd.f32 %v26911_v53, %v15996_v50  ;;  %v16064_v62 = vadd.f32 %v26930_v34, %v15997_v33 }
 0x92c   :  { %v16065_v5 = vadd.f32 %v26901_v37, %v15998_v16  ;;  %v16067_v25 = vadd.f32 %v26919_v46, %v26986_v8  ;;  %v16112_v47 = vrot.slane %v16045_v32, %v28176_v28  ;;  %v16116_v45 = vrot.slane %v16046_v43, %v28176_v28 }
 0x92d   :  { %v16120_v9 = vrot.slane %v16047_v59, %v28176_v28  ;;  %v16124_v40 = vrot.slane %v16048_v56, %v28176_v28  ;;  %v16128_v52 = vrot.slane %v16049_v7, %v28176_v28  ;;  %v16136_v20 = vrot.slane %v16051_v58, %v28176_v28 }
 0x92e   :  { %v16140_v53 = vrot.slane %v26994_v1, %v28176_v28  ;;  %v16144_v37 = vrot.slane %v16053_v22, %v28176_v28  ;;  %v16148_v34 = vrot.slane %v16054_v41, %v28176_v28  ;;  %v16152_v46 = vrot.slane %v16055_v63, %v28176_v28 }
 0x92f   :  { %v16156_v8 = vrot.slane %v16056_v6, %v28176_v28  ;;  %v16160_v19 = vrot.slane %v16057_v55, %v28176_v28  ;;  %v16168_v51 = vrot.slane %v16059_v49, %v28176_v28  ;;  %v16172_v4 = vrot.slane %v26998_v30, %v28176_v28 }
 0x930   :  { %v16176_v42 = vrot.slane %v16061_v10, %v28176_v28  ;;  %v16180_v23 = vrot.slane %v16062_v14, %v28176_v28  ;;  %v16184_v1 = vrot.slane %v16063_v39, %v28176_v28  ;;  %v16188_v54 = vrot.slane %v16064_v62, %v28176_v28 }
 0x931   :  { %v16192_v12 = vrot.slane %v16065_v5, %v28176_v28  ;;  %v16200_v15 = vrot.slane %v16067_v25, %v28176_v28  ;;  %v16204_v26 = vrot.slane %v27002_v3, %v28176_v28  ;;  %v16208_v31 = vrot.slane %v27005_v11, %v28176_v28 }
 0x932   :  { %v16212_v30 = vrot.slane %v27008_v0, %v28176_v28  ;;  %v16216_v36 = vrot.slane %v27011_v38, %v28176_v28  ;;  %v16220_v48 = vrot.slane %v27014_v61, %v28176_v28  ;;  %v16237_v27 = vsel %vm10034_vm8, %v16116_v45, %v16112_v47 }
 0x933   :  { %v16238_v60 = vsel %vm10036_vm10, %v16120_v9, %v16237_v27  ;;  %v16240_v3 = vsel %vm10034_vm8, %v16132_v35, %v16128_v52  ;;  %v16243_v11 = vsel %vm10034_vm8, %v16148_v34, %v16144_v37  ;;  %v16246_v0 = vsel %vm10034_vm8, %v16164_v44, %v16160_v19 }
 0x934   :  { %v16239_v38 = vsel %vm10038_vm11, %v16124_v40, %v16238_v60  ;;  %v16241_v61 = vsel %vm10036_vm10, %v16136_v20, %v16240_v3  ;;  %v16244_v2 = vsel %vm10036_vm10, %v16152_v46, %v16243_v11  ;;  %v16247_v13 = vsel %vm10036_vm10, %v16168_v51, %v16246_v0 }
 0x935   :  { %v16242_v18 = vsel %vm10038_vm11, %v16140_v53, %v16241_v61  ;;  %v16245_v35 = vsel %vm10038_vm11, %v16156_v8, %v16244_v2  ;;  %v16248_v21 = vsel %vm10038_vm11, %v16172_v4, %v16247_v13  ;;  %v16249_v17 = vsel %vm10034_vm8, %v16180_v23, %v16176_v42  ;;  %16270 = vst.msk [vmem:[#allocation4] sm:$0xf] %vm16269_vm12, %v16239_v38 }
 0x936   :  { %v16250_v44 = vsel %vm10036_vm10, %v16184_v1, %v16249_v17  ;;  %v16252_v24 = vsel %vm10034_vm8, %v16196_v57, %v16192_v12  ;;  %v16255_v50 = vsel %vm10034_vm8, %v16212_v30, %v16208_v31  ;;  %16271 = vst.msk [vmem:[#allocation4 + $0x4] sm:$0xf] %vm16269_vm12, %v16242_v18  ;;  %16272 = vst.msk [vmem:[#allocation4 + $0x8] sm:$0xf] %vm16269_vm12, %v16245_v35 }
 0x937   :  { %16273 = vst.msk [vmem:[#allocation4 + $0xc] sm:$0xf] %vm16269_vm12, %v16248_v21  ;;  %v16251_v33 = vsel %vm10038_vm11, %v16188_v54, %v16250_v44  ;;  %v16253_v16 = vsel %vm10036_vm10, %v16200_v15, %v16252_v24  ;;  %v16256_v32 = vsel %vm10036_vm10, %v16216_v36, %v16255_v50 }
 0x938   :  { %v16254_v43 = vsel %vm10038_vm11, %v16204_v26, %v16253_v16  ;;  %v16257_v28 = vsel %vm10038_vm11, %v16220_v48, %v16256_v32  ;;  %16274 = vst.msk [vmem:[#allocation4 + $0x10] sm:$0xf] %vm16269_vm12, %v16251_v33 }
 0x939   :  { %16275 = vst.msk [vmem:[#allocation4 + $0x14] sm:$0xf] %vm16269_vm12, %v16254_v43  ;;  %16276 = vst.msk [vmem:[#allocation4 + $0x18] sm:$0xf] %vm16269_vm12, %v16257_v28 }
 0x93a   :  { %19885 = shalt.err (!%p19882_p4)
}
 0x93b   :  { %s19886_s18 = scalar_lea.hbm %s27184_s9, 512 }
 0x93c   :  { %p19887_p5 = scmp.ne.s32.totalorder %s27184_s9, %s19886_s18  ;;  %p19890_p6 = scmp.lt.u32.totalorder %s19886_s18, %s27184_s9 }
 0x93e   :  { %p19892_p7 = pnand %p19890_p6, %p19887_p5 }
 0x940   :  { %19895 = shalt.err (!%p19892_p7)
}
 0x941   :  { %s19901_s0 = smov 64   ;;  %s19902_s21 = smov 4  }
 0x942   :  { %16289 = dma.vmem_to_hbm [thread:$0]  %s16284_s8, 512, %s27184_s9, [#allocation5], %s19901_s0, %s19901_s0, %s19902_s21  }
 0x943   :  { %19896 = dma.done.wait [#allocation5], 512  }
 0x944   :  { %19897 = vsyncadd [#allocation5], 4294966784 }
 0x945   :  { %16293 = vsyncpa [#allocation5], 1 }

</bundles_post_ra>
